<compile_context>
chip_gen: v7x
topology: tpu7x:2x2x1
jax: 0.10.0
libtpu: 0.0.40
codegen_flags: <defaults>
</compile_context>

<pallas_src>
import functools
import math

import jax
import jax.numpy as jnp
from jax.experimental import pallas as pl
from jax.experimental.pallas import tpu as pltpu

BN_EPS = 1e-5
NUM_HEADS = 8
OUTPUT_DIM = 128


# ----------------------------------------------------------------------------
# In-kernel building blocks (operate on a flat (B*L, C) activation slab)
# ----------------------------------------------------------------------------
def _shifted(x, masks):
    """x_prev[r] = x[r-1] (0 at l==0), x_next[r] = x[r+1] (0 at l==L-1).

    Sublane rotate (XLU) of the whole (B*L, C) slab; rows that would wrap
    across a sequence/batch boundary are zeroed by the precomputed (B*L, 1)
    masks, which also provides the conv's `padding=1` zeros.
    """
    first_mask, last_mask = masks
    BL = x.shape[0]
    x_prev = pltpu.roll(x, shift=1, axis=0) * first_mask
    x_next = pltpu.roll(x, shift=BL - 1, axis=0) * last_mask
    return x_prev, x_next


def _conv3(x, w_flat, b, masks):
    """Conv1d(k=3, pad=1) as ONE matmul: concat taps (BL, 3*Cin) @ (3*Cin, Cout)."""
    x_prev, x_next = _shifted(x, masks)
    taps = jnp.concatenate([x_prev, x, x_next], axis=-1)
    return jnp.dot(taps, w_flat, preferred_element_type=jnp.float32) + b


def _res_block(x, w1, b1, w2, b2, wd, bd, gamma, beta, masks, single_in):
    """ResidualConvBlock: conv3 -> relu -> conv3 -> + downsample(x) -> BN -> relu."""
    if single_in:
        # Cin == 1: x is the single input channel lane-broadcast to (BL, Cout).
        # Conv1 and the 1x1 downsample become VPU broadcast multiplies.
        x_prev, x_next = _shifted(x, masks)
        h = x_prev * w1[0:1, :] + x * w1[1:2, :] + x_next * w1[2:3, :] + b1
        res = x * wd + bd
    else:
        h = _conv3(x, w1, b1, masks)
        res = jnp.dot(x, wd, preferred_element_type=jnp.float32) + bd
    h = jnp.maximum(h, 0.0)
    h = _conv3(h, w2, b2, masks) + res
    # BatchNorm1d with train-mode batch statistics (biased variance), then ReLU.
    n_inv = 1.0 / h.shape[0]                       # compile-time constant
    mean = jnp.sum(h, axis=0, keepdims=True) * n_inv
    var = jnp.sum(h * h, axis=0, keepdims=True) * n_inv - mean * mean
    h = (h - mean) * (jax.lax.rsqrt(var + BN_EPS) * gamma) + beta
    return jnp.maximum(h, 0.0)


def _mha_block(x, wqkv, bqkv, wo, bo, B, L, H):
    """MultiheadAttention(self-attn, batch_first) + residual add + ReLU.

    Q/K/V are one fused (B*L, E) x (E, 3E) matmul (sliced back at vreg-aligned
    256-lane boundaries); the output projection is one (E, E) matmul.  Only the
    (L, L) score/softmax math is per-head, with batch folded into batched dots.
    """
    BL, E = x.shape
    hd = E // H
    scale = 1.0 / math.sqrt(hd)
    qkv = jnp.dot(x, wqkv, preferred_element_type=jnp.float32) + bqkv   # (BL, 3E)
    q = qkv[:, 0:E] * scale
    k = qkv[:, E:2 * E]
    v = qkv[:, 2 * E:3 * E]
    heads = []
    for hh in range(H):
        lo = hh * hd
        qh = q[:, lo:lo + hd].reshape(B, L, hd)
        kh = k[:, lo:lo + hd].reshape(B, L, hd)
        vh = v[:, lo:lo + hd].reshape(B, L, hd)
        s = jnp.einsum('bld,bmd->blm', qh, kh, preferred_element_type=jnp.float32)
        s = s - jnp.max(s, axis=-1, keepdims=True)
        p = jnp.exp(s)
        p = p * pl.reciprocal(jnp.sum(p, axis=-1, keepdims=True), approx=True)
        oh = jnp.einsum('blm,bmd->bld', p, vh, preferred_element_type=jnp.float32)
        heads.append(oh.reshape(BL, hd))
    o = jnp.concatenate(heads, axis=-1)                         # (BL, E)
    o = jnp.dot(o, wo, preferred_element_type=jnp.float32) + bo
    return jnp.maximum(o + x, 0.0)


# ----------------------------------------------------------------------------
# Fused forward kernel
# ----------------------------------------------------------------------------
def _cnn_attention_kernel(B, L, H, x_ref, *refs):
    *prm_refs, out_ref = refs
    it = iter(prm_refs)

    def take(n):                 # load params right before the block that uses them
        return [next(it)[...] for _ in range(n)]

    BL = B * L

    # Sequence-boundary masks for every k=3 / padding=1 conv, built once.
    l_idx = jax.lax.broadcasted_iota(jnp.int32, (B, L, 1), 1).reshape(BL, 1)
    first_mask = (l_idx != 0).astype(jnp.float32)     # zero where l == 0
    last_mask = (l_idx != L - 1).astype(jnp.float32)  # zero where l == L-1
    masks = (first_mask, last_mask)

    # resconv1 (Cin=1): broadcast the single input channel across lanes once.
    w1, b1, w2, b2, wd, bd, g, bt = take(8)
    x0 = jnp.broadcast_to(x_ref[...], (BL, w1.shape[-1]))
    h = _res_block(x0, w1, b1, w2, b2, wd, bd, g, bt, masks, single_in=True)

    # resconv2, resconv3
    for _ in range(2):
        w1, b1, w2, b2, wd, bd, g, bt = take(8)
        h = _res_block(h, w1, b1, w2, b2, wd, bd, g, bt, masks, single_in=False)

    # attention1, attention2 (+ residual + relu)
    for _ in range(2):
        wqkv, bqkv, wo, bo = take(4)
        h = _mha_block(h, wqkv, bqkv, wo, bo, B, L, H)

    # adaptive_avg_pool1d(., 1) over L, then Linear(256 -> output_dim):
    # single lane-dense (B, OUTPUT_DIM) store.
    fc_w, fc_b = take(2)
    E = h.shape[-1]
    pooled = jnp.sum(h.reshape(B, L, E), axis=1) * (1.0 / L)    # (B, E)
    out_ref[...] = jnp.dot(pooled, fc_w, preferred_element_type=jnp.float32) + fc_b


def _flatten_params(params):
    flat = []
    for name in ("rb1", "rb2", "rb3"):
        p = params[name]
        flat += [p["w1"], p["b1"], p["w2"], p["b2"],
                 p["wd"], p["bd"], p["gamma"], p["beta"]]
    for name in ("att1", "att2"):
        p = params[name]
        # Pack Q/K/V projections into one (E, 3E) weight / (1, 3E) bias so the
        # kernel does a single fused QKV matmul (slices are vreg-aligned).
        flat += [jnp.concatenate([p["wq"], p["wk"], p["wv"]], axis=1),
                 jnp.concatenate([p["bq"], p["bk"], p["bv"]], axis=1),
                 p["wo"], p["bo"]]
    flat += [params["fc"]["w"], params["fc"]["b"]]
    return flat


def cnn_attention_forward(x, params):
    """x: (B, L) float32 — same as the nn.Module input before unsqueeze(1)."""
    B, L = x.shape
    flat = _flatten_params(params)
    kernel = functools.partial(_cnn_attention_kernel, B, L, NUM_HEADS)
    vmem_spec = pl.BlockSpec(memory_space=pltpu.MemorySpace.VMEM)
    return pl.pallas_call(
        kernel,
        out_shape=jax.ShapeDtypeStruct((B, OUTPUT_DIM), jnp.float32),
        in_specs=[vmem_spec] * (1 + len(flat)),
        out_specs=vmem_spec,
        # Whole net (weights ~4 MiB f32 + tiny activations) lives in VMEM;
        # 32 MiB leaves ample headroom and fits every generation (v7x: 64 MiB).
        compiler_params=pltpu.CompilerParams(vmem_limit_bytes=32 * 1024 * 1024),
    )(x.reshape(B * L, 1), *flat)


# ----------------------------------------------------------------------------
# Parameters (deterministic synthetic init)
# ----------------------------------------------------------------------------
def init_params(key):
    keys = iter(jax.random.split(key, 64))

    def nrm(shape, scale):
        return scale * jax.random.normal(next(keys), shape, dtype=jnp.float32)

    def conv_block(cin, cout, k=3):
        # Conv weights are tap-flattened: (k*cin, cout), row index = tap*cin + cin_idx,
        # taps ordered [x[l-1]; x[l]; x[l+1]] (cross-correlation, padding=1).
        return dict(
            w1=nrm((k * cin, cout), 1.0 / math.sqrt(cin * k)),
            b1=nrm((1, cout), 0.05),
            w2=nrm((k * cout, cout), 1.0 / math.sqrt(cout * k)),
            b2=nrm((1, cout), 0.05),
            wd=nrm((cin, cout), 1.0 / math.sqrt(cin)),
            bd=nrm((1, cout), 0.05),
            gamma=jnp.ones((1, cout), jnp.float32),
            beta=jnp.zeros((1, cout), jnp.float32),
        )

    def mha(e):
        def proj():
            return nrm((e, e), 1.0 / math.sqrt(e)), nrm((1, e), 0.02)  # W^T: (in, out)
        wq, bq = proj()
        wk, bk = proj()
        wv, bv = proj()
        wo, bo = proj()
        return dict(wq=wq, bq=bq, wk=wk, bk=bk, wv=wv, bv=bv, wo=wo, bo=bo)

    return dict(
        rb1=conv_block(1, 64),
        rb2=conv_block(64, 128),
        rb3=conv_block(128, 256),
        att1=mha(256),
        att2=mha(256),
        fc=dict(w=nrm((256, OUTPUT_DIM), 1.0 / math.sqrt(256)),
                b=nrm((1, OUTPUT_DIM), 0.02)),
    )


# ----------------------------------------------------------------------------
# Pure-JAX reference (for a sanity check)
# ----------------------------------------------------------------------------
def _ref_conv3_flat(x, w_flat, b):
    # x: (B, L, Cin), w_flat: (3*Cin, Cout), taps ordered [x[l-1]; x[l]; x[l+1]].
    xp = jnp.pad(x, ((0, 0), (1, 1), (0, 0)))
    taps = jnp.concatenate([xp[:, :-2], xp[:, 1:-1], xp[:, 2:]], axis=-1)
    return jnp.einsum('blc,cd->bld', taps, w_flat) + b


def _ref_res_block(x, p):
    h = jax.nn.relu(_ref_conv3_flat(x, p["w1"], p["b1"]))
    h = _ref_conv3_flat(h, p["w2"], p["b2"])
    h = h + jnp.einsum('blc,cd->bld', x, p["wd"]) + p["bd"]
    mean = jnp.mean(h, axis=(0, 1), keepdims=True)
    var = jnp.mean((h - mean) ** 2, axis=(0, 1), keepdims=True)
    h = (h - mean) / jnp.sqrt(var + BN_EPS) * p["gamma"] + p["beta"]
    return jax.nn.relu(h)


def _ref_mha(x, p, H=NUM_HEADS):
    B, L, E = x.shape
    hd = E // H
    q = x @ p["wq"] + p["bq"]
    k = x @ p["wk"] + p["bk"]
    v = x @ p["wv"] + p["bv"]
    q = q.reshape(B, L, H, hd).transpose(0, 2, 1, 3)
    k = k.reshape(B, L, H, hd).transpose(0, 2, 1, 3)
    v = v.reshape(B, L, H, hd).transpose(0, 2, 1, 3)
    s = jnp.einsum('bhld,bhmd->bhlm', q, k) / math.sqrt(hd)
    a = jax.nn.softmax(s, axis=-1)
    o = jnp.einsum('bhlm,bhmd->bhld', a, v)
    o = o.transpose(0, 2, 1, 3).reshape(B, L, E)
    o = o @ p["wo"] + p["bo"]
    return jax.nn.relu(o + x)


def _ref_forward(x, params):
    h = x[:, :, None]
    for name in ("rb1", "rb2", "rb3"):
        h = _ref_res_block(h, params[name])
    for name in ("att1", "att2"):
        h = _ref_mha(h, params[name])
    pooled = jnp.mean(h, axis=1)
    return pooled @ params["fc"]["w"] + params["fc"]["b"]


# ----------------------------------------------------------------------------
if __name__ == "__main__":
    key = jax.random.PRNGKey(0)
    k_x, k_p = jax.random.split(key)
    x = jax.random.normal(k_x, (2, 16), dtype=jnp.float32)   # (batch, seq_len)
    params = init_params(k_p)

    out = jax.block_until_ready(cnn_attention_forward(x, params))
    assert out.shape == (2, OUTPUT_DIM), out.shape

    ref = jax.block_until_ready(_ref_forward(x, params))
    err = float(jnp.max(jnp.abs(out - ref)))
    assert err < 5e-2, f"max abs error {err}"
    print("KERNEL_OK")
</pallas_src>

<mosaic_0001>
module attributes {stable_mosaic.version = 11 : i64} {
  func.func @_cnn_attention_kernel(%arg0: memref<32x1xf32, #tpu.memory_space<vmem>>, %arg1: memref<3x64xf32, #tpu.memory_space<vmem>>, %arg2: memref<1x64xf32, #tpu.memory_space<vmem>>, %arg3: memref<192x64xf32, #tpu.memory_space<vmem>>, %arg4: memref<1x64xf32, #tpu.memory_space<vmem>>, %arg5: memref<1x64xf32, #tpu.memory_space<vmem>>, %arg6: memref<1x64xf32, #tpu.memory_space<vmem>>, %arg7: memref<1x64xf32, #tpu.memory_space<vmem>>, %arg8: memref<1x64xf32, #tpu.memory_space<vmem>>, %arg9: memref<192x128xf32, #tpu.memory_space<vmem>>, %arg10: memref<1x128xf32, #tpu.memory_space<vmem>>, %arg11: memref<384x128xf32, #tpu.memory_space<vmem>>, %arg12: memref<1x128xf32, #tpu.memory_space<vmem>>, %arg13: memref<64x128xf32, #tpu.memory_space<vmem>>, %arg14: memref<1x128xf32, #tpu.memory_space<vmem>>, %arg15: memref<1x128xf32, #tpu.memory_space<vmem>>, %arg16: memref<1x128xf32, #tpu.memory_space<vmem>>, %arg17: memref<384x256xf32, #tpu.memory_space<vmem>>, %arg18: memref<1x256xf32, #tpu.memory_space<vmem>>, %arg19: memref<768x256xf32, #tpu.memory_space<vmem>>, %arg20: memref<1x256xf32, #tpu.memory_space<vmem>>, %arg21: memref<128x256xf32, #tpu.memory_space<vmem>>, %arg22: memref<1x256xf32, #tpu.memory_space<vmem>>, %arg23: memref<1x256xf32, #tpu.memory_space<vmem>>, %arg24: memref<1x256xf32, #tpu.memory_space<vmem>>, %arg25: memref<256x768xf32, #tpu.memory_space<vmem>>, %arg26: memref<1x768xf32, #tpu.memory_space<vmem>>, %arg27: memref<256x256xf32, #tpu.memory_space<vmem>>, %arg28: memref<1x256xf32, #tpu.memory_space<vmem>>, %arg29: memref<256x768xf32, #tpu.memory_space<vmem>>, %arg30: memref<1x768xf32, #tpu.memory_space<vmem>>, %arg31: memref<256x256xf32, #tpu.memory_space<vmem>>, %arg32: memref<1x256xf32, #tpu.memory_space<vmem>>, %arg33: memref<256x128xf32, #tpu.memory_space<vmem>>, %arg34: memref<1x128xf32, #tpu.memory_space<vmem>>, %arg35: memref<2x128xf32, #tpu.memory_space<vmem>>) attributes {dimension_semantics = [], scalar_prefetch = 0 : i64, scratch_operands = 0 : i64, tpu.core_type = #tpu.core_type<tc>} {
    %0 = tpu.iota {dimensions = array<i32: 1>} : vector<2x16x1xi32>
    %1 = vector.shape_cast %0 : vector<2x16x1xi32> to vector<32x1xi32>
    %c0_i32 = arith.constant 0 : i32
    %2 = vector.broadcast %c0_i32 : i32 to vector<32x1xi32>
    %3 = arith.cmpi ne, %1, %2 : vector<32x1xi32>
    %4 = arith.extui %3 : vector<32x1xi1> to vector<32x1xi32>
    %5 = arith.sitofp %4 : vector<32x1xi32> to vector<32x1xf32>
    %c15_i32 = arith.constant 15 : i32
    %6 = vector.broadcast %c15_i32 : i32 to vector<32x1xi32>
    %7 = arith.cmpi ne, %1, %6 : vector<32x1xi32>
    %8 = arith.extui %7 : vector<32x1xi1> to vector<32x1xi32>
    %9 = arith.sitofp %8 : vector<32x1xi32> to vector<32x1xf32>
    %c0 = arith.constant 0 : index
    %c0_0 = arith.constant 0 : index
    %10 = vector.load %arg1[%c0, %c0_0] : memref<3x64xf32, #tpu.memory_space<vmem>>, vector<3x64xf32>
    %c0_1 = arith.constant 0 : index
    %c0_2 = arith.constant 0 : index
    %11 = vector.load %arg2[%c0_1, %c0_2] : memref<1x64xf32, #tpu.memory_space<vmem>>, vector<1x64xf32>
    %c0_3 = arith.constant 0 : index
    %c0_4 = arith.constant 0 : index
    %12 = vector.load %arg3[%c0_3, %c0_4] : memref<192x64xf32, #tpu.memory_space<vmem>>, vector<192x64xf32>
    %c0_5 = arith.constant 0 : index
    %c0_6 = arith.constant 0 : index
    %13 = vector.load %arg4[%c0_5, %c0_6] : memref<1x64xf32, #tpu.memory_space<vmem>>, vector<1x64xf32>
    %c0_7 = arith.constant 0 : index
    %c0_8 = arith.constant 0 : index
    %14 = vector.load %arg5[%c0_7, %c0_8] : memref<1x64xf32, #tpu.memory_space<vmem>>, vector<1x64xf32>
    %c0_9 = arith.constant 0 : index
    %c0_10 = arith.constant 0 : index
    %15 = vector.load %arg6[%c0_9, %c0_10] : memref<1x64xf32, #tpu.memory_space<vmem>>, vector<1x64xf32>
    %c0_11 = arith.constant 0 : index
    %c0_12 = arith.constant 0 : index
    %16 = vector.load %arg7[%c0_11, %c0_12] : memref<1x64xf32, #tpu.memory_space<vmem>>, vector<1x64xf32>
    %c0_13 = arith.constant 0 : index
    %c0_14 = arith.constant 0 : index
    %17 = vector.load %arg8[%c0_13, %c0_14] : memref<1x64xf32, #tpu.memory_space<vmem>>, vector<1x64xf32>
    %c0_15 = arith.constant 0 : index
    %c0_16 = arith.constant 0 : index
    %18 = vector.load %arg0[%c0_15, %c0_16] : memref<32x1xf32, #tpu.memory_space<vmem>>, vector<32x1xf32>
    %19 = vector.shape_cast %18 : vector<32x1xf32> to vector<32x1xf32>
    %20 = vector.broadcast %19 : vector<32x1xf32> to vector<32x64xf32>
    %c1_i32 = arith.constant 1 : i32
    %21 = tpu.dynamic_rotate %20 by %c1_i32 dim 0 : vector<32x64xf32>, i32 -> vector<32x64xf32>
    %22 = vector.broadcast %5 : vector<32x1xf32> to vector<32x64xf32>
    %23 = arith.mulf %21, %22 : vector<32x64xf32>
    %c31_i32 = arith.constant 31 : i32
    %24 = tpu.dynamic_rotate %20 by %c31_i32 dim 0 : vector<32x64xf32>, i32 -> vector<32x64xf32>
    %25 = vector.broadcast %9 : vector<32x1xf32> to vector<32x64xf32>
    %26 = arith.mulf %24, %25 : vector<32x64xf32>
    %27 = vector.extract_strided_slice %10 {offsets = [0, 0], sizes = [1, 64], strides = [1, 1]} : vector<3x64xf32> to vector<1x64xf32>
    %28 = vector.broadcast %27 : vector<1x64xf32> to vector<32x64xf32>
    %29 = arith.mulf %23, %28 : vector<32x64xf32>
    %30 = vector.extract_strided_slice %10 {offsets = [1, 0], sizes = [1, 64], strides = [1, 1]} : vector<3x64xf32> to vector<1x64xf32>
    %31 = vector.broadcast %30 : vector<1x64xf32> to vector<32x64xf32>
    %32 = arith.mulf %20, %31 : vector<32x64xf32>
    %33 = arith.addf %29, %32 : vector<32x64xf32>
    %34 = vector.extract_strided_slice %10 {offsets = [2, 0], sizes = [1, 64], strides = [1, 1]} : vector<3x64xf32> to vector<1x64xf32>
    %35 = vector.broadcast %34 : vector<1x64xf32> to vector<32x64xf32>
    %36 = arith.mulf %26, %35 : vector<32x64xf32>
    %37 = arith.addf %33, %36 : vector<32x64xf32>
    %38 = vector.broadcast %11 : vector<1x64xf32> to vector<32x64xf32>
    %39 = arith.addf %37, %38 : vector<32x64xf32>
    %40 = vector.broadcast %14 : vector<1x64xf32> to vector<32x64xf32>
    %41 = arith.mulf %20, %40 : vector<32x64xf32>
    %42 = vector.broadcast %15 : vector<1x64xf32> to vector<32x64xf32>
    %43 = arith.addf %41, %42 : vector<32x64xf32>
    %cst = arith.constant 0.000000e+00 : f32
    %44 = vector.broadcast %cst : f32 to vector<32x64xf32>
    %45 = arith.maximumf %39, %44 : vector<32x64xf32>
    %c1_i32_17 = arith.constant 1 : i32
    %46 = tpu.dynamic_rotate %45 by %c1_i32_17 dim 0 : vector<32x64xf32>, i32 -> vector<32x64xf32>
    %47 = vector.broadcast %5 : vector<32x1xf32> to vector<32x64xf32>
    %48 = arith.mulf %46, %47 : vector<32x64xf32>
    %c31_i32_18 = arith.constant 31 : i32
    %49 = tpu.dynamic_rotate %45 by %c31_i32_18 dim 0 : vector<32x64xf32>, i32 -> vector<32x64xf32>
    %50 = vector.broadcast %9 : vector<32x1xf32> to vector<32x64xf32>
    %51 = arith.mulf %49, %50 : vector<32x64xf32>
    %52 = tpu.concatenate %48, %45, %51 in 1 : vector<32x64xf32>, vector<32x64xf32>, vector<32x64xf32> -> vector<32x192xf32>
    %cst_19 = arith.constant dense<0.000000e+00> : vector<32x64xf32>
    %53 = tpu.matmul %52, %12, %cst_19 {dimension_numbers = #tpu.dot_dimension_numbers<[1], [0], [0], [1], [0, 0, 1, 1], [], []>} : vector<32x192xf32>, vector<192x64xf32>, vector<32x64xf32> -> vector<32x64xf32>
    %54 = vector.broadcast %13 : vector<1x64xf32> to vector<32x64xf32>
    %55 = arith.addf %53, %54 : vector<32x64xf32>
    %56 = arith.addf %55, %43 : vector<32x64xf32>
    %cst_20 = arith.constant dense<0.000000e+00> : vector<64xf32>
    %57 = vector.multi_reduction <add>, %56, %cst_20 [0] : vector<32x64xf32> to vector<64xf32>
    %58 = vector.shape_cast %57 : vector<64xf32> to vector<1x64xf32>
    %cst_21 = arith.constant 3.125000e-02 : f32
    %59 = vector.broadcast %cst_21 : f32 to vector<1x64xf32>
    %60 = arith.mulf %58, %59 : vector<1x64xf32>
    %61 = arith.mulf %56, %56 : vector<32x64xf32>
    %cst_22 = arith.constant dense<0.000000e+00> : vector<64xf32>
    %62 = vector.multi_reduction <add>, %61, %cst_22 [0] : vector<32x64xf32> to vector<64xf32>
    %63 = vector.shape_cast %62 : vector<64xf32> to vector<1x64xf32>
    %cst_23 = arith.constant 3.125000e-02 : f32
    %64 = vector.broadcast %cst_23 : f32 to vector<1x64xf32>
    %65 = arith.mulf %63, %64 : vector<1x64xf32>
    %66 = arith.mulf %60, %60 : vector<1x64xf32>
    %67 = arith.subf %65, %66 : vector<1x64xf32>
    %68 = vector.broadcast %60 : vector<1x64xf32> to vector<32x64xf32>
    %69 = arith.subf %56, %68 : vector<32x64xf32>
    %cst_24 = arith.constant 9.99999974E-6 : f32
    %70 = vector.broadcast %cst_24 : f32 to vector<1x64xf32>
    %71 = arith.addf %67, %70 : vector<1x64xf32>
    %72 = math.rsqrt %71 : vector<1x64xf32>
    %73 = arith.mulf %72, %16 : vector<1x64xf32>
    %74 = vector.broadcast %73 : vector<1x64xf32> to vector<32x64xf32>
    %75 = arith.mulf %69, %74 : vector<32x64xf32>
    %76 = vector.broadcast %17 : vector<1x64xf32> to vector<32x64xf32>
    %77 = arith.addf %75, %76 : vector<32x64xf32>
    %cst_25 = arith.constant 0.000000e+00 : f32
    %78 = vector.broadcast %cst_25 : f32 to vector<32x64xf32>
    %79 = arith.maximumf %77, %78 : vector<32x64xf32>
    %c0_26 = arith.constant 0 : index
    %c0_27 = arith.constant 0 : index
    %80 = vector.load %arg9[%c0_26, %c0_27] : memref<192x128xf32, #tpu.memory_space<vmem>>, vector<192x128xf32>
    %c0_28 = arith.constant 0 : index
    %c0_29 = arith.constant 0 : index
    %81 = vector.load %arg10[%c0_28, %c0_29] : memref<1x128xf32, #tpu.memory_space<vmem>>, vector<1x128xf32>
    %c0_30 = arith.constant 0 : index
    %c0_31 = arith.constant 0 : index
    %82 = vector.load %arg11[%c0_30, %c0_31] : memref<384x128xf32, #tpu.memory_space<vmem>>, vector<384x128xf32>
    %c0_32 = arith.constant 0 : index
    %c0_33 = arith.constant 0 : index
    %83 = vector.load %arg12[%c0_32, %c0_33] : memref<1x128xf32, #tpu.memory_space<vmem>>, vector<1x128xf32>
    %c0_34 = arith.constant 0 : index
    %c0_35 = arith.constant 0 : index
    %84 = vector.load %arg13[%c0_34, %c0_35] : memref<64x128xf32, #tpu.memory_space<vmem>>, vector<64x128xf32>
    %c0_36 = arith.constant 0 : index
    %c0_37 = arith.constant 0 : index
    %85 = vector.load %arg14[%c0_36, %c0_37] : memref<1x128xf32, #tpu.memory_space<vmem>>, vector<1x128xf32>
    %c0_38 = arith.constant 0 : index
    %c0_39 = arith.constant 0 : index
    %86 = vector.load %arg15[%c0_38, %c0_39] : memref<1x128xf32, #tpu.memory_space<vmem>>, vector<1x128xf32>
    %c0_40 = arith.constant 0 : index
    %c0_41 = arith.constant 0 : index
    %87 = vector.load %arg16[%c0_40, %c0_41] : memref<1x128xf32, #tpu.memory_space<vmem>>, vector<1x128xf32>
    %c1_i32_42 = arith.constant 1 : i32
    %88 = tpu.dynamic_rotate %79 by %c1_i32_42 dim 0 : vector<32x64xf32>, i32 -> vector<32x64xf32>
    %89 = vector.broadcast %5 : vector<32x1xf32> to vector<32x64xf32>
    %90 = arith.mulf %88, %89 : vector<32x64xf32>
    %c31_i32_43 = arith.constant 31 : i32
    %91 = tpu.dynamic_rotate %79 by %c31_i32_43 dim 0 : vector<32x64xf32>, i32 -> vector<32x64xf32>
    %92 = vector.broadcast %9 : vector<32x1xf32> to vector<32x64xf32>
    %93 = arith.mulf %91, %92 : vector<32x64xf32>
    %94 = tpu.concatenate %90, %79, %93 in 1 : vector<32x64xf32>, vector<32x64xf32>, vector<32x64xf32> -> vector<32x192xf32>
    %cst_44 = arith.constant dense<0.000000e+00> : vector<32x128xf32>
    %95 = tpu.matmul %94, %80, %cst_44 {dimension_numbers = #tpu.dot_dimension_numbers<[1], [0], [0], [1], [0, 0, 1, 1], [], []>} : vector<32x192xf32>, vector<192x128xf32>, vector<32x128xf32> -> vector<32x128xf32>
    %96 = vector.broadcast %81 : vector<1x128xf32> to vector<32x128xf32>
    %97 = arith.addf %95, %96 : vector<32x128xf32>
    %cst_45 = arith.constant dense<0.000000e+00> : vector<32x128xf32>
    %98 = tpu.matmul %79, %84, %cst_45 {dimension_numbers = #tpu.dot_dimension_numbers<[1], [0], [0], [1], [0, 0, 1, 1], [], []>} : vector<32x64xf32>, vector<64x128xf32>, vector<32x128xf32> -> vector<32x128xf32>
    %99 = vector.broadcast %85 : vector<1x128xf32> to vector<32x128xf32>
    %100 = arith.addf %98, %99 : vector<32x128xf32>
    %cst_46 = arith.constant 0.000000e+00 : f32
    %101 = vector.broadcast %cst_46 : f32 to vector<32x128xf32>
    %102 = arith.maximumf %97, %101 : vector<32x128xf32>
    %c1_i32_47 = arith.constant 1 : i32
    %103 = tpu.dynamic_rotate %102 by %c1_i32_47 dim 0 : vector<32x128xf32>, i32 -> vector<32x128xf32>
    %104 = vector.broadcast %5 : vector<32x1xf32> to vector<32x128xf32>
    %105 = arith.mulf %103, %104 : vector<32x128xf32>
    %c31_i32_48 = arith.constant 31 : i32
    %106 = tpu.dynamic_rotate %102 by %c31_i32_48 dim 0 : vector<32x128xf32>, i32 -> vector<32x128xf32>
    %107 = vector.broadcast %9 : vector<32x1xf32> to vector<32x128xf32>
    %108 = arith.mulf %106, %107 : vector<32x128xf32>
    %109 = tpu.concatenate %105, %102, %108 in 1 : vector<32x128xf32>, vector<32x128xf32>, vector<32x128xf32> -> vector<32x384xf32>
    %cst_49 = arith.constant dense<0.000000e+00> : vector<32x128xf32>
    %110 = tpu.matmul %109, %82, %cst_49 {dimension_numbers = #tpu.dot_dimension_numbers<[1], [0], [0], [1], [0, 0, 1, 1], [], []>} : vector<32x384xf32>, vector<384x128xf32>, vector<32x128xf32> -> vector<32x128xf32>
    %111 = vector.broadcast %83 : vector<1x128xf32> to vector<32x128xf32>
    %112 = arith.addf %110, %111 : vector<32x128xf32>
    %113 = arith.addf %112, %100 : vector<32x128xf32>
    %cst_50 = arith.constant dense<0.000000e+00> : vector<128xf32>
    %114 = vector.multi_reduction <add>, %113, %cst_50 [0] : vector<32x128xf32> to vector<128xf32>
    %115 = vector.shape_cast %114 : vector<128xf32> to vector<1x128xf32>
    %cst_51 = arith.constant 3.125000e-02 : f32
    %116 = vector.broadcast %cst_51 : f32 to vector<1x128xf32>
    %117 = arith.mulf %115, %116 : vector<1x128xf32>
    %118 = arith.mulf %113, %113 : vector<32x128xf32>
    %cst_52 = arith.constant dense<0.000000e+00> : vector<128xf32>
    %119 = vector.multi_reduction <add>, %118, %cst_52 [0] : vector<32x128xf32> to vector<128xf32>
    %120 = vector.shape_cast %119 : vector<128xf32> to vector<1x128xf32>
    %cst_53 = arith.constant 3.125000e-02 : f32
    %121 = vector.broadcast %cst_53 : f32 to vector<1x128xf32>
    %122 = arith.mulf %120, %121 : vector<1x128xf32>
    %123 = arith.mulf %117, %117 : vector<1x128xf32>
    %124 = arith.subf %122, %123 : vector<1x128xf32>
    %125 = vector.broadcast %117 : vector<1x128xf32> to vector<32x128xf32>
    %126 = arith.subf %113, %125 : vector<32x128xf32>
    %cst_54 = arith.constant 9.99999974E-6 : f32
    %127 = vector.broadcast %cst_54 : f32 to vector<1x128xf32>
    %128 = arith.addf %124, %127 : vector<1x128xf32>
    %129 = math.rsqrt %128 : vector<1x128xf32>
    %130 = arith.mulf %129, %86 : vector<1x128xf32>
    %131 = vector.broadcast %130 : vector<1x128xf32> to vector<32x128xf32>
    %132 = arith.mulf %126, %131 : vector<32x128xf32>
    %133 = vector.broadcast %87 : vector<1x128xf32> to vector<32x128xf32>
    %134 = arith.addf %132, %133 : vector<32x128xf32>
    %cst_55 = arith.constant 0.000000e+00 : f32
    %135 = vector.broadcast %cst_55 : f32 to vector<32x128xf32>
    %136 = arith.maximumf %134, %135 : vector<32x128xf32>
    %c0_56 = arith.constant 0 : index
    %c0_57 = arith.constant 0 : index
    %137 = vector.load %arg17[%c0_56, %c0_57] : memref<384x256xf32, #tpu.memory_space<vmem>>, vector<384x256xf32>
    %c0_58 = arith.constant 0 : index
    %c0_59 = arith.constant 0 : index
    %138 = vector.load %arg18[%c0_58, %c0_59] : memref<1x256xf32, #tpu.memory_space<vmem>>, vector<1x256xf32>
    %c0_60 = arith.constant 0 : index
    %c0_61 = arith.constant 0 : index
    %139 = vector.load %arg19[%c0_60, %c0_61] : memref<768x256xf32, #tpu.memory_space<vmem>>, vector<768x256xf32>
    %c0_62 = arith.constant 0 : index
    %c0_63 = arith.constant 0 : index
    %140 = vector.load %arg20[%c0_62, %c0_63] : memref<1x256xf32, #tpu.memory_space<vmem>>, vector<1x256xf32>
    %c0_64 = arith.constant 0 : index
    %c0_65 = arith.constant 0 : index
    %141 = vector.load %arg21[%c0_64, %c0_65] : memref<128x256xf32, #tpu.memory_space<vmem>>, vector<128x256xf32>
    %c0_66 = arith.constant 0 : index
    %c0_67 = arith.constant 0 : index
    %142 = vector.load %arg22[%c0_66, %c0_67] : memref<1x256xf32, #tpu.memory_space<vmem>>, vector<1x256xf32>
    %c0_68 = arith.constant 0 : index
    %c0_69 = arith.constant 0 : index
    %143 = vector.load %arg23[%c0_68, %c0_69] : memref<1x256xf32, #tpu.memory_space<vmem>>, vector<1x256xf32>
    %c0_70 = arith.constant 0 : index
    %c0_71 = arith.constant 0 : index
    %144 = vector.load %arg24[%c0_70, %c0_71] : memref<1x256xf32, #tpu.memory_space<vmem>>, vector<1x256xf32>
    %c1_i32_72 = arith.constant 1 : i32
    %145 = tpu.dynamic_rotate %136 by %c1_i32_72 dim 0 : vector<32x128xf32>, i32 -> vector<32x128xf32>
    %146 = vector.broadcast %5 : vector<32x1xf32> to vector<32x128xf32>
    %147 = arith.mulf %145, %146 : vector<32x128xf32>
    %c31_i32_73 = arith.constant 31 : i32
    %148 = tpu.dynamic_rotate %136 by %c31_i32_73 dim 0 : vector<32x128xf32>, i32 -> vector<32x128xf32>
    %149 = vector.broadcast %9 : vector<32x1xf32> to vector<32x128xf32>
    %150 = arith.mulf %148, %149 : vector<32x128xf32>
    %151 = tpu.concatenate %147, %136, %150 in 1 : vector<32x128xf32>, vector<32x128xf32>, vector<32x128xf32> -> vector<32x384xf32>
    %cst_74 = arith.constant dense<0.000000e+00> : vector<32x256xf32>
    %152 = tpu.matmul %151, %137, %cst_74 {dimension_numbers = #tpu.dot_dimension_numbers<[1], [0], [0], [1], [0, 0, 1, 1], [], []>} : vector<32x384xf32>, vector<384x256xf32>, vector<32x256xf32> -> vector<32x256xf32>
    %153 = vector.broadcast %138 : vector<1x256xf32> to vector<32x256xf32>
    %154 = arith.addf %152, %153 : vector<32x256xf32>
    %cst_75 = arith.constant dense<0.000000e+00> : vector<32x256xf32>
    %155 = tpu.matmul %136, %141, %cst_75 {dimension_numbers = #tpu.dot_dimension_numbers<[1], [0], [0], [1], [0, 0, 1, 1], [], []>} : vector<32x128xf32>, vector<128x256xf32>, vector<32x256xf32> -> vector<32x256xf32>
    %156 = vector.broadcast %142 : vector<1x256xf32> to vector<32x256xf32>
    %157 = arith.addf %155, %156 : vector<32x256xf32>
    %cst_76 = arith.constant 0.000000e+00 : f32
    %158 = vector.broadcast %cst_76 : f32 to vector<32x256xf32>
    %159 = arith.maximumf %154, %158 : vector<32x256xf32>
    %c1_i32_77 = arith.constant 1 : i32
    %160 = tpu.dynamic_rotate %159 by %c1_i32_77 dim 0 : vector<32x256xf32>, i32 -> vector<32x256xf32>
    %161 = vector.broadcast %5 : vector<32x1xf32> to vector<32x256xf32>
    %162 = arith.mulf %160, %161 : vector<32x256xf32>
    %c31_i32_78 = arith.constant 31 : i32
    %163 = tpu.dynamic_rotate %159 by %c31_i32_78 dim 0 : vector<32x256xf32>, i32 -> vector<32x256xf32>
    %164 = vector.broadcast %9 : vector<32x1xf32> to vector<32x256xf32>
    %165 = arith.mulf %163, %164 : vector<32x256xf32>
    %166 = tpu.concatenate %162, %159, %165 in 1 : vector<32x256xf32>, vector<32x256xf32>, vector<32x256xf32> -> vector<32x768xf32>
    %cst_79 = arith.constant dense<0.000000e+00> : vector<32x256xf32>
    %167 = tpu.matmul %166, %139, %cst_79 {dimension_numbers = #tpu.dot_dimension_numbers<[1], [0], [0], [1], [0, 0, 1, 1], [], []>} : vector<32x768xf32>, vector<768x256xf32>, vector<32x256xf32> -> vector<32x256xf32>
    %168 = vector.broadcast %140 : vector<1x256xf32> to vector<32x256xf32>
    %169 = arith.addf %167, %168 : vector<32x256xf32>
    %170 = arith.addf %169, %157 : vector<32x256xf32>
    %cst_80 = arith.constant dense<0.000000e+00> : vector<256xf32>
    %171 = vector.multi_reduction <add>, %170, %cst_80 [0] : vector<32x256xf32> to vector<256xf32>
    %172 = vector.shape_cast %171 : vector<256xf32> to vector<1x256xf32>
    %cst_81 = arith.constant 3.125000e-02 : f32
    %173 = vector.broadcast %cst_81 : f32 to vector<1x256xf32>
    %174 = arith.mulf %172, %173 : vector<1x256xf32>
    %175 = arith.mulf %170, %170 : vector<32x256xf32>
    %cst_82 = arith.constant dense<0.000000e+00> : vector<256xf32>
    %176 = vector.multi_reduction <add>, %175, %cst_82 [0] : vector<32x256xf32> to vector<256xf32>
    %177 = vector.shape_cast %176 : vector<256xf32> to vector<1x256xf32>
    %cst_83 = arith.constant 3.125000e-02 : f32
    %178 = vector.broadcast %cst_83 : f32 to vector<1x256xf32>
    %179 = arith.mulf %177, %178 : vector<1x256xf32>
    %180 = arith.mulf %174, %174 : vector<1x256xf32>
    %181 = arith.subf %179, %180 : vector<1x256xf32>
    %182 = vector.broadcast %174 : vector<1x256xf32> to vector<32x256xf32>
    %183 = arith.subf %170, %182 : vector<32x256xf32>
    %cst_84 = arith.constant 9.99999974E-6 : f32
    %184 = vector.broadcast %cst_84 : f32 to vector<1x256xf32>
    %185 = arith.addf %181, %184 : vector<1x256xf32>
    %186 = math.rsqrt %185 : vector<1x256xf32>
    %187 = arith.mulf %186, %143 : vector<1x256xf32>
    %188 = vector.broadcast %187 : vector<1x256xf32> to vector<32x256xf32>
    %189 = arith.mulf %183, %188 : vector<32x256xf32>
    %190 = vector.broadcast %144 : vector<1x256xf32> to vector<32x256xf32>
    %191 = arith.addf %189, %190 : vector<32x256xf32>
    %cst_85 = arith.constant 0.000000e+00 : f32
    %192 = vector.broadcast %cst_85 : f32 to vector<32x256xf32>
    %193 = arith.maximumf %191, %192 : vector<32x256xf32>
    %c0_86 = arith.constant 0 : index
    %c0_87 = arith.constant 0 : index
    %194 = vector.load %arg25[%c0_86, %c0_87] : memref<256x768xf32, #tpu.memory_space<vmem>>, vector<256x768xf32>
    %c0_88 = arith.constant 0 : index
    %c0_89 = arith.constant 0 : index
    %195 = vector.load %arg26[%c0_88, %c0_89] : memref<1x768xf32, #tpu.memory_space<vmem>>, vector<1x768xf32>
    %c0_90 = arith.constant 0 : index
    %c0_91 = arith.constant 0 : index
    %196 = vector.load %arg27[%c0_90, %c0_91] : memref<256x256xf32, #tpu.memory_space<vmem>>, vector<256x256xf32>
    %c0_92 = arith.constant 0 : index
    %c0_93 = arith.constant 0 : index
    %197 = vector.load %arg28[%c0_92, %c0_93] : memref<1x256xf32, #tpu.memory_space<vmem>>, vector<1x256xf32>
    %cst_94 = arith.constant dense<0.000000e+00> : vector<32x768xf32>
    %198 = tpu.matmul %193, %194, %cst_94 {dimension_numbers = #tpu.dot_dimension_numbers<[1], [0], [0], [1], [0, 0, 1, 1], [], []>} : vector<32x256xf32>, vector<256x768xf32>, vector<32x768xf32> -> vector<32x768xf32>
    %199 = vector.broadcast %195 : vector<1x768xf32> to vector<32x768xf32>
    %200 = arith.addf %198, %199 : vector<32x768xf32>
    %201 = vector.extract_strided_slice %200 {offsets = [0, 0], sizes = [32, 256], strides = [1, 1]} : vector<32x768xf32> to vector<32x256xf32>
    %cst_95 = arith.constant 0.176776692 : f32
    %202 = vector.broadcast %cst_95 : f32 to vector<32x256xf32>
    %203 = arith.mulf %201, %202 : vector<32x256xf32>
    %204 = vector.extract_strided_slice %200 {offsets = [0, 256], sizes = [32, 256], strides = [1, 1]} : vector<32x768xf32> to vector<32x256xf32>
    %205 = vector.extract_strided_slice %200 {offsets = [0, 512], sizes = [32, 256], strides = [1, 1]} : vector<32x768xf32> to vector<32x256xf32>
    %206 = vector.extract_strided_slice %203 {offsets = [0, 0], sizes = [32, 32], strides = [1, 1]} : vector<32x256xf32> to vector<32x32xf32>
    %207 = vector.shape_cast %206 : vector<32x32xf32> to vector<2x16x32xf32>
    %208 = vector.extract_strided_slice %204 {offsets = [0, 0], sizes = [32, 32], strides = [1, 1]} : vector<32x256xf32> to vector<32x32xf32>
    %209 = vector.shape_cast %208 : vector<32x32xf32> to vector<2x16x32xf32>
    %210 = vector.extract_strided_slice %205 {offsets = [0, 0], sizes = [32, 32], strides = [1, 1]} : vector<32x256xf32> to vector<32x32xf32>
    %211 = vector.shape_cast %210 : vector<32x32xf32> to vector<2x16x32xf32>
    "tpu.trace_start"() <{level = 10 : i32, message = "bld,bmd->blm"}> : () -> ()
    %cst_96 = arith.constant dense<0.000000e+00> : vector<2x16x16xf32>
    %212 = tpu.matmul %207, %209, %cst_96 {dimension_numbers = #tpu.dot_dimension_numbers<[2], [2], [1], [1], [0, 0, 0, 1, 1, 1], [0], [0]>} : vector<2x16x32xf32>, vector<2x16x32xf32>, vector<2x16x16xf32> -> vector<2x16x16xf32>
    "tpu.trace_stop"() : () -> ()
    %cst_97 = arith.constant dense<0xFF800000> : vector<2x16xf32>
    %213 = vector.multi_reduction <maximumf>, %212, %cst_97 [2] : vector<2x16x16xf32> to vector<2x16xf32>
    %214 = vector.shape_cast %213 : vector<2x16xf32> to vector<2x16x1xf32>
    %215 = vector.broadcast %214 : vector<2x16x1xf32> to vector<2x16x16xf32>
    %216 = arith.subf %212, %215 : vector<2x16x16xf32>
    %217 = math.exp %216 : vector<2x16x16xf32>
    %cst_98 = arith.constant dense<0.000000e+00> : vector<2x16xf32>
    %218 = vector.multi_reduction <add>, %217, %cst_98 [2] : vector<2x16x16xf32> to vector<2x16xf32>
    %219 = vector.shape_cast %218 : vector<2x16xf32> to vector<2x16x1xf32>
    %220 = tpu.reciprocal %219 {approx = true} : vector<2x16x1xf32> -> vector<2x16x1xf32>
    %221 = vector.broadcast %220 : vector<2x16x1xf32> to vector<2x16x16xf32>
    %222 = arith.mulf %217, %221 : vector<2x16x16xf32>
    "tpu.trace_start"() <{level = 10 : i32, message = "blm,bmd->bld"}> : () -> ()
    %cst_99 = arith.constant dense<0.000000e+00> : vector<2x16x32xf32>
    %223 = tpu.matmul %222, %211, %cst_99 {dimension_numbers = #tpu.dot_dimension_numbers<[2], [1], [1], [2], [0, 0, 0, 1, 1, 2], [0], [0]>} : vector<2x16x16xf32>, vector<2x16x32xf32>, vector<2x16x32xf32> -> vector<2x16x32xf32>
    "tpu.trace_stop"() : () -> ()
    %224 = vector.shape_cast %223 : vector<2x16x32xf32> to vector<32x32xf32>
    %225 = vector.extract_strided_slice %203 {offsets = [0, 32], sizes = [32, 32], strides = [1, 1]} : vector<32x256xf32> to vector<32x32xf32>
    %226 = vector.shape_cast %225 : vector<32x32xf32> to vector<2x16x32xf32>
    %227 = vector.extract_strided_slice %204 {offsets = [0, 32], sizes = [32, 32], strides = [1, 1]} : vector<32x256xf32> to vector<32x32xf32>
    %228 = vector.shape_cast %227 : vector<32x32xf32> to vector<2x16x32xf32>
    %229 = vector.extract_strided_slice %205 {offsets = [0, 32], sizes = [32, 32], strides = [1, 1]} : vector<32x256xf32> to vector<32x32xf32>
    %230 = vector.shape_cast %229 : vector<32x32xf32> to vector<2x16x32xf32>
    "tpu.trace_start"() <{level = 10 : i32, message = "bld,bmd->blm"}> : () -> ()
    %cst_100 = arith.constant dense<0.000000e+00> : vector<2x16x16xf32>
    %231 = tpu.matmul %226, %228, %cst_100 {dimension_numbers = #tpu.dot_dimension_numbers<[2], [2], [1], [1], [0, 0, 0, 1, 1, 1], [0], [0]>} : vector<2x16x32xf32>, vector<2x16x32xf32>, vector<2x16x16xf32> -> vector<2x16x16xf32>
    "tpu.trace_stop"() : () -> ()
    %cst_101 = arith.constant dense<0xFF800000> : vector<2x16xf32>
    %232 = vector.multi_reduction <maximumf>, %231, %cst_101 [2] : vector<2x16x16xf32> to vector<2x16xf32>
    %233 = vector.shape_cast %232 : vector<2x16xf32> to vector<2x16x1xf32>
    %234 = vector.broadcast %233 : vector<2x16x1xf32> to vector<2x16x16xf32>
    %235 = arith.subf %231, %234 : vector<2x16x16xf32>
    %236 = math.exp %235 : vector<2x16x16xf32>
    %cst_102 = arith.constant dense<0.000000e+00> : vector<2x16xf32>
    %237 = vector.multi_reduction <add>, %236, %cst_102 [2] : vector<2x16x16xf32> to vector<2x16xf32>
    %238 = vector.shape_cast %237 : vector<2x16xf32> to vector<2x16x1xf32>
    %239 = tpu.reciprocal %238 {approx = true} : vector<2x16x1xf32> -> vector<2x16x1xf32>
    %240 = vector.broadcast %239 : vector<2x16x1xf32> to vector<2x16x16xf32>
    %241 = arith.mulf %236, %240 : vector<2x16x16xf32>
    "tpu.trace_start"() <{level = 10 : i32, message = "blm,bmd->bld"}> : () -> ()
    %cst_103 = arith.constant dense<0.000000e+00> : vector<2x16x32xf32>
    %242 = tpu.matmul %241, %230, %cst_103 {dimension_numbers = #tpu.dot_dimension_numbers<[2], [1], [1], [2], [0, 0, 0, 1, 1, 2], [0], [0]>} : vector<2x16x16xf32>, vector<2x16x32xf32>, vector<2x16x32xf32> -> vector<2x16x32xf32>
    "tpu.trace_stop"() : () -> ()
    %243 = vector.shape_cast %242 : vector<2x16x32xf32> to vector<32x32xf32>
    %244 = vector.extract_strided_slice %203 {offsets = [0, 64], sizes = [32, 32], strides = [1, 1]} : vector<32x256xf32> to vector<32x32xf32>
    %245 = vector.shape_cast %244 : vector<32x32xf32> to vector<2x16x32xf32>
    %246 = vector.extract_strided_slice %204 {offsets = [0, 64], sizes = [32, 32], strides = [1, 1]} : vector<32x256xf32> to vector<32x32xf32>
    %247 = vector.shape_cast %246 : vector<32x32xf32> to vector<2x16x32xf32>
    %248 = vector.extract_strided_slice %205 {offsets = [0, 64], sizes = [32, 32], strides = [1, 1]} : vector<32x256xf32> to vector<32x32xf32>
    %249 = vector.shape_cast %248 : vector<32x32xf32> to vector<2x16x32xf32>
    "tpu.trace_start"() <{level = 10 : i32, message = "bld,bmd->blm"}> : () -> ()
    %cst_104 = arith.constant dense<0.000000e+00> : vector<2x16x16xf32>
    %250 = tpu.matmul %245, %247, %cst_104 {dimension_numbers = #tpu.dot_dimension_numbers<[2], [2], [1], [1], [0, 0, 0, 1, 1, 1], [0], [0]>} : vector<2x16x32xf32>, vector<2x16x32xf32>, vector<2x16x16xf32> -> vector<2x16x16xf32>
    "tpu.trace_stop"() : () -> ()
    %cst_105 = arith.constant dense<0xFF800000> : vector<2x16xf32>
    %251 = vector.multi_reduction <maximumf>, %250, %cst_105 [2] : vector<2x16x16xf32> to vector<2x16xf32>
    %252 = vector.shape_cast %251 : vector<2x16xf32> to vector<2x16x1xf32>
    %253 = vector.broadcast %252 : vector<2x16x1xf32> to vector<2x16x16xf32>
    %254 = arith.subf %250, %253 : vector<2x16x16xf32>
    %255 = math.exp %254 : vector<2x16x16xf32>
    %cst_106 = arith.constant dense<0.000000e+00> : vector<2x16xf32>
    %256 = vector.multi_reduction <add>, %255, %cst_106 [2] : vector<2x16x16xf32> to vector<2x16xf32>
    %257 = vector.shape_cast %256 : vector<2x16xf32> to vector<2x16x1xf32>
    %258 = tpu.reciprocal %257 {approx = true} : vector<2x16x1xf32> -> vector<2x16x1xf32>
    %259 = vector.broadcast %258 : vector<2x16x1xf32> to vector<2x16x16xf32>
    %260 = arith.mulf %255, %259 : vector<2x16x16xf32>
    "tpu.trace_start"() <{level = 10 : i32, message = "blm,bmd->bld"}> : () -> ()
    %cst_107 = arith.constant dense<0.000000e+00> : vector<2x16x32xf32>
    %261 = tpu.matmul %260, %249, %cst_107 {dimension_numbers = #tpu.dot_dimension_numbers<[2], [1], [1], [2], [0, 0, 0, 1, 1, 2], [0], [0]>} : vector<2x16x16xf32>, vector<2x16x32xf32>, vector<2x16x32xf32> -> vector<2x16x32xf32>
    "tpu.trace_stop"() : () -> ()
    %262 = vector.shape_cast %261 : vector<2x16x32xf32> to vector<32x32xf32>
    %263 = vector.extract_strided_slice %203 {offsets = [0, 96], sizes = [32, 32], strides = [1, 1]} : vector<32x256xf32> to vector<32x32xf32>
    %264 = vector.shape_cast %263 : vector<32x32xf32> to vector<2x16x32xf32>
    %265 = vector.extract_strided_slice %204 {offsets = [0, 96], sizes = [32, 32], strides = [1, 1]} : vector<32x256xf32> to vector<32x32xf32>
    %266 = vector.shape_cast %265 : vector<32x32xf32> to vector<2x16x32xf32>
    %267 = vector.extract_strided_slice %205 {offsets = [0, 96], sizes = [32, 32], strides = [1, 1]} : vector<32x256xf32> to vector<32x32xf32>
    %268 = vector.shape_cast %267 : vector<32x32xf32> to vector<2x16x32xf32>
    "tpu.trace_start"() <{level = 10 : i32, message = "bld,bmd->blm"}> : () -> ()
    %cst_108 = arith.constant dense<0.000000e+00> : vector<2x16x16xf32>
    %269 = tpu.matmul %264, %266, %cst_108 {dimension_numbers = #tpu.dot_dimension_numbers<[2], [2], [1], [1], [0, 0, 0, 1, 1, 1], [0], [0]>} : vector<2x16x32xf32>, vector<2x16x32xf32>, vector<2x16x16xf32> -> vector<2x16x16xf32>
    "tpu.trace_stop"() : () -> ()
    %cst_109 = arith.constant dense<0xFF800000> : vector<2x16xf32>
    %270 = vector.multi_reduction <maximumf>, %269, %cst_109 [2] : vector<2x16x16xf32> to vector<2x16xf32>
    %271 = vector.shape_cast %270 : vector<2x16xf32> to vector<2x16x1xf32>
    %272 = vector.broadcast %271 : vector<2x16x1xf32> to vector<2x16x16xf32>
    %273 = arith.subf %269, %272 : vector<2x16x16xf32>
    %274 = math.exp %273 : vector<2x16x16xf32>
    %cst_110 = arith.constant dense<0.000000e+00> : vector<2x16xf32>
    %275 = vector.multi_reduction <add>, %274, %cst_110 [2] : vector<2x16x16xf32> to vector<2x16xf32>
    %276 = vector.shape_cast %275 : vector<2x16xf32> to vector<2x16x1xf32>
    %277 = tpu.reciprocal %276 {approx = true} : vector<2x16x1xf32> -> vector<2x16x1xf32>
    %278 = vector.broadcast %277 : vector<2x16x1xf32> to vector<2x16x16xf32>
    %279 = arith.mulf %274, %278 : vector<2x16x16xf32>
    "tpu.trace_start"() <{level = 10 : i32, message = "blm,bmd->bld"}> : () -> ()
    %cst_111 = arith.constant dense<0.000000e+00> : vector<2x16x32xf32>
    %280 = tpu.matmul %279, %268, %cst_111 {dimension_numbers = #tpu.dot_dimension_numbers<[2], [1], [1], [2], [0, 0, 0, 1, 1, 2], [0], [0]>} : vector<2x16x16xf32>, vector<2x16x32xf32>, vector<2x16x32xf32> -> vector<2x16x32xf32>
    "tpu.trace_stop"() : () -> ()
    %281 = vector.shape_cast %280 : vector<2x16x32xf32> to vector<32x32xf32>
    %282 = vector.extract_strided_slice %203 {offsets = [0, 128], sizes = [32, 32], strides = [1, 1]} : vector<32x256xf32> to vector<32x32xf32>
    %283 = vector.shape_cast %282 : vector<32x32xf32> to vector<2x16x32xf32>
    %284 = vector.extract_strided_slice %204 {offsets = [0, 128], sizes = [32, 32], strides = [1, 1]} : vector<32x256xf32> to vector<32x32xf32>
    %285 = vector.shape_cast %284 : vector<32x32xf32> to vector<2x16x32xf32>
    %286 = vector.extract_strided_slice %205 {offsets = [0, 128], sizes = [32, 32], strides = [1, 1]} : vector<32x256xf32> to vector<32x32xf32>
    %287 = vector.shape_cast %286 : vector<32x32xf32> to vector<2x16x32xf32>
    "tpu.trace_start"() <{level = 10 : i32, message = "bld,bmd->blm"}> : () -> ()
    %cst_112 = arith.constant dense<0.000000e+00> : vector<2x16x16xf32>
    %288 = tpu.matmul %283, %285, %cst_112 {dimension_numbers = #tpu.dot_dimension_numbers<[2], [2], [1], [1], [0, 0, 0, 1, 1, 1], [0], [0]>} : vector<2x16x32xf32>, vector<2x16x32xf32>, vector<2x16x16xf32> -> vector<2x16x16xf32>
    "tpu.trace_stop"() : () -> ()
    %cst_113 = arith.constant dense<0xFF800000> : vector<2x16xf32>
    %289 = vector.multi_reduction <maximumf>, %288, %cst_113 [2] : vector<2x16x16xf32> to vector<2x16xf32>
    %290 = vector.shape_cast %289 : vector<2x16xf32> to vector<2x16x1xf32>
    %291 = vector.broadcast %290 : vector<2x16x1xf32> to vector<2x16x16xf32>
    %292 = arith.subf %288, %291 : vector<2x16x16xf32>
    %293 = math.exp %292 : vector<2x16x16xf32>
    %cst_114 = arith.constant dense<0.000000e+00> : vector<2x16xf32>
    %294 = vector.multi_reduction <add>, %293, %cst_114 [2] : vector<2x16x16xf32> to vector<2x16xf32>
    %295 = vector.shape_cast %294 : vector<2x16xf32> to vector<2x16x1xf32>
    %296 = tpu.reciprocal %295 {approx = true} : vector<2x16x1xf32> -> vector<2x16x1xf32>
    %297 = vector.broadcast %296 : vector<2x16x1xf32> to vector<2x16x16xf32>
    %298 = arith.mulf %293, %297 : vector<2x16x16xf32>
    "tpu.trace_start"() <{level = 10 : i32, message = "blm,bmd->bld"}> : () -> ()
    %cst_115 = arith.constant dense<0.000000e+00> : vector<2x16x32xf32>
    %299 = tpu.matmul %298, %287, %cst_115 {dimension_numbers = #tpu.dot_dimension_numbers<[2], [1], [1], [2], [0, 0, 0, 1, 1, 2], [0], [0]>} : vector<2x16x16xf32>, vector<2x16x32xf32>, vector<2x16x32xf32> -> vector<2x16x32xf32>
    "tpu.trace_stop"() : () -> ()
    %300 = vector.shape_cast %299 : vector<2x16x32xf32> to vector<32x32xf32>
    %301 = vector.extract_strided_slice %203 {offsets = [0, 160], sizes = [32, 32], strides = [1, 1]} : vector<32x256xf32> to vector<32x32xf32>
    %302 = vector.shape_cast %301 : vector<32x32xf32> to vector<2x16x32xf32>
    %303 = vector.extract_strided_slice %204 {offsets = [0, 160], sizes = [32, 32], strides = [1, 1]} : vector<32x256xf32> to vector<32x32xf32>
    %304 = vector.shape_cast %303 : vector<32x32xf32> to vector<2x16x32xf32>
    %305 = vector.extract_strided_slice %205 {offsets = [0, 160], sizes = [32, 32], strides = [1, 1]} : vector<32x256xf32> to vector<32x32xf32>
    %306 = vector.shape_cast %305 : vector<32x32xf32> to vector<2x16x32xf32>
    "tpu.trace_start"() <{level = 10 : i32, message = "bld,bmd->blm"}> : () -> ()
    %cst_116 = arith.constant dense<0.000000e+00> : vector<2x16x16xf32>
    %307 = tpu.matmul %302, %304, %cst_116 {dimension_numbers = #tpu.dot_dimension_numbers<[2], [2], [1], [1], [0, 0, 0, 1, 1, 1], [0], [0]>} : vector<2x16x32xf32>, vector<2x16x32xf32>, vector<2x16x16xf32> -> vector<2x16x16xf32>
    "tpu.trace_stop"() : () -> ()
    %cst_117 = arith.constant dense<0xFF800000> : vector<2x16xf32>
    %308 = vector.multi_reduction <maximumf>, %307, %cst_117 [2] : vector<2x16x16xf32> to vector<2x16xf32>
    %309 = vector.shape_cast %308 : vector<2x16xf32> to vector<2x16x1xf32>
    %310 = vector.broadcast %309 : vector<2x16x1xf32> to vector<2x16x16xf32>
    %311 = arith.subf %307, %310 : vector<2x16x16xf32>
    %312 = math.exp %311 : vector<2x16x16xf32>
    %cst_118 = arith.constant dense<0.000000e+00> : vector<2x16xf32>
    %313 = vector.multi_reduction <add>, %312, %cst_118 [2] : vector<2x16x16xf32> to vector<2x16xf32>
    %314 = vector.shape_cast %313 : vector<2x16xf32> to vector<2x16x1xf32>
    %315 = tpu.reciprocal %314 {approx = true} : vector<2x16x1xf32> -> vector<2x16x1xf32>
    %316 = vector.broadcast %315 : vector<2x16x1xf32> to vector<2x16x16xf32>
    %317 = arith.mulf %312, %316 : vector<2x16x16xf32>
    "tpu.trace_start"() <{level = 10 : i32, message = "blm,bmd->bld"}> : () -> ()
    %cst_119 = arith.constant dense<0.000000e+00> : vector<2x16x32xf32>
    %318 = tpu.matmul %317, %306, %cst_119 {dimension_numbers = #tpu.dot_dimension_numbers<[2], [1], [1], [2], [0, 0, 0, 1, 1, 2], [0], [0]>} : vector<2x16x16xf32>, vector<2x16x32xf32>, vector<2x16x32xf32> -> vector<2x16x32xf32>
    "tpu.trace_stop"() : () -> ()
    %319 = vector.shape_cast %318 : vector<2x16x32xf32> to vector<32x32xf32>
    %320 = vector.extract_strided_slice %203 {offsets = [0, 192], sizes = [32, 32], strides = [1, 1]} : vector<32x256xf32> to vector<32x32xf32>
    %321 = vector.shape_cast %320 : vector<32x32xf32> to vector<2x16x32xf32>
    %322 = vector.extract_strided_slice %204 {offsets = [0, 192], sizes = [32, 32], strides = [1, 1]} : vector<32x256xf32> to vector<32x32xf32>
    %323 = vector.shape_cast %322 : vector<32x32xf32> to vector<2x16x32xf32>
    %324 = vector.extract_strided_slice %205 {offsets = [0, 192], sizes = [32, 32], strides = [1, 1]} : vector<32x256xf32> to vector<32x32xf32>
    %325 = vector.shape_cast %324 : vector<32x32xf32> to vector<2x16x32xf32>
    "tpu.trace_start"() <{level = 10 : i32, message = "bld,bmd->blm"}> : () -> ()
    %cst_120 = arith.constant dense<0.000000e+00> : vector<2x16x16xf32>
    %326 = tpu.matmul %321, %323, %cst_120 {dimension_numbers = #tpu.dot_dimension_numbers<[2], [2], [1], [1], [0, 0, 0, 1, 1, 1], [0], [0]>} : vector<2x16x32xf32>, vector<2x16x32xf32>, vector<2x16x16xf32> -> vector<2x16x16xf32>
    "tpu.trace_stop"() : () -> ()
    %cst_121 = arith.constant dense<0xFF800000> : vector<2x16xf32>
    %327 = vector.multi_reduction <maximumf>, %326, %cst_121 [2] : vector<2x16x16xf32> to vector<2x16xf32>
    %328 = vector.shape_cast %327 : vector<2x16xf32> to vector<2x16x1xf32>
    %329 = vector.broadcast %328 : vector<2x16x1xf32> to vector<2x16x16xf32>
    %330 = arith.subf %326, %329 : vector<2x16x16xf32>
    %331 = math.exp %330 : vector<2x16x16xf32>
    %cst_122 = arith.constant dense<0.000000e+00> : vector<2x16xf32>
    %332 = vector.multi_reduction <add>, %331, %cst_122 [2] : vector<2x16x16xf32> to vector<2x16xf32>
    %333 = vector.shape_cast %332 : vector<2x16xf32> to vector<2x16x1xf32>
    %334 = tpu.reciprocal %333 {approx = true} : vector<2x16x1xf32> -> vector<2x16x1xf32>
    %335 = vector.broadcast %334 : vector<2x16x1xf32> to vector<2x16x16xf32>
    %336 = arith.mulf %331, %335 : vector<2x16x16xf32>
    "tpu.trace_start"() <{level = 10 : i32, message = "blm,bmd->bld"}> : () -> ()
    %cst_123 = arith.constant dense<0.000000e+00> : vector<2x16x32xf32>
    %337 = tpu.matmul %336, %325, %cst_123 {dimension_numbers = #tpu.dot_dimension_numbers<[2], [1], [1], [2], [0, 0, 0, 1, 1, 2], [0], [0]>} : vector<2x16x16xf32>, vector<2x16x32xf32>, vector<2x16x32xf32> -> vector<2x16x32xf32>
    "tpu.trace_stop"() : () -> ()
    %338 = vector.shape_cast %337 : vector<2x16x32xf32> to vector<32x32xf32>
    %339 = vector.extract_strided_slice %203 {offsets = [0, 224], sizes = [32, 32], strides = [1, 1]} : vector<32x256xf32> to vector<32x32xf32>
    %340 = vector.shape_cast %339 : vector<32x32xf32> to vector<2x16x32xf32>
    %341 = vector.extract_strided_slice %204 {offsets = [0, 224], sizes = [32, 32], strides = [1, 1]} : vector<32x256xf32> to vector<32x32xf32>
    %342 = vector.shape_cast %341 : vector<32x32xf32> to vector<2x16x32xf32>
    %343 = vector.extract_strided_slice %205 {offsets = [0, 224], sizes = [32, 32], strides = [1, 1]} : vector<32x256xf32> to vector<32x32xf32>
    %344 = vector.shape_cast %343 : vector<32x32xf32> to vector<2x16x32xf32>
    "tpu.trace_start"() <{level = 10 : i32, message = "bld,bmd->blm"}> : () -> ()
    %cst_124 = arith.constant dense<0.000000e+00> : vector<2x16x16xf32>
    %345 = tpu.matmul %340, %342, %cst_124 {dimension_numbers = #tpu.dot_dimension_numbers<[2], [2], [1], [1], [0, 0, 0, 1, 1, 1], [0], [0]>} : vector<2x16x32xf32>, vector<2x16x32xf32>, vector<2x16x16xf32> -> vector<2x16x16xf32>
    "tpu.trace_stop"() : () -> ()
    %cst_125 = arith.constant dense<0xFF800000> : vector<2x16xf32>
    %346 = vector.multi_reduction <maximumf>, %345, %cst_125 [2] : vector<2x16x16xf32> to vector<2x16xf32>
    %347 = vector.shape_cast %346 : vector<2x16xf32> to vector<2x16x1xf32>
    %348 = vector.broadcast %347 : vector<2x16x1xf32> to vector<2x16x16xf32>
    %349 = arith.subf %345, %348 : vector<2x16x16xf32>
    %350 = math.exp %349 : vector<2x16x16xf32>
    %cst_126 = arith.constant dense<0.000000e+00> : vector<2x16xf32>
    %351 = vector.multi_reduction <add>, %350, %cst_126 [2] : vector<2x16x16xf32> to vector<2x16xf32>
    %352 = vector.shape_cast %351 : vector<2x16xf32> to vector<2x16x1xf32>
    %353 = tpu.reciprocal %352 {approx = true} : vector<2x16x1xf32> -> vector<2x16x1xf32>
    %354 = vector.broadcast %353 : vector<2x16x1xf32> to vector<2x16x16xf32>
    %355 = arith.mulf %350, %354 : vector<2x16x16xf32>
    "tpu.trace_start"() <{level = 10 : i32, message = "blm,bmd->bld"}> : () -> ()
    %cst_127 = arith.constant dense<0.000000e+00> : vector<2x16x32xf32>
    %356 = tpu.matmul %355, %344, %cst_127 {dimension_numbers = #tpu.dot_dimension_numbers<[2], [1], [1], [2], [0, 0, 0, 1, 1, 2], [0], [0]>} : vector<2x16x16xf32>, vector<2x16x32xf32>, vector<2x16x32xf32> -> vector<2x16x32xf32>
    "tpu.trace_stop"() : () -> ()
    %357 = vector.shape_cast %356 : vector<2x16x32xf32> to vector<32x32xf32>
    %358 = tpu.concatenate %224, %243, %262, %281, %300, %319, %338, %357 in 1 : vector<32x32xf32>, vector<32x32xf32>, vector<32x32xf32>, vector<32x32xf32>, vector<32x32xf32>, vector<32x32xf32>, vector<32x32xf32>, vector<32x32xf32> -> vector<32x256xf32>
    %cst_128 = arith.constant dense<0.000000e+00> : vector<32x256xf32>
    %359 = tpu.matmul %358, %196, %cst_128 {dimension_numbers = #tpu.dot_dimension_numbers<[1], [0], [0], [1], [0, 0, 1, 1], [], []>} : vector<32x256xf32>, vector<256x256xf32>, vector<32x256xf32> -> vector<32x256xf32>
    %360 = vector.broadcast %197 : vector<1x256xf32> to vector<32x256xf32>
    %361 = arith.addf %359, %360 : vector<32x256xf32>
    %362 = arith.addf %361, %193 : vector<32x256xf32>
    %cst_129 = arith.constant 0.000000e+00 : f32
    %363 = vector.broadcast %cst_129 : f32 to vector<32x256xf32>
    %364 = arith.maximumf %362, %363 : vector<32x256xf32>
    %c0_130 = arith.constant 0 : index
    %c0_131 = arith.constant 0 : index
    %365 = vector.load %arg29[%c0_130, %c0_131] : memref<256x768xf32, #tpu.memory_space<vmem>>, vector<256x768xf32>
    %c0_132 = arith.constant 0 : index
    %c0_133 = arith.constant 0 : index
    %366 = vector.load %arg30[%c0_132, %c0_133] : memref<1x768xf32, #tpu.memory_space<vmem>>, vector<1x768xf32>
    %c0_134 = arith.constant 0 : index
    %c0_135 = arith.constant 0 : index
    %367 = vector.load %arg31[%c0_134, %c0_135] : memref<256x256xf32, #tpu.memory_space<vmem>>, vector<256x256xf32>
    %c0_136 = arith.constant 0 : index
    %c0_137 = arith.constant 0 : index
    %368 = vector.load %arg32[%c0_136, %c0_137] : memref<1x256xf32, #tpu.memory_space<vmem>>, vector<1x256xf32>
    %cst_138 = arith.constant dense<0.000000e+00> : vector<32x768xf32>
    %369 = tpu.matmul %364, %365, %cst_138 {dimension_numbers = #tpu.dot_dimension_numbers<[1], [0], [0], [1], [0, 0, 1, 1], [], []>} : vector<32x256xf32>, vector<256x768xf32>, vector<32x768xf32> -> vector<32x768xf32>
    %370 = vector.broadcast %366 : vector<1x768xf32> to vector<32x768xf32>
    %371 = arith.addf %369, %370 : vector<32x768xf32>
    %372 = vector.extract_strided_slice %371 {offsets = [0, 0], sizes = [32, 256], strides = [1, 1]} : vector<32x768xf32> to vector<32x256xf32>
    %cst_139 = arith.constant 0.176776692 : f32
    %373 = vector.broadcast %cst_139 : f32 to vector<32x256xf32>
    %374 = arith.mulf %372, %373 : vector<32x256xf32>
    %375 = vector.extract_strided_slice %371 {offsets = [0, 256], sizes = [32, 256], strides = [1, 1]} : vector<32x768xf32> to vector<32x256xf32>
    %376 = vector.extract_strided_slice %371 {offsets = [0, 512], sizes = [32, 256], strides = [1, 1]} : vector<32x768xf32> to vector<32x256xf32>
    %377 = vector.extract_strided_slice %374 {offsets = [0, 0], sizes = [32, 32], strides = [1, 1]} : vector<32x256xf32> to vector<32x32xf32>
    %378 = vector.shape_cast %377 : vector<32x32xf32> to vector<2x16x32xf32>
    %379 = vector.extract_strided_slice %375 {offsets = [0, 0], sizes = [32, 32], strides = [1, 1]} : vector<32x256xf32> to vector<32x32xf32>
    %380 = vector.shape_cast %379 : vector<32x32xf32> to vector<2x16x32xf32>
    %381 = vector.extract_strided_slice %376 {offsets = [0, 0], sizes = [32, 32], strides = [1, 1]} : vector<32x256xf32> to vector<32x32xf32>
    %382 = vector.shape_cast %381 : vector<32x32xf32> to vector<2x16x32xf32>
    "tpu.trace_start"() <{level = 10 : i32, message = "bld,bmd->blm"}> : () -> ()
    %cst_140 = arith.constant dense<0.000000e+00> : vector<2x16x16xf32>
    %383 = tpu.matmul %378, %380, %cst_140 {dimension_numbers = #tpu.dot_dimension_numbers<[2], [2], [1], [1], [0, 0, 0, 1, 1, 1], [0], [0]>} : vector<2x16x32xf32>, vector<2x16x32xf32>, vector<2x16x16xf32> -> vector<2x16x16xf32>
    "tpu.trace_stop"() : () -> ()
    %cst_141 = arith.constant dense<0xFF800000> : vector<2x16xf32>
    %384 = vector.multi_reduction <maximumf>, %383, %cst_141 [2] : vector<2x16x16xf32> to vector<2x16xf32>
    %385 = vector.shape_cast %384 : vector<2x16xf32> to vector<2x16x1xf32>
    %386 = vector.broadcast %385 : vector<2x16x1xf32> to vector<2x16x16xf32>
    %387 = arith.subf %383, %386 : vector<2x16x16xf32>
    %388 = math.exp %387 : vector<2x16x16xf32>
    %cst_142 = arith.constant dense<0.000000e+00> : vector<2x16xf32>
    %389 = vector.multi_reduction <add>, %388, %cst_142 [2] : vector<2x16x16xf32> to vector<2x16xf32>
    %390 = vector.shape_cast %389 : vector<2x16xf32> to vector<2x16x1xf32>
    %391 = tpu.reciprocal %390 {approx = true} : vector<2x16x1xf32> -> vector<2x16x1xf32>
    %392 = vector.broadcast %391 : vector<2x16x1xf32> to vector<2x16x16xf32>
    %393 = arith.mulf %388, %392 : vector<2x16x16xf32>
    "tpu.trace_start"() <{level = 10 : i32, message = "blm,bmd->bld"}> : () -> ()
    %cst_143 = arith.constant dense<0.000000e+00> : vector<2x16x32xf32>
    %394 = tpu.matmul %393, %382, %cst_143 {dimension_numbers = #tpu.dot_dimension_numbers<[2], [1], [1], [2], [0, 0, 0, 1, 1, 2], [0], [0]>} : vector<2x16x16xf32>, vector<2x16x32xf32>, vector<2x16x32xf32> -> vector<2x16x32xf32>
    "tpu.trace_stop"() : () -> ()
    %395 = vector.shape_cast %394 : vector<2x16x32xf32> to vector<32x32xf32>
    %396 = vector.extract_strided_slice %374 {offsets = [0, 32], sizes = [32, 32], strides = [1, 1]} : vector<32x256xf32> to vector<32x32xf32>
    %397 = vector.shape_cast %396 : vector<32x32xf32> to vector<2x16x32xf32>
    %398 = vector.extract_strided_slice %375 {offsets = [0, 32], sizes = [32, 32], strides = [1, 1]} : vector<32x256xf32> to vector<32x32xf32>
    %399 = vector.shape_cast %398 : vector<32x32xf32> to vector<2x16x32xf32>
    %400 = vector.extract_strided_slice %376 {offsets = [0, 32], sizes = [32, 32], strides = [1, 1]} : vector<32x256xf32> to vector<32x32xf32>
    %401 = vector.shape_cast %400 : vector<32x32xf32> to vector<2x16x32xf32>
    "tpu.trace_start"() <{level = 10 : i32, message = "bld,bmd->blm"}> : () -> ()
    %cst_144 = arith.constant dense<0.000000e+00> : vector<2x16x16xf32>
    %402 = tpu.matmul %397, %399, %cst_144 {dimension_numbers = #tpu.dot_dimension_numbers<[2], [2], [1], [1], [0, 0, 0, 1, 1, 1], [0], [0]>} : vector<2x16x32xf32>, vector<2x16x32xf32>, vector<2x16x16xf32> -> vector<2x16x16xf32>
    "tpu.trace_stop"() : () -> ()
    %cst_145 = arith.constant dense<0xFF800000> : vector<2x16xf32>
    %403 = vector.multi_reduction <maximumf>, %402, %cst_145 [2] : vector<2x16x16xf32> to vector<2x16xf32>
    %404 = vector.shape_cast %403 : vector<2x16xf32> to vector<2x16x1xf32>
    %405 = vector.broadcast %404 : vector<2x16x1xf32> to vector<2x16x16xf32>
    %406 = arith.subf %402, %405 : vector<2x16x16xf32>
    %407 = math.exp %406 : vector<2x16x16xf32>
    %cst_146 = arith.constant dense<0.000000e+00> : vector<2x16xf32>
    %408 = vector.multi_reduction <add>, %407, %cst_146 [2] : vector<2x16x16xf32> to vector<2x16xf32>
    %409 = vector.shape_cast %408 : vector<2x16xf32> to vector<2x16x1xf32>
    %410 = tpu.reciprocal %409 {approx = true} : vector<2x16x1xf32> -> vector<2x16x1xf32>
    %411 = vector.broadcast %410 : vector<2x16x1xf32> to vector<2x16x16xf32>
    %412 = arith.mulf %407, %411 : vector<2x16x16xf32>
    "tpu.trace_start"() <{level = 10 : i32, message = "blm,bmd->bld"}> : () -> ()
    %cst_147 = arith.constant dense<0.000000e+00> : vector<2x16x32xf32>
    %413 = tpu.matmul %412, %401, %cst_147 {dimension_numbers = #tpu.dot_dimension_numbers<[2], [1], [1], [2], [0, 0, 0, 1, 1, 2], [0], [0]>} : vector<2x16x16xf32>, vector<2x16x32xf32>, vector<2x16x32xf32> -> vector<2x16x32xf32>
    "tpu.trace_stop"() : () -> ()
    %414 = vector.shape_cast %413 : vector<2x16x32xf32> to vector<32x32xf32>
    %415 = vector.extract_strided_slice %374 {offsets = [0, 64], sizes = [32, 32], strides = [1, 1]} : vector<32x256xf32> to vector<32x32xf32>
    %416 = vector.shape_cast %415 : vector<32x32xf32> to vector<2x16x32xf32>
    %417 = vector.extract_strided_slice %375 {offsets = [0, 64], sizes = [32, 32], strides = [1, 1]} : vector<32x256xf32> to vector<32x32xf32>
    %418 = vector.shape_cast %417 : vector<32x32xf32> to vector<2x16x32xf32>
    %419 = vector.extract_strided_slice %376 {offsets = [0, 64], sizes = [32, 32], strides = [1, 1]} : vector<32x256xf32> to vector<32x32xf32>
    %420 = vector.shape_cast %419 : vector<32x32xf32> to vector<2x16x32xf32>
    "tpu.trace_start"() <{level = 10 : i32, message = "bld,bmd->blm"}> : () -> ()
    %cst_148 = arith.constant dense<0.000000e+00> : vector<2x16x16xf32>
    %421 = tpu.matmul %416, %418, %cst_148 {dimension_numbers = #tpu.dot_dimension_numbers<[2], [2], [1], [1], [0, 0, 0, 1, 1, 1], [0], [0]>} : vector<2x16x32xf32>, vector<2x16x32xf32>, vector<2x16x16xf32> -> vector<2x16x16xf32>
    "tpu.trace_stop"() : () -> ()
    %cst_149 = arith.constant dense<0xFF800000> : vector<2x16xf32>
    %422 = vector.multi_reduction <maximumf>, %421, %cst_149 [2] : vector<2x16x16xf32> to vector<2x16xf32>
    %423 = vector.shape_cast %422 : vector<2x16xf32> to vector<2x16x1xf32>
    %424 = vector.broadcast %423 : vector<2x16x1xf32> to vector<2x16x16xf32>
    %425 = arith.subf %421, %424 : vector<2x16x16xf32>
    %426 = math.exp %425 : vector<2x16x16xf32>
    %cst_150 = arith.constant dense<0.000000e+00> : vector<2x16xf32>
    %427 = vector.multi_reduction <add>, %426, %cst_150 [2] : vector<2x16x16xf32> to vector<2x16xf32>
    %428 = vector.shape_cast %427 : vector<2x16xf32> to vector<2x16x1xf32>
    %429 = tpu.reciprocal %428 {approx = true} : vector<2x16x1xf32> -> vector<2x16x1xf32>
    %430 = vector.broadcast %429 : vector<2x16x1xf32> to vector<2x16x16xf32>
    %431 = arith.mulf %426, %430 : vector<2x16x16xf32>
    "tpu.trace_start"() <{level = 10 : i32, message = "blm,bmd->bld"}> : () -> ()
    %cst_151 = arith.constant dense<0.000000e+00> : vector<2x16x32xf32>
    %432 = tpu.matmul %431, %420, %cst_151 {dimension_numbers = #tpu.dot_dimension_numbers<[2], [1], [1], [2], [0, 0, 0, 1, 1, 2], [0], [0]>} : vector<2x16x16xf32>, vector<2x16x32xf32>, vector<2x16x32xf32> -> vector<2x16x32xf32>
    "tpu.trace_stop"() : () -> ()
    %433 = vector.shape_cast %432 : vector<2x16x32xf32> to vector<32x32xf32>
    %434 = vector.extract_strided_slice %374 {offsets = [0, 96], sizes = [32, 32], strides = [1, 1]} : vector<32x256xf32> to vector<32x32xf32>
    %435 = vector.shape_cast %434 : vector<32x32xf32> to vector<2x16x32xf32>
    %436 = vector.extract_strided_slice %375 {offsets = [0, 96], sizes = [32, 32], strides = [1, 1]} : vector<32x256xf32> to vector<32x32xf32>
    %437 = vector.shape_cast %436 : vector<32x32xf32> to vector<2x16x32xf32>
    %438 = vector.extract_strided_slice %376 {offsets = [0, 96], sizes = [32, 32], strides = [1, 1]} : vector<32x256xf32> to vector<32x32xf32>
    %439 = vector.shape_cast %438 : vector<32x32xf32> to vector<2x16x32xf32>
    "tpu.trace_start"() <{level = 10 : i32, message = "bld,bmd->blm"}> : () -> ()
    %cst_152 = arith.constant dense<0.000000e+00> : vector<2x16x16xf32>
    %440 = tpu.matmul %435, %437, %cst_152 {dimension_numbers = #tpu.dot_dimension_numbers<[2], [2], [1], [1], [0, 0, 0, 1, 1, 1], [0], [0]>} : vector<2x16x32xf32>, vector<2x16x32xf32>, vector<2x16x16xf32> -> vector<2x16x16xf32>
    "tpu.trace_stop"() : () -> ()
    %cst_153 = arith.constant dense<0xFF800000> : vector<2x16xf32>
    %441 = vector.multi_reduction <maximumf>, %440, %cst_153 [2] : vector<2x16x16xf32> to vector<2x16xf32>
    %442 = vector.shape_cast %441 : vector<2x16xf32> to vector<2x16x1xf32>
    %443 = vector.broadcast %442 : vector<2x16x1xf32> to vector<2x16x16xf32>
    %444 = arith.subf %440, %443 : vector<2x16x16xf32>
    %445 = math.exp %444 : vector<2x16x16xf32>
    %cst_154 = arith.constant dense<0.000000e+00> : vector<2x16xf32>
    %446 = vector.multi_reduction <add>, %445, %cst_154 [2] : vector<2x16x16xf32> to vector<2x16xf32>
    %447 = vector.shape_cast %446 : vector<2x16xf32> to vector<2x16x1xf32>
    %448 = tpu.reciprocal %447 {approx = true} : vector<2x16x1xf32> -> vector<2x16x1xf32>
    %449 = vector.broadcast %448 : vector<2x16x1xf32> to vector<2x16x16xf32>
    %450 = arith.mulf %445, %449 : vector<2x16x16xf32>
    "tpu.trace_start"() <{level = 10 : i32, message = "blm,bmd->bld"}> : () -> ()
    %cst_155 = arith.constant dense<0.000000e+00> : vector<2x16x32xf32>
    %451 = tpu.matmul %450, %439, %cst_155 {dimension_numbers = #tpu.dot_dimension_numbers<[2], [1], [1], [2], [0, 0, 0, 1, 1, 2], [0], [0]>} : vector<2x16x16xf32>, vector<2x16x32xf32>, vector<2x16x32xf32> -> vector<2x16x32xf32>
    "tpu.trace_stop"() : () -> ()
    %452 = vector.shape_cast %451 : vector<2x16x32xf32> to vector<32x32xf32>
    %453 = vector.extract_strided_slice %374 {offsets = [0, 128], sizes = [32, 32], strides = [1, 1]} : vector<32x256xf32> to vector<32x32xf32>
    %454 = vector.shape_cast %453 : vector<32x32xf32> to vector<2x16x32xf32>
    %455 = vector.extract_strided_slice %375 {offsets = [0, 128], sizes = [32, 32], strides = [1, 1]} : vector<32x256xf32> to vector<32x32xf32>
    %456 = vector.shape_cast %455 : vector<32x32xf32> to vector<2x16x32xf32>
    %457 = vector.extract_strided_slice %376 {offsets = [0, 128], sizes = [32, 32], strides = [1, 1]} : vector<32x256xf32> to vector<32x32xf32>
    %458 = vector.shape_cast %457 : vector<32x32xf32> to vector<2x16x32xf32>
    "tpu.trace_start"() <{level = 10 : i32, message = "bld,bmd->blm"}> : () -> ()
    %cst_156 = arith.constant dense<0.000000e+00> : vector<2x16x16xf32>
    %459 = tpu.matmul %454, %456, %cst_156 {dimension_numbers = #tpu.dot_dimension_numbers<[2], [2], [1], [1], [0, 0, 0, 1, 1, 1], [0], [0]>} : vector<2x16x32xf32>, vector<2x16x32xf32>, vector<2x16x16xf32> -> vector<2x16x16xf32>
    "tpu.trace_stop"() : () -> ()
    %cst_157 = arith.constant dense<0xFF800000> : vector<2x16xf32>
    %460 = vector.multi_reduction <maximumf>, %459, %cst_157 [2] : vector<2x16x16xf32> to vector<2x16xf32>
    %461 = vector.shape_cast %460 : vector<2x16xf32> to vector<2x16x1xf32>
    %462 = vector.broadcast %461 : vector<2x16x1xf32> to vector<2x16x16xf32>
    %463 = arith.subf %459, %462 : vector<2x16x16xf32>
    %464 = math.exp %463 : vector<2x16x16xf32>
    %cst_158 = arith.constant dense<0.000000e+00> : vector<2x16xf32>
    %465 = vector.multi_reduction <add>, %464, %cst_158 [2] : vector<2x16x16xf32> to vector<2x16xf32>
    %466 = vector.shape_cast %465 : vector<2x16xf32> to vector<2x16x1xf32>
    %467 = tpu.reciprocal %466 {approx = true} : vector<2x16x1xf32> -> vector<2x16x1xf32>
    %468 = vector.broadcast %467 : vector<2x16x1xf32> to vector<2x16x16xf32>
    %469 = arith.mulf %464, %468 : vector<2x16x16xf32>
    "tpu.trace_start"() <{level = 10 : i32, message = "blm,bmd->bld"}> : () -> ()
    %cst_159 = arith.constant dense<0.000000e+00> : vector<2x16x32xf32>
    %470 = tpu.matmul %469, %458, %cst_159 {dimension_numbers = #tpu.dot_dimension_numbers<[2], [1], [1], [2], [0, 0, 0, 1, 1, 2], [0], [0]>} : vector<2x16x16xf32>, vector<2x16x32xf32>, vector<2x16x32xf32> -> vector<2x16x32xf32>
    "tpu.trace_stop"() : () -> ()
    %471 = vector.shape_cast %470 : vector<2x16x32xf32> to vector<32x32xf32>
    %472 = vector.extract_strided_slice %374 {offsets = [0, 160], sizes = [32, 32], strides = [1, 1]} : vector<32x256xf32> to vector<32x32xf32>
    %473 = vector.shape_cast %472 : vector<32x32xf32> to vector<2x16x32xf32>
    %474 = vector.extract_strided_slice %375 {offsets = [0, 160], sizes = [32, 32], strides = [1, 1]} : vector<32x256xf32> to vector<32x32xf32>
    %475 = vector.shape_cast %474 : vector<32x32xf32> to vector<2x16x32xf32>
    %476 = vector.extract_strided_slice %376 {offsets = [0, 160], sizes = [32, 32], strides = [1, 1]} : vector<32x256xf32> to vector<32x32xf32>
    %477 = vector.shape_cast %476 : vector<32x32xf32> to vector<2x16x32xf32>
    "tpu.trace_start"() <{level = 10 : i32, message = "bld,bmd->blm"}> : () -> ()
    %cst_160 = arith.constant dense<0.000000e+00> : vector<2x16x16xf32>
    %478 = tpu.matmul %473, %475, %cst_160 {dimension_numbers = #tpu.dot_dimension_numbers<[2], [2], [1], [1], [0, 0, 0, 1, 1, 1], [0], [0]>} : vector<2x16x32xf32>, vector<2x16x32xf32>, vector<2x16x16xf32> -> vector<2x16x16xf32>
    "tpu.trace_stop"() : () -> ()
    %cst_161 = arith.constant dense<0xFF800000> : vector<2x16xf32>
    %479 = vector.multi_reduction <maximumf>, %478, %cst_161 [2] : vector<2x16x16xf32> to vector<2x16xf32>
    %480 = vector.shape_cast %479 : vector<2x16xf32> to vector<2x16x1xf32>
    %481 = vector.broadcast %480 : vector<2x16x1xf32> to vector<2x16x16xf32>
    %482 = arith.subf %478, %481 : vector<2x16x16xf32>
    %483 = math.exp %482 : vector<2x16x16xf32>
    %cst_162 = arith.constant dense<0.000000e+00> : vector<2x16xf32>
    %484 = vector.multi_reduction <add>, %483, %cst_162 [2] : vector<2x16x16xf32> to vector<2x16xf32>
    %485 = vector.shape_cast %484 : vector<2x16xf32> to vector<2x16x1xf32>
    %486 = tpu.reciprocal %485 {approx = true} : vector<2x16x1xf32> -> vector<2x16x1xf32>
    %487 = vector.broadcast %486 : vector<2x16x1xf32> to vector<2x16x16xf32>
    %488 = arith.mulf %483, %487 : vector<2x16x16xf32>
    "tpu.trace_start"() <{level = 10 : i32, message = "blm,bmd->bld"}> : () -> ()
    %cst_163 = arith.constant dense<0.000000e+00> : vector<2x16x32xf32>
    %489 = tpu.matmul %488, %477, %cst_163 {dimension_numbers = #tpu.dot_dimension_numbers<[2], [1], [1], [2], [0, 0, 0, 1, 1, 2], [0], [0]>} : vector<2x16x16xf32>, vector<2x16x32xf32>, vector<2x16x32xf32> -> vector<2x16x32xf32>
    "tpu.trace_stop"() : () -> ()
    %490 = vector.shape_cast %489 : vector<2x16x32xf32> to vector<32x32xf32>
    %491 = vector.extract_strided_slice %374 {offsets = [0, 192], sizes = [32, 32], strides = [1, 1]} : vector<32x256xf32> to vector<32x32xf32>
    %492 = vector.shape_cast %491 : vector<32x32xf32> to vector<2x16x32xf32>
    %493 = vector.extract_strided_slice %375 {offsets = [0, 192], sizes = [32, 32], strides = [1, 1]} : vector<32x256xf32> to vector<32x32xf32>
    %494 = vector.shape_cast %493 : vector<32x32xf32> to vector<2x16x32xf32>
    %495 = vector.extract_strided_slice %376 {offsets = [0, 192], sizes = [32, 32], strides = [1, 1]} : vector<32x256xf32> to vector<32x32xf32>
    %496 = vector.shape_cast %495 : vector<32x32xf32> to vector<2x16x32xf32>
    "tpu.trace_start"() <{level = 10 : i32, message = "bld,bmd->blm"}> : () -> ()
    %cst_164 = arith.constant dense<0.000000e+00> : vector<2x16x16xf32>
    %497 = tpu.matmul %492, %494, %cst_164 {dimension_numbers = #tpu.dot_dimension_numbers<[2], [2], [1], [1], [0, 0, 0, 1, 1, 1], [0], [0]>} : vector<2x16x32xf32>, vector<2x16x32xf32>, vector<2x16x16xf32> -> vector<2x16x16xf32>
    "tpu.trace_stop"() : () -> ()
    %cst_165 = arith.constant dense<0xFF800000> : vector<2x16xf32>
    %498 = vector.multi_reduction <maximumf>, %497, %cst_165 [2] : vector<2x16x16xf32> to vector<2x16xf32>
    %499 = vector.shape_cast %498 : vector<2x16xf32> to vector<2x16x1xf32>
    %500 = vector.broadcast %499 : vector<2x16x1xf32> to vector<2x16x16xf32>
    %501 = arith.subf %497, %500 : vector<2x16x16xf32>
    %502 = math.exp %501 : vector<2x16x16xf32>
    %cst_166 = arith.constant dense<0.000000e+00> : vector<2x16xf32>
    %503 = vector.multi_reduction <add>, %502, %cst_166 [2] : vector<2x16x16xf32> to vector<2x16xf32>
    %504 = vector.shape_cast %503 : vector<2x16xf32> to vector<2x16x1xf32>
    %505 = tpu.reciprocal %504 {approx = true} : vector<2x16x1xf32> -> vector<2x16x1xf32>
    %506 = vector.broadcast %505 : vector<2x16x1xf32> to vector<2x16x16xf32>
    %507 = arith.mulf %502, %506 : vector<2x16x16xf32>
    "tpu.trace_start"() <{level = 10 : i32, message = "blm,bmd->bld"}> : () -> ()
    %cst_167 = arith.constant dense<0.000000e+00> : vector<2x16x32xf32>
    %508 = tpu.matmul %507, %496, %cst_167 {dimension_numbers = #tpu.dot_dimension_numbers<[2], [1], [1], [2], [0, 0, 0, 1, 1, 2], [0], [0]>} : vector<2x16x16xf32>, vector<2x16x32xf32>, vector<2x16x32xf32> -> vector<2x16x32xf32>
    "tpu.trace_stop"() : () -> ()
    %509 = vector.shape_cast %508 : vector<2x16x32xf32> to vector<32x32xf32>
    %510 = vector.extract_strided_slice %374 {offsets = [0, 224], sizes = [32, 32], strides = [1, 1]} : vector<32x256xf32> to vector<32x32xf32>
    %511 = vector.shape_cast %510 : vector<32x32xf32> to vector<2x16x32xf32>
    %512 = vector.extract_strided_slice %375 {offsets = [0, 224], sizes = [32, 32], strides = [1, 1]} : vector<32x256xf32> to vector<32x32xf32>
    %513 = vector.shape_cast %512 : vector<32x32xf32> to vector<2x16x32xf32>
    %514 = vector.extract_strided_slice %376 {offsets = [0, 224], sizes = [32, 32], strides = [1, 1]} : vector<32x256xf32> to vector<32x32xf32>
    %515 = vector.shape_cast %514 : vector<32x32xf32> to vector<2x16x32xf32>
    "tpu.trace_start"() <{level = 10 : i32, message = "bld,bmd->blm"}> : () -> ()
    %cst_168 = arith.constant dense<0.000000e+00> : vector<2x16x16xf32>
    %516 = tpu.matmul %511, %513, %cst_168 {dimension_numbers = #tpu.dot_dimension_numbers<[2], [2], [1], [1], [0, 0, 0, 1, 1, 1], [0], [0]>} : vector<2x16x32xf32>, vector<2x16x32xf32>, vector<2x16x16xf32> -> vector<2x16x16xf32>
    "tpu.trace_stop"() : () -> ()
    %cst_169 = arith.constant dense<0xFF800000> : vector<2x16xf32>
    %517 = vector.multi_reduction <maximumf>, %516, %cst_169 [2] : vector<2x16x16xf32> to vector<2x16xf32>
    %518 = vector.shape_cast %517 : vector<2x16xf32> to vector<2x16x1xf32>
    %519 = vector.broadcast %518 : vector<2x16x1xf32> to vector<2x16x16xf32>
    %520 = arith.subf %516, %519 : vector<2x16x16xf32>
    %521 = math.exp %520 : vector<2x16x16xf32>
    %cst_170 = arith.constant dense<0.000000e+00> : vector<2x16xf32>
    %522 = vector.multi_reduction <add>, %521, %cst_170 [2] : vector<2x16x16xf32> to vector<2x16xf32>
    %523 = vector.shape_cast %522 : vector<2x16xf32> to vector<2x16x1xf32>
    %524 = tpu.reciprocal %523 {approx = true} : vector<2x16x1xf32> -> vector<2x16x1xf32>
    %525 = vector.broadcast %524 : vector<2x16x1xf32> to vector<2x16x16xf32>
    %526 = arith.mulf %521, %525 : vector<2x16x16xf32>
    "tpu.trace_start"() <{level = 10 : i32, message = "blm,bmd->bld"}> : () -> ()
    %cst_171 = arith.constant dense<0.000000e+00> : vector<2x16x32xf32>
    %527 = tpu.matmul %526, %515, %cst_171 {dimension_numbers = #tpu.dot_dimension_numbers<[2], [1], [1], [2], [0, 0, 0, 1, 1, 2], [0], [0]>} : vector<2x16x16xf32>, vector<2x16x32xf32>, vector<2x16x32xf32> -> vector<2x16x32xf32>
    "tpu.trace_stop"() : () -> ()
    %528 = vector.shape_cast %527 : vector<2x16x32xf32> to vector<32x32xf32>
    %529 = tpu.concatenate %395, %414, %433, %452, %471, %490, %509, %528 in 1 : vector<32x32xf32>, vector<32x32xf32>, vector<32x32xf32>, vector<32x32xf32>, vector<32x32xf32>, vector<32x32xf32>, vector<32x32xf32>, vector<32x32xf32> -> vector<32x256xf32>
    %cst_172 = arith.constant dense<0.000000e+00> : vector<32x256xf32>
    %530 = tpu.matmul %529, %367, %cst_172 {dimension_numbers = #tpu.dot_dimension_numbers<[1], [0], [0], [1], [0, 0, 1, 1], [], []>} : vector<32x256xf32>, vector<256x256xf32>, vector<32x256xf32> -> vector<32x256xf32>
    %531 = vector.broadcast %368 : vector<1x256xf32> to vector<32x256xf32>
    %532 = arith.addf %530, %531 : vector<32x256xf32>
    %533 = arith.addf %532, %364 : vector<32x256xf32>
    %cst_173 = arith.constant 0.000000e+00 : f32
    %534 = vector.broadcast %cst_173 : f32 to vector<32x256xf32>
    %535 = arith.maximumf %533, %534 : vector<32x256xf32>
    %c0_174 = arith.constant 0 : index
    %c0_175 = arith.constant 0 : index
    %536 = vector.load %arg33[%c0_174, %c0_175] : memref<256x128xf32, #tpu.memory_space<vmem>>, vector<256x128xf32>
    %c0_176 = arith.constant 0 : index
    %c0_177 = arith.constant 0 : index
    %537 = vector.load %arg34[%c0_176, %c0_177] : memref<1x128xf32, #tpu.memory_space<vmem>>, vector<1x128xf32>
    %538 = vector.shape_cast %535 : vector<32x256xf32> to vector<2x16x256xf32>
    %cst_178 = arith.constant dense<0.000000e+00> : vector<2x256xf32>
    %539 = vector.multi_reduction <add>, %538, %cst_178 [1] : vector<2x16x256xf32> to vector<2x256xf32>
    %cst_179 = arith.constant 6.250000e-02 : f32
    %540 = vector.broadcast %cst_179 : f32 to vector<2x256xf32>
    %541 = arith.mulf %539, %540 : vector<2x256xf32>
    %cst_180 = arith.constant dense<0.000000e+00> : vector<2x128xf32>
    %542 = tpu.matmul %541, %536, %cst_180 {dimension_numbers = #tpu.dot_dimension_numbers<[1], [0], [0], [1], [0, 0, 1, 1], [], []>} : vector<2x256xf32>, vector<256x128xf32>, vector<2x128xf32> -> vector<2x128xf32>
    %543 = vector.broadcast %537 : vector<1x128xf32> to vector<2x128xf32>
    %544 = arith.addf %542, %543 : vector<2x128xf32>
    %c0_181 = arith.constant 0 : index
    %c0_182 = arith.constant 0 : index
    %545 = vector.load %arg35[%c0_181, %c0_182] : memref<2x128xf32, #tpu.memory_space<vmem>>, vector<2x128xf32>
    tpu.vector_store %arg35[%c0_181, %c0_182], %544 {strides = array<i32>} : memref<2x128xf32, #tpu.memory_space<vmem>>, vector<2x128xf32>,
    return
  }
}

</mosaic_0001>

<bundles_post_ra>
// kernel: tpu_custom_call.1
= control target key start
LH: loop header
LB: loop body
LE: loop exit
PB: predicated region body
PF: predicated region fallthrough
CT: control target
= control target key end

     0   :  { %s14328_s6 = smov 1   ;;  %s14329_s10 = smov 2   ;;  %s16356_s0 = inlined_call_operand.smem [shape: u32[36], index: -1, kind: input, shape index: {}] }
   0x1   :  { %s14405_s5 = sld [smem:[%s16356_s0]]   ;;  %s14330_s14 = smov 3  }
   0x2   :  { %s14410_s9 = sld [smem:[%s16356_s0 + %s14328_s6]]   ;;  %s14331_s18 = smov 4  }
   0x3   :  { %s14415_s13 = sld [smem:[%s16356_s0 + %s14329_s10]]   ;;  %s14332_s22 = smov 5  }
   0x4   :  { %s14420_s17 = sld [smem:[%s16356_s0 + %s14330_s14]]   ;;  %s14333_s26 = smov 6  }
   0x5   :  { %s14425_s21 = sld [smem:[%s16356_s0 + %s14331_s18]]   ;;  %s14334_s30 = smov 7  }
   0x6   :  { %s14430_s25 = sld [smem:[%s16356_s0 + %s14332_s22]]   ;;  %s14335_s4 = smov 8  }
   0x7   :  { %16369 = sst [smem:[#allocation48_spill]] %s14405_s5  ;;  %s14336_s10 = smov 9  }
   0x8   :  { %s14435_s29 = sld [smem:[%s16356_s0 + %s14333_s26]]   ;;  %s14337_s15 = smov 10  }
   0x9   :  { %s14440_s3 = sld [smem:[%s16356_s0 + %s14334_s30]]   ;;  %s14338_s20 = smov 11  }
   0xa   :  { %16370 = sst [smem:[#allocation49_spill]] %s14420_s17  ;;  %s14339_s26 = smov 12  }
   0xb   :  { %s14445_s8 = sld [smem:[%s16356_s0 + %s14335_s4]]   ;;  %s14340_s1 = smov 13  }
   0xc   :  { %s14450_s14 = sld [smem:[%s16356_s0 + %s14336_s10]]   ;;  %s14341_s7 = smov 14  }
   0xd   :  { %s14455_s19 = sld [smem:[%s16356_s0 + %s14337_s15]]   ;;  %s14342_s15 = smov 15  }
   0xe   :  { %s14460_s24 = sld [smem:[%s16356_s0 + %s14338_s20]]   ;;  %s14343_s22 = smov 16  }
   0xf   :  { %s14465_s30 = sld [smem:[%s16356_s0 + %s14339_s26]]   ;;  %s14344_s28 = smov 17  }
  0x10   :  { %s14470_s6 = sld [smem:[%s16356_s0 + %s14340_s1]]  }
  0x11   :  { %s14475_s12 = sld [smem:[%s16356_s0 + %s14341_s7]]   ;;  %s14345_s7 = smov 18  }
  0x12   :  { %s14480_s20 = sld [smem:[%s16356_s0 + %s14342_s15]]   ;;  %s14346_s15 = smov 19  }
  0x13   :  { %16371 = sst [smem:[#allocation50_spill]] %s14455_s19 }
  0x14   :  { %16372 = sst [smem:[#allocation51_spill]] %s14460_s24 }
  0x15   :  { %s14485_s27 = sld [smem:[%s16356_s0 + %s14343_s22]]   ;;  %s14347_s22 = smov 20  }
  0x16   :  { %16373 = sst [smem:[#allocation52_spill]] %s14470_s6 }
  0x17   :  { %s14490_s4 = sld [smem:[%s16356_s0 + %s14344_s28]]   ;;  %s14348_s28 = smov 21  }
  0x18   :  { %16374 = sst [smem:[#allocation53_spill]] %s14480_s20 }
  0x19   :  { %s14495_s24 = sld [smem:[%s16356_s0 + %s14345_s7]]   ;;  %s14349_s7 = smov 22  }
  0x1a   :  { %s14500_s17 = sld [smem:[%s16356_s0 + %s14346_s15]]   ;;  %s14350_s15 = smov 23  }
  0x1b   :  { %16375 = sst [smem:[#allocation54_spill]] %s14485_s27 }
  0x1c   :  { %s14505_s27 = sld [smem:[%s16356_s0 + %s14347_s22]]   ;;  %s14351_s22 = smov 24  }
  0x1d   :  { %s14510_s5 = sld [smem:[%s16356_s0 + %s14348_s28]]   ;;  %s14352_s28 = smov 25  }
  0x1e   :  { %s14530_s20 = sld [smem:[%s16356_s0 + %s14352_s28]]   ;;  %s14356_s28 = smov 29  }
  0x1f   :  { %16376 = sst [smem:[#allocation55_spill]] %s14495_s24 }
  0x20   :  { %16377 = sst [smem:[#allocation56_spill]] %s14500_s17 }
  0x21   :  { %s14515_s24 = sld [smem:[%s16356_s0 + %s14349_s7]]   ;;  %s14353_s7 = smov 26  }
  0x22   :  { %16378 = sst [smem:[#allocation57_spill]] %s14505_s27 }
  0x23   :  { %s14520_s17 = sld [smem:[%s16356_s0 + %s14350_s15]]   ;;  %s14354_s15 = smov 27  }
  0x24   :  { %s14525_s27 = sld [smem:[%s16356_s0 + %s14351_s22]]   ;;  %s14355_s22 = smov 28  }
  0x25   :  { %16382 = sst [smem:[#allocation61_spill]] %s14530_s20 }
  0x26   :  { %s14550_s20 = sld [smem:[%s16356_s0 + %s14356_s28]]   ;;  %s14360_s28 = smov 33  }
  0x27   :  { %16379 = sst [smem:[#allocation58_spill]] %s14515_s24 }
  0x28   :  { %s14535_s24 = sld [smem:[%s16356_s0 + %s14353_s7]]   ;;  %s14357_s7 = smov 30  }
  0x29   :  { %16380 = sst [smem:[#allocation59_spill]] %s14520_s17 }
  0x2a   :  { %16381 = sst [smem:[#allocation60_spill]] %s14525_s27 }
  0x2b   :  { %s14540_s17 = sld [smem:[%s16356_s0 + %s14354_s15]]   ;;  %s14358_s15 = smov 31  }
  0x2c   :  { %s14545_s27 = sld [smem:[%s16356_s0 + %s14355_s22]]   ;;  %s14359_s22 = smov 32  }
  0x2d   :  { %16385 = sst [smem:[#allocation64_spill]] %s14550_s20 }
  0x2e   :  { %16383 = sst [smem:[#allocation62_spill]] %s14535_s24 }
  0x2f   :  { %s14555_s24 = sld [smem:[%s16356_s0 + %s14357_s7]]   ;;  %s14361_s7 = smov 34  }
  0x30   :  { %s14560_s6 = sld [smem:[%s16356_s0 + %s14358_s15]]   ;;  %s14362_s15 = smov 35  }
  0x31   :  { %s14570_s20 = sld [smem:[%s16356_s0 + %s14360_s28]]  }
  0x32   :  { %16384 = sst [smem:[#allocation63_spill]] %s14545_s27 }
  0x33   :  { %s14565_s27 = sld [smem:[%s16356_s0 + %s14359_s22]]  }
  0x34   :  { %s14580_s19 = sld [smem:[%s16356_s0 + %s14362_s15]]  }
  0x35   :  { %16386 = sst [smem:[#allocation65_spill]] %s14555_s24 }
  0x36   :  { %s14575_s24 = sld [smem:[%s16356_s0 + %s14361_s7]]  }
  0x37   :  { %76 = vsyncpa [#allocation3], 0 }
  0x38   :  { %77 = vsyncpa [#allocation6], 0 }
  0x39   :  { %78 = vsyncpa [#allocation9], 0 }
  0x3a   :  { %79 = vsyncpa [#allocation12], 0 }
  0x3b   :  { %80 = vsyncpa [#allocation15], 0 }
  0x3c   :  { %81 = vsyncpa [#allocation18], 0 }
  0x3d   :  { %82 = vsyncpa [#allocation21], 0 }
  0x3e   :  { %83 = vsyncpa [#allocation24], 0 }
  0x3f   :  { %84 = vsyncpa [#allocation27], 0 }
  0x40   :  { %85 = vsyncpa [#allocation30], 0 }
  0x41   :  { %86 = vsyncpa [#allocation33], 0 }
  0x42   :  { %87 = vsyncpa [#allocation4], 0  ;;  %s14363_s22 = smov [#allocation5]   ;;  %s14364_s26 = smov [#allocation8]  }
  0x43   :  { %s106_s23 = sshll.u32 %s14363_s22, 4  ;;  %s128_s0 = sshll.u32 %s14364_s26, 4  ;;  %s107_s23 = int_to_ptr.vmem [resolvable:$true] %s106_s23  ;;  %s129_s0 = int_to_ptr.vmem [resolvable:$true] %s128_s0 }
  0x44   :  { %s13820_s28 = scalar_lea.hbm %s14415_s13, 16 }
  0x45   :  { %p13821_p0 = scmp.ne.s32.totalorder %s14415_s13, %s13820_s28  ;;  %p13824_p1 = scmp.lt.u32.totalorder %s13820_s28, %s14415_s13 }
  0x47   :  { %p13826_p2 = pnand %p13824_p1, %p13821_p0 }
  0x49   :  { %13829 = shalt.err (!%p13826_p2)
}
  0x4a   :  { %s13830_s1 = scalar_lea.vmem %s107_s23, 16  ;;  %s13834_s2 = scalar_lea.vmem %s107_s23, 32 }
  0x4b   :  { %p13831_p3 = scmp.ne.s32.totalorder %s107_s23, %s13830_s1  ;;  %p13835_p4 = scmp.lt.s32.totalorder %s107_s23, %s107_s23 }
  0x4c   :  { %p13836_p5 = scmp.lt.s32.totalorder %s13834_s2, %s13830_s1 }
  0x4e   :  { %p13837_p6 = por %p13836_p5, %p13835_p4 }
  0x50   :  { %p13838_p7 = pnand %p13837_p6, %p13831_p3 }
  0x52   :  { %13841 = shalt.err (!%p13838_p7)
}
  0x53   :  { %109 = dma.hbm_to_vmem [thread:$0]  %s14415_s13, 16, %s107_s23, [#allocation6]  }
  0x54   :  { %s13842_s7 = scalar_lea.hbm %s14430_s25, 16 }
  0x55   :  { %p13843_p8 = scmp.ne.s32.totalorder %s14430_s25, %s13842_s7  ;;  %p13846_p9 = scmp.lt.u32.totalorder %s13842_s7, %s14430_s25 }
  0x57   :  { %p13848_p10 = pnand %p13846_p9, %p13843_p8 }
  0x59   :  { %13851 = shalt.err (!%p13848_p10)
}
  0x5a   :  { %s13852_s10 = scalar_lea.vmem %s129_s0, 16  ;;  %s13856_s11 = scalar_lea.vmem %s129_s0, 32 }
  0x5b   :  { %p13853_p11 = scmp.ne.s32.totalorder %s129_s0, %s13852_s10  ;;  %p13857_p12 = scmp.lt.s32.totalorder %s129_s0, %s129_s0 }
  0x5c   :  { %p13858_p13 = scmp.lt.s32.totalorder %s13856_s11, %s13852_s10 }
  0x5e   :  { %p13859_p0 = por %p13858_p13, %p13857_p12 }
  0x60   :  { %p13860_p1 = pnand %p13859_p0, %p13853_p11 }
  0x62   :  { %13863 = shalt.err (!%p13860_p1)
}
  0x63   :  { %131 = dma.hbm_to_vmem [thread:$0]  %s14430_s25, 16, %s129_s0, [#allocation9]  }
  0x64   :  { %s14365_s15 = smov [#allocation11]   ;;  %s14366_s16 = smov [#allocation14]  }
  0x65   :  { %s148_s13 = sshll.u32 %s14365_s15, 4  ;;  %s167_s18 = sshll.u32 %s14366_s16, 4  ;;  %s149_s13 = int_to_ptr.vmem [resolvable:$true] %s148_s13  ;;  %s14590_s18 = int_to_ptr.vmem [resolvable:$true] %s167_s18 }
  0x66   :  { %s13864_s22 = scalar_lea.hbm %s14440_s3, 16 }
  0x67   :  { %p13865_p2 = scmp.ne.s32.totalorder %s14440_s3, %s13864_s22  ;;  %p13868_p3 = scmp.lt.u32.totalorder %s13864_s22, %s14440_s3 }
  0x69   :  { %p13870_p4 = pnand %p13868_p3, %p13865_p2 }
  0x6b   :  { %13873 = shalt.err (!%p13870_p4)
}
  0x6c   :  { %s13874_s23 = scalar_lea.vmem %s149_s13, 16  ;;  %s13878_s26 = scalar_lea.vmem %s149_s13, 32 }
  0x6d   :  { %p13875_p5 = scmp.ne.s32.totalorder %s149_s13, %s13874_s23  ;;  %p13879_p6 = scmp.lt.s32.totalorder %s149_s13, %s149_s13 }
  0x6e   :  { %p13880_p7 = scmp.lt.s32.totalorder %s13878_s26, %s13874_s23 }
  0x70   :  { %p13881_p8 = por %p13880_p7, %p13879_p6 }
  0x72   :  { %p13882_p9 = pnand %p13881_p8, %p13875_p5 }
  0x74   :  { %13885 = shalt.err (!%p13882_p9)
}
  0x75   :  { %151 = dma.hbm_to_vmem [thread:$0]  %s14440_s3, 16, %s149_s13, [#allocation12]  }
  0x76   :  { %s13886_s25 = scalar_lea.hbm %s14450_s14, 3072 }
  0x77   :  { %p13887_p10 = scmp.ne.s32.totalorder %s14450_s14, %s13886_s25  ;;  %p13890_p11 = scmp.lt.u32.totalorder %s13886_s25, %s14450_s14 }
  0x79   :  { %p13892_p12 = pnand %p13890_p11, %p13887_p10 }
  0x7b   :  { %13895 = shalt.err (!%p13892_p12)
}
  0x7c   :  { %s13896_s0 = scalar_lea.vmem %s14590_s18, 3072  ;;  %p13901_p0 = scmp.lt.s32.totalorder %s14590_s18, %s14590_s18 }
  0x7d   :  { %p13897_p13 = scmp.ne.s32.totalorder %s14590_s18, %s13896_s0  ;;  %p13902_p1 = scmp.lt.s32.totalorder %s13896_s0, %s13896_s0 }
  0x7f   :  { %p13903_p2 = por %p13902_p1, %p13901_p0 }
  0x81   :  { %p13904_p3 = pnand %p13903_p2, %p13897_p13 }
  0x83   :  { %13907 = shalt.err (!%p13904_p3)
}
  0x84   :  { %s14367_s28 = smov 128   ;;  %s14368_s3 = smov 8  }
  0x85   :  { %173 = dma.hbm_to_vmem [thread:$0]  %s14450_s14, 3072, %s14590_s18, [#allocation15], %s14367_s28, %s14367_s28, %s14368_s3  }
  0x86   :  { %s14369_s1 = smov [#allocation17]   ;;  %s14370_s7 = smov [#allocation20]  }
  0x87   :  { %s192_s2 = sshll.u32 %s14369_s1, 4  ;;  %s214_s10 = sshll.u32 %s14370_s7, 4  ;;  %s193_s2 = int_to_ptr.vmem [resolvable:$true] %s192_s2  ;;  %s215_s10 = int_to_ptr.vmem [resolvable:$true] %s214_s10 }
  0x88   :  { %s13908_s11 = scalar_lea.hbm %s14465_s30, 16 }
  0x89   :  { %p13909_p4 = scmp.ne.s32.totalorder %s14465_s30, %s13908_s11  ;;  %p13912_p5 = scmp.lt.u32.totalorder %s13908_s11, %s14465_s30 }
  0x8b   :  { %p13914_p6 = pnand %p13912_p5, %p13909_p4 }
  0x8d   :  { %13917 = shalt.err (!%p13914_p6)
}
  0x8e   :  { %s13918_s15 = scalar_lea.vmem %s193_s2, 16  ;;  %s13922_s13 = scalar_lea.vmem %s193_s2, 32 }
  0x8f   :  { %p13919_p7 = scmp.ne.s32.totalorder %s193_s2, %s13918_s15  ;;  %p13923_p8 = scmp.lt.s32.totalorder %s193_s2, %s193_s2 }
  0x90   :  { %p13924_p9 = scmp.lt.s32.totalorder %s13922_s13, %s13918_s15 }
  0x92   :  { %p13925_p10 = por %p13924_p9, %p13923_p8 }
  0x94   :  { %p13926_p11 = pnand %p13925_p10, %p13919_p7 }
  0x96   :  { %13929 = shalt.err (!%p13926_p11)
}
  0x97   :  { %195 = dma.hbm_to_vmem [thread:$0]  %s14465_s30, 16, %s193_s2, [#allocation18]  }
  0x98   :  { %s13930_s14 = scalar_lea.hbm %s14475_s12, 16 }
  0x99   :  { %p13931_p12 = scmp.ne.s32.totalorder %s14475_s12, %s13930_s14  ;;  %p13934_p13 = scmp.lt.u32.totalorder %s13930_s14, %s14475_s12 }
  0x9b   :  { %p13936_p0 = pnand %p13934_p13, %p13931_p12 }
  0x9d   :  { %13939 = shalt.err (!%p13936_p0)
}
  0x9e   :  { %s13940_s16 = scalar_lea.vmem %s215_s10, 16  ;;  %s13944_s18 = scalar_lea.vmem %s215_s10, 32 }
  0x9f   :  { %p13941_p1 = scmp.ne.s32.totalorder %s215_s10, %s13940_s16  ;;  %p13945_p2 = scmp.lt.s32.totalorder %s215_s10, %s215_s10 }
  0xa0   :  { %p13946_p3 = scmp.lt.s32.totalorder %s13944_s18, %s13940_s16 }
  0xa2   :  { %p13947_p4 = por %p13946_p3, %p13945_p2 }
  0xa4   :  { %p13948_p5 = pnand %p13947_p4, %p13941_p1 }
  0xa6   :  { %13951 = shalt.err (!%p13948_p5)
}
  0xa7   :  { %217 = dma.hbm_to_vmem [thread:$0]  %s14475_s12, 16, %s215_s10, [#allocation21]  }
  0xa8   :  { %s14371_s22 = smov [#allocation23]   ;;  %s13952_s23 = scalar_lea.hbm %s14490_s4, 12288 }
  0xa9   :  { %s235_s30 = sshll.u32 %s14371_s22, 4  ;;  %p13953_p6 = scmp.ne.s32.totalorder %s14490_s4, %s13952_s23  ;;  %s236_s30 = int_to_ptr.vmem [resolvable:$true] %s235_s30 }
  0xaa   :  { %p13956_p7 = scmp.lt.u32.totalorder %s13952_s23, %s14490_s4 }
  0xac   :  { %p13958_p8 = pnand %p13956_p7, %p13953_p6 }
  0xae   :  { %13961 = shalt.err (!%p13958_p8)
}
  0xaf   :  { %s13962_s26 = scalar_lea.vmem %s236_s30, 12288  ;;  %p13967_p10 = scmp.lt.s32.totalorder %s236_s30, %s236_s30 }
  0xb0   :  { %p13963_p9 = scmp.ne.s32.totalorder %s236_s30, %s13962_s26  ;;  %p13968_p11 = scmp.lt.s32.totalorder %s13962_s26, %s13962_s26 }
  0xb2   :  { %p13969_p12 = por %p13968_p11, %p13967_p10 }
  0xb4   :  { %p13970_p13 = pnand %p13969_p12, %p13963_p9 }
  0xb6   :  { %13973 = shalt.err (!%p13970_p13)
}
  0xb7   :  { %s14372_s25 = smov 256   ;;  %s14373_s12 = smov 16  }
  0xb8   :  { %241 = dma.hbm_to_vmem [thread:$0]  %s14490_s4, 12288, %s236_s30, [#allocation24], %s14372_s25, %s14372_s25, %s14373_s12  }
  0xb9   :  { %s14374_s0 = smov [#allocation26]   ;;  %s14375_s2 = smov [#allocation29]  }
  0xba   :  { %s263_s1 = sshll.u32 %s14374_s0, 4  ;;  %s295_s7 = sshll.u32 %s14375_s2, 4  ;;  %s264_s1 = int_to_ptr.vmem [resolvable:$true] %s263_s1  ;;  %s296_s7 = int_to_ptr.vmem [resolvable:$true] %s295_s7 }
  0xbb   :  { %s13974_s10 = scalar_lea.hbm %s14510_s5, 4096 }
  0xbc   :  { %p13975_p0 = scmp.ne.s32.totalorder %s14510_s5, %s13974_s10  ;;  %p13978_p1 = scmp.lt.u32.totalorder %s13974_s10, %s14510_s5 }
  0xbe   :  { %p13980_p2 = pnand %p13978_p1, %p13975_p0 }
  0xc0   :  { %13983 = shalt.err (!%p13980_p2)
}
  0xc1   :  { %s13984_s11 = scalar_lea.vmem %s264_s1, 4096  ;;  %p13989_p4 = scmp.lt.s32.totalorder %s264_s1, %s264_s1 }
  0xc2   :  { %p13985_p3 = scmp.ne.s32.totalorder %s264_s1, %s13984_s11  ;;  %p13990_p5 = scmp.lt.s32.totalorder %s13984_s11, %s13984_s11 }
  0xc4   :  { %p13991_p6 = por %p13990_p5, %p13989_p4 }
  0xc6   :  { %p13992_p7 = pnand %p13991_p6, %p13985_p3 }
  0xc8   :  { %13995 = shalt.err (!%p13992_p7)
}
  0xc9   :  { %269 = dma.hbm_to_vmem [thread:$0]  %s14510_s5, 4096, %s264_s1, [#allocation27], %s14372_s25, %s14372_s25, %s14373_s12  }
  0xca   :  { %s13996_s4 = scalar_lea.hbm %s14540_s17, 8192 }
  0xcb   :  { %p13997_p8 = scmp.ne.s32.totalorder %s14540_s17, %s13996_s4  ;;  %p14000_p9 = scmp.lt.u32.totalorder %s13996_s4, %s14540_s17 }
  0xcd   :  { %p14002_p10 = pnand %p14000_p9, %p13997_p8 }
  0xcf   :  { %14005 = shalt.err (!%p14002_p10)
}
  0xd0   :  { %s14006_s15 = scalar_lea.vmem %s296_s7, 8192  ;;  %p14011_p12 = scmp.lt.s32.totalorder %s296_s7, %s296_s7 }
  0xd1   :  { %p14007_p11 = scmp.ne.s32.totalorder %s296_s7, %s14006_s15  ;;  %p14012_p13 = scmp.lt.s32.totalorder %s14006_s15, %s14006_s15 }
  0xd3   :  { %p14013_p0 = por %p14012_p13, %p14011_p12 }
  0xd5   :  { %p14014_p1 = pnand %p14013_p0, %p14007_p11 }
  0xd7   :  { %14017 = shalt.err (!%p14014_p1)
}
  0xd8   :  { %301 = dma.hbm_to_vmem [thread:$0]  %s14540_s17, 8192, %s296_s7, [#allocation30], %s14372_s25, %s14372_s25, %s14373_s12  }
  0xd9   :  { %s14376_s5 = smov [#allocation32]   ;;  %s14377_s14 = smov [#allocation2]  }
  0xda   :  { %s323_s13 = sshll.u32 %s14376_s5, 4  ;;  %s96_s16 = sshll.u32 %s14377_s14, 4  ;;  %s324_s13 = int_to_ptr.vmem [resolvable:$true] %s323_s13  ;;  %s97_s16 = int_to_ptr.vmem [resolvable:$true] %s96_s16 }
  0xdb   :  { %s14018_s18 = scalar_lea.hbm %s14560_s6, 8192 }
  0xdc   :  { %p14019_p2 = scmp.ne.s32.totalorder %s14560_s6, %s14018_s18  ;;  %p14022_p3 = scmp.lt.u32.totalorder %s14018_s18, %s14560_s6 }
  0xde   :  { %p14024_p4 = pnand %p14022_p3, %p14019_p2 }
  0xe0   :  { %14027 = shalt.err (!%p14024_p4)
}
  0xe1   :  { %s14028_s22 = scalar_lea.vmem %s324_s13, 8192  ;;  %p14033_p6 = scmp.lt.s32.totalorder %s324_s13, %s324_s13 }
  0xe2   :  { %p14029_p5 = scmp.ne.s32.totalorder %s324_s13, %s14028_s22  ;;  %p14034_p7 = scmp.lt.s32.totalorder %s14028_s22, %s14028_s22 }
  0xe4   :  { %p14035_p8 = por %p14034_p7, %p14033_p6 }
  0xe6   :  { %p14036_p9 = pnand %p14035_p8, %p14029_p5 }
  0xe8   :  { %14039 = shalt.err (!%p14036_p9)
}
  0xe9   :  { %329 = dma.hbm_to_vmem [thread:$0]  %s14560_s6, 8192, %s324_s13, [#allocation33], %s14372_s25, %s14372_s25, %s14373_s12  }
  0xea   :  { %s14040_s17 = scalar_lea.hbm %s14410_s9, 64 }
  0xeb   :  { %p14041_p10 = scmp.ne.s32.totalorder %s14410_s9, %s14040_s17  ;;  %p14044_p11 = scmp.lt.u32.totalorder %s14040_s17, %s14410_s9 }
  0xed   :  { %p14046_p12 = pnand %p14044_p11, %p14041_p10 }
  0xef   :  { %14049 = shalt.err (!%p14046_p12)
}
  0xf0   :  { %s14050_s30 = scalar_lea.vmem %s97_s16, 64  ;;  %p14055_p0 = scmp.lt.s32.totalorder %s97_s16, %s97_s16 }
  0xf1   :  { %p14051_p13 = scmp.ne.s32.totalorder %s97_s16, %s14050_s30  ;;  %p14056_p1 = scmp.lt.s32.totalorder %s14050_s30, %s14050_s30 }
  0xf3   :  { %p14057_p2 = por %p14056_p1, %p14055_p0 }
  0xf5   :  { %p14058_p3 = pnand %p14057_p2, %p14051_p13 }
  0xf7   :  { %14061 = shalt.err (!%p14058_p3)
}
  0xf8   :  { %99 = dma.hbm_to_vmem [thread:$0]  %s14410_s9, 64, %s97_s16, [#allocation3]  }
  0xf9   :  { %s14378_s23 = smov [#allocation7]   ;;  %s14379_s26 = smov [#allocation10]  }
  0xfa   :  { %s118_s6 = sshll.u32 %s14378_s23, 4  ;;  %s138_s0 = sshll.u32 %s14379_s26, 4  ;;  %s119_s6 = int_to_ptr.vmem [resolvable:$true] %s118_s6  ;;  %s139_s0 = int_to_ptr.vmem [resolvable:$true] %s138_s0 }
  0xfb   :  { %s14062_s1 = scalar_lea.hbm %s14425_s21, 16 }
  0xfc   :  { %p14063_p4 = scmp.ne.s32.totalorder %s14425_s21, %s14062_s1  ;;  %p14066_p5 = scmp.lt.u32.totalorder %s14062_s1, %s14425_s21 }
  0xfe   :  { %p14068_p6 = pnand %p14066_p5, %p14063_p4 }
 0x100   :  { %14071 = shalt.err (!%p14068_p6)
}
 0x101   :  { %s14072_s2 = scalar_lea.vmem %s119_s6, 16  ;;  %s14076_s7 = scalar_lea.vmem %s119_s6, 32 }
 0x102   :  { %p14073_p7 = scmp.ne.s32.totalorder %s119_s6, %s14072_s2  ;;  %p14077_p8 = scmp.lt.s32.totalorder %s119_s6, %s119_s6 }
 0x103   :  { %p14078_p9 = scmp.lt.s32.totalorder %s14076_s7, %s14072_s2 }
 0x105   :  { %p14079_p10 = por %p14078_p9, %p14077_p8 }
 0x107   :  { %p14080_p11 = pnand %p14079_p10, %p14073_p7 }
 0x109   :  { %14083 = shalt.err (!%p14080_p11)
}
 0x10a   :  { %121 = dma.hbm_to_vmem [thread:$0]  %s14425_s21, 16, %s119_s6, [#allocation6]  }
 0x10b   :  { %s14084_s9 = scalar_lea.hbm %s14435_s29, 16 }
 0x10c   :  { %p14085_p12 = scmp.ne.s32.totalorder %s14435_s29, %s14084_s9  ;;  %p14088_p13 = scmp.lt.u32.totalorder %s14084_s9, %s14435_s29 }
 0x10e   :  { %p14090_p0 = pnand %p14088_p13, %p14085_p12 }
 0x110   :  { %14093 = shalt.err (!%p14090_p0)
}
 0x111   :  { %s14094_s10 = scalar_lea.vmem %s139_s0, 16  ;;  %s14098_s11 = scalar_lea.vmem %s139_s0, 32 }
 0x112   :  { %p14095_p1 = scmp.ne.s32.totalorder %s139_s0, %s14094_s10  ;;  %p14099_p2 = scmp.lt.s32.totalorder %s139_s0, %s139_s0 }
 0x113   :  { %p14100_p3 = scmp.lt.s32.totalorder %s14098_s11, %s14094_s10 }
 0x115   :  { %p14101_p4 = por %p14100_p3, %p14099_p2 }
 0x117   :  { %p14102_p5 = pnand %p14101_p4, %p14095_p1 }
 0x119   :  { %14105 = shalt.err (!%p14102_p5)
}
 0x11a   :  { %141 = dma.hbm_to_vmem [thread:$0]  %s14435_s29, 16, %s139_s0, [#allocation9]  }
 0x11b   :  { %s14380_s21 = smov [#allocation13]   ;;  %s14381_s15 = smov [#allocation16]  }
 0x11c   :  { %s158_s4 = sshll.u32 %s14380_s21, 4  ;;  %s180_s5 = sshll.u32 %s14381_s15, 4  ;;  %s159_s4 = int_to_ptr.vmem [resolvable:$true] %s158_s4  ;;  %s181_s5 = int_to_ptr.vmem [resolvable:$true] %s180_s5 }
 0x11d   :  { %s14106_s13 = scalar_lea.hbm %s14445_s8, 16 }
 0x11e   :  { %p14107_p6 = scmp.ne.s32.totalorder %s14445_s8, %s14106_s13  ;;  %p14110_p7 = scmp.lt.u32.totalorder %s14106_s13, %s14445_s8 }
 0x120   :  { %p14112_p8 = pnand %p14110_p7, %p14107_p6 }
 0x122   :  { %14115 = shalt.err (!%p14112_p8)
}
 0x123   :  { %s14116_s14 = scalar_lea.vmem %s159_s4, 16  ;;  %s14120_s16 = scalar_lea.vmem %s159_s4, 32 }
 0x124   :  { %p14117_p9 = scmp.ne.s32.totalorder %s159_s4, %s14116_s14  ;;  %p14121_p10 = scmp.lt.s32.totalorder %s159_s4, %s159_s4 }
 0x125   :  { %p14122_p11 = scmp.lt.s32.totalorder %s14120_s16, %s14116_s14 }
 0x127   :  { %p14123_p12 = por %p14122_p11, %p14121_p10 }
 0x129   :  { %p14124_p13 = pnand %p14123_p12, %p14117_p9 }
 0x12b   :  { %14127 = shalt.err (!%p14124_p13)
}
 0x12c   :  { %s16387_s29 = sld [smem:[#allocation50_spill]] }
 0x12d   :  { %161 = dma.hbm_to_vmem [thread:$0]  %s14445_s8, 16, %s159_s4, [#allocation12]  }
 0x132   :  { %s14128_s18 = scalar_lea.hbm %s16387_s29, 16 }
 0x133   :  { %p14129_p0 = scmp.ne.s32.totalorder %s16387_s29, %s14128_s18  ;;  %p14132_p1 = scmp.lt.u32.totalorder %s14128_s18, %s16387_s29 }
 0x135   :  { %p14134_p2 = pnand %p14132_p1, %p14129_p0 }
 0x137   :  { %14137 = shalt.err (!%p14134_p2)
}
 0x138   :  { %s14138_s22 = scalar_lea.vmem %s181_s5, 16  ;;  %s14142_s17 = scalar_lea.vmem %s181_s5, 32 }
 0x139   :  { %p14139_p3 = scmp.ne.s32.totalorder %s181_s5, %s14138_s22  ;;  %p14143_p4 = scmp.lt.s32.totalorder %s181_s5, %s181_s5 }
 0x13a   :  { %p14144_p5 = scmp.lt.s32.totalorder %s14142_s17, %s14138_s22 }
 0x13c   :  { %p14145_p6 = por %p14144_p5, %p14143_p4 }
 0x13e   :  { %p14146_p7 = pnand %p14145_p6, %p14139_p3 }
 0x140   :  { %14149 = shalt.err (!%p14146_p7)
}
 0x141   :  { %s16388_s30 = sld [smem:[#allocation52_spill]]  ;;  %s14382_s8 = smov [#allocation19]  }
 0x142   :  { %183 = dma.hbm_to_vmem [thread:$0]  %s16387_s29, 16, %s181_s5, [#allocation15]  }
 0x143   :  { %s201_s23 = sshll.u32 %s14382_s8, 4  ;;  %s14383_s6 = smov [#allocation22]   ;;  %s202_s23 = int_to_ptr.vmem [resolvable:$true] %s201_s23 }
 0x144   :  { %s224_s26 = sshll.u32 %s14383_s6, 4  ;;  %s225_s26 = int_to_ptr.vmem [resolvable:$true] %s224_s26 }
 0x147   :  { %s14150_s0 = scalar_lea.hbm %s16388_s30, 1024 }
 0x148   :  { %p14151_p8 = scmp.ne.s32.totalorder %s16388_s30, %s14150_s0  ;;  %p14154_p9 = scmp.lt.u32.totalorder %s14150_s0, %s16388_s30 }
 0x14a   :  { %p14156_p10 = pnand %p14154_p9, %p14151_p8 }
 0x14c   :  { %14159 = shalt.err (!%p14156_p10)
}
 0x14d   :  { %s14160_s1 = scalar_lea.vmem %s202_s23, 1024  ;;  %p14165_p12 = scmp.lt.s32.totalorder %s202_s23, %s202_s23 }
 0x14e   :  { %p14161_p11 = scmp.ne.s32.totalorder %s202_s23, %s14160_s1  ;;  %p14166_p13 = scmp.lt.s32.totalorder %s14160_s1, %s14160_s1 }
 0x150   :  { %p14167_p0 = por %p14166_p13, %p14165_p12 }
 0x152   :  { %p14168_p1 = pnand %p14167_p0, %p14161_p11 }
 0x154   :  { %14171 = shalt.err (!%p14168_p1)
}
 0x155   :  { %s16389_s2 = sld [smem:[#allocation53_spill]] }
 0x156   :  { %207 = dma.hbm_to_vmem [thread:$0]  %s16388_s30, 1024, %s202_s23, [#allocation18], %s14367_s28, %s14367_s28, %s14368_s3  }
 0x15b   :  { %s14172_s7 = scalar_lea.hbm %s16389_s2, 16 }
 0x15c   :  { %p14173_p2 = scmp.ne.s32.totalorder %s16389_s2, %s14172_s7  ;;  %p14176_p3 = scmp.lt.u32.totalorder %s14172_s7, %s16389_s2 }
 0x15e   :  { %p14178_p4 = pnand %p14176_p3, %p14173_p2 }
 0x160   :  { %14181 = shalt.err (!%p14178_p4)
}
 0x161   :  { %s14182_s9 = scalar_lea.vmem %s225_s26, 16  ;;  %s14186_s10 = scalar_lea.vmem %s225_s26, 32 }
 0x162   :  { %p14183_p5 = scmp.ne.s32.totalorder %s225_s26, %s14182_s9  ;;  %p14187_p6 = scmp.lt.s32.totalorder %s225_s26, %s225_s26 }
 0x163   :  { %p14188_p7 = scmp.lt.s32.totalorder %s14186_s10, %s14182_s9 }
 0x165   :  { %p14189_p8 = por %p14188_p7, %p14187_p6 }
 0x167   :  { %p14190_p9 = pnand %p14189_p8, %p14183_p5 }
 0x169   :  { %14193 = shalt.err (!%p14190_p9)
}
 0x16a   :  { %s16390_s11 = sld [smem:[#allocation56_spill]]  ;;  %s14384_s21 = smov [#allocation25]  }
 0x16b   :  { %227 = dma.hbm_to_vmem [thread:$0]  %s16389_s2, 16, %s225_s26, [#allocation21]  }
 0x16c   :  { %s249_s4 = sshll.u32 %s14384_s21, 4  ;;  %s14385_s15 = smov [#allocation28]   ;;  %s250_s4 = int_to_ptr.vmem [resolvable:$true] %s249_s4 }
 0x16d   :  { %s281_s5 = sshll.u32 %s14385_s15, 4  ;;  %s282_s5 = int_to_ptr.vmem [resolvable:$true] %s281_s5 }
 0x170   :  { %s14194_s13 = scalar_lea.hbm %s16390_s11, 24576 }
 0x171   :  { %p14195_p10 = scmp.ne.s32.totalorder %s16390_s11, %s14194_s13  ;;  %p14198_p11 = scmp.lt.u32.totalorder %s14194_s13, %s16390_s11 }
 0x173   :  { %p14200_p12 = pnand %p14198_p11, %p14195_p10 }
 0x175   :  { %14203 = shalt.err (!%p14200_p12)
}
 0x176   :  { %s14204_s14 = scalar_lea.vmem %s250_s4, 24576  ;;  %p14209_p0 = scmp.lt.s32.totalorder %s250_s4, %s250_s4 }
 0x177   :  { %p14205_p13 = scmp.ne.s32.totalorder %s250_s4, %s14204_s14  ;;  %p14210_p1 = scmp.lt.s32.totalorder %s14204_s14, %s14204_s14 }
 0x179   :  { %p14211_p2 = por %p14210_p1, %p14209_p0 }
 0x17b   :  { %p14212_p3 = pnand %p14211_p2, %p14205_p13 }
 0x17d   :  { %14215 = shalt.err (!%p14212_p3)
}
 0x17e   :  { %s16391_s16 = sld [smem:[#allocation61_spill]] }
 0x17f   :  { %255 = dma.hbm_to_vmem [thread:$0]  %s16390_s11, 24576, %s250_s4, [#allocation24], %s14372_s25, %s14372_s25, %s14373_s12  }
 0x184   :  { %s14216_s29 = scalar_lea.hbm %s16391_s16, 24576 }
 0x185   :  { %p14217_p4 = scmp.ne.s32.totalorder %s16391_s16, %s14216_s29  ;;  %p14220_p5 = scmp.lt.u32.totalorder %s14216_s29, %s16391_s16 }
 0x187   :  { %p14222_p6 = pnand %p14220_p5, %p14217_p4 }
 0x189   :  { %14225 = shalt.err (!%p14222_p6)
}
 0x18a   :  { %s14226_s18 = scalar_lea.vmem %s282_s5, 24576  ;;  %p14231_p8 = scmp.lt.s32.totalorder %s282_s5, %s282_s5 }
 0x18b   :  { %p14227_p7 = scmp.ne.s32.totalorder %s282_s5, %s14226_s18  ;;  %p14232_p9 = scmp.lt.s32.totalorder %s14226_s18, %s14226_s18 }
 0x18d   :  { %p14233_p10 = por %p14232_p9, %p14231_p8 }
 0x18f   :  { %p14234_p11 = pnand %p14233_p10, %p14227_p7 }
 0x191   :  { %14237 = shalt.err (!%p14234_p11)
}
 0x192   :  { %s14386_s22 = smov 768   ;;  %s16392_s17 = sld [smem:[#allocation64_spill]] }
 0x193   :  { %s14387_s30 = smov 48   ;;  %s14388_s25 = smov [#allocation31]  }
 0x194   :  { %287 = dma.hbm_to_vmem [thread:$0]  %s16391_s16, 24576, %s282_s5, [#allocation27], %s14386_s22, %s14386_s22, %s14387_s30  }
 0x195   :  { %s309_s12 = sshll.u32 %s14388_s25, 4  ;;  %s14389_s8 = smov [#allocation34]   ;;  %s310_s12 = int_to_ptr.vmem [resolvable:$true] %s309_s12 }
 0x196   :  { %s337_s23 = sshll.u32 %s14389_s8, 4  ;;  %s338_s23 = int_to_ptr.vmem [resolvable:$true] %s337_s23 }
 0x198   :  { %s14238_s6 = scalar_lea.hbm %s16392_s17, 24576 }
 0x199   :  { %p14239_p12 = scmp.ne.s32.totalorder %s16392_s17, %s14238_s6  ;;  %p14242_p13 = scmp.lt.u32.totalorder %s14238_s6, %s16392_s17 }
 0x19b   :  { %p14244_p0 = pnand %p14242_p13, %p14239_p12 }
 0x19d   :  { %14247 = shalt.err (!%p14244_p0)
}
 0x19e   :  { %s14248_s26 = scalar_lea.vmem %s310_s12, 24576  ;;  %p14253_p2 = scmp.lt.s32.totalorder %s310_s12, %s310_s12 }
 0x19f   :  { %p14249_p1 = scmp.ne.s32.totalorder %s310_s12, %s14248_s26  ;;  %p14254_p3 = scmp.lt.s32.totalorder %s14248_s26, %s14248_s26 }
 0x1a1   :  { %p14255_p4 = por %p14254_p3, %p14253_p2 }
 0x1a3   :  { %p14256_p5 = pnand %p14255_p4, %p14249_p1 }
 0x1a5   :  { %14259 = shalt.err (!%p14256_p5)
}
 0x1a6   :  { %315 = dma.hbm_to_vmem [thread:$0]  %s16392_s17, 24576, %s310_s12, [#allocation30], %s14386_s22, %s14386_s22, %s14387_s30  }
 0x1a7   :  { %s14260_s0 = scalar_lea.hbm %s14570_s20, 4096 }
 0x1a8   :  { %p14261_p6 = scmp.ne.s32.totalorder %s14570_s20, %s14260_s0  ;;  %p14264_p7 = scmp.lt.u32.totalorder %s14260_s0, %s14570_s20 }
 0x1aa   :  { %p14266_p8 = pnand %p14264_p7, %p14261_p6 }
 0x1ac   :  { %14269 = shalt.err (!%p14266_p8)
}
 0x1ad   :  { %s14270_s1 = scalar_lea.vmem %s338_s23, 4096  ;;  %p14275_p10 = scmp.lt.s32.totalorder %s338_s23, %s338_s23 }
 0x1ae   :  { %p14271_p9 = scmp.ne.s32.totalorder %s338_s23, %s14270_s1  ;;  %p14276_p11 = scmp.lt.s32.totalorder %s14270_s1, %s14270_s1 }
 0x1b0   :  { %p14277_p12 = por %p14276_p11, %p14275_p10 }
 0x1b2   :  { %p14278_p13 = pnand %p14277_p12, %p14271_p9 }
 0x1b4   :  { %14281 = shalt.err (!%p14278_p13)
}
 0x1b5   :  { %343 = dma.hbm_to_vmem [thread:$0]  %s14570_s20, 4096, %s338_s23, [#allocation33], %s14367_s28, %s14367_s28, %s14368_s3  }
 0x1b6   :  { %14304 = dma.done.wait [#allocation3], 64  }
 0x1b7   :  { %14305 = vsyncadd [#allocation3], 4294967232 }
 0x1b8   :  { %14306 = dma.done.wait [#allocation6], 32  }
 0x1b9   :  { %14307 = vsyncadd [#allocation6], 4294967264 }
 0x1ba   :  { %14308 = dma.done.wait [#allocation9], 32  }
 0x1bb   :  { %14309 = vsyncadd [#allocation9], 4294967264 }
 0x1bc   :  { %14310 = dma.done.wait [#allocation12], 32  }
 0x1bd   :  { %14311 = vsyncadd [#allocation12], 4294967264 }
 0x1be   :  { %14312 = dma.done.wait [#allocation15], 3088  }
 0x1bf   :  { %14313 = vsyncadd [#allocation15], 4294964208 }
 0x1c0   :  { %14314 = dma.done.wait [#allocation18], 1040  }
 0x1c1   :  { %14315 = vsyncadd [#allocation18], 4294966256 }
 0x1c2   :  { %14316 = dma.done.wait [#allocation21], 32  }
 0x1c3   :  { %14317 = vsyncadd [#allocation21], 4294967264 }
 0x1c4   :  { %14318 = dma.done.wait [#allocation24], 36864  }
 0x1c5   :  { %14319 = vsyncadd [#allocation24], 4294930432 }
 0x1c6   :  { %14320 = dma.done.wait [#allocation27], 28672  }
 0x1c7   :  { %14321 = vsyncadd [#allocation27], 4294938624 }
 0x1c8   :  { %14322 = dma.done.wait [#allocation30], 32768  }
 0x1c9   :  { %14323 = vsyncadd [#allocation30], 4294934528 }
 0x1ca   :  { %14324 = dma.done.wait [#allocation33], 12288  }
 0x1cb   :  { %14325 = vsyncadd [#allocation33], 4294955008  ;;  %s16393_s20 = sld [smem:[#allocation48_spill]]  ;;  %s16394_s28 = sld [smem:[#allocation49_spill]]  ;;  %v14390_v0 = vmov 0   ;;  %v14391_v8 = vmov 0.0|0.0   ;;  %v409_v39 = vlaneseq }
 0x1cc   :  { %13195 = vset.pattern.permute.xlu1 %v14390_v0  ;;  %13194 = vset.pattern.permute.xlu0 %v14390_v0  ;;  %v424_v44 = vld [vmem:[#allocation2] sm:$0x7]  ;;  %v14392_v58 = vmov 0.0   ;;  %s14393_s3 = smov 64   ;;  %vm611_vm4 = vcmask 523264   ;;  %s16395_s2 = sld [smem:[#allocation51_spill]] }
 0x1cd   :  { %11721 = vmatprep.subr.bf16.mxu0 %v14391_v8  ;;  %11757 = vmatprep.subr.bf16.mxu1 %v14391_v8  ;;  %v14736_v40 = vshrl.u32 %v409_v39, 7  ;;  %s16396_s7 = sld [smem:[#allocation54_spill]]  ;;  %s16397_s9 = sld [smem:[#allocation55_spill]]  ;;  %vm3044_vm5 = vcmask 261120   ;;  %vm3219_vm7 = vcmask 130048   ;;  %vm6318_vm8 = vcmask 785408  }
 0x1ce   :  { %s16398_s10 = sld [smem:[#allocation57_spill]]  ;;  %s16399_s11 = sld [smem:[#allocation58_spill]]  ;;  %vm15281_vm6 = vmpackc.low %vm3044_vm5, %vm3044_vm5  ;;  %vm10494_vm9 = vcmask 1041409  }
 0x1cf   :  { %v14739_v41 = vsub.s32 0, %v14736_v40  ;;  %v411_v42 = vadd.s32 8, %v14736_v40  ;;  %v14743_v43 = vsub.s32 1, %v14736_v40  ;;  %vm483_vm0 = vcmp.lt.s32.totalorder %v14736_v40, 1  ;;  %s16400_s21 = sld [smem:[#allocation59_spill]]  ;;  %s16401_s4 = sld [smem:[#allocation60_spill]] }
 0x1d0   :  { %v14752_v48 = vsub.s32 2, %v14736_v40  ;;  %vm412_vm2 = vcmp.ne.s32.totalorder %v14736_v40, 0  ;;  %vm496_vm3 = vcmp.lt.s32.totalorder %v14736_v40, 7  ;;  %s16402_s15 = sld [smem:[#allocation62_spill]]  ;;  %s14394_s5 = smov 96  }
 0x1d1   :  { %v456_v1 = vld [vmem:[%s16393_s20 + $0x8] sm:$0xff]  ;;  %v455_v2 = vld [vmem:[%s16393_s20] sm:$0xff]  ;;  %v457_v3 = vld [vmem:[%s16393_s20 + $0x10] sm:$0xff]  ;;  %v508_v47 = vrot.slane %v424_v44, %v14739_v41  ;;  %vm419_vm1 = vcmp.ne.s32.totalorder %v411_v42, 15  ;;  %v516_v52 = vrot.slane %v424_v44, %v14743_v43  ;;  %v14773_v61 = vsel %vm412_vm2, 1.0, %v14392_v58  ;;  %s14395_s13 = smov 32  }
 0x1d2   :  { %466 = vperm.xlu1 %13195, %v456_v1   ;;  %461 = vperm.xlu0 %13194, %v455_v2   ;;  %v458_v4 = vld [vmem:[%s16393_s20 + $0x18] sm:$0xff]  ;;  %v426_v5 = vld [vmem:[%s16394_s28] sm:$0xff]  ;;  %v427_v6 = vld [vmem:[%s16394_s28 + $0x8] sm:$0xff]  ;;  %v14769_v59 = vsel %vm419_vm1, 1.0, %v14392_v58  ;;  %v528_v60 = vrot.slane %v424_v44, %v14752_v48  ;;  %s16409_s14 = sld [smem:[#allocation63_spill]]  ;;  %s16410_s16 = sld [smem:[#allocation65_spill]] }
 0x1d3   :  { %v428_v7 = vld [vmem:[%s16394_s28 + $0x10] sm:$0xff]  ;;  %v11722_v9 = vpack.c.bf16 %v427_v6, %v426_v5  ;;  %v429_v10 = vld [vmem:[%s16394_s28 + $0x18] sm:$0xff]  ;;  %v430_v12 = vld [vmem:[%s16394_s28 + $0x20] sm:$0xff] }
 0x1d4   :  { %v11725_v11 = vpack.c.bf16 %v429_v10, %v428_v7  ;;  %v431_v13 = vld [vmem:[%s16394_s28 + $0x28] sm:$0xff]  ;;  %v432_v15 = vld [vmem:[%s16394_s28 + $0x30] sm:$0xff]  ;;  %v433_v16 = vld [vmem:[%s16394_s28 + $0x38] sm:$0xff] }
 0x1d5   :  { %11723 = vmatpush1.bf16.msra.mxu0 %v11722_v9  ;;  %v11728_v14 = vpack.c.bf16 %v431_v13, %v430_v12  ;;  %v11731_v17 = vpack.c.bf16 %v433_v16, %v432_v15  ;;  %v434_v18 = vld [vmem:[%s16394_s28 + $0x40] sm:$0xff]  ;;  %v435_v19 = vld [vmem:[%s16394_s28 + $0x48] sm:$0xff]  ;;  %v436_v21 = vld [vmem:[%s16394_s28 + $0x50] sm:$0xff] }
 0x1d6   :  { %471 = vperm.xlu1 %13195, %v457_v3   ;;  %476 = vperm.xlu0 %13194, %v458_v4   ;;  %v11734_v20 = vpack.c.bf16 %v435_v19, %v434_v18  ;;  %v437_v22 = vld [vmem:[%s16394_s28 + $0x58] sm:$0xff]  ;;  %v438_v24 = vld [vmem:[%s16394_s28 + $0x60] sm:$0xff]  ;;  %v439_v25 = vld [vmem:[%s16394_s28 + $0x68] sm:$0xff] }
 0x1d7   :  { %11724 = vmatprep.subr.bf16.mxu0 %v14391_v8  ;;  %v11737_v23 = vpack.c.bf16 %v437_v22, %v436_v21  ;;  %v11740_v26 = vpack.c.bf16 %v439_v25, %v438_v24  ;;  %v440_v27 = vld [vmem:[%s16394_s28 + $0x70] sm:$0xff]  ;;  %v441_v28 = vld [vmem:[%s16394_s28 + $0x78] sm:$0xff]  ;;  %v442_v30 = vld [vmem:[%s16394_s28 + $0x80] sm:$0xff] }
 0x1d8   :  { %v11743_v29 = vpack.c.bf16 %v441_v28, %v440_v27  ;;  %v443_v31 = vld [vmem:[%s16394_s28 + $0x88] sm:$0xff]  ;;  %v444_v33 = vld [vmem:[%s16394_s28 + $0x90] sm:$0xff]  ;;  %v445_v34 = vld [vmem:[%s16394_s28 + $0x98] sm:$0xff] }
 0x1d9   :  { %11726 = vmatpush1.bf16.msra.mxu0 %v11725_v11  ;;  %v11746_v32 = vpack.c.bf16 %v443_v31, %v442_v30  ;;  %v11749_v35 = vpack.c.bf16 %v445_v34, %v444_v33  ;;  %v446_v36 = vld [vmem:[%s16394_s28 + $0xa0] sm:$0xff]  ;;  %v447_v37 = vld [vmem:[%s16394_s28 + $0xa8] sm:$0xff]  ;;  %v448_v6 = vld [vmem:[%s16394_s28 + $0xb0] sm:$0xff] }
 0x1da   :  { %11727 = vmatprep.subr.bf16.mxu0 %v14391_v8  ;;  %v11752_v38 = vpack.c.bf16 %v447_v37, %v446_v36  ;;  %v449_v7 = vld [vmem:[%s16394_s28 + $0xb8] sm:$0xff] }
 0x1dd   :  { %11729 = vmatpush1.bf16.msra.mxu0 %v11728_v14 }
 0x1de   :  { %11730 = vmatprep.subr.bf16.mxu0 %v14391_v8 }
 0x1e1   :  { %11732 = vmatpush1.bf16.msra.mxu0 %v11731_v17 }
 0x1e2   :  { %11733 = vmatprep.subr.bf16.mxu0 %v14391_v8 }
 0x1e5   :  { %11735 = vmatpush1.bf16.msra.mxu0 %v11734_v20  ;;  %v11755_v20 = vpack.c.bf16 %v449_v7, %v448_v6 }
 0x1e6   :  { %11736 = vmatprep.subr.bf16.mxu0 %v14391_v8 }
 0x1e9   :  { %11738 = vmatpush1.bf16.msra.mxu0 %v11737_v23 }
 0x1ea   :  { %11739 = vmatprep.subr.bf16.mxu0 %v14391_v8 }
 0x1ed   :  { %11741 = vmatpush1.bf16.msra.mxu0 %v11740_v26  ;;  %v10632_v26 = vld [vmem:[#allocation5] ss:$0 sm:$0xff] }
 0x1ee   :  { %11742 = vmatprep.subr.bf16.mxu0 %v14391_v8 }
 0x1f1   :  { %11744 = vmatpush1.bf16.msra.mxu0 %v11743_v29 }
 0x1f2   :  { %11745 = vmatprep.subr.bf16.mxu0 %v14391_v8 }
 0x1f5   :  { %11747 = vmatpush1.bf16.msra.mxu0 %v11746_v32 }
 0x1f6   :  { %11748 = vmatprep.subr.bf16.mxu0 %v14391_v8 }
 0x1f9   :  { %11750 = vmatpush1.bf16.msra.mxu0 %v11749_v35 }
 0x1fa   :  { %11751 = vmatprep.subr.bf16.mxu0 %v14391_v8 }
 0x1fd   :  { %11753 = vmatpush1.bf16.msra.mxu0 %v11752_v38 }
 0x1fe   :  { %11754 = vmatprep.subr.bf16.mxu0 %v14391_v8 }
 0x201   :  { %11756 = vmatpush1.bf16.msra.mxu0 %v11755_v20 }
 0x251   :  { %v14745_v45 = vpop.permute.xlu1 %466  ;;  %v14747_v46 = vpop.permute.xlu0 %461 }
 0x252   :  { %v480_v49 = vrot.slane %v14745_v45, 7  ;;  %v479_v50 = vrot.slane %v14747_v46, 7  ;;  %v493_v51 = vrot.slane %v14745_v45, 1  ;;  %v492_v53 = vrot.slane %v14747_v46, 1 }
 0x253   :  { %v518_v55 = vmul.f32 %v516_v52, %v14745_v45  ;;  %v517_v2 = vmul.f32 %v516_v52, %v14747_v46 }
 0x254   :  { %v486_v54 = vsel %vm483_vm0, %v479_v50, %v480_v49  ;;  %v499_v5 = vsel %vm496_vm3, %v492_v53, %v493_v51 }
 0x255   :  { %v14764_v56 = vpop.permute.xlu1 %471  ;;  %v14766_v57 = vpop.permute.xlu0 %476  ;;  %v510_v1 = vmul.f32 %v508_v47, %v486_v54  ;;  %v529_v31 = vmul.f32 %v528_v60, %v499_v5 }
 0x256   :  { %v481_v62 = vrot.slane %v14764_v56, 7  ;;  %v494_v63 = vrot.slane %v14764_v56, 1  ;;  %v482_v0 = vrot.slane %v14766_v57, 7  ;;  %v495_v3 = vrot.slane %v14766_v57, 1 }
 0x257   :  { %v520_v4 = vmul.f32 %v516_v52, %v14766_v57  ;;  %v522_v17 = vadd.f32 %v518_v55, %v510_v1  ;;  %v519_v25 = vmul.f32 %v516_v52, %v14764_v56 }
 0x258   :  { %v485_v9 = vsel %vm483_vm0, %v480_v49, %v481_v62  ;;  %v487_v10 = vsel %vm483_vm0, %v482_v0, %v479_v50  ;;  %v498_v11 = vsel %vm496_vm3, %v493_v51, %v494_v63  ;;  %v484_v12 = vsel %vm483_vm0, %v481_v62, %v482_v0 }
 0x259   :  { %v502_v13 = vmul.f32 %v14769_v59, %v498_v11  ;;  %v488_v14 = vmul.f32 %v14773_v61, %v487_v10  ;;  %v500_v15 = vsel %vm496_vm3, %v495_v3, %v492_v53  ;;  %v512_v16 = vmul.f32 %v508_v47, %v484_v12 }
 0x25a   :  { %v504_v18 = vmul.f32 %v14769_v59, %v500_v15  ;;  %v490_v19 = vmul.f32 %v14773_v61, %v485_v9  ;;  %v497_v24 = vsel %vm496_vm3, %v494_v63, %v495_v3 }
 0x25b   :  { %v530_v21 = vmul.f32 %v528_v60, %v502_v13  ;;  %v509_v22 = vmul.f32 %v508_v47, %v488_v14  ;;  %v524_v23 = vadd.f32 %v520_v4, %v512_v16  ;;  %v531_v34 = vmul.f32 %v528_v60, %v497_v24 }
 0x25c   :  { %v532_v27 = vmul.f32 %v528_v60, %v504_v18  ;;  %v511_v28 = vmul.f32 %v508_v47, %v490_v19 }
 0x25d   :  { %v534_v29 = vadd.f32 %v530_v21, %v522_v17  ;;  %v521_v30 = vadd.f32 %v517_v2, %v509_v22  ;;  %v786_v21 = vld [vmem:[#allocation14] sm:$0xff]  ;;  %v787_v22 = vld [vmem:[#allocation14 + $0x8] sm:$0xff] }
 0x25e   :  { %v536_v32 = vadd.f32 %v532_v27, %v524_v23  ;;  %v523_v33 = vadd.f32 %v519_v25, %v511_v28  ;;  %v788_v23 = vld [vmem:[#allocation14 + $0x10] sm:$0xff]  ;;  %v11758_v24 = vpack.c.bf16 %v787_v22, %v786_v21  ;;  %v789_v25 = vld [vmem:[#allocation14 + $0x18] sm:$0xff]  ;;  %v790_v27 = vld [vmem:[#allocation14 + $0x20] sm:$0xff] }
 0x25f   :  { %v544_v35 = vadd.f32 %v10632_v26, %v534_v29  ;;  %v533_v36 = vadd.f32 %v529_v31, %v521_v30  ;;  %v791_v28 = vld [vmem:[#allocation14 + $0x28] sm:$0xff]  ;;  %v792_v30 = vld [vmem:[#allocation14 + $0x30] sm:$0xff]  ;;  %v793_v31 = vld [vmem:[#allocation14 + $0x38] sm:$0xff] }
 0x260   :  { %v546_v37 = vadd.f32 %v10632_v26, %v536_v32  ;;  %v535_v38 = vadd.f32 %v531_v34, %v523_v33  ;;  %11759 = vmatpush1.bf16.msra.mxu1 %v11758_v24  ;;  %v11764_v29 = vpack.c.bf16 %v791_v28, %v790_v27  ;;  %v11767_v32 = vpack.c.bf16 %v793_v31, %v792_v30  ;;  %v794_v33 = vld [vmem:[#allocation14 + $0x40] sm:$0xff]  ;;  %v795_v34 = vld [vmem:[#allocation14 + $0x48] sm:$0xff] }
 0x261   :  { %v568_v39 = vmax.f32 %v544_v35, 0.0  ;;  %v543_v42 = vadd.f32 %v10632_v26, %v533_v36  ;;  %11760 = vmatprep.subr.bf16.mxu1 %v14391_v8  ;;  %v11770_v35 = vpack.c.bf16 %v795_v34, %v794_v33  ;;  %v796_v36 = vld [vmem:[#allocation14 + $0x50] sm:$0xff] }
 0x262   :  { %v570_v44 = vmax.f32 %v546_v37, 0.0  ;;  %v545_v49 = vadd.f32 %v10632_v26, %v535_v38  ;;  %v11761_v26 = vpack.c.bf16 %v789_v25, %v788_v23  ;;  %v797_v37 = vld [vmem:[#allocation14 + $0x58] sm:$0xff] }
 0x263   :  { %601 = vrot.lane.b32.xlu1 %v568_v39, %s14393_s3  ;;  %v567_v50 = vmax.f32 %v543_v42, 0.0  ;;  %v584_v47 = vrot.slane %v568_v39, 1  ;;  %v572_v52 = vrot.slane %v568_v39, 7  ;;  %v11773_v38 = vpack.c.bf16 %v797_v37, %v796_v36  ;;  %v798_v39 = vld [vmem:[#allocation14 + $0x60] sm:$0xff]  ;;  %v799_v42 = vld [vmem:[#allocation14 + $0x68] sm:$0xff] }
 0x264   :  { %v569_v51 = vmax.f32 %v545_v49, 0.0  ;;  %v574_v54 = vrot.slane %v570_v44, 7  ;;  %v586_v60 = vrot.slane %v570_v44, 1  ;;  %11762 = vmatpush1.bf16.msra.mxu1 %v11761_v26  ;;  %v800_v49 = vld [vmem:[#allocation14 + $0x70] sm:$0xff] }
 0x265   :  { %599 = vrot.lane.b32.xlu0 %v567_v50, %s14393_s3  ;;  %v571_v53 = vrot.slane %v567_v50, 7  ;;  %v583_v55 = vrot.slane %v567_v50, 1  ;;  %11763 = vmatprep.subr.bf16.mxu1 %v14391_v8  ;;  %v801_v50 = vld [vmem:[#allocation14 + $0x78] sm:$0xff] }
 0x266   :  { %v573_v62 = vrot.slane %v569_v51, 7  ;;  %v585_v63 = vrot.slane %v569_v51, 1 }
 0x267   :  { %605 = vrot.lane.b32.xlu1 %v570_v44, %s14393_s3  ;;  %v589_v0 = vsel %vm496_vm3, %v583_v55, %v584_v47  ;;  %v578_v1 = vsel %vm483_vm0, %v574_v54, %v571_v53  ;;  %v577_v2 = vsel %vm483_vm0, %v571_v53, %v572_v52  ;;  %v590_v3 = vsel %vm496_vm3, %v586_v60, %v583_v55  ;;  %v805_v55 = vld [vmem:[#allocation14 + $0x98] sm:$0xff] }
 0x268   :  { %10636 = vmatprep.mubr.msk.f32.mxu0 %vm611_vm4, %v589_v0  ;;  %v588_v4 = vsel %vm496_vm3, %v584_v47, %v585_v63  ;;  %v587_v5 = vsel %vm496_vm3, %v585_v63, %v586_v60  ;;  %v576_v6 = vsel %vm483_vm0, %v572_v52, %v573_v62  ;;  %v575_v7 = vsel %vm483_vm0, %v573_v62, %v574_v54  ;;  %v803_v52 = vld [vmem:[#allocation14 + $0x88] sm:$0xff]  ;;  %v804_v54 = vld [vmem:[#allocation14 + $0x90] sm:$0xff]  ;;  %v806_v62 = vld [vmem:[#allocation14 + $0xa0] sm:$0xff] }
 0x269   :  { %603 = vrot.lane.b32.xlu0 %v569_v51, %s14393_s3  ;;  %v579_v9 = vmul.f32 %v14773_v61, %v578_v1  ;;  %v592_v12 = vmul.f32 %v14769_v59, %v588_v4  ;;  %v581_v16 = vmul.f32 %v14773_v61, %v576_v6  ;;  %v594_v18 = vmul.f32 %v14769_v59, %v590_v3  ;;  %v802_v51 = vld [vmem:[#allocation14 + $0x80] sm:$0xff]  ;;  %v807_v63 = vld [vmem:[#allocation14 + $0xa8] sm:$0xff]  ;;  %v808_v1 = vld [vmem:[#allocation14 + $0xb0] sm:$0xff] }
 0x26a   :  { %11765 = vmatpush1.bf16.msra.mxu1 %v11764_v29  ;;  %v11776_v44 = vpack.c.bf16 %v799_v42, %v798_v39  ;;  %v11779_v47 = vpack.c.bf16 %v801_v50, %v800_v49  ;;  %v11782_v53 = vpack.c.bf16 %v803_v52, %v802_v51  ;;  %v11785_v60 = vpack.c.bf16 %v805_v55, %v804_v54  ;;  %v10633_v4 = vld [vmem:[#allocation8] ss:$0 sm:$0xff]  ;;  %v10635_v6 = vld [vmem:[#allocation7] ss:$0 sm:$0xff] }
 0x26b   :  { %11766 = vmatprep.subr.bf16.mxu1 %v14391_v8  ;;  %v11788_v0 = vpack.c.bf16 %v807_v63, %v806_v62  ;;  %v556_v22 = vmul.f32 %v10633_v4, %v14766_v57 }
 0x26e   :  { %11768 = vmatpush1.bf16.msra.mxu1 %v11767_v32 }
 0x26f   :  { %11769 = vmatprep.subr.bf16.mxu1 %v14391_v8 }
 0x272   :  { %11771 = vmatpush1.bf16.msra.mxu1 %v11770_v35 }
 0x273   :  { %11772 = vmatprep.subr.bf16.mxu1 %v14391_v8 }
 0x276   :  { %11774 = vmatpush1.bf16.msra.mxu1 %v11773_v38 }
 0x277   :  { %11775 = vmatprep.subr.bf16.mxu1 %v14391_v8 }
 0x27a   :  { %11777 = vmatpush1.bf16.msra.mxu1 %v11776_v44 }
 0x27b   :  { %11778 = vmatprep.subr.bf16.mxu1 %v14391_v8 }
 0x27e   :  { %11780 = vmatpush1.bf16.msra.mxu1 %v11779_v47 }
 0x27f   :  { %11781 = vmatprep.subr.bf16.mxu1 %v14391_v8 }
 0x282   :  { %11783 = vmatpush1.bf16.msra.mxu1 %v11782_v53 }
 0x283   :  { %11784 = vmatprep.subr.bf16.mxu1 %v14391_v8 }
 0x286   :  { %11786 = vmatpush1.bf16.msra.mxu1 %v11785_v60 }
 0x287   :  { %11787 = vmatprep.subr.bf16.mxu1 %v14391_v8 }
 0x28a   :  { %11789 = vmatpush1.bf16.msra.mxu1 %v11788_v0 }
 0x28b   :  { %11790 = vmatprep.subr.bf16.mxu1 %v14391_v8 }
 0x2d5   :  { %v602_v13 = vpop.permute.xlu1 %601 }
 0x2d6   :  { %v613_v14 = vsel %vm611_vm4, %v577_v2, %v602_v13  ;;  %v809_v2 = vld [vmem:[#allocation14 + $0xb8] sm:$0xff]  ;;  %v554_v13 = vmul.f32 %v10633_v4, %v14745_v45 }
 0x2d7   :  { %v600_v10 = vpop.permute.xlu0 %599  ;;  %v11791_v3 = vpack.c.bf16 %v809_v2, %v808_v1 }
 0x2d8   :  { %v612_v11 = vsel %vm611_vm4, %v579_v9, %v600_v10 }
 0x2d9   :  { %699 = vmatmul.mubr.f32.vlgmr.msra.gmra.mrb[0].mxu0 %v612_v11  ;;  %v606_v19 = vpop.permute.xlu1 %605  ;;  %11792 = vmatpush1.bf16.msra.mxu1 %v11791_v3 }
 0x2da   :  { %10637 = vmatprep.mubr.msk.f32.mxu0 %vm611_vm4, %v592_v12  ;;  %v615_v20 = vsel %vm611_vm4, %v575_v7, %v606_v19  ;;  %v10634_v7 = vld [vmem:[#allocation10] ss:$0 sm:$0xff] }
 0x2db   :  { %v604_v15 = vpop.permute.xlu0 %603  ;;  %v566_v57 = vadd.f32 %v10634_v7, %v556_v22 }
 0x2dc   :  { %v614_v17 = vsel %vm611_vm4, %v581_v16, %v604_v15  ;;  %v555_v16 = vmul.f32 %v10633_v4, %v14764_v56 }
 0x2dd   :  { %704 = vmatmul.mubr.f32.gmra.mrb[2].mxu0 %v613_v14 }
 0x2de   :  { %10638 = vmatprep.mubr.msk.f32.mxu0 %vm611_vm4, %v587_v5  ;;  %v553_v5 = vmul.f32 %v10633_v4, %v14747_v46 }
 0x2e0   :  { %v563_v10 = vadd.f32 %v10634_v7, %v553_v5 }
 0x2e1   :  { %709 = vmatmul.mubr.f32.gmra.mrb[4].mxu0 %v614_v17  ;;  %v564_v17 = vadd.f32 %v10634_v7, %v554_v13 }
 0x2e2   :  { %10639 = vmatprep.mubr.msk.f32.mxu0 %vm611_vm4, %v594_v18 }
 0x2e5   :  { %714 = vmatmul.mubr.f32.gmra.mrb[6].mxu0 %v615_v20  ;;  %v565_v20 = vadd.f32 %v10634_v7, %v555_v16  ;;  %v860_v16 = vld [vmem:[#allocation19] sm:$0xff] }
 0x3ac   :  { %v700_v9 = vpop.f32.mrb[0].mxu0 }
 0x3ad   :  { %v701_v11 = vadd.f32 %v10635_v6, %v700_v9  ;;  %v702_v12 = vpop.f32.mrb[1].mxu0 }
 0x3af   :  { %v14847_v14 = vadd.f32 %v701_v11, %v563_v10 }
 0x3b0   :  { %v705_v15 = vpop.f32.mrb[2].mxu0 }
 0x3b1   :  { %v706_v18 = vadd.f32 %v10635_v6, %v705_v15  ;;  %v707_v8 = vpop.f32.mrb[3].mxu0  ;;  %v737_v19 = vmul.f32 %v14847_v14, %v14847_v14  ;;  %v723_v23 = vsel %vm611_vm4, %v14847_v14, 0.0  ;;  %v453_v15 = vld [vmem:[#allocation11] sm:$0x1] }
 0x3b3   :  { %v720_v46 = vadd.f32 %v706_v18, %v564_v17  ;;  %v741_v27 = vsel %vm611_vm4, %v737_v19, 0.0  ;;  %v861_v17 = vld [vmem:[#allocation19 + $0x8] sm:$0xff] }
 0x3b4   :  { %v710_v21 = vpop.f32.mrb[4].mxu0  ;;  %v14863_v8 = vpack.c.bf16 %v861_v17, %v860_v16  ;;  %v867_v16 = vld [vmem:[#allocation19 + $0x38] sm:$0xff] }
 0x3b5   :  { %v724_v45 = vsel %vm611_vm4, %v720_v46, 0.0  ;;  %v738_v24 = vmul.f32 %v720_v46, %v720_v46  ;;  %v711_v25 = vadd.f32 %v10635_v6, %v710_v21  ;;  %v712_v26 = vpop.f32.mrb[5].mxu0  ;;  %v10640_v21 = vld [vmem:[#allocation13] ss:$0 sm:$0xff] }
 0x3b6   :  { %v725_v56 = vadd.f32 %v724_v45, %v723_v23  ;;  %11794 = vmatprep.subr.bf16.mxu1 %v14863_v8 }
 0x3b7   :  { %v742_v28 = vsel %vm611_vm4, %v738_v24, 0.0  ;;  %v721_v29 = vadd.f32 %v711_v25, %v565_v20 }
 0x3b8   :  { %v743_v30 = vadd.f32 %v742_v28, %v741_v27  ;;  %v715_v31 = vpop.f32.mrb[6].mxu0 }
 0x3b9   :  { %v726_v32 = vsel %vm611_vm4, %v721_v29, 0.0  ;;  %v739_v33 = vmul.f32 %v721_v29, %v721_v29  ;;  %v716_v34 = vadd.f32 %v10635_v6, %v715_v31  ;;  %v717_v35 = vpop.f32.mrb[7].mxu0 }
 0x3ba   :  { %v727_v36 = vadd.f32 %v726_v32, %v725_v56  ;;  %v845_v35 = vld [vmem:[%s16395_s2 + $0x110] sm:$0xff] }
 0x3bb   :  { %v744_v37 = vsel %vm611_vm4, %v739_v33, 0.0  ;;  %v722_v38 = vadd.f32 %v716_v34, %v566_v57  ;;  %v843_v33 = vld [vmem:[%s16395_s2 + $0x100] sm:$0xff]  ;;  %v844_v57 = vld [vmem:[%s16395_s2 + $0x108] sm:$0xff] }
 0x3bc   :  { %v745_v39 = vadd.f32 %v744_v37, %v743_v30  ;;  %v11841_v34 = vpack.c.bf16 %v844_v57, %v843_v33 }
 0x3bd   :  { %v728_v42 = vsel %vm611_vm4, %v722_v38, 0.0  ;;  %v740_v44 = vmul.f32 %v722_v38, %v722_v38 }
 0x3be   :  { %v729_v49 = vadd.f32 %v728_v42, %v727_v36  ;;  %v846_v36 = vld [vmem:[%s16395_s2 + $0x118] sm:$0xff]  ;;  %11842 = vmatprep.subr.bf16.mxu0 %v11841_v34 }
 0x3bf   :  { %v746_v50 = vsel %vm611_vm4, %v740_v44, 0.0  ;;  %v11845_v37 = vpack.c.bf16 %v846_v36, %v845_v35  ;;  %11844 = vmatpush3.bf16.msra.mxu0 %v11841_v34  ;;  %v849_v44 = vld [vmem:[%s16395_s2 + $0x130] sm:$0xff]  ;;  %v814_v35 = vld [vmem:[%s16395_s2 + $0x18] sm:$0xff]  ;;  %v831_v36 = vld [vmem:[%s16395_s2 + $0xa0] sm:$0xff] }
 0x3c0   :  { %v730_v47 = vrot.slane %v729_v49, 4  ;;  %v747_v51 = vadd.f32 %v746_v50, %v745_v39  ;;  %v848_v39 = vld [vmem:[%s16395_s2 + $0x128] sm:$0xff]  ;;  %v813_v34 = vld [vmem:[%s16395_s2 + $0x10] sm:$0xff] }
 0x3c1   :  { %11846 = vmatprep.subr.bf16.mxu0 %v11845_v37 }
 0x3c2   :  { %v731_v52 = vadd.f32 %v730_v47, %v729_v49  ;;  %v748_v53 = vrot.slane %v747_v51, 4  ;;  %v850_v49 = vld [vmem:[%s16395_s2 + $0x138] sm:$0xff] }
 0x3c3   :  { %11848 = vmatpush3.bf16.msra.mxu0 %v11845_v37  ;;  %v11853_v50 = vpack.c.bf16 %v850_v49, %v849_v44  ;;  %v832_v37 = vld [vmem:[%s16395_s2 + $0xa8] sm:$0xff]  ;;  %v851_v49 = vld [vmem:[%s16395_s2 + $0x140] sm:$0xff] }
 0x3c4   :  { %v732_v54 = vrot.slane %v731_v52, 2  ;;  %v749_v55 = vadd.f32 %v748_v53, %v747_v51 }
 0x3c6   :  { %v733_v60 = vadd.f32 %v732_v54, %v731_v52  ;;  %v750_v62 = vrot.slane %v749_v55, 2  ;;  %v862_v54 = vld [vmem:[#allocation19 + $0x10] sm:$0xff] }
 0x3c8   :  { %v734_v63 = vrot.slane %v733_v60, 1  ;;  %v751_v0 = vadd.f32 %v750_v62, %v749_v55  ;;  %v863_v55 = vld [vmem:[#allocation19 + $0x18] sm:$0xff] }
 0x3ca   :  { %v735_v1 = vadd.f32 %v734_v63, %v733_v60  ;;  %v752_v2 = vrot.slane %v751_v0, 1 }
 0x3cc   :  { %v736_v3 = vmul.f32 0.03125, %v735_v1  ;;  %v753_v4 = vadd.f32 %v752_v2, %v751_v0  ;;  %v11797_v1 = vpack.c.bf16 %v863_v55, %v862_v54  ;;  %v836_v55 = vld [vmem:[%s16395_s2 + $0xc8] sm:$0xff] }
 0x3ce   :  { %v754_v5 = vmul.f32 0.03125, %v753_v4  ;;  %v755_v6 = vmul.f32 %v736_v3, %v736_v3  ;;  %v760_v7 = vsub.f32 %v722_v38, %v736_v3  ;;  %v758_v9 = vsub.f32 %v720_v46, %v736_v3  ;;  %v847_v38 = vld [vmem:[%s16395_s2 + $0x120] sm:$0xff] }
 0x3cf   :  { %v757_v10 = vsub.f32 %v14847_v14, %v736_v3  ;;  %v759_v11 = vsub.f32 %v721_v29, %v736_v3  ;;  %v11849_v42 = vpack.c.bf16 %v848_v39, %v847_v38  ;;  %v11817_v38 = vpack.c.bf16 %v832_v37, %v831_v36  ;;  %v815_v39 = vld [vmem:[%s16395_s2 + $0x20] sm:$0xff] }
 0x3d0   :  { %v756_v12 = vsub.f32 %v754_v5, %v755_v6  ;;  %v864_v5 = vld [vmem:[#allocation19 + $0x20] sm:$0xff]  ;;  %v865_v6 = vld [vmem:[#allocation19 + $0x28] sm:$0xff] }
 0x3d1   :  { %11850 = vmatprep.subr.bf16.mxu0 %v11849_v42 }
 0x3d2   :  { %v761_v13 = vadd.f32 1e-05, %v756_v12  ;;  %11852 = vmatpush3.bf16.msra.mxu0 %v11849_v42  ;;  %v11801_v12 = vpack.c.bf16 %v865_v6, %v864_v5  ;;  %v816_v42 = vld [vmem:[%s16395_s2 + $0x28] sm:$0xff]  ;;  %v838_v5 = vld [vmem:[%s16395_s2 + $0xd8] sm:$0xff]  ;;  %v855_v6 = vld [vmem:[%s16395_s2 + $0x160] sm:$0xff] }
 0x3d3   :  { %11854 = vmatprep.subr.bf16.mxu0 %v11853_v50  ;;  %v11819_v44 = vpack.c.bf16 %v816_v42, %v815_v39 }
 0x3d4   :  { %13556 = vrsqrt.f32 %v761_v13 }
 0x3d6   :  { %11856 = vmatpush3.bf16.msra.mxu0 %v11853_v50 }
 0x3de   :  { %v13557_v18 = vpop.eup %13556 }
 0x3df   :  { %v763_v19 = vmul.f32 %v13557_v18, %v453_v15  ;;  %v866_v15 = vld [vmem:[#allocation19 + $0x30] sm:$0xff] }
 0x3e1   :  { %v767_v20 = vrot.slane %v763_v19, %v14739_v41 }
 0x3e3   :  { %v771_v22 = vmul.f32 %v767_v20, %v760_v7  ;;  %v769_v46 = vmul.f32 %v767_v20, %v758_v9  ;;  %v768_v23 = vmul.f32 %v767_v20, %v757_v10  ;;  %v770_v14 = vmul.f32 %v767_v20, %v759_v11 }
 0x3e4   :  { %v11805_v20 = vpack.c.bf16 %v867_v16, %v866_v15  ;;  %v839_v15 = vld [vmem:[%s16395_s2 + $0xe0] sm:$0xff]  ;;  %v840_v16 = vld [vmem:[%s16395_s2 + $0xe8] sm:$0xff] }
 0x3e5   :  { %v779_v45 = vadd.f32 %v10640_v21, %v769_v46  ;;  %v778_v24 = vadd.f32 %v10640_v21, %v768_v23  ;;  %v781_v56 = vadd.f32 %v10640_v21, %v771_v22  ;;  %v780_v27 = vadd.f32 %v10640_v21, %v770_v14  ;;  %v827_v46 = vld [vmem:[%s16395_s2 + $0x80] sm:$0xff]  ;;  %v828_v23 = vld [vmem:[%s16395_s2 + $0x88] sm:$0xff] }
 0x3e7   :  { %v14867_v25 = vmax.f32 %v779_v45, 0.0  ;;  %v14869_v26 = vmax.f32 %v778_v24, 0.0  ;;  %v14879_v31 = vmax.f32 %v781_v56, 0.0  ;;  %v14881_v32 = vmax.f32 %v780_v27, 0.0  ;;  %v811_v56 = vld [vmem:[%s16395_s2] sm:$0xff]  ;;  %v812_v27 = vld [vmem:[%s16395_s2 + $0x8] sm:$0xff] }
 0x3e8   :  { %v11809_v24 = vpack.c.bf16 %v828_v23, %v827_v46  ;;  %v11811_v33 = vpack.c.bf16 %v812_v27, %v811_v56  ;;  %v841_v46 = vld [vmem:[%s16395_s2 + $0xf0] sm:$0xff]  ;;  %v842_v23 = vld [vmem:[%s16395_s2 + $0xf8] sm:$0xff] }
 0x3e9   :  { %901 = vrot.lane.b32.xlu1 %v14867_v25, %s14393_s3  ;;  %899 = vrot.lane.b32.xlu0 %v14869_v26, %s14393_s3  ;;  %v883_v28 = vrot.slane %v14869_v26, 1  ;;  %v884_v29 = vrot.slane %v14867_v25, 1  ;;  %v871_v47 = vrot.slane %v14869_v26, 7  ;;  %v874_v51 = vrot.slane %v14879_v31, 7  ;;  %v10641_v27 = vld [vmem:[#allocation16] ss:$0 sm:$0xff] }
 0x3ea   :  { %v885_v52 = vrot.slane %v14881_v32, 1  ;;  %v872_v0 = vrot.slane %v14867_v25, 7  ;;  %v873_v2 = vrot.slane %v14881_v32, 7  ;;  %v886_v9 = vrot.slane %v14879_v31, 1 }
 0x3eb   :  { %v889_v30 = vsel %vm496_vm3, %v883_v28, %v884_v29  ;;  %v878_v53 = vsel %vm483_vm0, %v874_v51, %v871_v47 }
 0x3ec   :  { %10642 = vmatprep.mubr.msk.f32.mxu1 %vm611_vm4, %v889_v30  ;;  %v888_v60 = vsel %vm496_vm3, %v884_v29, %v885_v52  ;;  %v879_v62 = vmul.f32 %v14773_v61, %v878_v53  ;;  %v877_v10 = vsel %vm483_vm0, %v871_v47, %v872_v0  ;;  %v876_v11 = vsel %vm483_vm0, %v872_v0, %v873_v2  ;;  %v829_v29 = vld [vmem:[%s16395_s2 + $0x90] sm:$0xff]  ;;  %v830_v30 = vld [vmem:[%s16395_s2 + $0x98] sm:$0xff]  ;;  %v852_v47 = vld [vmem:[%s16395_s2 + $0x148] sm:$0xff] }
 0x3ed   :  { %905 = vrot.lane.b32.xlu1 %v14879_v31, %s14393_s3  ;;  %903 = vrot.lane.b32.xlu0 %v14881_v32, %s14393_s3  ;;  %v892_v4 = vmul.f32 %v14769_v59, %v888_v60  ;;  %v887_v18 = vsel %vm496_vm3, %v885_v52, %v886_v9  ;;  %v881_v19 = vmul.f32 %v14773_v61, %v876_v11  ;;  %v818_v52 = vld [vmem:[%s16395_s2 + $0x38] sm:$0xff]  ;;  %v853_v60 = vld [vmem:[%s16395_s2 + $0x150] sm:$0xff] }
 0x3ee   :  { %v875_v45 = vsel %vm483_vm0, %v873_v2, %v874_v51  ;;  %v11813_v57 = vpack.c.bf16 %v830_v30, %v829_v29  ;;  %v817_v51 = vld [vmem:[%s16395_s2 + $0x30] sm:$0xff]  ;;  %v11857_v53 = vpack.c.bf16 %v852_v47, %v851_v49  ;;  %v819_v0 = vld [vmem:[%s16395_s2 + $0x40] sm:$0xff]  ;;  %v822_v11 = vld [vmem:[%s16395_s2 + $0x58] sm:$0xff] }
 0x3ef   :  { %v11823_v54 = vpack.c.bf16 %v818_v52, %v817_v51 }
 0x3f0   :  { %11858 = vmatprep.subr.bf16.mxu0 %v11857_v53 }
 0x3f1   :  { %11860 = vmatpush3.bf16.msra.mxu0 %v11857_v53 }
 0x45b   :  { %v900_v63 = vpop.permute.xlu0 %899  ;;  %v902_v7 = vpop.permute.xlu1 %901 }
 0x45c   :  { %v911_v3 = vsel %vm611_vm4, %v879_v62, %v900_v63  ;;  %v912_v13 = vsel %vm611_vm4, %v877_v10, %v902_v7  ;;  %v854_v63 = vld [vmem:[%s16395_s2 + $0x158] sm:$0xff]  ;;  %v821_v10 = vld [vmem:[%s16395_s2 + $0x50] sm:$0xff] }
 0x45d   :  { %998 = vmatmul.mubr.f32.vlgmr.msra.gmra.mrb[0].mxu1 %v911_v3  ;;  %v11861_v2 = vpack.c.bf16 %v854_v63, %v853_v60 }
 0x45e   :  { %10643 = vmatprep.mubr.msk.f32.mxu1 %vm611_vm4, %v892_v4  ;;  %11796 = vmatpush3.bf16.msra.mxu1 %v14863_v8  ;;  %v890_v8 = vsel %vm496_vm3, %v886_v9, %v883_v28  ;;  %v837_v4 = vld [vmem:[%s16395_s2 + $0xd0] sm:$0xff]  ;;  %v856_v9 = vld [vmem:[%s16395_s2 + $0x168] sm:$0xff] }
 0x45f   :  { %11798 = vmatprep.subr.bf16.mxu1 %v11797_v1  ;;  %v904_v17 = vpop.permute.xlu0 %903  ;;  %v894_v22 = vmul.f32 %v14769_v59, %v890_v8  ;;  %v906_v14 = vpop.permute.xlu1 %905  ;;  %11862 = vmatprep.subr.bf16.mxu0 %v11861_v2  ;;  %v11829_v7 = vpack.c.bf16 %v838_v5, %v837_v4  ;;  %v858_v8 = vld [vmem:[%s16395_s2 + $0x178] sm:$0xff] }
 0x460   :  { %v913_v21 = vsel %vm611_vm4, %v881_v19, %v904_v17  ;;  %v914_v28 = vsel %vm611_vm4, %v875_v45, %v906_v14  ;;  %11864 = vmatpush3.bf16.msra.mxu0 %v11861_v2  ;;  %v857_v17 = vld [vmem:[%s16395_s2 + $0x170] sm:$0xff]  ;;  %v823_v19 = vld [vmem:[%s16395_s2 + $0x60] sm:$0xff]  ;;  %v11837_v14 = vpack.c.bf16 %v842_v23, %v841_v46 }
 0x461   :  { %1003 = vmatmul.mubr.f32.gmra.mrb[2].mxu1 %v912_v13  ;;  %v11831_v13 = vpack.c.bf16 %v822_v11, %v821_v10  ;;  %v825_v45 = vld [vmem:[%s16395_s2 + $0x70] sm:$0xff] }
 0x462   :  { %10644 = vmatprep.mubr.msk.f32.mxu1 %vm611_vm4, %v887_v18  ;;  %11800 = vmatpush3.bf16.msra.mxu1 %v11797_v1  ;;  %v820_v1 = vld [vmem:[%s16395_s2 + $0x48] sm:$0xff]  ;;  %v11833_v18 = vpack.c.bf16 %v840_v16, %v839_v15  ;;  %v1383_v15 = vld [vmem:[#allocation23 + $0x18] sm:$0xff]  ;;  %v1386_v46 = vld [vmem:[#allocation23 + $0x30] sm:$0xff] }
 0x463   :  { %11802 = vmatprep.subr.bf16.mxu1 %v11801_v12  ;;  %v11827_v3 = vpack.c.bf16 %v820_v1, %v819_v0 }
 0x465   :  { %1008 = vmatmul.mubr.f32.gmra.mrb[4].mxu1 %v913_v21  ;;  %v11869_v21 = vpack.c.bf16 %v858_v8, %v857_v17  ;;  %v1380_v17 = vld [vmem:[#allocation23] sm:$0xff] }
 0x466   :  { %10645 = vmatprep.mubr.msk.f32.mxu1 %vm611_vm4, %v894_v22  ;;  %11804 = vmatpush3.bf16.msra.mxu1 %v11801_v12  ;;  %v11865_v12 = vpack.c.bf16 %v856_v9, %v855_v6 }
 0x467   :  { %11806 = vmatprep.subr.bf16.mxu1 %v11805_v20 }
 0x468   :  { %11866 = vmatprep.subr.bf16.mxu0 %v11865_v12 }
 0x469   :  { %1013 = vmatmul.mubr.f32.gmra.mrb[6].mxu1 %v914_v28  ;;  %11868 = vmatpush3.bf16.msra.mxu0 %v11865_v12 }
 0x46a   :  { %11808 = vmatpush3.bf16.msra.mxu1 %v11805_v20  ;;  %11229 = vmatprep.mubr.msk.f32.mxu1 %vm611_vm4, %v14869_v26  ;;  %v11815_v26 = vpack.c.bf16 %v814_v35, %v813_v34  ;;  %v824_v20 = vld [vmem:[%s16395_s2 + $0x68] sm:$0xff] }
 0x46b   :  { %11810 = vmatprep.subr.bf16.mxu1 %v11809_v24  ;;  %v11835_v22 = vpack.c.bf16 %v824_v20, %v823_v19  ;;  %11870 = vmatprep.subr.bf16.mxu0 %v11869_v21  ;;  %v826_v24 = vld [vmem:[%s16395_s2 + $0x78] sm:$0xff]  ;;  %v1385_v19 = vld [vmem:[#allocation23 + $0x28] sm:$0xff] }
 0x46c   :  { %v11839_v56 = vpack.c.bf16 %v826_v24, %v825_v45  ;;  %v1387_v20 = vld [vmem:[#allocation23 + $0x38] sm:$0xff] }
 0x46d   :  { %11230 = vmatmul.mubr.msk.f32.vlgmr.msra.gmra.mrb[8].mxu1 %vm611_vm4, %v14867_v25  ;;  %v833_v25 = vld [vmem:[%s16395_s2 + $0xb0] sm:$0xff]  ;;  %11872 = vmatpush3.bf16.msra.mxu0 %v11869_v21  ;;  %v11877_v21 = vpack.c.bf16 %v1387_v20, %v1385_v19  ;;  %v1391_v45 = vld [vmem:[#allocation23 + $0x58] sm:$0xff]  ;;  %v1412_v19 = vld [vmem:[#allocation23 + $0x100] sm:$0xff] }
 0x46e   :  { %11232 = vmatprep.mubr.msk.f32.mxu1 %vm611_vm4, %v14881_v32  ;;  %11812 = vmatpush3.bf16.msra.mxu1 %v11811_v33  ;;  %v834_v32 = vld [vmem:[%s16395_s2 + $0xb8] sm:$0xff]  ;;  %v1414_v20 = vld [vmem:[#allocation23 + $0x110] sm:$0xff] }
 0x46f   :  { %11814 = vmatprep.subr.bf16.mxu1 %v11813_v57  ;;  %v11821_v50 = vpack.c.bf16 %v834_v32, %v833_v25 }
 0x471   :  { %11233 = vmatmul.mubr.msk.f32.gmra.mrb[10].mxu1 %vm611_vm4, %v14879_v31  ;;  %v835_v31 = vld [vmem:[%s16395_s2 + $0xc0] sm:$0xff] }
 0x472   :  { %11816 = vmatpush3.bf16.msra.mxu1 %v11815_v26  ;;  %v11825_v62 = vpack.c.bf16 %v836_v55, %v835_v31 }
 0x473   :  { %11818 = vmatprep.subr.bf16.mxu1 %v11817_v38 }
 0x476   :  { %11820 = vmatpush3.bf16.msra.mxu1 %v11819_v44 }
 0x477   :  { %11822 = vmatprep.subr.bf16.mxu1 %v11821_v50 }
 0x47a   :  { %11824 = vmatpush3.bf16.msra.mxu1 %v11823_v54 }
 0x47b   :  { %11826 = vmatprep.subr.bf16.mxu1 %v11825_v62 }
 0x47e   :  { %11828 = vmatpush3.bf16.msra.mxu1 %v11827_v3 }
 0x47f   :  { %11830 = vmatprep.subr.bf16.mxu1 %v11829_v7 }
 0x482   :  { %11832 = vmatpush3.bf16.msra.mxu1 %v11831_v13  ;;  %v1381_v13 = vld [vmem:[#allocation23 + $0x8] sm:$0xff] }
 0x483   :  { %11834 = vmatprep.subr.bf16.mxu1 %v11833_v18  ;;  %v11873_v16 = vpack.c.bf16 %v1383_v15, %v1381_v13  ;;  %v1382_v18 = vld [vmem:[#allocation23 + $0x10] sm:$0xff]  ;;  %v1413_v15 = vld [vmem:[#allocation23 + $0x108] sm:$0xff] }
 0x484   :  { %v11875_v8 = vpack.c.bf16 %v1382_v18, %v1380_v17  ;;  %v1675_v17 = vld [vmem:[#allocation26 + $0x28] sm:$0xff] }
 0x486   :  { %11836 = vmatpush3.bf16.msra.mxu1 %v11835_v22  ;;  %v1384_v22 = vld [vmem:[#allocation23 + $0x20] sm:$0xff] }
 0x487   :  { %11838 = vmatprep.subr.bf16.mxu1 %v11837_v14  ;;  %v11879_v23 = vpack.c.bf16 %v1386_v46, %v1384_v22  ;;  %v1389_v14 = vld [vmem:[#allocation23 + $0x48] sm:$0xff]  ;;  %v11907_v22 = vpack.c.bf16 %v1414_v20, %v1412_v19  ;;  %v1674_v46 = vld [vmem:[#allocation26 + $0x20] sm:$0xff]  ;;  %v1692_v19 = vld [vmem:[#allocation26 + $0xb0] sm:$0xff] }
 0x488   :  { %v11881_v24 = vpack.c.bf16 %v1391_v45, %v1389_v14  ;;  %v1417_v45 = vld [vmem:[#allocation23 + $0x128] sm:$0xff] }
 0x48a   :  { %11840 = vmatpush3.bf16.msra.mxu1 %v11839_v56  ;;  %v1388_v56 = vld [vmem:[#allocation23 + $0x40] sm:$0xff] }
 0x48b   :  { %11874 = vmatprep.subr.bf16.mxu1 %v11873_v16  ;;  %v1415_v16 = vld [vmem:[#allocation23 + $0x118] sm:$0xff] }
 0x48c   :  { %v11905_v18 = vpack.c.bf16 %v1415_v16, %v1413_v15  ;;  %v1428_v15 = vld [vmem:[#allocation23 + $0x180] sm:$0xff]  ;;  %v1430_v16 = vld [vmem:[#allocation23 + $0x190] sm:$0xff] }
 0x530   :  { %v999_v28 = vpop.f32.mrb[0].mxu1 }
 0x531   :  { %v1000_v29 = vadd.f32 %v10641_v27, %v999_v28  ;;  %v1001_v30 = vpop.f32.mrb[1].mxu1 }
 0x532   :  { %v1395_v30 = vld [vmem:[#allocation23 + $0x78] sm:$0xff] }
 0x533   :  { %v1117_v33 = vmax.f32 %v1000_v29, 0.0  ;;  %v1393_v29 = vld [vmem:[#allocation23 + $0x68] sm:$0xff] }
 0x534   :  { %v1004_v57 = vpop.f32.mrb[2].mxu1 }
 0x535   :  { %v1005_v34 = vadd.f32 %v10641_v27, %v1004_v57  ;;  %v1006_v35 = vpop.f32.mrb[3].mxu1  ;;  %1215 = vmatprep.mubr.f32.mxu1 %v1117_v33  ;;  %v1121_v37 = vrot.slane %v1117_v33, 7  ;;  %v1133_v38 = vrot.slane %v1117_v33, 1  ;;  %v11885_v33 = vpack.c.bf16 %v1395_v30, %v1393_v29  ;;  %v1392_v57 = vld [vmem:[#allocation23 + $0x60] sm:$0xff]  ;;  %v1418_v30 = vld [vmem:[#allocation23 + $0x130] sm:$0xff] }
 0x536   :  { %v1416_v29 = vld [vmem:[#allocation23 + $0x120] sm:$0xff] }
 0x537   :  { %v1118_v36 = vmax.f32 %v1005_v34, 0.0  ;;  %v1394_v34 = vld [vmem:[#allocation23 + $0x70] sm:$0xff] }
 0x538   :  { %v1009_v26 = vpop.f32.mrb[4].mxu1  ;;  %v11887_v35 = vpack.c.bf16 %v1394_v34, %v1392_v57  ;;  %v11911_v57 = vpack.c.bf16 %v1418_v30, %v1416_v29  ;;  %v1678_v34 = vld [vmem:[#allocation26 + $0x40] sm:$0xff]  ;;  %v1696_v29 = vld [vmem:[#allocation26 + $0xd0] sm:$0xff]  ;;  %v1437_v30 = vld [vmem:[#allocation23 + $0x1c8] sm:$0xff] }
 0x539   :  { %v1122_v39 = vrot.slane %v1118_v36, 7  ;;  %v1134_v42 = vrot.slane %v1118_v36, 1  ;;  %v1010_v44 = vadd.f32 %v10641_v27, %v1009_v26  ;;  %v1011_v25 = vpop.f32.mrb[5].mxu1 }
 0x53a   :  { %v1403_v25 = vld [vmem:[#allocation23 + $0xb8] sm:$0xff] }
 0x53b   :  { %v1119_v32 = vmax.f32 %v1010_v44, 0.0  ;;  %v1139_v49 = vsel %vm496_vm3, %v1133_v38, %v1134_v42  ;;  %v1127_v50 = vsel %vm483_vm0, %v1121_v37, %v1122_v39  ;;  %v1401_v44 = vld [vmem:[#allocation23 + $0xa8] sm:$0xff] }
 0x53c   :  { %v1014_v47 = vpop.f32.mrb[6].mxu1  ;;  %11267 = vmatprep.mubr.f32.mxu0 %v1139_v49  ;;  %v1400_v49 = vld [vmem:[#allocation23 + $0xa0] sm:$0xff] }
 0x53d   :  { %v1123_v51 = vrot.slane %v1119_v32, 7  ;;  %v1135_v52 = vrot.slane %v1119_v32, 1  ;;  %v1015_v53 = vadd.f32 %v10641_v27, %v1014_v47  ;;  %v1016_v54 = vpop.f32.mrb[7].mxu1  ;;  %v1390_v27 = vld [vmem:[#allocation23 + $0x50] sm:$0xff] }
 0x53e   :  { %v11883_v28 = vpack.c.bf16 %v1390_v27, %v1388_v56  ;;  %v1404_v54 = vld [vmem:[#allocation23 + $0xc0] sm:$0xff]  ;;  %v1679_v56 = vld [vmem:[#allocation26 + $0x48] sm:$0xff] }
 0x53f   :  { %v1138_v31 = vsel %vm496_vm3, %v1134_v42, %v1135_v52  ;;  %v1120_v55 = vmax.f32 %v1015_v53, 0.0  ;;  %v1126_v60 = vsel %vm483_vm0, %v1122_v39, %v1123_v51  ;;  %v1398_v39 = vld [vmem:[#allocation23 + $0x90] sm:$0xff] }
 0x540   :  { %v1142_v62 = vmul.f32 %v14769_v59, %v1138_v31  ;;  %v14985_v63 = vpop.f32.mrb[8].mxu1  ;;  %v1131_v12 = vmul.f32 %v14773_v61, %v1126_v60  ;;  %v1406_v31 = vld [vmem:[#allocation23 + $0xd0] sm:$0xff]  ;;  %v1409_v60 = vld [vmem:[#allocation23 + $0xe8] sm:$0xff] }
 0x541   :  { %v1124_v0 = vrot.slane %v1120_v55, 7  ;;  %v1136_v1 = vrot.slane %v1120_v55, 1  ;;  %v14987_v2 = vpop.f32.mrb[9].mxu1 }
 0x542   :  { %11268 = vmatmul.mubr.f32.vlgmr.msra.gmra.mrb[8].mxu0 %v1142_v62  ;;  %v1411_v62 = vld [vmem:[#allocation23 + $0xf8] sm:$0xff] }
 0x543   :  { %v1128_v3 = vsel %vm483_vm0, %v1124_v0, %v1121_v37  ;;  %v1137_v4 = vsel %vm496_vm3, %v1135_v52, %v1136_v1  ;;  %v1140_v5 = vsel %vm496_vm3, %v1136_v1, %v1133_v38  ;;  %v1125_v6 = vsel %vm483_vm0, %v1123_v51, %v1124_v0  ;;  %v1399_v37 = vld [vmem:[#allocation23 + $0x98] sm:$0xff]  ;;  %v1396_v38 = vld [vmem:[#allocation23 + $0x80] sm:$0xff]  ;;  %v1405_v51 = vld [vmem:[#allocation23 + $0xc8] sm:$0xff] }
 0x544   :  { %v1129_v7 = vmul.f32 %v14773_v61, %v1128_v3  ;;  %v14998_v9 = vpop.f32.mrb[10].mxu1  ;;  %11270 = vmatprep.mubr.f32.mxu0 %v1137_v4  ;;  %v1144_v10 = vmul.f32 %v14769_v59, %v1140_v5  ;;  %v11891_v42 = vpack.c.bf16 %v1398_v39, %v1396_v38  ;;  %v1407_v52 = vld [vmem:[#allocation23 + $0xd8] sm:$0xff]  ;;  %v1671_v0 = vld [vmem:[#allocation26 + $0x8] sm:$0xff]  ;;  %v11901_v1 = vpack.c.bf16 %v1411_v62, %v1409_v60  ;;  %v1408_v4 = vld [vmem:[#allocation23 + $0xe0] sm:$0xff] }
 0x545   :  { %v15001_v11 = vpop.f32.mrb[11].mxu1  ;;  %v11897_v53 = vpack.c.bf16 %v1407_v52, %v1405_v51  ;;  %v1673_v3 = vld [vmem:[#allocation26 + $0x18] sm:$0xff]  ;;  %v1410_v5 = vld [vmem:[#allocation23 + $0xf0] sm:$0xff]  ;;  %v1683_v38 = vld [vmem:[#allocation26 + $0x68] sm:$0xff] }
 0x546   :  { %1216 = vmatmul.mubr.f32.vlgmr.msra.gmra.mrb[12].mxu1 %v1129_v7  ;;  %11271 = vmatmul.mubr.f32.gmra.mrb[10].mxu0 %v1144_v10  ;;  %v11903_v7 = vpack.c.bf16 %v1410_v5, %v1408_v4  ;;  %v1670_v10 = vld [vmem:[#allocation26] sm:$0xff]  ;;  %v1425_v52 = vld [vmem:[#allocation23 + $0x168] sm:$0xff]  ;;  %v1426_v62 = vld [vmem:[#allocation23 + $0x170] sm:$0xff] }
 0x547   :  { %1220 = vmatprep.mubr.f32.mxu1 %v1118_v36  ;;  %1993 = vmatprep.mubr.f32.mxu0 %v14392_v58  ;;  %v1397_v36 = vld [vmem:[#allocation23 + $0x88] sm:$0xff]  ;;  %v1424_v60 = vld [vmem:[#allocation23 + $0x160] sm:$0xff]  ;;  %v1688_v4 = vld [vmem:[#allocation26 + $0x90] sm:$0xff] }
 0x548   :  { %11876 = vmatpush1.bf16.msra.mxu1 %v11875_v8  ;;  %v11889_v26 = vpack.c.bf16 %v1399_v37, %v1397_v36  ;;  %v1677_v8 = vld [vmem:[#allocation26 + $0x38] sm:$0xff]  ;;  %v1421_v37 = vld [vmem:[#allocation23 + $0x148] sm:$0xff] }
 0x549   :  { %11878 = vmatprep.subr.bf16.mxu1 %v11877_v21  ;;  %v11973_v21 = vpack.c.bf16 %v1677_v8, %v1675_v17  ;;  %v1690_v8 = vld [vmem:[#allocation26 + $0xa0] sm:$0xff] }
 0x54a   :  { %1221 = vmatmul.mubr.f32.gmra.mrb[14].mxu1 %v1127_v50  ;;  %v1402_v50 = vld [vmem:[#allocation23 + $0xb0] sm:$0xff]  ;;  %v11991_v20 = vpack.c.bf16 %v1692_v19, %v1690_v8 }
 0x54b   :  { %1225 = vmatprep.mubr.f32.mxu1 %v1119_v32  ;;  %v11893_v32 = vpack.c.bf16 %v1403_v25, %v1401_v44  ;;  %v11895_v47 = vpack.c.bf16 %v1402_v50, %v1400_v49  ;;  %v1420_v44 = vld [vmem:[#allocation23 + $0x140] sm:$0xff]  ;;  %v1422_v25 = vld [vmem:[#allocation23 + $0x150] sm:$0xff] }
 0x54c   :  { %11880 = vmatpush1.bf16.msra.mxu1 %v11879_v23  ;;  %v1676_v23 = vld [vmem:[#allocation26 + $0x30] sm:$0xff]  ;;  %v11915_v49 = vpack.c.bf16 %v1422_v25, %v1420_v44  ;;  %v1682_v50 = vld [vmem:[#allocation26 + $0x60] sm:$0xff]  ;;  %v1441_v25 = vld [vmem:[#allocation23 + $0x1e8] sm:$0xff] }
 0x54d   :  { %11882 = vmatprep.subr.bf16.mxu1 %v11881_v24  ;;  %v11975_v14 = vpack.c.bf16 %v1676_v23, %v1674_v46  ;;  %v1419_v24 = vld [vmem:[#allocation23 + $0x138] sm:$0xff]  ;;  %v1695_v46 = vld [vmem:[#allocation26 + $0xc8] sm:$0xff]  ;;  %v1700_v44 = vld [vmem:[#allocation26 + $0xf0] sm:$0xff] }
 0x54e   :  { %1226 = vmatmul.mubr.f32.gmra.mrb[16].mxu1 %v1131_v12  ;;  %v1672_v12 = vld [vmem:[#allocation26 + $0x10] sm:$0xff]  ;;  %v11909_v27 = vpack.c.bf16 %v1419_v24, %v1417_v45  ;;  %v1432_v45 = vld [vmem:[#allocation23 + $0x1a0] sm:$0xff] }
 0x54f   :  { %1230 = vmatprep.mubr.f32.mxu1 %v1120_v55  ;;  %v11899_v55 = vpack.c.bf16 %v1406_v31, %v1404_v54  ;;  %v11971_v13 = vpack.c.bf16 %v1672_v12, %v1670_v10  ;;  %v1687_v54 = vld [vmem:[#allocation26 + $0x88] sm:$0xff]  ;;  %v1434_v24 = vld [vmem:[#allocation23 + $0x1b0] sm:$0xff] }
 0x550   :  { %11884 = vmatpush1.bf16.msra.mxu1 %v11883_v28  ;;  %v1681_v28 = vld [vmem:[#allocation26 + $0x58] sm:$0xff]  ;;  %v1691_v10 = vld [vmem:[#allocation26 + $0xa8] sm:$0xff] }
 0x551   :  { %11886 = vmatprep.subr.bf16.mxu1 %v11885_v33  ;;  %v11977_v33 = vpack.c.bf16 %v1681_v28, %v1679_v56  ;;  %v1694_v28 = vld [vmem:[#allocation26 + $0xc0] sm:$0xff] }
 0x552   :  { %1231 = vmatmul.mubr.f32.gmra.mrb[18].mxu1 %v1125_v6  ;;  %v11969_v6 = vpack.c.bf16 %v1673_v3, %v1671_v0  ;;  %v1686_v3 = vld [vmem:[#allocation26 + $0x80] sm:$0xff] }
 0x553   :  { %v11987_v5 = vpack.c.bf16 %v1688_v4, %v1686_v3 }
 0x554   :  { %11888 = vmatpush1.bf16.msra.mxu1 %v11887_v35  ;;  %11970 = vmatprep.subr.bf16.mxu0 %v11969_v6  ;;  %v1680_v35 = vld [vmem:[#allocation26 + $0x50] sm:$0xff]  ;;  %v1429_v6 = vld [vmem:[#allocation23 + $0x188] sm:$0xff] }
 0x555   :  { %11890 = vmatprep.subr.bf16.mxu1 %v11889_v26  ;;  %11972 = vmatpush1.bf16.msra.mxu0 %v11971_v13  ;;  %v11979_v36 = vpack.c.bf16 %v1680_v35, %v1678_v34  ;;  %v1423_v26 = vld [vmem:[#allocation23 + $0x158] sm:$0xff]  ;;  %v1699_v34 = vld [vmem:[#allocation26 + $0xe8] sm:$0xff] }
 0x556   :  { %11974 = vmatprep.subr.bf16.mxu0 %v11973_v21  ;;  %v11913_v39 = vpack.c.bf16 %v1423_v26, %v1421_v37  ;;  %v1693_v13 = vld [vmem:[#allocation26 + $0xb8] sm:$0xff]  ;;  %v1433_v21 = vld [vmem:[#allocation23 + $0x1a8] sm:$0xff]  ;;  %v1436_v26 = vld [vmem:[#allocation23 + $0x1c0] sm:$0xff] }
 0x557   :  { %v11989_v17 = vpack.c.bf16 %v1693_v13, %v1691_v10  ;;  %v1701_v35 = vld [vmem:[#allocation26 + $0xf8] sm:$0xff] }
 0x558   :  { %11892 = vmatpush1.bf16.msra.mxu1 %v11891_v42  ;;  %v1685_v42 = vld [vmem:[#allocation26 + $0x78] sm:$0xff]  ;;  %v11997_v37 = vpack.c.bf16 %v1701_v35, %v1699_v34 }
 0x559   :  { %11894 = vmatprep.subr.bf16.mxu1 %v11893_v32  ;;  %11976 = vmatpush1.bf16.msra.mxu0 %v11975_v14  ;;  %v11981_v32 = vpack.c.bf16 %v1685_v42, %v1683_v38  ;;  %v1697_v14 = vld [vmem:[#allocation26 + $0xd8] sm:$0xff]  ;;  %v1438_v38 = vld [vmem:[#allocation23 + $0x1d0] sm:$0xff] }
 0x55a   :  { %11978 = vmatprep.subr.bf16.mxu0 %v11977_v33  ;;  %v11993_v56 = vpack.c.bf16 %v1697_v14, %v1695_v46  ;;  %v11995_v33 = vpack.c.bf16 %v1696_v29, %v1694_v28  ;;  %v11931_v42 = vpack.c.bf16 %v1438_v38, %v1436_v26 }
 0x55c   :  { %11896 = vmatpush1.bf16.msra.mxu1 %v11895_v47  ;;  %v1684_v47 = vld [vmem:[#allocation26 + $0x70] sm:$0xff] }
 0x55d   :  { %11898 = vmatprep.subr.bf16.mxu1 %v11897_v53  ;;  %11980 = vmatpush1.bf16.msra.mxu0 %v11979_v36  ;;  %v11983_v51 = vpack.c.bf16 %v1684_v47, %v1682_v50  ;;  %v1427_v53 = vld [vmem:[#allocation23 + $0x178] sm:$0xff]  ;;  %v1440_v47 = vld [vmem:[#allocation23 + $0x1e0] sm:$0xff] }
 0x55e   :  { %11982 = vmatprep.subr.bf16.mxu0 %v11981_v32  ;;  %v11917_v31 = vpack.c.bf16 %v1427_v53, %v1425_v52  ;;  %v1443_v32 = vld [vmem:[#allocation23 + $0x1f8] sm:$0xff]  ;;  %v1445_v52 = vld [vmem:[#allocation23 + $0x208] sm:$0xff] }
 0x55f   :  { %v11933_v50 = vpack.c.bf16 %v1443_v32, %v1441_v25  ;;  %v1447_v53 = vld [vmem:[#allocation23 + $0x218] sm:$0xff] }
 0x560   :  { %11900 = vmatpush1.bf16.msra.mxu1 %v11899_v55  ;;  %v1689_v55 = vld [vmem:[#allocation26 + $0x98] sm:$0xff] }
 0x561   :  { %11902 = vmatprep.subr.bf16.mxu1 %v11901_v1  ;;  %11984 = vmatpush1.bf16.msra.mxu0 %v11983_v51  ;;  %v11985_v0 = vpack.c.bf16 %v1689_v55, %v1687_v54  ;;  %v11919_v1 = vpack.c.bf16 %v1426_v62, %v1424_v60  ;;  %v1442_v51 = vld [vmem:[#allocation23 + $0x1f0] sm:$0xff]  ;;  %v1478_v55 = vld [vmem:[#allocation25 + $0x8] sm:$0xff]  ;;  %v1480_v60 = vld [vmem:[#allocation25 + $0x18] sm:$0xff] }
 0x562   :  { %v11935_v54 = vpack.c.bf16 %v1442_v51, %v1440_v47  ;;  %v12001_v62 = vpack.c.bf16 %v1480_v60, %v1478_v55 }
 0x563   :  { %11986 = vmatprep.subr.bf16.mxu0 %v11985_v0 }
 0x564   :  { %11904 = vmatpush1.bf16.msra.mxu1 %v11903_v7  ;;  %v1431_v7 = vld [vmem:[#allocation23 + $0x198] sm:$0xff] }
 0x565   :  { %11906 = vmatprep.subr.bf16.mxu1 %v11905_v18  ;;  %11988 = vmatpush1.bf16.msra.mxu0 %v11987_v5  ;;  %v11921_v12 = vpack.c.bf16 %v1431_v7, %v1429_v6  ;;  %v11923_v18 = vpack.c.bf16 %v1430_v16, %v1428_v15  ;;  %v10646_v5 = vld [vmem:[#allocation20] ss:$0 sm:$0xff]  ;;  %v10651_v6 = vld [vmem:[#allocation17] ss:$0 sm:$0xff] }
 0x566   :  { %11990 = vmatprep.subr.bf16.mxu0 %v11989_v17  ;;  %v1099_v13 = vadd.f32 %v10646_v5, %v14987_v2  ;;  %v1104_v19 = vadd.f32 %v14985_v63, %v10646_v5  ;;  %v1114_v34 = vadd.f32 %v14998_v9, %v10646_v5 }
 0x568   :  { %11908 = vmatpush1.bf16.msra.mxu1 %v11907_v22  ;;  %v1435_v22 = vld [vmem:[#allocation23 + $0x1b8] sm:$0xff] }
 0x569   :  { %11910 = vmatprep.subr.bf16.mxu1 %v11909_v27  ;;  %v11925_v23 = vpack.c.bf16 %v1435_v22, %v1433_v21  ;;  %11992 = vmatpush1.bf16.msra.mxu0 %v11991_v20  ;;  %v11927_v27 = vpack.c.bf16 %v1434_v24, %v1432_v45  ;;  %v1109_v45 = vadd.f32 %v10646_v5, %v15001_v11 }
 0x56a   :  { %11994 = vmatprep.subr.bf16.mxu0 %v11993_v56 }
 0x56c   :  { %11912 = vmatpush1.bf16.msra.mxu1 %v11911_v57  ;;  %v1439_v57 = vld [vmem:[#allocation23 + $0x1d8] sm:$0xff] }
 0x56d   :  { %11914 = vmatprep.subr.bf16.mxu1 %v11913_v39  ;;  %v11929_v36 = vpack.c.bf16 %v1439_v57, %v1437_v30  ;;  %v1698_v39 = vld [vmem:[#allocation26 + $0xe0] sm:$0xff]  ;;  %11996 = vmatpush1.bf16.msra.mxu0 %v11995_v33 }
 0x56e   :  { %11998 = vmatprep.subr.bf16.mxu0 %v11997_v37 }
 0x570   :  { %11916 = vmatpush1.bf16.msra.mxu1 %v11915_v49  ;;  %v11999_v49 = vpack.c.bf16 %v1700_v44, %v1698_v39 }
 0x571   :  { %11918 = vmatprep.subr.bf16.mxu1 %v11917_v31  ;;  %v11937_v31 = vpack.c.bf16 %v1447_v53, %v1445_v52 }
 0x572   :  { %12000 = vmatpush1.bf16.msra.mxu0 %v11999_v49 }
 0x573   :  { %12002 = vmatprep.subr.bf16.mxu0 %v12001_v62 }
 0x574   :  { %11920 = vmatpush1.bf16.msra.mxu1 %v11919_v1 }
 0x575   :  { %11922 = vmatprep.subr.bf16.mxu1 %v11921_v12 }
 0x578   :  { %11924 = vmatpush1.bf16.msra.mxu1 %v11923_v18 }
 0x579   :  { %11926 = vmatprep.subr.bf16.mxu1 %v11925_v23 }
 0x57c   :  { %11928 = vmatpush1.bf16.msra.mxu1 %v11927_v27 }
 0x57d   :  { %11930 = vmatprep.subr.bf16.mxu1 %v11929_v36 }
 0x580   :  { %11932 = vmatpush1.bf16.msra.mxu1 %v11931_v42 }
 0x581   :  { %11934 = vmatprep.subr.bf16.mxu1 %v11933_v50 }
 0x584   :  { %11936 = vmatpush1.bf16.msra.mxu1 %v11935_v54 }
 0x585   :  { %11938 = vmatprep.subr.bf16.mxu1 %v11937_v31 }
 0x615   :  { %v11269_v0 = vpop.f32.mrb[8].mxu0 }
 0x616   :  { %v1302_v1 = vpop.f32.mrb[9].mxu0 }
 0x619   :  { %v10890_v3 = vpop.f32.mrb[12].mxu1  ;;  %v11272_v4 = vpop.f32.mrb[10].mxu0 }
 0x61a   :  { %v10891_v7 = vpop.f32.mrb[13].mxu1  ;;  %v1312_v10 = vpop.f32.mrb[11].mxu0 }
 0x61b   :  { %v10892_v12 = vadd.f32 %v10891_v7, %v10890_v3 }
 0x61d   :  { %v1218_v15 = vadd.f32 %v10892_v12, %v10651_v6  ;;  %v10893_v16 = vpop.f32.mrb[14].mxu1  ;;  %v869_v12 = vld [vmem:[#allocation22] sm:$0x1] }
 0x61e   :  { %v10894_v17 = vpop.f32.mrb[15].mxu1 }
 0x61f   :  { %v13061_v18 = vadd.f32 %v1218_v15, %v1099_v13  ;;  %v10895_v8 = vadd.f32 %v10894_v17, %v10893_v16  ;;  %v10652_v17 = vld [vmem:[%s16396_s7] ss:$0 sm:$0xff] }
 0x621   :  { %v13062_v20 = vadd.f32 %v13061_v18, %v1302_v1  ;;  %v1223_v21 = vadd.f32 %v10895_v8, %v10651_v6  ;;  %v10896_v22 = vpop.f32.mrb[16].mxu1  ;;  %v1477_v18 = vld [vmem:[#allocation25] sm:$0xff] }
 0x622   :  { %v10897_v46 = vpop.f32.mrb[17].mxu1 }
 0x623   :  { %v13058_v23 = vadd.f32 %v1223_v21, %v1104_v19  ;;  %v10898_v14 = vadd.f32 %v10897_v46, %v10896_v22  ;;  %v1335_v28 = vmul.f32 %v13062_v20, %v13062_v20  ;;  %v1479_v46 = vld [vmem:[#allocation25 + $0x10] sm:$0xff] }
 0x625   :  { %v13059_v24 = vadd.f32 %v13058_v23, %v11269_v0  ;;  %v1228_v56 = vadd.f32 %v10898_v14, %v10651_v6  ;;  %v10899_v27 = vpop.f32.mrb[18].mxu1  ;;  %v1482_v23 = vld [vmem:[#allocation25 + $0x28] sm:$0xff]  ;;  %v1484_v14 = vld [vmem:[#allocation25 + $0x38] sm:$0xff] }
 0x626   :  { %v10900_v2 = vpop.f32.mrb[19].mxu1 }
 0x627   :  { %v1325_v29 = vadd.f32 %v13062_v20, %v13059_v24  ;;  %v1336_v30 = vmul.f32 %v13059_v24, %v13059_v24  ;;  %v13067_v33 = vadd.f32 %v1228_v56, %v1109_v45  ;;  %v10901_v57 = vadd.f32 %v10900_v2, %v10899_v27  ;;  %v1446_v27 = vld [vmem:[#allocation23 + $0x210] sm:$0xff]  ;;  %v1451_v2 = vld [vmem:[#allocation23 + $0x238] sm:$0xff] }
 0x629   :  { %v1339_v63 = vadd.f32 %v1336_v30, %v1335_v28  ;;  %v13068_v35 = vadd.f32 %v13067_v33, %v1312_v10  ;;  %v1233_v36 = vadd.f32 %v10901_v57, %v10651_v6  ;;  %v1449_v28 = vld [vmem:[#allocation23 + $0x228] sm:$0xff]  ;;  %v12003_v30 = vpack.c.bf16 %v1479_v46, %v1477_v18  ;;  %v1452_v18 = vld [vmem:[#allocation23 + $0x240] sm:$0xff] }
 0x62a   :  { %v12005_v33 = vpack.c.bf16 %v1484_v14, %v1482_v23  ;;  %v1489_v23 = vld [vmem:[#allocation25 + $0x60] sm:$0xff]  ;;  %v1491_v14 = vld [vmem:[#allocation25 + $0x70] sm:$0xff] }
 0x62b   :  { %v1326_v37 = vadd.f32 %v13068_v35, %v1325_v29  ;;  %v1337_v26 = vmul.f32 %v13068_v35, %v13068_v35  ;;  %v13064_v38 = vadd.f32 %v1233_v36, %v1114_v34 }
 0x62d   :  { %v1340_v39 = vadd.f32 %v1339_v63, %v1337_v26  ;;  %v13065_v42 = vadd.f32 %v13064_v38, %v11272_v4 }
 0x62f   :  { %v1327_v11 = vadd.f32 %v13065_v42, %v1326_v37  ;;  %v1338_v44 = vmul.f32 %v13065_v42, %v13065_v42  ;;  %v11941_v37 = vpack.c.bf16 %v1451_v2, %v1449_v28  ;;  %v1456_v28 = vld [vmem:[#allocation23 + $0x260] sm:$0xff]  ;;  %v1458_v2 = vld [vmem:[#allocation23 + $0x270] sm:$0xff] }
 0x631   :  { %v1328_v25 = vrot.slane %v1327_v11, 4  ;;  %v1341_v32 = vadd.f32 %v1340_v39, %v1338_v44  ;;  %v1483_v44 = vld [vmem:[#allocation25 + $0x30] sm:$0xff] }
 0x633   :  { %v1329_v49 = vadd.f32 %v1328_v25, %v1327_v11  ;;  %v1342_v50 = vrot.slane %v1341_v32, 4  ;;  %v1481_v11 = vld [vmem:[#allocation25 + $0x20] sm:$0xff] }
 0x635   :  { %v1330_v47 = vrot.slane %v1329_v49, 2  ;;  %v1343_v51 = vadd.f32 %v1342_v50, %v1341_v32 }
 0x637   :  { %v1331_v52 = vadd.f32 %v1330_v47, %v1329_v49  ;;  %v1344_v53 = vrot.slane %v1343_v51, 2  ;;  %v1486_v47 = vld [vmem:[#allocation25 + $0x48] sm:$0xff] }
 0x639   :  { %v1332_v54 = vrot.slane %v1331_v52, 1  ;;  %v1345_v9 = vadd.f32 %v1344_v53, %v1343_v51  ;;  %v1488_v51 = vld [vmem:[#allocation25 + $0x58] sm:$0xff] }
 0x63b   :  { %v1333_v31 = vadd.f32 %v1332_v54, %v1331_v52  ;;  %v1346_v55 = vrot.slane %v1345_v9, 1 }
 0x63d   :  { %v1334_v60 = vmul.f32 0.03125, %v1333_v31  ;;  %v1347_v62 = vadd.f32 %v1346_v55, %v1345_v9  ;;  %v1448_v55 = vld [vmem:[#allocation23 + $0x220] sm:$0xff] }
 0x63f   :  { %v1348_v0 = vmul.f32 0.03125, %v1347_v62  ;;  %v1349_v1 = vmul.f32 %v1334_v60, %v1334_v60  ;;  %v1354_v3 = vsub.f32 %v13065_v42, %v1334_v60  ;;  %v1351_v4 = vsub.f32 %v13062_v20, %v1334_v60  ;;  %v1444_v20 = vld [vmem:[#allocation23 + $0x200] sm:$0xff]  ;;  %v1453_v62 = vld [vmem:[#allocation23 + $0x248] sm:$0xff] }
 0x640   :  { %v1352_v5 = vsub.f32 %v13059_v24, %v1334_v60  ;;  %v1353_v6 = vsub.f32 %v13068_v35, %v1334_v60  ;;  %v11939_v36 = vpack.c.bf16 %v1446_v27, %v1444_v20  ;;  %v1450_v60 = vld [vmem:[#allocation23 + $0x230] sm:$0xff]  ;;  %v1494_v20 = vld [vmem:[#allocation25 + $0x88] sm:$0xff] }
 0x641   :  { %v1350_v7 = vsub.f32 %v1348_v0, %v1349_v1 }
 0x643   :  { %v1355_v10 = vadd.f32 1e-05, %v1350_v7  ;;  %v12009_v7 = vpack.c.bf16 %v1488_v51, %v1486_v47  ;;  %v1502_v47 = vld [vmem:[#allocation25 + $0xc8] sm:$0xff]  ;;  %v1504_v51 = vld [vmem:[#allocation25 + $0xd8] sm:$0xff] }
 0x645   :  { %13558 = vrsqrt.f32 %v1355_v10  ;;  %v1485_v10 = vld [vmem:[#allocation25 + $0x40] sm:$0xff] }
 0x64f   :  { %v13559_v13 = vpop.eup %13558 }
 0x650   :  { %v1357_v15 = vmul.f32 %v13559_v13, %v869_v12  ;;  %v1487_v12 = vld [vmem:[#allocation25 + $0x50] sm:$0xff]  ;;  %v1490_v13 = vld [vmem:[#allocation25 + $0x68] sm:$0xff] }
 0x652   :  { %v1361_v16 = vrot.slane %v1357_v15, %v14739_v41  ;;  %v1492_v15 = vld [vmem:[#allocation25 + $0x78] sm:$0xff] }
 0x653   :  { %v12013_v46 = vpack.c.bf16 %v1492_v15, %v1490_v13  ;;  %v1468_v13 = vld [vmem:[#allocation23 + $0x2c0] sm:$0xff]  ;;  %v1470_v15 = vld [vmem:[#allocation23 + $0x2d0] sm:$0xff] }
 0x654   :  { %v1365_v8 = vmul.f32 %v1361_v16, %v1354_v3  ;;  %v1362_v19 = vmul.f32 %v1361_v16, %v1351_v4  ;;  %v1363_v21 = vmul.f32 %v1361_v16, %v1352_v5  ;;  %v1364_v22 = vmul.f32 %v1361_v16, %v1353_v6  ;;  %v1455_v4 = vld [vmem:[#allocation23 + $0x258] sm:$0xff] }
 0x655   :  { %v12007_v3 = vpack.c.bf16 %v1483_v44, %v1481_v11  ;;  %v11943_v16 = vpack.c.bf16 %v1450_v60, %v1448_v55  ;;  %v1465_v11 = vld [vmem:[#allocation23 + $0x2a8] sm:$0xff]  ;;  %v1471_v60 = vld [vmem:[#allocation23 + $0x2d8] sm:$0xff] }
 0x656   :  { %v1372_v45 = vadd.f32 %v10652_v17, %v1362_v19  ;;  %v1375_v24 = vadd.f32 %v10652_v17, %v1365_v8  ;;  %v1373_v56 = vadd.f32 %v10652_v17, %v1363_v21  ;;  %v1374_v29 = vadd.f32 %v10652_v17, %v1364_v22  ;;  %v1454_v8 = vld [vmem:[#allocation23 + $0x250] sm:$0xff]  ;;  %v1457_v19 = vld [vmem:[#allocation23 + $0x268] sm:$0xff]  ;;  %v1459_v22 = vld [vmem:[#allocation23 + $0x278] sm:$0xff] }
 0x657   :  { %v11945_v17 = vpack.c.bf16 %v1455_v4, %v1453_v62  ;;  %v12011_v21 = vpack.c.bf16 %v1487_v12, %v1485_v10  ;;  %v11949_v27 = vpack.c.bf16 %v1459_v22, %v1457_v19  ;;  %v12025_v62 = vpack.c.bf16 %v1504_v51, %v1502_v47  ;;  %v1503_v4 = vld [vmem:[#allocation25 + $0xd0] sm:$0xff]  ;;  %v1505_v19 = vld [vmem:[#allocation25 + $0xe0] sm:$0xff]  ;;  %v1510_v22 = vld [vmem:[#allocation25 + $0x108] sm:$0xff] }
 0x658   :  { %v1376_v57 = vmax.f32 %v1372_v45, 0.0  ;;  %v15011_v34 = vmax.f32 %v1375_v24, 0.0  ;;  %v1377_v63 = vmax.f32 %v1373_v56, 0.0  ;;  %v1378_v35 = vmax.f32 %v1374_v29, 0.0  ;;  %v1496_v45 = vld [vmem:[#allocation25 + $0x98] sm:$0xff]  ;;  %v1461_v29 = vld [vmem:[#allocation23 + $0x288] sm:$0xff] }
 0x659   :  { %v11947_v24 = vpack.c.bf16 %v1454_v8, %v1452_v18  ;;  %v1475_v18 = vld [vmem:[#allocation23 + $0x2f8] sm:$0xff]  ;;  %v1526_v51 = vld [vmem:[#allocation25 + $0x188] sm:$0xff] }
 0x65a   :  { %v1705_v26 = vrot.slane %v1376_v57, 7  ;;  %1804 = vmatprep.mubr.f32.mxu1 %v1376_v57  ;;  %1994 = vmatmul.mubr.f32.vlgmr.msra.gmra.mrb[12].mxu0 %v1376_v57  ;;  %v1708_v38 = vrot.slane %v15011_v34, 7  ;;  %v1706_v39 = vrot.slane %v1377_v63, 7  ;;  %v1707_v42 = vrot.slane %v1378_v35, 7 }
 0x65b   :  { %1999 = vmatprep.mubr.f32.mxu0 %v14392_v58  ;;  %v1717_v25 = vrot.slane %v1376_v57, 1  ;;  %v1718_v32 = vrot.slane %v1377_v63, 1  ;;  %v1719_v49 = vrot.slane %v1378_v35, 1  ;;  %v1720_v50 = vrot.slane %v15011_v34, 1  ;;  %12004 = vmatpush1.bf16.msra.mxu0 %v12003_v30 }
 0x65c   :  { %v1712_v52 = vsel %vm483_vm0, %v1708_v38, %v1705_v26  ;;  %v1711_v53 = vsel %vm483_vm0, %v1705_v26, %v1706_v39  ;;  %v1710_v54 = vsel %vm483_vm0, %v1706_v39, %v1707_v42  ;;  %v15024_v9 = vsel %vm483_vm0, %v1707_v42, %v1708_v38  ;;  %12006 = vmatprep.subr.bf16.mxu0 %v12005_v33  ;;  %v1463_v33 = vld [vmem:[#allocation23 + $0x298] sm:$0xff]  ;;  %v1460_v39 = vld [vmem:[#allocation23 + $0x280] sm:$0xff]  ;;  %v1462_v42 = vld [vmem:[#allocation23 + $0x290] sm:$0xff] }
 0x65d   :  { %v1713_v31 = vmul.f32 %v14773_v61, %v1712_v52  ;;  %v15029_v0 = vsel %vm496_vm3, %v1717_v25, %v1718_v32  ;;  %v15033_v1 = vsel %vm496_vm3, %v1718_v32, %v1719_v49  ;;  %v15037_v5 = vsel %vm496_vm3, %v1719_v49, %v1720_v50  ;;  %v1497_v49 = vld [vmem:[#allocation25 + $0xa0] sm:$0xff] }
 0x65e   :  { %2000 = vmatmul.mubr.f32.gmra.mrb[14].mxu0 %v1377_v63  ;;  %v15041_v6 = vsel %vm496_vm3, %v1720_v50, %v1717_v25  ;;  %v1715_v56 = vmul.f32 %v14773_v61, %v1710_v54  ;;  %v12015_v30 = vpack.c.bf16 %v1491_v14, %v1489_v23  ;;  %v12017_v57 = vpack.c.bf16 %v1496_v45, %v1494_v20  ;;  %v1467_v25 = vld [vmem:[#allocation23 + $0x2b8] sm:$0xff]  ;;  %v1499_v50 = vld [vmem:[#allocation25 + $0xb0] sm:$0xff]  ;;  %v1472_v20 = vld [vmem:[#allocation23 + $0x2e0] sm:$0xff] }
 0x65f   :  { %1805 = vmatmul.mubr.f32.vlgmr.msra.gmra.mrb[20].mxu1 %v1713_v31  ;;  %2005 = vmatprep.mubr.f32.mxu0 %v14392_v58  ;;  %v11951_v26 = vpack.c.bf16 %v1458_v2, %v1456_v28  ;;  %v11953_v38 = vpack.c.bf16 %v1463_v33, %v1461_v29  ;;  %v11955_v52 = vpack.c.bf16 %v1462_v42, %v1460_v39  ;;  %v1466_v54 = vld [vmem:[#allocation23 + $0x2b0] sm:$0xff]  ;;  %v1469_v31 = vld [vmem:[#allocation23 + $0x2c8] sm:$0xff]  ;;  %v1516_v29 = vld [vmem:[#allocation25 + $0x138] sm:$0xff] }
 0x660   :  { %11940 = vmatpush1.bf16.msra.mxu1 %v11939_v36  ;;  %1810 = vmatprep.mubr.f32.mxu1 %v1377_v63  ;;  %v1493_v63 = vld [vmem:[#allocation25 + $0x80] sm:$0xff]  ;;  %v1495_v36 = vld [vmem:[#allocation25 + $0x90] sm:$0xff]  ;;  %v12023_v55 = vpack.c.bf16 %v1499_v50, %v1497_v49  ;;  %v11961_v12 = vpack.c.bf16 %v1471_v60, %v1469_v31  ;;  %v11963_v23 = vpack.c.bf16 %v1470_v15, %v1468_v13  ;;  %v1514_v2 = vld [vmem:[#allocation25 + $0x128] sm:$0xff] }
 0x661   :  { %11942 = vmatprep.subr.bf16.mxu1 %v11941_v37  ;;  %12008 = vmatpush1.bf16.msra.mxu0 %v12007_v3  ;;  %v1498_v37 = vld [vmem:[#allocation25 + $0xa8] sm:$0xff]  ;;  %v12019_v44 = vpack.c.bf16 %v1495_v36, %v1493_v63  ;;  %v1501_v3 = vld [vmem:[#allocation25 + $0xc0] sm:$0xff]  ;;  %v1474_v45 = vld [vmem:[#allocation23 + $0x2f0] sm:$0xff]  ;;  %v1726_v39 = vmul.f32 %v14769_v59, %v15033_v1  ;;  %v1728_v42 = vmul.f32 %v14769_v59, %v15041_v6 }
 0x662   :  { %2006 = vmatmul.mubr.f32.gmra.mrb[16].mxu0 %v1378_v35  ;;  %12010 = vmatprep.subr.bf16.mxu0 %v12009_v7  ;;  %v1506_v7 = vld [vmem:[#allocation25 + $0xe8] sm:$0xff]  ;;  %v1511_v28 = vld [vmem:[#allocation25 + $0x110] sm:$0xff]  ;;  %v1513_v63 = vld [vmem:[#allocation25 + $0x120] sm:$0xff] }
 0x663   :  { %1811 = vmatmul.mubr.f32.gmra.mrb[22].mxu1 %v1711_v53  ;;  %2011 = vmatprep.mubr.f32.mxu0 %v14392_v58  ;;  %v1464_v53 = vld [vmem:[#allocation23 + $0x2a0] sm:$0xff]  ;;  %v1515_v36 = vld [vmem:[#allocation25 + $0x130] sm:$0xff]  ;;  %v1530_v6 = vld [vmem:[#allocation25 + $0x1a8] sm:$0xff] }
 0x664   :  { %11944 = vmatpush1.bf16.msra.mxu1 %v11943_v16  ;;  %1816 = vmatprep.mubr.f32.mxu1 %v1378_v35  ;;  %v1500_v35 = vld [vmem:[#allocation25 + $0xb8] sm:$0xff]  ;;  %v11959_v10 = vpack.c.bf16 %v1466_v54, %v1464_v53  ;;  %v1473_v16 = vld [vmem:[#allocation23 + $0x2e8] sm:$0xff]  ;;  %v1521_v49 = vld [vmem:[#allocation25 + $0x160] sm:$0xff] }
 0x665   :  { %11946 = vmatprep.subr.bf16.mxu1 %v11945_v17  ;;  %12012 = vmatpush1.bf16.msra.mxu0 %v12011_v21  ;;  %v12021_v32 = vpack.c.bf16 %v1500_v35, %v1498_v37  ;;  %v12027_v17 = vpack.c.bf16 %v1503_v4, %v1501_v3  ;;  %v1507_v21 = vld [vmem:[#allocation25 + $0xf0] sm:$0xff]  ;;  %v11965_v14 = vpack.c.bf16 %v1475_v18, %v1473_v16  ;;  %v1518_v37 = vld [vmem:[#allocation25 + $0x148] sm:$0xff]  ;;  %v1520_v35 = vld [vmem:[#allocation25 + $0x158] sm:$0xff] }
 0x666   :  { %2012 = vmatmul.mubr.f32.gmra.mrb[18].mxu0 %v15011_v34  ;;  %12014 = vmatprep.subr.bf16.mxu0 %v12013_v46  ;;  %v1512_v46 = vld [vmem:[#allocation25 + $0x118] sm:$0xff]  ;;  %v1523_v50 = vld [vmem:[#allocation25 + $0x170] sm:$0xff]  ;;  %v1534_v3 = vld [vmem:[#allocation25 + $0x1c8] sm:$0xff] }
 0x667   :  { %1817 = vmatmul.mubr.f32.gmra.mrb[24].mxu1 %v1715_v56  ;;  %v12033_v56 = vpack.c.bf16 %v1512_v46, %v1510_v22  ;;  %v12047_v47 = vpack.c.bf16 %v1523_v50, %v1521_v49  ;;  %v1532_v54 = vld [vmem:[#allocation25 + $0x1b8] sm:$0xff]  ;;  %v1531_v60 = vld [vmem:[#allocation25 + $0x1b0] sm:$0xff]  ;;  %v1538_v13 = vld [vmem:[#allocation25 + $0x1e8] sm:$0xff] }
 0x668   :  { %11948 = vmatpush1.bf16.msra.mxu1 %v11947_v24  ;;  %1822 = vmatprep.mubr.f32.mxu1 %v15011_v34  ;;  %v11957_v34 = vpack.c.bf16 %v1467_v25, %v1465_v11  ;;  %v12031_v24 = vpack.c.bf16 %v1507_v21, %v1505_v19  ;;  %v1517_v11 = vld [vmem:[#allocation25 + $0x140] sm:$0xff]  ;;  %v1522_v25 = vld [vmem:[#allocation25 + $0x168] sm:$0xff]  ;;  %v12053_v31 = vpack.c.bf16 %v1532_v54, %v1530_v6  ;;  %v1536_v4 = vld [vmem:[#allocation25 + $0x1d8] sm:$0xff] }
 0x669   :  { %11950 = vmatprep.subr.bf16.mxu1 %v11949_v27  ;;  %12016 = vmatpush1.bf16.msra.mxu0 %v12015_v30  ;;  %v1509_v27 = vld [vmem:[#allocation25 + $0x100] sm:$0xff]  ;;  %v11967_v30 = vpack.c.bf16 %v1474_v45, %v1472_v20  ;;  %v1540_v15 = vld [vmem:[#allocation25 + $0x1f8] sm:$0xff]  ;;  %v1539_v18 = vld [vmem:[#allocation25 + $0x1f0] sm:$0xff] }
 0x66a   :  { %12018 = vmatprep.subr.bf16.mxu0 %v12017_v57  ;;  %v12035_v33 = vpack.c.bf16 %v1511_v28, %v1509_v27  ;;  %v12037_v57 = vpack.c.bf16 %v1516_v29, %v1514_v2  ;;  %v1537_v16 = vld [vmem:[#allocation25 + $0x1e0] sm:$0xff]  ;;  %v1542_v19 = vld [vmem:[#allocation25 + $0x208] sm:$0xff]  ;;  %v1544_v21 = vld [vmem:[#allocation25 + $0x218] sm:$0xff] }
 0x66b   :  { %1823 = vmatmul.mubr.f32.gmra.mrb[26].mxu1 %v15024_v9  ;;  %v1508_v9 = vld [vmem:[#allocation25 + $0xf8] sm:$0xff]  ;;  %v12065_v22 = vpack.c.bf16 %v1544_v21, %v1542_v19  ;;  %v1541_v50 = vld [vmem:[#allocation25 + $0x200] sm:$0xff] }
 0x66c   :  { %11952 = vmatpush1.bf16.msra.mxu1 %v11951_v26  ;;  %1893 = vmatprep.mubr.f32.mxu1 %v14392_v58  ;;  %v12029_v8 = vpack.c.bf16 %v1508_v9, %v1506_v7  ;;  %v12039_v26 = vpack.c.bf16 %v1515_v36, %v1513_v63  ;;  %v12057_v7 = vpack.c.bf16 %v1536_v4, %v1534_v3  ;;  %v1533_v9 = vld [vmem:[#allocation25 + $0x1c0] sm:$0xff]  ;;  %v1547_v4 = vld [vmem:[#allocation25 + $0x230] sm:$0xff] }
 0x66d   :  { %11954 = vmatprep.subr.bf16.mxu1 %v11953_v38  ;;  %12020 = vmatpush1.bf16.msra.mxu0 %v12019_v44  ;;  %v12041_v38 = vpack.c.bf16 %v1520_v35, %v1518_v37  ;;  %v1545_v3 = vld [vmem:[#allocation25 + $0x220] sm:$0xff] }
 0x66e   :  { %12022 = vmatprep.subr.bf16.mxu0 %v12021_v32  ;;  %v1524_v32 = vld [vmem:[#allocation25 + $0x178] sm:$0xff] }
 0x66f   :  { %v12045_v1 = vpack.c.bf16 %v1524_v32, %v1522_v25 }
 0x670   :  { %11956 = vmatpush1.bf16.msra.mxu1 %v11955_v52 }
 0x671   :  { %11958 = vmatprep.subr.bf16.mxu1 %v11957_v34  ;;  %12024 = vmatpush1.bf16.msra.mxu0 %v12023_v55  ;;  %v1527_v34 = vld [vmem:[#allocation25 + $0x190] sm:$0xff]  ;;  %v1529_v55 = vld [vmem:[#allocation25 + $0x1a0] sm:$0xff] }
 0x672   :  { %12026 = vmatprep.subr.bf16.mxu0 %v12025_v62  ;;  %v12055_v62 = vpack.c.bf16 %v1531_v60, %v1529_v55 }
 0x674   :  { %11960 = vmatpush1.bf16.msra.mxu1 %v11959_v10  ;;  %v1535_v10 = vld [vmem:[#allocation25 + $0x1d0] sm:$0xff] }
 0x675   :  { %11962 = vmatprep.subr.bf16.mxu1 %v11961_v12  ;;  %12028 = vmatpush1.bf16.msra.mxu0 %v12027_v17  ;;  %v12059_v12 = vpack.c.bf16 %v1535_v10, %v1533_v9  ;;  %v12061_v17 = vpack.c.bf16 %v1540_v15, %v1538_v13  ;;  %v1550_v10 = vld [vmem:[#allocation25 + $0x248] sm:$0xff] }
 0x676   :  { %12030 = vmatprep.subr.bf16.mxu0 %v12029_v8  ;;  %v12063_v8 = vpack.c.bf16 %v1539_v18, %v1537_v16  ;;  %v12071_v16 = vpack.c.bf16 %v1547_v4, %v1545_v3  ;;  %v1549_v18 = vld [vmem:[#allocation25 + $0x240] sm:$0xff]  ;;  %v1570_v3 = vld [vmem:[#allocation25 + $0x2e8] sm:$0xff]  ;;  %v1572_v4 = vld [vmem:[#allocation25 + $0x2f8] sm:$0xff] }
 0x678   :  { %11964 = vmatpush1.bf16.msra.mxu1 %v11963_v23 }
 0x679   :  { %11966 = vmatprep.subr.bf16.mxu1 %v11965_v14  ;;  %12032 = vmatpush1.bf16.msra.mxu0 %v12031_v24  ;;  %v1476_v14 = vld [vmem:[%s16397_s9] sm:$0x3] }
 0x67a   :  { %12034 = vmatprep.subr.bf16.mxu0 %v12033_v56  ;;  %v1733_v45 = vrot.slane %v1476_v14, %v14739_v41  ;;  %v1737_v56 = vrot.slane %v1476_v14, %v14743_v43 }
 0x67c   :  { %11968 = vmatpush1.bf16.msra.mxu1 %v11967_v30 }
 0x67d   :  { %12036 = vmatpush1.bf16.msra.mxu0 %v12035_v33 }
 0x67e   :  { %12038 = vmatprep.subr.bf16.mxu0 %v12037_v57 }
 0x67f   :  { %1894 = vmatmul.mubr.f32.vlgmr.msra.gmra.mrb[20].mxu1 %v15029_v0  ;;  %v1519_v0 = vld [vmem:[#allocation25 + $0x150] sm:$0xff] }
 0x680   :  { %1899 = vmatprep.mubr.f32.mxu1 %v14392_v58  ;;  %v12043_v44 = vpack.c.bf16 %v1519_v0, %v1517_v11 }
 0x681   :  { %12040 = vmatpush1.bf16.msra.mxu0 %v12039_v26 }
 0x682   :  { %12042 = vmatprep.subr.bf16.mxu0 %v12041_v38 }
 0x683   :  { %1900 = vmatmul.mubr.f32.gmra.mrb[22].mxu1 %v1726_v39 }
 0x684   :  { %1905 = vmatprep.mubr.f32.mxu1 %v14392_v58 }
 0x685   :  { %12044 = vmatpush1.bf16.msra.mxu0 %v12043_v44 }
 0x686   :  { %12046 = vmatprep.subr.bf16.mxu0 %v12045_v1 }
 0x687   :  { %1906 = vmatmul.mubr.f32.gmra.mrb[24].mxu1 %v15037_v5  ;;  %v1528_v5 = vld [vmem:[#allocation25 + $0x198] sm:$0xff] }
 0x688   :  { %1911 = vmatprep.mubr.f32.mxu1 %v14392_v58  ;;  %v12049_v52 = vpack.c.bf16 %v1528_v5, %v1526_v51  ;;  %v1525_v58 = vld [vmem:[#allocation25 + $0x180] sm:$0xff] }
 0x689   :  { %12048 = vmatpush1.bf16.msra.mxu0 %v12047_v47  ;;  %v12051_v53 = vpack.c.bf16 %v1527_v34, %v1525_v58  ;;  %v1543_v47 = vld [vmem:[#allocation25 + $0x210] sm:$0xff]  ;;  %v1546_v58 = vld [vmem:[#allocation25 + $0x228] sm:$0xff]  ;;  %v1548_v34 = vld [vmem:[#allocation25 + $0x238] sm:$0xff] }
 0x68a   :  { %12050 = vmatprep.subr.bf16.mxu0 %v12049_v52  ;;  %v12067_v55 = vpack.c.bf16 %v1543_v47, %v1541_v50  ;;  %v2493_v50 = vld [vmem:[#allocation28 + $0x68] sm:$0xff]  ;;  %v2499_v47 = vld [vmem:[#allocation28 + $0x98] sm:$0xff] }
 0x68b   :  { %1912 = vmatmul.mubr.f32.gmra.mrb[26].mxu1 %v1728_v42 }
 0x68d   :  { %12052 = vmatpush1.bf16.msra.mxu0 %v12051_v53 }
 0x68e   :  { %12054 = vmatprep.subr.bf16.mxu0 %v12053_v31 }
 0x691   :  { %12056 = vmatpush1.bf16.msra.mxu0 %v12055_v62  ;;  %v12069_v62 = vpack.c.bf16 %v1548_v34, %v1546_v58  ;;  %v1561_v58 = vld [vmem:[#allocation25 + $0x2a0] sm:$0xff]  ;;  %v1563_v34 = vld [vmem:[#allocation25 + $0x2b0] sm:$0xff] }
 0x692   :  { %12058 = vmatprep.subr.bf16.mxu0 %v12057_v7 }
 0x695   :  { %12060 = vmatpush1.bf16.msra.mxu0 %v12059_v12  ;;  %v1552_v12 = vld [vmem:[#allocation25 + $0x258] sm:$0xff] }
 0x696   :  { %12062 = vmatprep.subr.bf16.mxu0 %v12061_v17  ;;  %v12073_v17 = vpack.c.bf16 %v1552_v12, %v1550_v10  ;;  %v1569_v10 = vld [vmem:[#allocation25 + $0x2e0] sm:$0xff]  ;;  %v1571_v12 = vld [vmem:[#allocation25 + $0x2f0] sm:$0xff] }
 0x699   :  { %12064 = vmatpush1.bf16.msra.mxu0 %v12063_v8  ;;  %v1551_v8 = vld [vmem:[#allocation25 + $0x250] sm:$0xff] }
 0x69a   :  { %12066 = vmatprep.subr.bf16.mxu0 %v12065_v22  ;;  %v12075_v14 = vpack.c.bf16 %v1551_v8, %v1549_v18  ;;  %v1573_v18 = vld [vmem:[#allocation25 + $0x300] sm:$0xff]  ;;  %v1575_v8 = vld [vmem:[#allocation25 + $0x310] sm:$0xff] }
 0x752   :  { %v1895_v46 = vpop.f32.mrb[20].mxu1 }
 0x753   :  { %v1897_v23 = vpop.f32.mrb[21].mxu1  ;;  %v13069_v28 = vadd.f32 %v1895_v46, %v1733_v45  ;;  %v1554_v46 = vld [vmem:[#allocation25 + $0x268] sm:$0xff] }
 0x754   :  { %v13070_v29 = vadd.f32 %v1897_v23, %v1737_v56  ;;  %v1556_v23 = vld [vmem:[#allocation25 + $0x278] sm:$0xff] }
 0x755   :  { %v15062_v63 = vmax.f32 %v13069_v28, 0.0  ;;  %v1560_v28 = vld [vmem:[#allocation25 + $0x298] sm:$0xff] }
 0x756   :  { %v1901_v20 = vpop.f32.mrb[22].mxu1  ;;  %v15064_v35 = vmax.f32 %v13070_v29, 0.0 }
 0x757   :  { %v1903_v24 = vpop.f32.mrb[23].mxu1  ;;  %v13071_v38 = vadd.f32 %v1901_v20, %v1733_v45  ;;  %v2026_v25 = vrot.slane %v15062_v63, 7 }
 0x758   :  { %v13072_v30 = vadd.f32 %v1903_v24, %v1737_v56  ;;  %v2027_v1 = vrot.slane %v15064_v35, 7  ;;  %v1553_v24 = vld [vmem:[#allocation25 + $0x260] sm:$0xff] }
 0x759   :  { %v15078_v51 = vmax.f32 %v13071_v38, 0.0  ;;  %v2487_v38 = vld [vmem:[#allocation28 + $0x38] sm:$0xff] }
 0x75a   :  { %v1907_v27 = vpop.f32.mrb[24].mxu1  ;;  %v15068_v11 = vmax.f32 %v13072_v30, 0.0 }
 0x75b   :  { %v1909_v2 = vpop.f32.mrb[25].mxu1  ;;  %v13073_v39 = vadd.f32 %v1907_v27, %v1733_v45  ;;  %v2028_v7 = vrot.slane %v15078_v51, 7  ;;  %v1558_v27 = vld [vmem:[#allocation25 + $0x288] sm:$0xff] }
 0x75c   :  { %v13074_v33 = vadd.f32 %v1909_v2, %v1737_v56  ;;  %v2029_v53 = vrot.slane %v15068_v11, 7  ;;  %v12081_v30 = vpack.c.bf16 %v1560_v28, %v1558_v27  ;;  %v1581_v27 = vld [vmem:[#allocation25 + $0x340] sm:$0xff]  ;;  %v1583_v28 = vld [vmem:[#allocation25 + $0x350] sm:$0xff] }
 0x75d   :  { %v15080_v5 = vmax.f32 %v13073_v39, 0.0  ;;  %v2038_v19 = vsel %vm483_vm0, %v2026_v25, %v2028_v7  ;;  %v2480_v39 = vld [vmem:[#allocation28] sm:$0xff] }
 0x75e   :  { %v1913_v57 = vpop.f32.mrb[26].mxu1  ;;  %v15070_v0 = vmax.f32 %v13074_v33, 0.0  ;;  %v2039_v13 = vsel %vm483_vm0, %v2027_v1, %v2029_v53  ;;  %v1557_v33 = vld [vmem:[#allocation25 + $0x280] sm:$0xff] }
 0x75f   :  { %v13075_v36 = vadd.f32 %v1913_v57, %v1733_v45  ;;  %v1915_v37 = vpop.f32.mrb[27].mxu1  ;;  %v2030_v9 = vrot.slane %v15080_v5, 7  ;;  %v12077_v45 = vpack.c.bf16 %v1556_v23, %v1554_v46  ;;  %v1559_v57 = vld [vmem:[#allocation25 + $0x290] sm:$0xff]  ;;  %v1577_v23 = vld [vmem:[#allocation25 + $0x320] sm:$0xff] }
 0x760   :  { %v13076_v26 = vadd.f32 %v1915_v37, %v1737_v56  ;;  %v2031_v6 = vrot.slane %v15070_v0, 7  ;;  %v1555_v56 = vld [vmem:[#allocation25 + $0x270] sm:$0xff]  ;;  %v1564_v37 = vld [vmem:[#allocation25 + $0x2b8] sm:$0xff] }
 0x761   :  { %v15066_v42 = vmax.f32 %v13075_v36, 0.0  ;;  %v2036_v22 = vsel %vm483_vm0, %v2028_v7, %v2030_v9  ;;  %v12079_v29 = vpack.c.bf16 %v1555_v56, %v1553_v24 }
 0x762   :  { %v15072_v44 = vmax.f32 %v13076_v26, 0.0  ;;  %v2037_v15 = vsel %vm483_vm0, %v2029_v53, %v2031_v6  ;;  %v2046_v20 = vmul.f32 %v14773_v61, %v2036_v22  ;;  %v2481_v26 = vld [vmem:[#allocation28 + $0x8] sm:$0xff]  ;;  %v12099_v22 = vpack.c.bf16 %v1575_v8, %v1573_v18  ;;  %v1612_v18 = vld [vmem:[#allocation25 + $0x438] sm:$0xff] }
 0x763   :  { %v2032_v32 = vrot.slane %v15066_v42, 7  ;;  %v2047_v21 = vmul.f32 %v14773_v61, %v2037_v15  ;;  %v1576_v15 = vld [vmem:[#allocation25 + $0x318] sm:$0xff] }
 0x764   :  { %v2033_v49 = vrot.slane %v15072_v44, 7 }
 0x765   :  { %v2040_v52 = vsel %vm483_vm0, %v2032_v32, %v2026_v25  ;;  %v2034_v36 = vsel %vm483_vm0, %v2030_v9, %v2032_v32  ;;  %v12083_v25 = vpack.c.bf16 %v1559_v57, %v1557_v33  ;;  %v12197_v32 = vpack.c.bf16 %v2499_v47, %v2493_v50  ;;  %v1585_v57 = vld [vmem:[#allocation25 + $0x360] sm:$0xff] }
 0x766   :  { %v2041_v54 = vsel %vm483_vm0, %v2033_v49, %v2027_v1  ;;  %v2042_v60 = vmul.f32 %v14773_v61, %v2040_v52  ;;  %v2035_v2 = vsel %vm483_vm0, %v2031_v6, %v2033_v49  ;;  %v12193_v1 = vpack.c.bf16 %v2487_v38, %v2481_v26  ;;  %v2486_v49 = vld [vmem:[#allocation28 + $0x30] sm:$0xff]  ;;  %v1566_v6 = vld [vmem:[#allocation25 + $0x2c8] sm:$0xff] }
 0x767   :  { %v2043_v31 = vmul.f32 %v14773_v61, %v2041_v54  ;;  %v1562_v61 = vld [vmem:[#allocation25 + $0x2a8] sm:$0xff]  ;;  %v12195_v53 = vpack.c.bf16 %v2486_v49, %v2480_v39  ;;  %v1568_v54 = vld [vmem:[#allocation25 + $0x2d8] sm:$0xff]  ;;  %v12093_v9 = vpack.c.bf16 %v1572_v4, %v1570_v3  ;;  %v1589_v39 = vld [vmem:[#allocation25 + $0x380] sm:$0xff] }
 0x768   :  { %v12085_v52 = vpack.c.bf16 %v1564_v37, %v1562_v61  ;;  %12194 = vmatprep.subr.bf16.mxu1 %v12193_v1  ;;  %v1590_v61 = vld [vmem:[#allocation25 + $0x388] sm:$0xff]  ;;  %v1592_v37 = vld [vmem:[#allocation25 + $0x398] sm:$0xff]  ;;  %v1601_v4 = vld [vmem:[#allocation25 + $0x3e0] sm:$0xff] }
 0x769   :  { %2149 = vmatprep.mubr.f32.mxu0 %v2043_v31  ;;  %12196 = vmatpush1.bf16.msra.mxu1 %v12195_v53  ;;  %v12087_v31 = vpack.c.bf16 %v1563_v34, %v1561_v58  ;;  %v12113_v38 = vpack.c.bf16 %v1592_v37, %v1590_v61  ;;  %v1594_v1 = vld [vmem:[#allocation25 + $0x3a8] sm:$0xff]  ;;  %v1596_v49 = vld [vmem:[#allocation25 + $0x3b8] sm:$0xff]  ;;  %v1595_v58 = vld [vmem:[#allocation25 + $0x3b0] sm:$0xff]  ;;  %v2051_v37 = vrot.slane %v15064_v35, 1 }
 0x76a   :  { %2150 = vmatmul.mubr.f32.vlgmr.msra.gmra.mrb[12].mxu0 %v2042_v60  ;;  %12198 = vmatprep.subr.bf16.mxu1 %v12197_v32  ;;  %v1565_v60 = vld [vmem:[#allocation25 + $0x2c0] sm:$0xff]  ;;  %v12117_v47 = vpack.c.bf16 %v1596_v49, %v1594_v1  ;;  %v1598_v34 = vld [vmem:[#allocation25 + $0x3c8] sm:$0xff]  ;;  %v1600_v53 = vld [vmem:[#allocation25 + $0x3d8] sm:$0xff] }
 0x76b   :  { %12068 = vmatpush1.bf16.msra.mxu0 %v12067_v55  ;;  %2155 = vmatprep.mubr.f32.mxu0 %v2039_v13  ;;  %v12089_v55 = vpack.c.bf16 %v1568_v54, %v1566_v6  ;;  %v1574_v13 = vld [vmem:[#allocation25 + $0x308] sm:$0xff]  ;;  %v12121_v6 = vpack.c.bf16 %v1600_v53, %v1598_v34  ;;  %v1597_v54 = vld [vmem:[#allocation25 + $0x3c0] sm:$0xff]  ;;  %v1628_v1 = vld [vmem:[#allocation25 + $0x4b8] sm:$0xff] }
 0x76c   :  { %12070 = vmatprep.subr.bf16.mxu0 %v12069_v62  ;;  %v1567_v62 = vld [vmem:[#allocation25 + $0x2d0] sm:$0xff]  ;;  %v1630_v34 = vld [vmem:[#allocation25 + $0x4c8] sm:$0xff]  ;;  %v1632_v53 = vld [vmem:[#allocation25 + $0x4d8] sm:$0xff] }
 0x76d   :  { %v12091_v7 = vpack.c.bf16 %v1567_v62, %v1565_v60  ;;  %v1604_v60 = vld [vmem:[#allocation25 + $0x3f8] sm:$0xff] }
 0x76e   :  { %2156 = vmatmul.mubr.f32.gmra.mrb[14].mxu0 %v2038_v19  ;;  %v1578_v19 = vld [vmem:[#allocation25 + $0x328] sm:$0xff] }
 0x76f   :  { %12072 = vmatpush1.bf16.msra.mxu0 %v12071_v16  ;;  %2161 = vmatprep.mubr.f32.mxu0 %v2047_v21  ;;  %v12095_v16 = vpack.c.bf16 %v1571_v12, %v1569_v10  ;;  %v1580_v21 = vld [vmem:[#allocation25 + $0x338] sm:$0xff] }
 0x770   :  { %12074 = vmatprep.subr.bf16.mxu0 %v12073_v17  ;;  %v12097_v17 = vpack.c.bf16 %v1576_v15, %v1574_v13  ;;  %v12101_v46 = vpack.c.bf16 %v1580_v21, %v1578_v19  ;;  %v1608_v10 = vld [vmem:[#allocation25 + $0x418] sm:$0xff]  ;;  %v1605_v15 = vld [vmem:[#allocation25 + $0x400] sm:$0xff] }
 0x771   :  { %v1609_v21 = vld [vmem:[#allocation25 + $0x420] sm:$0xff] }
 0x772   :  { %2162 = vmatmul.mubr.f32.gmra.mrb[16].mxu0 %v2046_v20  ;;  %v1582_v20 = vld [vmem:[#allocation25 + $0x348] sm:$0xff] }
 0x773   :  { %12076 = vmatpush1.bf16.msra.mxu0 %v12075_v14  ;;  %2167 = vmatprep.mubr.f32.mxu0 %v2035_v2  ;;  %v1579_v14 = vld [vmem:[#allocation25 + $0x330] sm:$0xff]  ;;  %v1586_v2 = vld [vmem:[#allocation25 + $0x368] sm:$0xff] }
 0x774   :  { %12078 = vmatprep.subr.bf16.mxu0 %v12077_v45  ;;  %v1584_v45 = vld [vmem:[#allocation25 + $0x358] sm:$0xff]  ;;  %v12103_v24 = vpack.c.bf16 %v1579_v14, %v1577_v23 }
 0x775   :  { %v12105_v56 = vpack.c.bf16 %v1584_v45, %v1582_v20  ;;  %v1616_v23 = vld [vmem:[#allocation25 + $0x458] sm:$0xff]  ;;  %v1613_v45 = vld [vmem:[#allocation25 + $0x440] sm:$0xff] }
 0x776   :  { %2168 = vmatmul.mubr.f32.gmra.mrb[18].mxu0 %v2034_v36  ;;  %v1587_v36 = vld [vmem:[#allocation25 + $0x370] sm:$0xff] }
 0x777   :  { %12080 = vmatpush1.bf16.msra.mxu0 %v12079_v29  ;;  %2238 = vmatprep.mubr.f32.mxu0 %v15064_v35  ;;  %v1588_v29 = vld [vmem:[#allocation25 + $0x378] sm:$0xff]  ;;  %v12111_v26 = vpack.c.bf16 %v1587_v36, %v1585_v57  ;;  %v2053_v36 = vrot.slane %v15068_v11, 1 }
 0x778   :  { %12082 = vmatprep.subr.bf16.mxu0 %v12081_v30  ;;  %v12107_v30 = vpack.c.bf16 %v1583_v28, %v1581_v27  ;;  %v12109_v33 = vpack.c.bf16 %v1588_v29, %v1586_v2  ;;  %v1620_v27 = vld [vmem:[#allocation25 + $0x478] sm:$0xff]  ;;  %v1617_v29 = vld [vmem:[#allocation25 + $0x460] sm:$0xff] }
 0x779   :  { %v1624_v57 = vld [vmem:[#allocation25 + $0x498] sm:$0xff]  ;;  %v2063_v49 = vsel %vm496_vm3, %v2051_v37, %v2053_v36 }
 0x77b   :  { %12084 = vmatpush1.bf16.msra.mxu0 %v12083_v25  ;;  %v1591_v25 = vld [vmem:[#allocation25 + $0x390] sm:$0xff] }
 0x77c   :  { %12086 = vmatprep.subr.bf16.mxu0 %v12085_v52  ;;  %v12115_v50 = vpack.c.bf16 %v1591_v25, %v1589_v39  ;;  %v1593_v52 = vld [vmem:[#allocation25 + $0x3a0] sm:$0xff]  ;;  %v1623_v39 = vld [vmem:[#allocation25 + $0x490] sm:$0xff]  ;;  %v1626_v25 = vld [vmem:[#allocation25 + $0x4a8] sm:$0xff] }
 0x77d   :  { %v12119_v32 = vpack.c.bf16 %v1595_v58, %v1593_v52  ;;  %v1625_v52 = vld [vmem:[#allocation25 + $0x4a0] sm:$0xff]  ;;  %v1627_v58 = vld [vmem:[#allocation25 + $0x4b0] sm:$0xff] }
 0x77f   :  { %12088 = vmatpush1.bf16.msra.mxu0 %v12087_v31  ;;  %v1599_v31 = vld [vmem:[#allocation25 + $0x3d0] sm:$0xff] }
 0x780   :  { %12090 = vmatprep.subr.bf16.mxu0 %v12089_v55  ;;  %v1602_v55 = vld [vmem:[#allocation25 + $0x3e8] sm:$0xff]  ;;  %v12123_v62 = vpack.c.bf16 %v1599_v31, %v1597_v54  ;;  %v1629_v54 = vld [vmem:[#allocation25 + $0x4c0] sm:$0xff]  ;;  %v1631_v31 = vld [vmem:[#allocation25 + $0x4d0] sm:$0xff] }
 0x781   :  { %v12125_v3 = vpack.c.bf16 %v1604_v60, %v1602_v55  ;;  %v1634_v55 = vld [vmem:[#allocation25 + $0x4e8] sm:$0xff]  ;;  %v1636_v60 = vld [vmem:[#allocation25 + $0x4f8] sm:$0xff] }
 0x783   :  { %12092 = vmatpush1.bf16.msra.mxu0 %v12091_v7  ;;  %v1603_v7 = vld [vmem:[#allocation25 + $0x3f0] sm:$0xff] }
 0x784   :  { %12094 = vmatprep.subr.bf16.mxu0 %v12093_v9  ;;  %v1606_v9 = vld [vmem:[#allocation25 + $0x408] sm:$0xff]  ;;  %v12127_v12 = vpack.c.bf16 %v1603_v7, %v1601_v4  ;;  %v1633_v4 = vld [vmem:[#allocation25 + $0x4e0] sm:$0xff]  ;;  %v1635_v7 = vld [vmem:[#allocation25 + $0x4f0] sm:$0xff] }
 0x785   :  { %v12129_v13 = vpack.c.bf16 %v1608_v10, %v1606_v9  ;;  %v1638_v9 = vld [vmem:[#allocation25 + $0x508] sm:$0xff]  ;;  %v1640_v10 = vld [vmem:[#allocation25 + $0x518] sm:$0xff] }
 0x787   :  { %12096 = vmatpush1.bf16.msra.mxu0 %v12095_v16  ;;  %v1607_v16 = vld [vmem:[#allocation25 + $0x410] sm:$0xff] }
 0x788   :  { %12098 = vmatprep.subr.bf16.mxu0 %v12097_v17  ;;  %v1610_v17 = vld [vmem:[#allocation25 + $0x428] sm:$0xff]  ;;  %v12131_v8 = vpack.c.bf16 %v1607_v16, %v1605_v15  ;;  %v1637_v15 = vld [vmem:[#allocation25 + $0x500] sm:$0xff]  ;;  %v1639_v16 = vld [vmem:[#allocation25 + $0x510] sm:$0xff] }
 0x789   :  { %v12133_v19 = vpack.c.bf16 %v1612_v18, %v1610_v17  ;;  %v1642_v17 = vld [vmem:[#allocation25 + $0x528] sm:$0xff]  ;;  %v1644_v18 = vld [vmem:[#allocation25 + $0x538] sm:$0xff] }
 0x78b   :  { %12100 = vmatpush1.bf16.msra.mxu0 %v12099_v22  ;;  %v1611_v22 = vld [vmem:[#allocation25 + $0x430] sm:$0xff] }
 0x78c   :  { %12102 = vmatprep.subr.bf16.mxu0 %v12101_v46  ;;  %v1614_v46 = vld [vmem:[#allocation25 + $0x448] sm:$0xff]  ;;  %v12135_v14 = vpack.c.bf16 %v1611_v22, %v1609_v21  ;;  %v1641_v21 = vld [vmem:[#allocation25 + $0x520] sm:$0xff]  ;;  %v1643_v22 = vld [vmem:[#allocation25 + $0x530] sm:$0xff] }
 0x78d   :  { %v12137_v20 = vpack.c.bf16 %v1616_v23, %v1614_v46  ;;  %v1646_v46 = vld [vmem:[#allocation25 + $0x548] sm:$0xff]  ;;  %v1648_v23 = vld [vmem:[#allocation25 + $0x558] sm:$0xff] }
 0x78f   :  { %12104 = vmatpush1.bf16.msra.mxu0 %v12103_v24  ;;  %v1615_v24 = vld [vmem:[#allocation25 + $0x450] sm:$0xff] }
 0x790   :  { %12106 = vmatprep.subr.bf16.mxu0 %v12105_v56  ;;  %v1618_v56 = vld [vmem:[#allocation25 + $0x468] sm:$0xff]  ;;  %v12139_v28 = vpack.c.bf16 %v1615_v24, %v1613_v45  ;;  %v1645_v45 = vld [vmem:[#allocation25 + $0x540] sm:$0xff]  ;;  %v1647_v24 = vld [vmem:[#allocation25 + $0x550] sm:$0xff] }
 0x791   :  { %v12141_v2 = vpack.c.bf16 %v1620_v27, %v1618_v56  ;;  %v1650_v56 = vld [vmem:[#allocation25 + $0x568] sm:$0xff]  ;;  %v1652_v27 = vld [vmem:[#allocation25 + $0x578] sm:$0xff] }
 0x793   :  { %12108 = vmatpush1.bf16.msra.mxu0 %v12107_v30  ;;  %v1619_v30 = vld [vmem:[#allocation25 + $0x470] sm:$0xff] }
 0x794   :  { %12110 = vmatprep.subr.bf16.mxu0 %v12109_v33  ;;  %v1622_v33 = vld [vmem:[#allocation25 + $0x488] sm:$0xff]  ;;  %v12143_v61 = vpack.c.bf16 %v1619_v30, %v1617_v29  ;;  %v1649_v29 = vld [vmem:[#allocation25 + $0x560] sm:$0xff]  ;;  %v1651_v30 = vld [vmem:[#allocation25 + $0x570] sm:$0xff] }
 0x797   :  { %12112 = vmatpush1.bf16.msra.mxu0 %v12111_v26  ;;  %v12145_v26 = vpack.c.bf16 %v1624_v57, %v1622_v33  ;;  %v1654_v33 = vld [vmem:[#allocation25 + $0x588] sm:$0xff]  ;;  %v1656_v57 = vld [vmem:[#allocation25 + $0x598] sm:$0xff] }
 0x798   :  { %12114 = vmatprep.subr.bf16.mxu0 %v12113_v38  ;;  %v1621_v38 = vld [vmem:[#allocation25 + $0x480] sm:$0xff] }
 0x79b   :  { %12116 = vmatpush1.bf16.msra.mxu0 %v12115_v50  ;;  %v12147_v50 = vpack.c.bf16 %v1623_v39, %v1621_v38  ;;  %v1653_v38 = vld [vmem:[#allocation25 + $0x580] sm:$0xff]  ;;  %v1655_v39 = vld [vmem:[#allocation25 + $0x590] sm:$0xff] }
 0x79c   :  { %12118 = vmatprep.subr.bf16.mxu0 %v12117_v47  ;;  %v12149_v47 = vpack.c.bf16 %v1628_v1, %v1626_v25  ;;  %v1658_v25 = vld [vmem:[#allocation25 + $0x5a8] sm:$0xff]  ;;  %v1660_v1 = vld [vmem:[#allocation25 + $0x5b8] sm:$0xff] }
 0x79f   :  { %12120 = vmatpush1.bf16.msra.mxu0 %v12119_v32  ;;  %v12151_v32 = vpack.c.bf16 %v1627_v58, %v1625_v52  ;;  %v1659_v52 = vld [vmem:[#allocation25 + $0x5b0] sm:$0xff]  ;;  %v1662_v58 = vld [vmem:[#allocation25 + $0x5c8] sm:$0xff] }
 0x7a0   :  { %12122 = vmatprep.subr.bf16.mxu0 %v12121_v6  ;;  %v12153_v6 = vpack.c.bf16 %v1632_v53, %v1630_v34  ;;  %v1664_v34 = vld [vmem:[#allocation25 + $0x5d8] sm:$0xff] }
 0x7a3   :  { %12124 = vmatpush1.bf16.msra.mxu0 %v12123_v62  ;;  %v12155_v62 = vpack.c.bf16 %v1631_v31, %v1629_v54  ;;  %v1663_v54 = vld [vmem:[#allocation25 + $0x5d0] sm:$0xff]  ;;  %v1666_v31 = vld [vmem:[#allocation25 + $0x5e8] sm:$0xff] }
 0x7a4   :  { %12126 = vmatprep.subr.bf16.mxu0 %v12125_v3  ;;  %v12157_v3 = vpack.c.bf16 %v1636_v60, %v1634_v55  ;;  %v1668_v55 = vld [vmem:[#allocation25 + $0x5f8] sm:$0xff] }
 0x7a7   :  { %12128 = vmatpush1.bf16.msra.mxu0 %v12127_v12  ;;  %v12159_v12 = vpack.c.bf16 %v1635_v7, %v1633_v4  ;;  %v1667_v4 = vld [vmem:[#allocation25 + $0x5f0] sm:$0xff]  ;;  %v2055_v7 = vrot.slane %v15070_v0, 1 }
 0x7a8   :  { %12130 = vmatprep.subr.bf16.mxu0 %v12129_v13  ;;  %v12161_v13 = vpack.c.bf16 %v1640_v10, %v1638_v9  ;;  %v2052_v10 = vrot.slane %v15078_v51, 1 }
 0x7aa   :  { %2239 = vmatmul.mubr.f32.vlgmr.msra.gmra.mrb[12].mxu0 %v15062_v63 }
 0x7ab   :  { %2244 = vmatprep.mubr.f32.mxu0 %v15068_v11  ;;  %12132 = vmatpush1.bf16.msra.mxu0 %v12131_v8  ;;  %v12163_v8 = vpack.c.bf16 %v1639_v16, %v1637_v15  ;;  %v2050_v15 = vrot.slane %v15062_v63, 1 }
 0x7ac   :  { %12134 = vmatprep.subr.bf16.mxu0 %v12133_v19  ;;  %v12165_v19 = vpack.c.bf16 %v1644_v18, %v1642_v17 }
 0x7ad   :  { %v2062_v16 = vsel %vm496_vm3, %v2050_v15, %v2052_v10 }
 0x7ae   :  { %2245 = vmatmul.mubr.f32.gmra.mrb[14].mxu0 %v15078_v51  ;;  %v2057_v51 = vrot.slane %v15072_v44, 1 }
 0x7af   :  { %2250 = vmatprep.mubr.f32.mxu0 %v15070_v0  ;;  %12136 = vmatpush1.bf16.msra.mxu0 %v12135_v14  ;;  %v12167_v14 = vpack.c.bf16 %v1643_v22, %v1641_v21  ;;  %v2498_v21 = vld [vmem:[#allocation28 + $0x90] sm:$0xff]  ;;  %v2505_v22 = vld [vmem:[#allocation28 + $0xc8] sm:$0xff] }
 0x7b0   :  { %12138 = vmatprep.subr.bf16.mxu0 %v12137_v20  ;;  %v12169_v20 = vpack.c.bf16 %v1648_v23, %v1646_v46  ;;  %v2059_v63 = vsel %vm496_vm3, %v2055_v7, %v2057_v51  ;;  %v2504_v23 = vld [vmem:[#allocation28 + $0xc0] sm:$0xff] }
 0x7b2   :  { %2251 = vmatmul.mubr.f32.gmra.mrb[16].mxu0 %v15080_v5 }
 0x7b3   :  { %2256 = vmatprep.mubr.f32.mxu0 %v15072_v44  ;;  %12140 = vmatpush1.bf16.msra.mxu0 %v12139_v28  ;;  %v12171_v28 = vpack.c.bf16 %v1647_v24, %v1645_v45  ;;  %v2517_v45 = vld [vmem:[#allocation28 + $0x128] sm:$0xff]  ;;  %v2523_v24 = vld [vmem:[#allocation28 + $0x158] sm:$0xff] }
 0x7b4   :  { %12142 = vmatprep.subr.bf16.mxu0 %v12141_v2  ;;  %v12173_v2 = vpack.c.bf16 %v1652_v27, %v1650_v56  ;;  %v12205_v56 = vpack.c.bf16 %v2523_v24, %v2517_v45  ;;  %v2516_v27 = vld [vmem:[#allocation28 + $0x120] sm:$0xff]  ;;  %v2637_v45 = vld [vmem:[#allocation28 + $0x4e8] sm:$0xff]  ;;  %v2643_v24 = vld [vmem:[#allocation28 + $0x518] sm:$0xff] }
 0x7b6   :  { %2257 = vmatmul.mubr.f32.gmra.mrb[18].mxu0 %v15066_v42 }
 0x7b7   :  { %12144 = vmatpush1.bf16.msra.mxu0 %v12143_v61  ;;  %2327 = vmatprep.mubr.f32.mxu0 %v2063_v49  ;;  %v12175_v61 = vpack.c.bf16 %v1651_v30, %v1649_v29  ;;  %v12179_v49 = vpack.c.bf16 %v1655_v39, %v1653_v38  ;;  %v2535_v29 = vld [vmem:[#allocation28 + $0x1b8] sm:$0xff] }
 0x7b8   :  { %12146 = vmatprep.subr.bf16.mxu0 %v12145_v26  ;;  %v12177_v26 = vpack.c.bf16 %v1656_v57, %v1654_v33  ;;  %v2528_v33 = vld [vmem:[#allocation28 + $0x180] sm:$0xff]  ;;  %v2534_v57 = vld [vmem:[#allocation28 + $0x1b0] sm:$0xff]  ;;  %v2547_v38 = vld [vmem:[#allocation28 + $0x218] sm:$0xff] }
 0x7bb   :  { %12148 = vmatpush1.bf16.msra.mxu0 %v12147_v50  ;;  %v12181_v50 = vpack.c.bf16 %v1660_v1, %v1658_v25  ;;  %v2540_v25 = vld [vmem:[#allocation28 + $0x1e0] sm:$0xff]  ;;  %v2546_v1 = vld [vmem:[#allocation28 + $0x210] sm:$0xff] }
 0x7bc   :  { %12150 = vmatprep.subr.bf16.mxu0 %v12149_v47  ;;  %v1657_v47 = vld [vmem:[#allocation25 + $0x5a0] sm:$0xff] }
 0x7bd   :  { %v12183_v53 = vpack.c.bf16 %v1659_v52, %v1657_v47  ;;  %v2559_v47 = vld [vmem:[#allocation28 + $0x278] sm:$0xff] }
 0x7bf   :  { %12152 = vmatpush1.bf16.msra.mxu0 %v12151_v32  ;;  %v12185_v32 = vpack.c.bf16 %v1664_v34, %v1662_v58  ;;  %v2552_v58 = vld [vmem:[#allocation28 + $0x240] sm:$0xff]  ;;  %v2558_v34 = vld [vmem:[#allocation28 + $0x270] sm:$0xff] }
 0x7c0   :  { %12154 = vmatprep.subr.bf16.mxu0 %v12153_v6  ;;  %v1661_v6 = vld [vmem:[#allocation25 + $0x5c0] sm:$0xff] }
 0x7c1   :  { %v12187_v60 = vpack.c.bf16 %v1663_v54, %v1661_v6  ;;  %v2571_v6 = vld [vmem:[#allocation28 + $0x2d8] sm:$0xff] }
 0x7c3   :  { %12156 = vmatpush1.bf16.msra.mxu0 %v12155_v62  ;;  %v12189_v62 = vpack.c.bf16 %v1668_v55, %v1666_v31  ;;  %v2564_v31 = vld [vmem:[#allocation28 + $0x2a0] sm:$0xff]  ;;  %v2570_v55 = vld [vmem:[#allocation28 + $0x2d0] sm:$0xff] }
 0x7c4   :  { %12158 = vmatprep.subr.bf16.mxu0 %v12157_v3  ;;  %v1665_v3 = vld [vmem:[#allocation25 + $0x5e0] sm:$0xff] }
 0x7c5   :  { %v12191_v9 = vpack.c.bf16 %v1667_v4, %v1665_v3  ;;  %v2583_v3 = vld [vmem:[#allocation28 + $0x338] sm:$0xff] }
 0x7c7   :  { %12160 = vmatpush1.bf16.msra.mxu0 %v12159_v12  ;;  %v2054_v12 = vrot.slane %v15080_v5, 1  ;;  %v2056_v5 = vrot.slane %v15066_v42, 1 }
 0x7c8   :  { %12162 = vmatprep.subr.bf16.mxu0 %v12161_v13  ;;  %v2061_v13 = vsel %vm496_vm3, %v2053_v36, %v2055_v7  ;;  %v2065_v36 = vsel %vm496_vm3, %v2057_v51, %v2051_v37  ;;  %v2511_v37 = vld [vmem:[#allocation28 + $0xf8] sm:$0xff]  ;;  %v2576_v7 = vld [vmem:[#allocation28 + $0x300] sm:$0xff]  ;;  %v2601_v51 = vld [vmem:[#allocation28 + $0x3c8] sm:$0xff] }
 0x7c9   :  { %v2069_v0 = vmul.f32 %v14769_v59, %v2061_v13  ;;  %v2060_v17 = vsel %vm496_vm3, %v2052_v10, %v2054_v12  ;;  %v2058_v18 = vsel %vm496_vm3, %v2054_v12, %v2056_v5  ;;  %v2073_v44 = vmul.f32 %v14769_v59, %v2065_v36  ;;  %v2589_v12 = vld [vmem:[#allocation28 + $0x368] sm:$0xff]  ;;  %v2595_v13 = vld [vmem:[#allocation28 + $0x398] sm:$0xff]  ;;  %v2606_v36 = vld [vmem:[#allocation28 + $0x3f0] sm:$0xff] }
 0x7ca   :  { %v2068_v11 = vmul.f32 %v14769_v59, %v2060_v17  ;;  %v12201_v46 = vpack.c.bf16 %v2511_v37, %v2505_v22  ;;  %v2625_v22 = vld [vmem:[#allocation28 + $0x488] sm:$0xff]  ;;  %v2631_v37 = vld [vmem:[#allocation28 + $0x4b8] sm:$0xff] }
 0x7cb   :  { %12164 = vmatpush1.bf16.msra.mxu0 %v12163_v8  ;;  %v2064_v8 = vsel %vm496_vm3, %v2056_v5, %v2050_v15  ;;  %v12229_v15 = vpack.c.bf16 %v2595_v13, %v2589_v12 }
 0x7cc   :  { %12166 = vmatprep.subr.bf16.mxu0 %v12165_v19  ;;  %v2072_v42 = vmul.f32 %v14769_v59, %v2064_v8  ;;  %v2492_v19 = vld [vmem:[#allocation28 + $0x60] sm:$0xff]  ;;  %v2529_v59 = vld [vmem:[#allocation28 + $0x188] sm:$0xff]  ;;  %v2619_v8 = vld [vmem:[#allocation28 + $0x458] sm:$0xff] }
 0x7cd   :  { %v12199_v35 = vpack.c.bf16 %v2498_v21, %v2492_v19  ;;  %v12209_v30 = vpack.c.bf16 %v2535_v29, %v2529_v59  ;;  %v2612_v19 = vld [vmem:[#allocation28 + $0x420] sm:$0xff]  ;;  %v2618_v21 = vld [vmem:[#allocation28 + $0x450] sm:$0xff]  ;;  %v2649_v59 = vld [vmem:[#allocation28 + $0x548] sm:$0xff] }
 0x7ce   :  { %v2655_v29 = vld [vmem:[#allocation28 + $0x578] sm:$0xff] }
 0x7cf   :  { %12168 = vmatpush1.bf16.msra.mxu0 %v12167_v14  ;;  %12200 = vmatpush1.bf16.msra.mxu1 %v12199_v35  ;;  %v2510_v14 = vld [vmem:[#allocation28 + $0xf0] sm:$0xff]  ;;  %v12239_v35 = vpack.c.bf16 %v2618_v21, %v2612_v19 }
 0x7d0   :  { %12170 = vmatprep.subr.bf16.mxu0 %v12169_v20  ;;  %v12203_v20 = vpack.c.bf16 %v2510_v14, %v2504_v23  ;;  %12202 = vmatprep.subr.bf16.mxu1 %v12201_v46  ;;  %v12241_v46 = vpack.c.bf16 %v2631_v37, %v2625_v22  ;;  %v2624_v23 = vld [vmem:[#allocation28 + $0x480] sm:$0xff]  ;;  %v2630_v14 = vld [vmem:[#allocation28 + $0x4b0] sm:$0xff] }
 0x7d3   :  { %12172 = vmatpush1.bf16.msra.mxu0 %v12171_v28  ;;  %12204 = vmatpush1.bf16.msra.mxu1 %v12203_v20  ;;  %v2522_v28 = vld [vmem:[#allocation28 + $0x150] sm:$0xff]  ;;  %v12243_v20 = vpack.c.bf16 %v2630_v14, %v2624_v23 }
 0x7d4   :  { %12174 = vmatprep.subr.bf16.mxu0 %v12173_v2  ;;  %v12207_v2 = vpack.c.bf16 %v2522_v28, %v2516_v27  ;;  %12206 = vmatprep.subr.bf16.mxu1 %v12205_v56  ;;  %v12245_v56 = vpack.c.bf16 %v2643_v24, %v2637_v45  ;;  %v2636_v27 = vld [vmem:[#allocation28 + $0x4e0] sm:$0xff]  ;;  %v2642_v28 = vld [vmem:[#allocation28 + $0x510] sm:$0xff] }
 0x7d7   :  { %12176 = vmatpush1.bf16.msra.mxu0 %v12175_v61  ;;  %12208 = vmatpush1.bf16.msra.mxu1 %v12207_v2  ;;  %v12211_v61 = vpack.c.bf16 %v2534_v57, %v2528_v33  ;;  %v12247_v2 = vpack.c.bf16 %v2642_v28, %v2636_v27  ;;  %v2648_v33 = vld [vmem:[#allocation28 + $0x540] sm:$0xff]  ;;  %v2654_v57 = vld [vmem:[#allocation28 + $0x570] sm:$0xff] }
 0x7d8   :  { %12178 = vmatprep.subr.bf16.mxu0 %v12177_v26  ;;  %12210 = vmatprep.subr.bf16.mxu1 %v12209_v30  ;;  %v2541_v26 = vld [vmem:[#allocation28 + $0x1e8] sm:$0xff]  ;;  %v12249_v30 = vpack.c.bf16 %v2655_v29, %v2649_v59 }
 0x7d9   :  { %v12213_v39 = vpack.c.bf16 %v2547_v38, %v2541_v26  ;;  %v12251_v26 = vpack.c.bf16 %v2654_v57, %v2648_v33  ;;  %v2667_v38 = vld [vmem:[#allocation28 + $0x5d8] sm:$0xff] }
 0x7db   :  { %12180 = vmatpush1.bf16.msra.mxu0 %v12179_v49  ;;  %12212 = vmatpush1.bf16.msra.mxu1 %v12211_v61  ;;  %v12215_v49 = vpack.c.bf16 %v2546_v1, %v2540_v25  ;;  %v2661_v61 = vld [vmem:[#allocation28 + $0x5a8] sm:$0xff]  ;;  %v2666_v25 = vld [vmem:[#allocation28 + $0x5d0] sm:$0xff] }
 0x7dc   :  { %12182 = vmatprep.subr.bf16.mxu0 %v12181_v50  ;;  %12214 = vmatprep.subr.bf16.mxu1 %v12213_v39  ;;  %v2553_v50 = vld [vmem:[#allocation28 + $0x248] sm:$0xff]  ;;  %v2660_v39 = vld [vmem:[#allocation28 + $0x5a0] sm:$0xff]  ;;  %v12253_v1 = vpack.c.bf16 %v2667_v38, %v2661_v61 }
 0x7dd   :  { %v12217_v52 = vpack.c.bf16 %v2559_v47, %v2553_v50  ;;  %v2483_v50 = vld [vmem:[#allocation28 + $0x18] sm:$0xff]  ;;  %v2489_v47 = vld [vmem:[#allocation28 + $0x48] sm:$0xff] }
 0x7df   :  { %12184 = vmatpush1.bf16.msra.mxu0 %v12183_v53  ;;  %12216 = vmatpush1.bf16.msra.mxu1 %v12215_v49  ;;  %v12219_v53 = vpack.c.bf16 %v2558_v34, %v2552_v58  ;;  %v12255_v49 = vpack.c.bf16 %v2666_v25, %v2660_v39  ;;  %v1669_v58 = vld [vmem:[%s16398_s10] sm:$0x3] }
 0x7e0   :  { %12186 = vmatprep.subr.bf16.mxu0 %v12185_v32  ;;  %12218 = vmatprep.subr.bf16.mxu1 %v12217_v52  ;;  %v2565_v32 = vld [vmem:[#allocation28 + $0x2a8] sm:$0xff]  ;;  %v12257_v52 = vpack.c.bf16 %v2489_v47, %v2483_v50  ;;  %v1702_v34 = vld [vmem:[%s16399_s11] sm:$0x3] }
 0x7e1   :  { %v12221_v54 = vpack.c.bf16 %v2571_v6, %v2565_v32  ;;  %v2078_v32 = vrot.slane %v1669_v58, %v14739_v41  ;;  %v1926_v6 = vrot.slane %v1702_v34, %v14743_v43 }
 0x7e3   :  { %12188 = vmatpush1.bf16.msra.mxu0 %v12187_v60  ;;  %12220 = vmatpush1.bf16.msra.mxu1 %v12219_v53  ;;  %v12223_v60 = vpack.c.bf16 %v2570_v55, %v2564_v31  ;;  %v1922_v53 = vrot.slane %v1702_v34, %v14739_v41 }
 0x7e4   :  { %12190 = vmatprep.subr.bf16.mxu0 %v12189_v62  ;;  %12222 = vmatprep.subr.bf16.mxu1 %v12221_v54  ;;  %v2577_v62 = vld [vmem:[#allocation28 + $0x308] sm:$0xff]  ;;  %v2082_v54 = vrot.slane %v1669_v58, %v14743_v43 }
 0x7e5   :  { %v12225_v4 = vpack.c.bf16 %v2583_v3, %v2577_v62  ;;  %v13077_v31 = vadd.f32 %v2078_v32, %v1922_v53 }
 0x7e7   :  { %12192 = vmatpush1.bf16.msra.mxu0 %v12191_v9  ;;  %12224 = vmatpush1.bf16.msra.mxu1 %v12223_v60  ;;  %v2582_v9 = vld [vmem:[#allocation28 + $0x330] sm:$0xff]  ;;  %v13079_v60 = vadd.f32 %v2082_v54, %v1926_v6 }
 0x7e8   :  { %v12227_v10 = vpack.c.bf16 %v2582_v9, %v2576_v7  ;;  %12226 = vmatprep.subr.bf16.mxu1 %v12225_v4 }
 0x7ea   :  { %2328 = vmatmul.mubr.f32.vlgmr.msra.gmra.mrb[12].mxu0 %v2062_v16  ;;  %v2588_v16 = vld [vmem:[#allocation28 + $0x360] sm:$0xff] }
 0x7eb   :  { %2333 = vmatprep.mubr.f32.mxu0 %v2069_v0  ;;  %12228 = vmatpush1.bf16.msra.mxu1 %v12227_v10  ;;  %v2594_v0 = vld [vmem:[#allocation28 + $0x390] sm:$0xff] }
 0x7ec   :  { %v12231_v17 = vpack.c.bf16 %v2594_v0, %v2588_v16  ;;  %12230 = vmatprep.subr.bf16.mxu1 %v12229_v15 }
 0x7ee   :  { %2334 = vmatmul.mubr.f32.gmra.mrb[14].mxu0 %v2068_v11  ;;  %v2607_v11 = vld [vmem:[#allocation28 + $0x3f8] sm:$0xff] }
 0x7ef   :  { %2339 = vmatprep.mubr.f32.mxu0 %v2059_v63  ;;  %12232 = vmatpush1.bf16.msra.mxu1 %v12231_v17  ;;  %v12233_v5 = vpack.c.bf16 %v2607_v11, %v2601_v51  ;;  %v2600_v63 = vld [vmem:[#allocation28 + $0x3c0] sm:$0xff] }
 0x7f1   :  { %12234 = vmatprep.subr.bf16.mxu1 %v12233_v5 }
 0x7f2   :  { %2340 = vmatmul.mubr.f32.gmra.mrb[16].mxu0 %v2058_v18  ;;  %v12235_v18 = vpack.c.bf16 %v2606_v36, %v2600_v63 }
 0x7f3   :  { %2345 = vmatprep.mubr.f32.mxu0 %v2073_v44  ;;  %v2613_v44 = vld [vmem:[#allocation28 + $0x428] sm:$0xff] }
 0x7f4   :  { %12236 = vmatpush1.bf16.msra.mxu1 %v12235_v18 }
 0x7f6   :  { %2346 = vmatmul.mubr.f32.gmra.mrb[18].mxu0 %v2072_v42  ;;  %v12237_v42 = vpack.c.bf16 %v2619_v8, %v2613_v44 }
 0x7f8   :  { %12238 = vmatprep.subr.bf16.mxu1 %v12237_v42 }
 0x7f9   :  { %12240 = vmatpush1.bf16.msra.mxu1 %v12239_v35 }
 0x7fa   :  { %12242 = vmatprep.subr.bf16.mxu1 %v12241_v46 }
 0x7fd   :  { %12244 = vmatpush1.bf16.msra.mxu1 %v12243_v20 }
 0x7fe   :  { %12246 = vmatprep.subr.bf16.mxu1 %v12245_v56 }
 0x801   :  { %12248 = vmatpush1.bf16.msra.mxu1 %v12247_v2 }
 0x802   :  { %12250 = vmatprep.subr.bf16.mxu1 %v12249_v30 }
 0x805   :  { %12252 = vmatpush1.bf16.msra.mxu1 %v12251_v26 }
 0x806   :  { %12254 = vmatprep.subr.bf16.mxu1 %v12253_v1 }
 0x809   :  { %12256 = vmatpush1.bf16.msra.mxu1 %v12255_v49 }
 0x80a   :  { %12258 = vmatprep.subr.bf16.mxu1 %v12257_v52 }
 0x8bd   :  { %v2329_v55 = vpop.f32.mrb[12].mxu0 }
 0x8be   :  { %v2331_v62 = vpop.f32.mrb[13].mxu0  ;;  %v15156_v3 = vadd.f32 %v13077_v31, %v2329_v55 }
 0x8bf   :  { %v15158_v4 = vadd.f32 %v13079_v60, %v2331_v62 }
 0x8c0   :  { %v2380_v13 = vmul.f32 %v15156_v3, %v15156_v3 }
 0x8c1   :  { %v2335_v7 = vpop.f32.mrb[14].mxu0  ;;  %v2381_v0 = vmul.f32 %v15158_v4, %v15158_v4 }
 0x8c2   :  { %v15160_v9 = vadd.f32 %v13077_v31, %v2335_v7  ;;  %v2337_v10 = vpop.f32.mrb[15].mxu0 }
 0x8c3   :  { %v15162_v12 = vadd.f32 %v13079_v60, %v2337_v10 }
 0x8c4   :  { %v2360_v15 = vadd.f32 %v15160_v9, %v15156_v3  ;;  %v2382_v16 = vmul.f32 %v15160_v9, %v15160_v9 }
 0x8c5   :  { %v2369_v17 = vadd.f32 %v15162_v12, %v15158_v4  ;;  %v2383_v51 = vmul.f32 %v15162_v12, %v15162_v12  ;;  %v2341_v11 = vpop.f32.mrb[16].mxu0 }
 0x8c6   :  { %v2388_v5 = vadd.f32 %v2382_v16, %v2380_v13  ;;  %v15176_v63 = vadd.f32 %v13077_v31, %v2341_v11  ;;  %v2343_v36 = vpop.f32.mrb[17].mxu0 }
 0x8c7   :  { %v2397_v18 = vadd.f32 %v2383_v51, %v2381_v0  ;;  %v15178_v44 = vadd.f32 %v13079_v60, %v2343_v36 }
 0x8c8   :  { %v2361_v8 = vadd.f32 %v15176_v63, %v2360_v15  ;;  %v2384_v42 = vmul.f32 %v15176_v63, %v15176_v63 }
 0x8c9   :  { %v2370_v19 = vadd.f32 %v15178_v44, %v2369_v17  ;;  %v2385_v21 = vmul.f32 %v15178_v44, %v15178_v44  ;;  %v2347_v35 = vpop.f32.mrb[18].mxu0 }
 0x8ca   :  { %v2389_v22 = vadd.f32 %v2388_v5, %v2384_v42  ;;  %v15186_v37 = vadd.f32 %v13077_v31, %v2347_v35  ;;  %v2349_v46 = vpop.f32.mrb[19].mxu0 }
 0x8cb   :  { %v2398_v23 = vadd.f32 %v2397_v18, %v2385_v21  ;;  %v15188_v14 = vadd.f32 %v13079_v60, %v2349_v46 }
 0x8cc   :  { %v2362_v20 = vadd.f32 %v15186_v37, %v2361_v8  ;;  %v2386_v45 = vmul.f32 %v15186_v37, %v15186_v37 }
 0x8cd   :  { %v2371_v24 = vadd.f32 %v15188_v14, %v2370_v19  ;;  %v2387_v56 = vmul.f32 %v15188_v14, %v15188_v14 }
 0x8ce   :  { %v2363_v27 = vrot.slane %v2362_v20, 4  ;;  %v2390_v28 = vadd.f32 %v2389_v22, %v2386_v45 }
 0x8cf   :  { %v2372_v2 = vrot.slane %v2371_v24, 4  ;;  %v2399_v59 = vadd.f32 %v2398_v23, %v2387_v56 }
 0x8d0   :  { %v2364_v29 = vadd.f32 %v2363_v27, %v2362_v20  ;;  %v2391_v30 = vrot.slane %v2390_v28, 4 }
 0x8d1   :  { %v2373_v33 = vadd.f32 %v2372_v2, %v2371_v24  ;;  %v2400_v57 = vrot.slane %v2399_v59, 4 }
 0x8d2   :  { %v2365_v61 = vrot.slane %v2364_v29, 2  ;;  %v2392_v26 = vadd.f32 %v2391_v30, %v2390_v28  ;;  %v2482_v30 = vld [vmem:[#allocation28 + $0x10] sm:$0xff] }
 0x8d3   :  { %v2374_v38 = vrot.slane %v2373_v33, 2  ;;  %v2401_v39 = vadd.f32 %v2400_v57, %v2399_v59 }
 0x8d4   :  { %v2366_v25 = vadd.f32 %v2365_v61, %v2364_v29  ;;  %v2393_v1 = vrot.slane %v2392_v26, 2 }
 0x8d5   :  { %v2375_v49 = vadd.f32 %v2374_v38, %v2373_v33  ;;  %v2402_v50 = vrot.slane %v2401_v39, 2  ;;  %v2488_v33 = vld [vmem:[#allocation28 + $0x40] sm:$0xff]  ;;  %v2501_v38 = vld [vmem:[#allocation28 + $0xa8] sm:$0xff] }
 0x8d6   :  { %v2367_v47 = vrot.slane %v2366_v25, 1  ;;  %v2394_v52 = vadd.f32 %v2393_v1, %v2392_v26  ;;  %v2495_v26 = vld [vmem:[#allocation28 + $0x78] sm:$0xff] }
 0x8d7   :  { %v2376_v58 = vrot.slane %v2375_v49, 1  ;;  %v2403_v34 = vadd.f32 %v2402_v50, %v2401_v39 }
 0x8d8   :  { %v2368_v53 = vadd.f32 %v2367_v47, %v2366_v25  ;;  %v2395_v32 = vrot.slane %v2394_v52, 1  ;;  %v12259_v25 = vpack.c.bf16 %v2488_v33, %v2482_v30  ;;  %v2494_v47 = vld [vmem:[#allocation28 + $0x70] sm:$0xff]  ;;  %v2585_v30 = vld [vmem:[#allocation28 + $0x348] sm:$0xff] }
 0x8d9   :  { %v2377_v6 = vadd.f32 %v2376_v58, %v2375_v49  ;;  %v2404_v54 = vrot.slane %v2403_v34, 1  ;;  %v12261_v49 = vpack.c.bf16 %v2501_v38, %v2495_v26  ;;  %v2584_v26 = vld [vmem:[#allocation28 + $0x340] sm:$0xff]  ;;  %v2591_v38 = vld [vmem:[#allocation28 + $0x378] sm:$0xff] }
 0x8da   :  { %v2378_v31 = vmul.f32 0.03125, %v2368_v53  ;;  %v2396_v55 = vadd.f32 %v2395_v32, %v2394_v52  ;;  %v2500_v52 = vld [vmem:[#allocation28 + $0xa0] sm:$0xff]  ;;  %v2507_v53 = vld [vmem:[#allocation28 + $0xd8] sm:$0xff]  ;;  %v2513_v32 = vld [vmem:[#allocation28 + $0x108] sm:$0xff] }
 0x8db   :  { %v2379_v60 = vmul.f32 0.03125, %v2377_v6  ;;  %v2405_v62 = vadd.f32 %v2404_v54, %v2403_v34  ;;  %v12263_v6 = vpack.c.bf16 %v2500_v52, %v2494_v47  ;;  %v2590_v47 = vld [vmem:[#allocation28 + $0x370] sm:$0xff]  ;;  %v2596_v52 = vld [vmem:[#allocation28 + $0x3a0] sm:$0xff] }
 0x8dc   :  { %v2406_v7 = vmul.f32 0.03125, %v2396_v55  ;;  %v2408_v10 = vmul.f32 %v2378_v31, %v2378_v31  ;;  %v2418_v13 = vsub.f32 %v15186_v37, %v2378_v31  ;;  %v2412_v15 = vsub.f32 %v15156_v3, %v2378_v31  ;;  %v1703_v3 = vld [vmem:[%s16400_s21] sm:$0x3] }
 0x8dd   :  { %v2407_v16 = vmul.f32 0.03125, %v2405_v62  ;;  %v2409_v0 = vmul.f32 %v2379_v60, %v2379_v60  ;;  %v2419_v17 = vsub.f32 %v15188_v14, %v2379_v60  ;;  %v2413_v51 = vsub.f32 %v15158_v4, %v2379_v60  ;;  %v1704_v37 = vld [vmem:[%s16401_s4] sm:$0x3] }
 0x8de   :  { %v2410_v11 = vsub.f32 %v2406_v7, %v2408_v10  ;;  %v2415_v5 = vsub.f32 %v15162_v12, %v2379_v60  ;;  %v2414_v36 = vsub.f32 %v15160_v9, %v2378_v31  ;;  %v2417_v18 = vsub.f32 %v15178_v44, %v2379_v60  ;;  %v2506_v60 = vld [vmem:[#allocation28 + $0xd0] sm:$0xff]  ;;  %v2512_v62 = vld [vmem:[#allocation28 + $0x100] sm:$0xff] }
 0x8df   :  { %v2411_v8 = vsub.f32 %v2407_v16, %v2409_v0  ;;  %v2416_v42 = vsub.f32 %v15176_v63, %v2378_v31  ;;  %v2428_v35 = vrot.slane %v1703_v3, %v14739_v41  ;;  %v2432_v22 = vrot.slane %v1703_v3, %v14743_v43  ;;  %v2530_v3 = vld [vmem:[#allocation28 + $0x190] sm:$0xff] }
 0x8e0   :  { %v2420_v19 = vadd.f32 1e-05, %v2410_v11  ;;  %v2457_v44 = vrot.slane %v1704_v37, %v14739_v41  ;;  %v2461_v14 = vrot.slane %v1704_v37, %v14743_v43  ;;  %v12265_v31 = vpack.c.bf16 %v2513_v32, %v2507_v53  ;;  %v2518_v11 = vld [vmem:[#allocation28 + $0x130] sm:$0xff]  ;;  %v2609_v53 = vld [vmem:[#allocation28 + $0x408] sm:$0xff] }
 0x8e1   :  { %v2421_v21 = vadd.f32 1e-05, %v2411_v8  ;;  %v12267_v16 = vpack.c.bf16 %v2512_v62, %v2506_v60  ;;  %v2537_v8 = vld [vmem:[#allocation28 + $0x1c8] sm:$0xff]  ;;  %v12295_v32 = vpack.c.bf16 %v2596_v52, %v2590_v47  ;;  %v2615_v60 = vld [vmem:[#allocation28 + $0x438] sm:$0xff] }
 0x8e2   :  { %13560 = vrsqrt.f32 %v2420_v19  ;;  %v2621_v62 = vld [vmem:[#allocation28 + $0x468] sm:$0xff] }
 0x8e3   :  { %13562 = vrsqrt.f32 %v2421_v21 }
 0x8ec   :  { %v13561_v4 = vpop.eup %13560 }
 0x8ed   :  { %v13563_v46 = vpop.eup %13562  ;;  %v2435_v12 = vmul.f32 %v13561_v4, %v2428_v35  ;;  %v2536_v35 = vld [vmem:[#allocation28 + $0x1c0] sm:$0xff]  ;;  %v2549_v4 = vld [vmem:[#allocation28 + $0x228] sm:$0xff] }
 0x8ee   :  { %v2436_v23 = vmul.f32 %v13563_v46, %v2432_v22  ;;  %v2543_v22 = vld [vmem:[#allocation28 + $0x1f8] sm:$0xff]  ;;  %v12275_v37 = vpack.c.bf16 %v2536_v35, %v2530_v3 }
 0x8ef   :  { %v2440_v9 = vrot.slane %v2435_v12, %v14739_v41  ;;  %v12277_v46 = vpack.c.bf16 %v2549_v4, %v2543_v22  ;;  %v2542_v12 = vld [vmem:[#allocation28 + $0x1f0] sm:$0xff]  ;;  %v2644_v4 = vld [vmem:[#allocation28 + $0x520] sm:$0xff] }
 0x8f0   :  { %v2444_v63 = vrot.slane %v2436_v23, %v14739_v41  ;;  %v2548_v23 = vld [vmem:[#allocation28 + $0x220] sm:$0xff]  ;;  %v2638_v22 = vld [vmem:[#allocation28 + $0x4f0] sm:$0xff] }
 0x8f1   :  { %v2451_v20 = vmul.f32 %v2440_v9, %v2418_v13  ;;  %v2445_v45 = vmul.f32 %v2440_v9, %v2412_v15  ;;  %v2447_v24 = vmul.f32 %v2440_v9, %v2414_v36  ;;  %v2449_v56 = vmul.f32 %v2440_v9, %v2416_v42  ;;  %v2519_v13 = vld [vmem:[#allocation28 + $0x138] sm:$0xff]  ;;  %v2525_v15 = vld [vmem:[#allocation28 + $0x168] sm:$0xff] }
 0x8f2   :  { %v2452_v27 = vmul.f32 %v2444_v63, %v2419_v17  ;;  %v2446_v28 = vmul.f32 %v2444_v63, %v2413_v51  ;;  %v2448_v2 = vmul.f32 %v2444_v63, %v2415_v5  ;;  %v2450_v59 = vmul.f32 %v2444_v63, %v2417_v18  ;;  %v2524_v5 = vld [vmem:[#allocation28 + $0x160] sm:$0xff]  ;;  %v2531_v18 = vld [vmem:[#allocation28 + $0x198] sm:$0xff] }
 0x8f3   :  { %v2464_v29 = vadd.f32 %v2457_v44, %v2445_v45  ;;  %v2466_v50 = vadd.f32 %v2457_v44, %v2447_v24  ;;  %v2468_v55 = vadd.f32 %v2457_v44, %v2449_v56  ;;  %v12269_v17 = vpack.c.bf16 %v2525_v15, %v2519_v13  ;;  %v2555_v9 = vld [vmem:[#allocation28 + $0x258] sm:$0xff]  ;;  %v2560_v45 = vld [vmem:[#allocation28 + $0x280] sm:$0xff]  ;;  %v2573_v56 = vld [vmem:[#allocation28 + $0x2e8] sm:$0xff] }
 0x8f4   :  { %v2465_v57 = vadd.f32 %v2461_v14, %v2446_v28  ;;  %v2467_v61 = vadd.f32 %v2461_v14, %v2448_v2  ;;  %v2469_v34 = vadd.f32 %v2461_v14, %v2450_v59  ;;  %v2471_v10 = vadd.f32 %v2461_v14, %v2452_v27  ;;  %v2567_v24 = vld [vmem:[#allocation28 + $0x2b8] sm:$0xff]  ;;  %v2566_v2 = vld [vmem:[#allocation28 + $0x2b0] sm:$0xff]  ;;  %v2572_v59 = vld [vmem:[#allocation28 + $0x2e0] sm:$0xff] }
 0x8f5   :  { %v15214_v1 = vmax.f32 %v2464_v29, 0.0  ;;  %v15221_v54 = vmax.f32 %v2466_v50, 0.0  ;;  %v15227_v0 = vmax.f32 %v2468_v55, 0.0  ;;  %v2470_v51 = vadd.f32 %v2457_v44, %v2451_v20  ;;  %v2561_v44 = vld [vmem:[#allocation28 + $0x288] sm:$0xff]  ;;  %v2554_v20 = vld [vmem:[#allocation28 + $0x250] sm:$0xff]  ;;  %v2579_v29 = vld [vmem:[#allocation28 + $0x318] sm:$0xff] }
 0x8f6   :  { %v15212_v39 = vmax.f32 %v2465_v57, 0.0  ;;  %v15217_v58 = vmax.f32 %v2467_v61, 0.0  ;;  %v15223_v7 = vmax.f32 %v2469_v34, 0.0  ;;  %v15229_v36 = vmax.f32 %v2471_v10, 0.0  ;;  %v2578_v61 = vld [vmem:[#allocation28 + $0x310] sm:$0xff]  ;;  %v2603_v34 = vld [vmem:[#allocation28 + $0x3d8] sm:$0xff] }
 0x8f7   :  { %v12271_v42 = vpack.c.bf16 %v2524_v5, %v2518_v11  ;;  %v15233_v19 = vmax.f32 %v2470_v51, 0.0  ;;  %v12273_v21 = vpack.c.bf16 %v2537_v8, %v2531_v18  ;;  %v12279_v63 = vpack.c.bf16 %v2548_v23, %v2542_v12  ;;  %v2608_v55 = vld [vmem:[#allocation28 + $0x400] sm:$0xff]  ;;  %v2614_v15 = vld [vmem:[#allocation28 + $0x430] sm:$0xff]  ;;  %v2633_v51 = vld [vmem:[#allocation28 + $0x4c8] sm:$0xff] }
 0x8f8   :  { %2833 = vmatprep.mubr.f32.mxu1 %v15212_v39  ;;  %v12281_v14 = vpack.c.bf16 %v2561_v44, %v2555_v9  ;;  %v12283_v27 = vpack.c.bf16 %v2560_v45, %v2554_v20  ;;  %v12285_v28 = vpack.c.bf16 %v2573_v56, %v2567_v24  ;;  %v12287_v33 = vpack.c.bf16 %v2572_v59, %v2566_v2  ;;  %v2626_v18 = vld [vmem:[#allocation28 + $0x490] sm:$0xff]  ;;  %v2632_v8 = vld [vmem:[#allocation28 + $0x4c0] sm:$0xff] }
 0x8f9   :  { %2834 = vmatmul.mubr.f32.vlgmr.msra.gmra.mrb[28].mxu1 %v15214_v1  ;;  %v12289_v57 = vpack.c.bf16 %v2585_v30, %v2579_v29  ;;  %v12301_v13 = vpack.c.bf16 %v2621_v62, %v2615_v60  ;;  %v12307_v3 = vpack.c.bf16 %v2632_v8, %v2626_v18  ;;  %v12311_v12 = vpack.c.bf16 %v2644_v4, %v2638_v22  ;;  %v2650_v9 = vld [vmem:[#allocation28 + $0x550] sm:$0xff]  ;;  %v2656_v44 = vld [vmem:[#allocation28 + $0x580] sm:$0xff] }
 0x8fa   :  { %12260 = vmatpush1.bf16.msra.mxu1 %v12259_v25  ;;  %2839 = vmatprep.mubr.f32.mxu1 %v15217_v58  ;;  %v2597_v25 = vld [vmem:[#allocation28 + $0x3a8] sm:$0xff]  ;;  %v12315_v20 = vpack.c.bf16 %v2656_v44, %v2650_v9  ;;  %v2662_v24 = vld [vmem:[#allocation28 + $0x5b0] sm:$0xff]  ;;  %v2668_v56 = vld [vmem:[#allocation28 + $0x5e0] sm:$0xff] }
 0x8fb   :  { %12262 = vmatprep.subr.bf16.mxu1 %v12261_v49  ;;  %v12291_v49 = vpack.c.bf16 %v2584_v26, %v2578_v61  ;;  %v12293_v50 = vpack.c.bf16 %v2597_v25, %v2591_v38  ;;  %v12319_v2 = vpack.c.bf16 %v2668_v56, %v2662_v24  ;;  %v2484_v29 = vld [vmem:[#allocation28 + $0x20] sm:$0xff]  ;;  %v2490_v30 = vld [vmem:[#allocation28 + $0x50] sm:$0xff] }
 0x8fc   :  { %v12323_v61 = vpack.c.bf16 %v2490_v30, %v2484_v29  ;;  %v2496_v38 = vld [vmem:[#allocation28 + $0x80] sm:$0xff]  ;;  %v2502_v25 = vld [vmem:[#allocation28 + $0xb0] sm:$0xff] }
 0x8fd   :  { %2840 = vmatmul.mubr.f32.gmra.mrb[30].mxu1 %v15221_v54  ;;  %v12327_v47 = vpack.c.bf16 %v2502_v25, %v2496_v38  ;;  %v2520_v60 = vld [vmem:[#allocation28 + $0x140] sm:$0xff]  ;;  %v2526_v62 = vld [vmem:[#allocation28 + $0x170] sm:$0xff] }
 0x8fe   :  { %12264 = vmatpush1.bf16.msra.mxu1 %v12263_v6  ;;  %2845 = vmatprep.mubr.f32.mxu1 %v15223_v7  ;;  %v12297_v6 = vpack.c.bf16 %v2609_v53, %v2603_v34  ;;  %v2508_v34 = vld [vmem:[#allocation28 + $0xe0] sm:$0xff]  ;;  %v2514_v53 = vld [vmem:[#allocation28 + $0x110] sm:$0xff] }
 0x8ff   :  { %12266 = vmatprep.subr.bf16.mxu1 %v12265_v31  ;;  %v2602_v31 = vld [vmem:[#allocation28 + $0x3d0] sm:$0xff] }
 0x900   :  { %v12299_v10 = vpack.c.bf16 %v2608_v55, %v2602_v31  ;;  %v12331_v31 = vpack.c.bf16 %v2514_v53, %v2508_v34 }
 0x901   :  { %2846 = vmatmul.mubr.f32.gmra.mrb[32].mxu1 %v15227_v0 }
 0x902   :  { %12268 = vmatpush1.bf16.msra.mxu1 %v12267_v16  ;;  %2851 = vmatprep.mubr.f32.mxu1 %v15229_v36  ;;  %v2620_v16 = vld [vmem:[#allocation28 + $0x460] sm:$0xff] }
 0x903   :  { %12270 = vmatprep.subr.bf16.mxu1 %v12269_v17  ;;  %v2627_v17 = vld [vmem:[#allocation28 + $0x498] sm:$0xff]  ;;  %v12303_v11 = vpack.c.bf16 %v2620_v16, %v2614_v15  ;;  %v12335_v15 = vpack.c.bf16 %v2526_v62, %v2520_v60 }
 0x904   :  { %v12305_v5 = vpack.c.bf16 %v2633_v51, %v2627_v17  ;;  %v2532_v17 = vld [vmem:[#allocation28 + $0x1a0] sm:$0xff]  ;;  %v2538_v51 = vld [vmem:[#allocation28 + $0x1d0] sm:$0xff] }
 0x905   :  { %2852 = vmatmul.mubr.f32.gmra.mrb[34].mxu1 %v15233_v19  ;;  %v12339_v18 = vpack.c.bf16 %v2538_v51, %v2532_v17 }
 0x906   :  { %12272 = vmatpush1.bf16.msra.mxu1 %v12271_v42  ;;  %2922 = vmatprep.mubr.f32.mxu1 %v15212_v39  ;;  %v2639_v42 = vld [vmem:[#allocation28 + $0x4f8] sm:$0xff] }
 0x907   :  { %12274 = vmatprep.subr.bf16.mxu1 %v12273_v21  ;;  %v2645_v21 = vld [vmem:[#allocation28 + $0x528] sm:$0xff] }
 0x908   :  { %v12309_v35 = vpack.c.bf16 %v2645_v21, %v2639_v42  ;;  %v2544_v42 = vld [vmem:[#allocation28 + $0x200] sm:$0xff]  ;;  %v2550_v21 = vld [vmem:[#allocation28 + $0x230] sm:$0xff] }
 0x909   :  { %v12343_v22 = vpack.c.bf16 %v2550_v21, %v2544_v42 }
 0x90a   :  { %12276 = vmatpush1.bf16.msra.mxu1 %v12275_v37  ;;  %v2651_v37 = vld [vmem:[#allocation28 + $0x558] sm:$0xff] }
 0x90b   :  { %12278 = vmatprep.subr.bf16.mxu1 %v12277_v46  ;;  %v2657_v46 = vld [vmem:[#allocation28 + $0x588] sm:$0xff] }
 0x90c   :  { %v12313_v23 = vpack.c.bf16 %v2657_v46, %v2651_v37  ;;  %v2556_v37 = vld [vmem:[#allocation28 + $0x260] sm:$0xff]  ;;  %v2562_v46 = vld [vmem:[#allocation28 + $0x290] sm:$0xff] }
 0x90d   :  { %v12347_v9 = vpack.c.bf16 %v2562_v46, %v2556_v37 }
 0x90e   :  { %12280 = vmatpush1.bf16.msra.mxu1 %v12279_v63  ;;  %v2663_v63 = vld [vmem:[#allocation28 + $0x5b8] sm:$0xff] }
 0x90f   :  { %12282 = vmatprep.subr.bf16.mxu1 %v12281_v14  ;;  %v2669_v14 = vld [vmem:[#allocation28 + $0x5e8] sm:$0xff] }
 0x910   :  { %v12317_v45 = vpack.c.bf16 %v2669_v14, %v2663_v63  ;;  %v2568_v63 = vld [vmem:[#allocation28 + $0x2c0] sm:$0xff]  ;;  %v2574_v14 = vld [vmem:[#allocation28 + $0x2f0] sm:$0xff] }
 0x911   :  { %v12351_v24 = vpack.c.bf16 %v2574_v14, %v2568_v63 }
 0x912   :  { %12284 = vmatpush1.bf16.msra.mxu1 %v12283_v27  ;;  %v2485_v27 = vld [vmem:[#allocation28 + $0x28] sm:$0xff] }
 0x913   :  { %12286 = vmatprep.subr.bf16.mxu1 %v12285_v28  ;;  %v2491_v28 = vld [vmem:[#allocation28 + $0x58] sm:$0xff] }
 0x914   :  { %v12321_v59 = vpack.c.bf16 %v2491_v28, %v2485_v27  ;;  %v2580_v27 = vld [vmem:[#allocation28 + $0x320] sm:$0xff]  ;;  %v2586_v28 = vld [vmem:[#allocation28 + $0x350] sm:$0xff] }
 0x915   :  { %v12355_v29 = vpack.c.bf16 %v2586_v28, %v2580_v27 }
 0x916   :  { %12288 = vmatpush1.bf16.msra.mxu1 %v12287_v33  ;;  %v2497_v33 = vld [vmem:[#allocation28 + $0x88] sm:$0xff] }
 0x917   :  { %12290 = vmatprep.subr.bf16.mxu1 %v12289_v57  ;;  %v2503_v57 = vld [vmem:[#allocation28 + $0xb8] sm:$0xff] }
 0x918   :  { %v12325_v26 = vpack.c.bf16 %v2503_v57, %v2497_v33  ;;  %v2592_v33 = vld [vmem:[#allocation28 + $0x380] sm:$0xff]  ;;  %v2598_v57 = vld [vmem:[#allocation28 + $0x3b0] sm:$0xff] }
 0x919   :  { %v12359_v38 = vpack.c.bf16 %v2598_v57, %v2592_v33 }
 0x91a   :  { %12292 = vmatpush1.bf16.msra.mxu1 %v12291_v49  ;;  %v2509_v49 = vld [vmem:[#allocation28 + $0xe8] sm:$0xff] }
 0x91b   :  { %12294 = vmatprep.subr.bf16.mxu1 %v12293_v50  ;;  %v2515_v50 = vld [vmem:[#allocation28 + $0x118] sm:$0xff] }
 0x91c   :  { %v12329_v52 = vpack.c.bf16 %v2515_v50, %v2509_v49  ;;  %v2604_v49 = vld [vmem:[#allocation28 + $0x3e0] sm:$0xff]  ;;  %v2610_v50 = vld [vmem:[#allocation28 + $0x410] sm:$0xff] }
 0x91d   :  { %v12363_v34 = vpack.c.bf16 %v2610_v50, %v2604_v49 }
 0x91e   :  { %12296 = vmatpush1.bf16.msra.mxu1 %v12295_v32  ;;  %v2521_v32 = vld [vmem:[#allocation28 + $0x148] sm:$0xff] }
 0x91f   :  { %12298 = vmatprep.subr.bf16.mxu1 %v12297_v6  ;;  %v2527_v6 = vld [vmem:[#allocation28 + $0x178] sm:$0xff] }
 0x920   :  { %v12333_v55 = vpack.c.bf16 %v2527_v6, %v2521_v32  ;;  %v2616_v32 = vld [vmem:[#allocation28 + $0x440] sm:$0xff]  ;;  %v2622_v6 = vld [vmem:[#allocation28 + $0x470] sm:$0xff] }
 0x921   :  { %v12367_v60 = vpack.c.bf16 %v2622_v6, %v2616_v32 }
 0x922   :  { %12300 = vmatpush1.bf16.msra.mxu1 %v12299_v10  ;;  %v2533_v10 = vld [vmem:[#allocation28 + $0x1a8] sm:$0xff] }
 0x923   :  { %12302 = vmatprep.subr.bf16.mxu1 %v12301_v13  ;;  %v2539_v13 = vld [vmem:[#allocation28 + $0x1d8] sm:$0xff] }
 0x924   :  { %v12337_v16 = vpack.c.bf16 %v2539_v13, %v2533_v10  ;;  %v2628_v10 = vld [vmem:[#allocation28 + $0x4a0] sm:$0xff]  ;;  %v2634_v13 = vld [vmem:[#allocation28 + $0x4d0] sm:$0xff] }
 0x925   :  { %v12371_v17 = vpack.c.bf16 %v2634_v13, %v2628_v10 }
 0x926   :  { %12304 = vmatpush1.bf16.msra.mxu1 %v12303_v11  ;;  %v2545_v11 = vld [vmem:[#allocation28 + $0x208] sm:$0xff] }
 0x927   :  { %12306 = vmatprep.subr.bf16.mxu1 %v12305_v5  ;;  %v2551_v5 = vld [vmem:[#allocation28 + $0x238] sm:$0xff] }
 0x928   :  { %v12341_v8 = vpack.c.bf16 %v2551_v5, %v2545_v11  ;;  %v2640_v11 = vld [vmem:[#allocation28 + $0x500] sm:$0xff]  ;;  %v2646_v5 = vld [vmem:[#allocation28 + $0x530] sm:$0xff] }
 0x929   :  { %v12375_v42 = vpack.c.bf16 %v2646_v5, %v2640_v11 }
 0x92a   :  { %12308 = vmatpush1.bf16.msra.mxu1 %v12307_v3  ;;  %v2557_v3 = vld [vmem:[#allocation28 + $0x268] sm:$0xff] }
 0x92b   :  { %12310 = vmatprep.subr.bf16.mxu1 %v12309_v35  ;;  %v2563_v35 = vld [vmem:[#allocation28 + $0x298] sm:$0xff] }
 0x92c   :  { %v12345_v4 = vpack.c.bf16 %v2563_v35, %v2557_v3  ;;  %v2652_v3 = vld [vmem:[#allocation28 + $0x560] sm:$0xff]  ;;  %v2658_v35 = vld [vmem:[#allocation28 + $0x590] sm:$0xff] }
 0x92d   :  { %v12379_v37 = vpack.c.bf16 %v2658_v35, %v2652_v3 }
 0x92e   :  { %12312 = vmatpush1.bf16.msra.mxu1 %v12311_v12  ;;  %v2569_v12 = vld [vmem:[#allocation28 + $0x2c8] sm:$0xff] }
 0x92f   :  { %12314 = vmatprep.subr.bf16.mxu1 %v12313_v23  ;;  %v2575_v23 = vld [vmem:[#allocation28 + $0x2f8] sm:$0xff] }
 0x930   :  { %v12349_v44 = vpack.c.bf16 %v2575_v23, %v2569_v12  ;;  %v2664_v12 = vld [vmem:[#allocation28 + $0x5c0] sm:$0xff]  ;;  %v2670_v23 = vld [vmem:[#allocation28 + $0x5f0] sm:$0xff] }
 0x932   :  { %12316 = vmatpush1.bf16.msra.mxu1 %v12315_v20  ;;  %v2581_v20 = vld [vmem:[#allocation28 + $0x328] sm:$0xff] }
 0x933   :  { %12318 = vmatprep.subr.bf16.mxu1 %v12317_v45  ;;  %v2587_v45 = vld [vmem:[#allocation28 + $0x358] sm:$0xff] }
 0x934   :  { %v12353_v56 = vpack.c.bf16 %v2587_v45, %v2581_v20 }
 0x936   :  { %12320 = vmatpush1.bf16.msra.mxu1 %v12319_v2  ;;  %v2593_v2 = vld [vmem:[#allocation28 + $0x388] sm:$0xff] }
 0x937   :  { %12322 = vmatprep.subr.bf16.mxu1 %v12321_v59  ;;  %v2599_v59 = vld [vmem:[#allocation28 + $0x3b8] sm:$0xff] }
 0x938   :  { %v12357_v30 = vpack.c.bf16 %v2599_v59, %v2593_v2 }
 0x939   :  { %2923 = vmatmul.mubr.f32.vlgmr.msra.gmra.mrb[36].mxu1 %v15214_v1 }
 0x93a   :  { %2928 = vmatprep.mubr.f32.mxu1 %v15217_v58  ;;  %12324 = vmatpush1.bf16.msra.mxu1 %v12323_v61  ;;  %v2605_v61 = vld [vmem:[#allocation28 + $0x3e8] sm:$0xff] }
 0x93b   :  { %12326 = vmatprep.subr.bf16.mxu1 %v12325_v26  ;;  %v2611_v26 = vld [vmem:[#allocation28 + $0x418] sm:$0xff] }
 0x93c   :  { %v12361_v25 = vpack.c.bf16 %v2611_v26, %v2605_v61  ;;  %v16368_v26 = vsub.s32 3, %v14736_v40 }
 0x93d   :  { %2929 = vmatmul.mubr.f32.gmra.mrb[38].mxu1 %v15221_v54 }
 0x93e   :  { %2934 = vmatprep.mubr.f32.mxu1 %v15223_v7  ;;  %12328 = vmatpush1.bf16.msra.mxu1 %v12327_v47  ;;  %v2617_v47 = vld [vmem:[#allocation28 + $0x448] sm:$0xff] }
 0x93f   :  { %12330 = vmatprep.subr.bf16.mxu1 %v12329_v52  ;;  %v2623_v52 = vld [vmem:[#allocation28 + $0x478] sm:$0xff] }
 0x940   :  { %v12365_v53 = vpack.c.bf16 %v2623_v52, %v2617_v47 }
 0x941   :  { %2935 = vmatmul.mubr.f32.gmra.mrb[40].mxu1 %v15227_v0 }
 0x942   :  { %2940 = vmatprep.mubr.f32.mxu1 %v15229_v36  ;;  %12332 = vmatpush1.bf16.msra.mxu1 %v12331_v31  ;;  %v2629_v31 = vld [vmem:[#allocation28 + $0x4a8] sm:$0xff] }
 0x943   :  { %12334 = vmatprep.subr.bf16.mxu1 %v12333_v55  ;;  %v2635_v55 = vld [vmem:[#allocation28 + $0x4d8] sm:$0xff] }
 0x944   :  { %v12369_v62 = vpack.c.bf16 %v2635_v55, %v2629_v31 }
 0x945   :  { %2941 = vmatmul.mubr.f32.gmra.mrb[42].mxu1 %v15233_v19 }
 0x946   :  { %12336 = vmatpush1.bf16.msra.mxu1 %v12335_v15  ;;  %3011 = vmatprep.mubr.f32.mxu1 %v15212_v39  ;;  %v2641_v15 = vld [vmem:[#allocation28 + $0x508] sm:$0xff] }
 0x947   :  { %12338 = vmatprep.subr.bf16.mxu1 %v12337_v16  ;;  %v2647_v16 = vld [vmem:[#allocation28 + $0x538] sm:$0xff] }
 0x948   :  { %v12373_v51 = vpack.c.bf16 %v2647_v16, %v2641_v15 }
 0x94a   :  { %12340 = vmatpush1.bf16.msra.mxu1 %v12339_v18  ;;  %v2653_v18 = vld [vmem:[#allocation28 + $0x568] sm:$0xff] }
 0x94b   :  { %12342 = vmatprep.subr.bf16.mxu1 %v12341_v8  ;;  %v2659_v8 = vld [vmem:[#allocation28 + $0x598] sm:$0xff] }
 0x94c   :  { %v12377_v21 = vpack.c.bf16 %v2659_v8, %v2653_v18 }
 0x94e   :  { %12344 = vmatpush1.bf16.msra.mxu1 %v12343_v22  ;;  %v2665_v22 = vld [vmem:[#allocation28 + $0x5c8] sm:$0xff] }
 0x94f   :  { %12346 = vmatprep.subr.bf16.mxu1 %v12345_v4  ;;  %v2671_v4 = vld [vmem:[#allocation28 + $0x5f8] sm:$0xff] }
 0x950   :  { %v12381_v46 = vpack.c.bf16 %v2671_v4, %v2665_v22  ;;  %v16367_v4 = vsub.s32 4, %v14736_v40 }
 0x952   :  { %12348 = vmatpush1.bf16.msra.mxu1 %v12347_v9  ;;  %v12383_v9 = vpack.c.bf16 %v2670_v23, %v2664_v12 }
 0x953   :  { %12350 = vmatprep.subr.bf16.mxu1 %v12349_v44  ;;  %v15253_v44 = vld [vmem:[%s16402_s15] sm:$0x3f] }
 0x954   :  { %v2742_v63 = vrot.slane %v15253_v44, %v14739_v41  ;;  %v2754_v50 = vrot.slane %v15253_v44, %v16368_v26  ;;  %v2758_v12 = vrot.slane %v15253_v44, %v16367_v4 }
 0x956   :  { %12352 = vmatpush1.bf16.msra.mxu1 %v12351_v24 }
 0x957   :  { %12354 = vmatprep.subr.bf16.mxu1 %v12353_v56 }
 0x95a   :  { %12356 = vmatpush1.bf16.msra.mxu1 %v12355_v29 }
 0x95b   :  { %12358 = vmatprep.subr.bf16.mxu1 %v12357_v30 }
 0x95e   :  { %12360 = vmatpush1.bf16.msra.mxu1 %v12359_v38 }
 0x95f   :  { %12362 = vmatprep.subr.bf16.mxu1 %v12361_v25  ;;  %v2750_v25 = vrot.slane %v15253_v44, %v14752_v48 }
 0x962   :  { %12364 = vmatpush1.bf16.msra.mxu1 %v12363_v34 }
 0x963   :  { %12366 = vmatprep.subr.bf16.mxu1 %v12365_v53 }
 0x966   :  { %12368 = vmatpush1.bf16.msra.mxu1 %v12367_v60 }
 0x967   :  { %12370 = vmatprep.subr.bf16.mxu1 %v12369_v62 }
 0x96a   :  { %12372 = vmatpush1.bf16.msra.mxu1 %v12371_v17 }
 0x96b   :  { %12374 = vmatprep.subr.bf16.mxu1 %v12373_v51 }
 0x96e   :  { %12376 = vmatpush1.bf16.msra.mxu1 %v12375_v42 }
 0x96f   :  { %12378 = vmatprep.subr.bf16.mxu1 %v12377_v21 }
 0x972   :  { %12380 = vmatpush1.bf16.msra.mxu1 %v12379_v37  ;;  %v16366_v37 = vsub.s32 5, %v14736_v40 }
 0x973   :  { %12382 = vmatprep.subr.bf16.mxu1 %v12381_v46 }
 0x976   :  { %12384 = vmatpush1.bf16.msra.mxu1 %v12383_v9  ;;  %v2762_v9 = vrot.slane %v15253_v44, %v16366_v37 }
 0x979   :  { %3012 = vmatmul.mubr.f32.vlgmr.msra.gmra.mrb[44].mxu1 %v15214_v1 }
 0x97a   :  { %3017 = vmatprep.mubr.f32.mxu1 %v15217_v58 }
 0x97d   :  { %3018 = vmatmul.mubr.f32.gmra.mrb[46].mxu1 %v15221_v54 }
 0x97e   :  { %3023 = vmatprep.mubr.f32.mxu1 %v15223_v7 }
 0x981   :  { %3024 = vmatmul.mubr.f32.gmra.mrb[48].mxu1 %v15227_v0 }
 0x982   :  { %3029 = vmatprep.mubr.f32.mxu1 %v15229_v36 }
 0x985   :  { %3030 = vmatmul.mubr.f32.gmra.mrb[50].mxu1 %v15233_v19 }
 0x9cc   :  { %v2835_v14 = vpop.f32.mrb[28].mxu1 }
 0x9cd   :  { %v2836_v20 = vadd.f32 %v2835_v14, %v2742_v63  ;;  %v15257_v45 = vpop.f32.mrb[29].mxu1 }
 0x9cf   :  { %v15259_v24 = vmul.f32 0.17677669, %v2836_v20 }
 0x9d0   :  { %v2841_v56 = vpop.f32.mrb[30].mxu1 }
 0x9d1   :  { %v2842_v27 = vadd.f32 %v2841_v56, %v2742_v63  ;;  %v15261_v28 = vpop.f32.mrb[31].mxu1  ;;  %11277 = vmatprep.mubr.msk.f32.mxu1 %vm3044_vm5, %v15259_v24 }
 0x9d3   :  { %v15295_v5 = vmul.f32 0.17677669, %v2842_v27 }
 0x9d4   :  { %v2847_v2 = vpop.f32.mrb[32].mxu1 }
 0x9d5   :  { %v2848_v59 = vadd.f32 %v2847_v2, %v2742_v63  ;;  %v15265_v29 = vpop.f32.mrb[33].mxu1 }
 0x9d7   :  { %v15267_v30 = vmul.f32 0.17677669, %v2848_v59 }
 0x9d8   :  { %v2853_v33 = vpop.f32.mrb[34].mxu1 }
 0x9d9   :  { %v2854_v57 = vadd.f32 %v2853_v33, %v2742_v63  ;;  %v15269_v61 = vpop.f32.mrb[35].mxu1  ;;  %11284 = vmatprep.mubr.msk.f32.mxu0 %vm3044_vm5, %v15267_v30 }
 0x9db   :  { %v15309_v22 = vmul.f32 0.17677669, %v2854_v57 }
 0xa0c   :  { %v2924_v38 = vpop.f32.mrb[36].mxu1 }
 0xa0d   :  { %v2926_v49 = vpop.f32.mrb[37].mxu1  ;;  %v2925_v52 = vadd.f32 %v2924_v38, %v2750_v25 }
 0xa0e   :  { %v2927_v32 = vadd.f32 %v2926_v49, %v2754_v50 }
 0xa10   :  { %v2930_v47 = vpop.f32.mrb[38].mxu1 }
 0xa11   :  { %v2931_v34 = vadd.f32 %v2930_v47, %v2750_v25  ;;  %v2932_v53 = vpop.f32.mrb[39].mxu1 }
 0xa12   :  { %v2933_v6 = vadd.f32 %v2932_v53, %v2754_v50 }
 0xa13   :  { %v12385_v55 = vpack.c.bf16 %v2931_v34, %v2925_v52  ;;  %v15285_v60 = vpack.i.bf16 %v2931_v34, %v2925_v52 }
 0xa14   :  { %v2936_v62 = vpop.f32.mrb[40].mxu1  ;;  %v15287_v10 = vpack.c.bf16 %v2933_v6, %v2927_v32  ;;  %v15289_v13 = vpack.i.bf16 %v2933_v6, %v2927_v32 }
 0xa15   :  { %v2938_v15 = vpop.f32.mrb[41].mxu1  ;;  %12387 = vmatprep.subr.msk.bf16.mxu1 %vm15281_vm6, %v12385_v55  ;;  %v2937_v17 = vadd.f32 %v2936_v62, %v2750_v25 }
 0xa16   :  { %12390 = vmatpush3.bf16.xpose.msk.msra.mxu1 %vm15281_vm6, %v12385_v55  ;;  %v2939_v18 = vadd.f32 %v2938_v15, %v2754_v50 }
 0xa18   :  { %v2942_v16 = vpop.f32.mrb[42].mxu1 }
 0xa19   :  { %v2943_v51 = vadd.f32 %v2942_v16, %v2750_v25  ;;  %v2944_v11 = vpop.f32.mrb[43].mxu1 }
 0xa1a   :  { %v2945_v8 = vadd.f32 %v2944_v11, %v2754_v50 }
 0xa1b   :  { %v12391_v42 = vpack.c.bf16 %v2943_v51, %v2937_v17  ;;  %v15297_v21 = vpack.i.bf16 %v2943_v51, %v2937_v17 }
 0xa1c   :  { %v15299_v3 = vpack.c.bf16 %v2945_v8, %v2939_v18  ;;  %v15301_v35 = vpack.i.bf16 %v2945_v8, %v2939_v18 }
 0xa1d   :  { %11278 = vmatmul.mubr.msk.f32.vlgmr.msra.gmra.mrb[52].mxu1 %vm3044_vm5, %v15295_v5  ;;  %12393 = vmatprep.subr.msk.bf16.mxu0 %vm15281_vm6, %v12391_v42 }
 0xa1e   :  { %12396 = vmatpush3.bf16.xpose.msk.msra.mxu0 %vm15281_vm6, %v12391_v42 }
 0xa25   :  { %11285 = vmatmul.mubr.msk.f32.vlgmr.msra.gmra.mrb[20].mxu0 %vm3044_vm5, %v15309_v22 }
 0xa4c   :  { %v3013_v46 = vpop.f32.mrb[44].mxu1 }
 0xa4d   :  { %v3015_v23 = vpop.f32.mrb[45].mxu1  ;;  %v3014_v14 = vadd.f32 %v3013_v46, %v2758_v12 }
 0xa4e   :  { %v3016_v27 = vadd.f32 %v3015_v23, %v2762_v9 }
 0xa50   :  { %v3019_v63 = vpop.f32.mrb[46].mxu1 }
 0xa51   :  { %v3020_v20 = vadd.f32 %v3019_v63, %v2758_v12  ;;  %v3021_v56 = vpop.f32.mrb[47].mxu1 }
 0xa52   :  { %v3022_v2 = vadd.f32 %v3021_v56, %v2762_v9 }
 0xa53   :  { %v12397_v59 = vpack.c.bf16 %v3020_v20, %v3014_v14  ;;  %v15321_v33 = vpack.i.bf16 %v3020_v20, %v3014_v14 }
 0xa54   :  { %v3025_v57 = vpop.f32.mrb[48].mxu1  ;;  %v15323_v38 = vpack.c.bf16 %v3022_v2, %v3016_v27  ;;  %v15325_v25 = vpack.i.bf16 %v3022_v2, %v3016_v27 }
 0xa55   :  { %v3027_v49 = vpop.f32.mrb[49].mxu1  ;;  %12398 = vmatprep.subr.bf16.mxu0 %v12397_v59  ;;  %v3026_v47 = vadd.f32 %v3025_v57, %v2758_v12 }
 0xa56   :  { %12400 = vmatpush3.bf16.msra.mxu0 %v12397_v59  ;;  %v3028_v53 = vadd.f32 %v3027_v49, %v2762_v9 }
 0xa58   :  { %v3031_v50 = vpop.f32.mrb[50].mxu1 }
 0xa59   :  { %v3032_v52 = vadd.f32 %v3031_v50, %v2758_v12  ;;  %v3033_v34 = vpop.f32.mrb[51].mxu1 }
 0xa5a   :  { %v3034_v32 = vadd.f32 %v3033_v34, %v2762_v9 }
 0xa5b   :  { %v15327_v6 = vpack.c.bf16 %v3032_v52, %v3026_v47  ;;  %v15329_v55 = vpack.i.bf16 %v3032_v52, %v3026_v47 }
 0xa5c   :  { %v15331_v62 = vpack.c.bf16 %v3034_v32, %v3028_v53  ;;  %v15333_v15 = vpack.i.bf16 %v3034_v32, %v3028_v53 }
 0xa5d   :  { %12402 = vmatprep.subr.bf16.mxu0 %v15327_v6 }
 0xaf0   :  { %v11279_v16 = vpop.f32.mrb[52].mxu1 }
 0xaf1   :  { %v3123_v17 = vpop.f32.mrb[53].mxu1  ;;  %v3223_v51 = vsel %vm3219_vm7, %v11279_v16, -inf }
 0xaf2   :  { %3224 = vmax.xlane.f32.xlu1 %v3223_v51  ;;  %v3220_v11 = vsel %vm3219_vm7, %v3123_v17, -inf }
 0xaf3   :  { %3221 = vmax.xlane.f32.xlu0 %v3220_v11 }
 0xaf8   :  { %v11286_v18 = vpop.f32.mrb[20].mxu0 }
 0xaf9   :  { %v3210_v8 = vpop.f32.mrb[21].mxu0  ;;  %v3229_v46 = vsel %vm3219_vm7, %v11286_v18, -inf }
 0xafa   :  { %v3226_v42 = vsel %vm3219_vm7, %v3210_v8, -inf }
 0xafb   :  { %3227 = vmax.xlane.f32.xlu0 %v3226_v42 }
 0xaff   :  { %3230 = vmax.xlane.f32.xlu0 %v3229_v46 }
 0xb7f   :  { %v3225_v12 = vpop.xlane.xlu1 %3224 }
 0xb80   :  { %v3233_v23 = vsub.f32 %v11279_v16, %v3225_v12  ;;  %v3222_v9 = vpop.xlane.xlu0 %3221 }
 0xb81   :  { %v3232_v63 = vsub.f32 %v3123_v17, %v3222_v9 }
 0xb82   :  { %v3238_v14 = vmul.f32 1.442695, %v3233_v23 }
 0xb83   :  { %v3236_v20 = vmul.f32 1.442695, %v3232_v63 }
 0xb84   :  { %13564 = vpow2.f32 %v3238_v14 }
 0xb85   :  { %13566 = vpow2.f32 %v3236_v20 }
 0xb88   :  { %v3228_v56 = vpop.xlane.xlu0 %3227 }
 0xb89   :  { %v3234_v53 = vsub.f32 %v3210_v8, %v3228_v56 }
 0xb8b   :  { %v3240_v32 = vmul.f32 1.442695, %v3234_v53 }
 0xb8c   :  { %v3231_v27 = vpop.xlane.xlu0 %3230 }
 0xb8d   :  { %v3235_v2 = vsub.f32 %v11286_v18, %v3231_v27 }
 0xb8e   :  { %v13565_v59 = vpop.eup %13564 }
 0xb8f   :  { %v13567_v57 = vpop.eup %13566  ;;  %v3242_v49 = vmul.f32 1.442695, %v3235_v2  ;;  %v3247_v50 = vsel %vm3219_vm7, %v13565_v59, 0.0 }
 0xb90   :  { %3248 = vadd.xlane.f32.xlu0 %v3247_v50  ;;  %v3244_v47 = vsel %vm3219_vm7, %v13567_v57, 0.0 }
 0xb91   :  { %13568 = vpow2.f32 %v3242_v49  ;;  %3245 = vadd.xlane.f32.xlu1 %v3244_v47 }
 0xb92   :  { %13570 = vpow2.f32 %v3240_v32 }
 0xb9b   :  { %v13569_v52 = vpop.eup %13568 }
 0xb9c   :  { %v3253_v34 = vsel %vm3219_vm7, %v13569_v52, 0.0  ;;  %v13571_v16 = vpop.eup %13570 }
 0xb9d   :  { %3254 = vadd.xlane.f32.xlu0 %v3253_v34  ;;  %v3250_v17 = vsel %vm3219_vm7, %v13571_v16, 0.0 }
 0xba2   :  { %13197 = vrot.lane.b32.xlu1 %v15285_v60, %s14394_s5 }
 0xba6   :  { %13202 = vrot.lane.b32.xlu1 %v15297_v21, %s14394_s5 }
 0xbb3   :  { %3426 = vrot.lane.b32.xlu0 %v15259_v24, %s14394_s5 }
 0xbb7   :  { %3517 = vrot.lane.b32.xlu0 %v15267_v30, %s14394_s5 }
 0xbca   :  { %3251 = vadd.xlane.f32.xlu1 %v3250_v17 }
 0xbdb   :  { %3428 = vrot.lane.b32.xlu1 %v15295_v5, %s14394_s5 }
 0xbdf   :  { %3519 = vrot.lane.b32.xlu1 %v15309_v22, %s14394_s5 }
 0xc1d   :  { %v3249_v51 = vpop.xlane.xlu0 %3248 }
 0xc1e   :  { %13572 = vrcp.f32 %v3249_v51  ;;  %v3246_v11 = vpop.xlane.xlu1 %3245 }
 0xc1f   :  { %13574 = vrcp.f32 %v3246_v11 }
 0xc22   :  { %v13198_v18 = vpop.permute.xlu1 %13197 }
 0xc23   :  { %v13200_v46 = vunpack.i.h.bf16 %v13198_v18  ;;  %v13199_v12 = vunpack.i.l.bf16 %v13198_v18 }
 0xc25   :  { %v12405_v63 = vpack.c.bf16 %v13200_v46, %v13199_v12 }
 0xc26   :  { %v13203_v14 = vpop.permute.xlu1 %13202 }
 0xc27   :  { %v13205_v49 = vunpack.i.h.bf16 %v13203_v14 }
 0xc28   :  { %v13573_v8 = vpop.eup %13572 }
 0xc29   :  { %v13575_v42 = vpop.eup %13574  ;;  %v3261_v9 = vmul.f32 %v13573_v8, %v13565_v59 }
 0xc2a   :  { %v3260_v23 = vmul.f32 %v13575_v42, %v13567_v57  ;;  %v3255_v20 = vpop.xlane.xlu0 %3254  ;;  %v13204_v57 = vunpack.i.l.bf16 %v13203_v14 }
 0xc2b   :  { %13576 = vrcp.f32 %v3255_v20 }
 0xc2c   :  { %11291 = vmatprep.mubr.msk.f32.mxu0 %vm3219_vm7, %v3260_v23  ;;  %v12411_v47 = vpack.c.bf16 %v13205_v49, %v13204_v57 }
 0xc2d   :  { %11292 = vmatmul.mubr.msk.f32.vlgmr.msra.gmra.mrb[22].mxu0 %vm3219_vm7, %v3261_v9 }
 0xc2e   :  { %12404 = vmatpush3.bf16.msra.mxu0 %v15327_v6  ;;  %v3427_v34 = vpop.permute.xlu0 %3426 }
 0xc2f   :  { %12407 = vmatprep.subr.msk.bf16.mxu0 %vm15281_vm6, %v12405_v63 }
 0xc32   :  { %v3518_v53 = vpop.permute.xlu0 %3517 }
 0xc35   :  { %v13577_v27 = vpop.eup %13576 }
 0xc36   :  { %v3263_v50 = vmul.f32 %v13577_v27, %v13569_v52 }
 0xc57   :  { %v3252_v56 = vpop.xlane.xlu1 %3251 }
 0xc58   :  { %13578 = vrcp.f32 %v3252_v56 }
 0xc5b   :  { %v3429_v6 = vpop.permute.xlu1 %3428 }
 0xc5f   :  { %v3520_v52 = vpop.permute.xlu1 %3519 }
 0xc62   :  { %v13579_v2 = vpop.eup %13578 }
 0xc63   :  { %v3262_v59 = vmul.f32 %v13579_v2, %v13571_v16 }
 0xc65   :  { %11298 = vmatprep.mubr.msk.f32.mxu0 %vm3219_vm7, %v3262_v59 }
 0xc66   :  { %11299 = vmatmul.mubr.msk.f32.vlgmr.msra.gmra.mrb[24].mxu0 %vm3219_vm7, %v3263_v50 }
 0xc67   :  { %12410 = vmatpush3.bf16.xpose.msk.msra.mxu0 %vm15281_vm6, %v12405_v63  ;;  %11305 = vmatprep.mubr.msk.f32.mxu0 %vm3044_vm5, %v3427_v34 }
 0xc68   :  { %12413 = vmatprep.subr.msk.bf16.mxu0 %vm15281_vm6, %v12411_v47 }
 0xc6e   :  { %11306 = vmatmul.mubr.msk.f32.vlgmr.msra.gmra.mrb[26].mxu0 %vm3044_vm5, %v3429_v6 }
 0xc6f   :  { %12416 = vmatpush3.bf16.xpose.msk.msra.mxu0 %vm15281_vm6, %v12411_v47  ;;  %11312 = vmatprep.mubr.msk.f32.mxu0 %vm3044_vm5, %v3518_v53 }
 0xc76   :  { %11313 = vmatmul.mubr.msk.f32.vlgmr.msra.gmra.mrb[28].mxu0 %vm3044_vm5, %v3520_v52 }
 0xd00   :  { %v15373_v32 = vpop.f32.mrb[22].mxu0 }
 0xd01   :  { %v15375_v16 = vpop.f32.mrb[23].mxu0 }
 0xd39   :  { %v15377_v17 = vpop.f32.mrb[24].mxu0 }
 0xd3a   :  { %v15379_v51 = vpop.f32.mrb[25].mxu0 }
 0xd41   :  { %v11307_v11 = vpop.f32.mrb[26].mxu0 }
 0xd42   :  { %v3508_v18 = vpop.f32.mrb[27].mxu0  ;;  %v3611_v8 = vsel %vm3219_vm7, %v11307_v11, -inf }
 0xd43   :  { %3612 = vmax.xlane.f32.xlu1 %v3611_v8  ;;  %v3608_v42 = vsel %vm3219_vm7, %v3508_v18, -inf }
 0xd44   :  { %3609 = vmax.xlane.f32.xlu0 %v3608_v42 }
 0xd49   :  { %v11314_v46 = vpop.f32.mrb[28].mxu0 }
 0xd4a   :  { %v3599_v12 = vpop.f32.mrb[29].mxu0  ;;  %v3617_v9 = vsel %vm3219_vm7, %v11314_v46, -inf }
 0xd4b   :  { %v3614_v23 = vsel %vm3219_vm7, %v3599_v12, -inf }
 0xd4c   :  { %3615 = vmax.xlane.f32.xlu0 %v3614_v23 }
 0xd50   :  { %3618 = vmax.xlane.f32.xlu0 %v3617_v9 }
 0xd54   :  { %13207 = vrot.lane.b32.xlu1 %v15321_v33, %s14394_s5 }
 0xdd0   :  { %v3613_v63 = vpop.xlane.xlu1 %3612 }
 0xdd1   :  { %v3621_v14 = vsub.f32 %v11307_v11, %v3613_v63  ;;  %v3610_v20 = vpop.xlane.xlu0 %3609 }
 0xdd2   :  { %v3620_v56 = vsub.f32 %v3508_v18, %v3610_v20 }
 0xdd3   :  { %v3626_v27 = vmul.f32 1.442695, %v3621_v14 }
 0xdd4   :  { %v3624_v2 = vmul.f32 1.442695, %v3620_v56  ;;  %v13208_v49 = vpop.permute.xlu1 %13207 }
 0xdd5   :  { %13580 = vpow2.f32 %v3626_v27  ;;  %v13210_v57 = vunpack.i.h.bf16 %v13208_v49  ;;  %v13209_v59 = vunpack.i.l.bf16 %v13208_v49 }
 0xdd6   :  { %13582 = vpow2.f32 %v3624_v2 }
 0xdd7   :  { %v12417_v50 = vpack.c.bf16 %v13210_v57, %v13209_v59 }
 0xdd9   :  { %12418 = vmatprep.subr.bf16.mxu0 %v12417_v50  ;;  %v3616_v47 = vpop.xlane.xlu0 %3615 }
 0xdda   :  { %12420 = vmatpush3.bf16.msra.mxu0 %v12417_v50 }
 0xddd   :  { %v3619_v34 = vpop.xlane.xlu0 %3618 }
 0xdde   :  { %v3623_v6 = vsub.f32 %v11314_v46, %v3619_v34  ;;  %v3622_v46 = vsub.f32 %v3599_v12, %v3616_v47 }
 0xddf   :  { %v13581_v53 = vpop.eup %13580 }
 0xde0   :  { %v13583_v52 = vpop.eup %13582  ;;  %v3630_v8 = vmul.f32 1.442695, %v3623_v6  ;;  %v3635_v11 = vsel %vm3219_vm7, %v13581_v53, 0.0  ;;  %v3628_v9 = vmul.f32 1.442695, %v3622_v46 }
 0xde1   :  { %3636 = vadd.xlane.f32.xlu0 %v3635_v11  ;;  %v3632_v18 = vsel %vm3219_vm7, %v13583_v52, 0.0 }
 0xde2   :  { %13584 = vpow2.f32 %v3630_v8  ;;  %3633 = vadd.xlane.f32.xlu1 %v3632_v18 }
 0xde3   :  { %13586 = vpow2.f32 %v3628_v9 }
 0xdec   :  { %v13585_v42 = vpop.eup %13584 }
 0xded   :  { %v3641_v23 = vsel %vm3219_vm7, %v13585_v42, 0.0  ;;  %v13587_v63 = vpop.eup %13586 }
 0xdee   :  { %3642 = vadd.xlane.f32.xlu0 %v3641_v23  ;;  %v3638_v14 = vsel %vm3219_vm7, %v13587_v63, 0.0 }
 0xdf3   :  { %13217 = vrot.lane.b32.xlu1 %v15285_v60, %s14393_s3 }
 0xdf7   :  { %13222 = vrot.lane.b32.xlu1 %v15297_v21, %s14393_s3 }
 0xe04   :  { %13212 = vrot.lane.b32.xlu0 %v15329_v55, %s14394_s5 }
 0xe08   :  { %3830 = vrot.lane.b32.xlu0 %v15259_v24, %s14393_s3 }
 0xe0c   :  { %3921 = vrot.lane.b32.xlu0 %v15267_v30, %s14393_s3 }
 0xe1b   :  { %3639 = vadd.xlane.f32.xlu1 %v3638_v14 }
 0xe2c   :  { %3832 = vrot.lane.b32.xlu1 %v15295_v5, %s14393_s3 }
 0xe30   :  { %3923 = vrot.lane.b32.xlu1 %v15309_v22, %s14393_s3 }
 0xe6e   :  { %v3637_v20 = vpop.xlane.xlu0 %3636 }
 0xe6f   :  { %13588 = vrcp.f32 %v3637_v20  ;;  %v3634_v12 = vpop.xlane.xlu1 %3633 }
 0xe70   :  { %13590 = vrcp.f32 %v3634_v12 }
 0xe73   :  { %v13218_v56 = vpop.permute.xlu1 %13217 }
 0xe74   :  { %v13220_v11 = vunpack.i.h.bf16 %v13218_v56  ;;  %v13219_v18 = vunpack.i.l.bf16 %v13218_v56 }
 0xe76   :  { %v12425_v20 = vpack.c.bf16 %v13220_v11, %v13219_v18 }
 0xe77   :  { %v13223_v27 = vpop.permute.xlu1 %13222 }
 0xe78   :  { %v13225_v2 = vunpack.i.h.bf16 %v13223_v27  ;;  %v13224_v49 = vunpack.i.l.bf16 %v13223_v27 }
 0xe79   :  { %v13589_v57 = vpop.eup %13588 }
 0xe7a   :  { %v13591_v59 = vpop.eup %13590  ;;  %v12431_v50 = vpack.c.bf16 %v13225_v2, %v13224_v49  ;;  %v3649_v6 = vmul.f32 %v13589_v57, %v13581_v53 }
 0xe7b   :  { %v3643_v47 = vpop.xlane.xlu0 %3642  ;;  %v3648_v34 = vmul.f32 %v13591_v59, %v13583_v52 }
 0xe7c   :  { %12433 = vmatprep.subr.msk.bf16.mxu1 %vm15281_vm6, %v12431_v50  ;;  %13592 = vrcp.f32 %v3643_v47 }
 0xe7d   :  { %11319 = vmatprep.mubr.msk.f32.mxu0 %vm3219_vm7, %v3648_v34  ;;  %12436 = vmatpush3.bf16.xpose.msk.msra.mxu1 %vm15281_vm6, %v12431_v50 }
 0xe7e   :  { %11320 = vmatmul.mubr.msk.f32.vlgmr.msra.gmra.mrb[30].mxu0 %vm3219_vm7, %v3649_v6 }
 0xe7f   :  { %v13213_v8 = vpop.permute.xlu0 %13212 }
 0xe80   :  { %v13215_v23 = vunpack.i.h.bf16 %v13213_v8  ;;  %v13214_v46 = vunpack.i.l.bf16 %v13213_v8 }
 0xe82   :  { %v12421_v9 = vpack.c.bf16 %v13215_v23, %v13214_v46 }
 0xe83   :  { %v3831_v14 = vpop.permute.xlu0 %3830 }
 0xe84   :  { %12422 = vmatprep.subr.bf16.mxu0 %v12421_v9 }
 0xe85   :  { %12424 = vmatpush3.bf16.msra.mxu0 %v12421_v9 }
 0xe86   :  { %12427 = vmatprep.subr.msk.bf16.mxu0 %vm15281_vm6, %v12425_v20  ;;  %v13593_v56 = vpop.eup %13592 }
 0xe87   :  { %v3922_v53 = vpop.permute.xlu0 %3921  ;;  %v3651_v57 = vmul.f32 %v13593_v56, %v13585_v42 }
 0xe88   :  { %11340 = vmatprep.mubr.msk.f32.mxu1 %vm3044_vm5, %v3922_v53 }
 0xea8   :  { %v3640_v52 = vpop.xlane.xlu1 %3639 }
 0xea9   :  { %13594 = vrcp.f32 %v3640_v52 }
 0xeac   :  { %v3833_v12 = vpop.permute.xlu1 %3832 }
 0xeb0   :  { %v3924_v27 = vpop.permute.xlu1 %3923 }
 0xeb1   :  { %11341 = vmatmul.mubr.msk.f32.vlgmr.msra.gmra.mrb[54].mxu1 %vm3044_vm5, %v3924_v27 }
 0xeb3   :  { %v13595_v2 = vpop.eup %13594 }
 0xeb4   :  { %v3650_v49 = vmul.f32 %v13595_v2, %v13587_v63 }
 0xeb6   :  { %11326 = vmatprep.mubr.msk.f32.mxu0 %vm3219_vm7, %v3650_v49 }
 0xeb7   :  { %11327 = vmatmul.mubr.msk.f32.vlgmr.msra.gmra.mrb[32].mxu0 %vm3219_vm7, %v3651_v57 }
 0xeb8   :  { %12430 = vmatpush3.bf16.xpose.msk.msra.mxu0 %vm15281_vm6, %v12425_v20  ;;  %11333 = vmatprep.mubr.msk.f32.mxu0 %vm3044_vm5, %v3831_v14 }
 0xebf   :  { %11334 = vmatmul.mubr.msk.f32.vlgmr.msra.gmra.mrb[34].mxu0 %vm3044_vm5, %v3833_v12 }
 0xf51   :  { %v15421_v59 = vpop.f32.mrb[30].mxu0 }
 0xf52   :  { %v15423_v50 = vpop.f32.mrb[31].mxu0 }
 0xf84   :  { %v11342_v47 = vpop.f32.mrb[54].mxu1 }
 0xf85   :  { %v4003_v34 = vpop.f32.mrb[55].mxu1  ;;  %v4021_v46 = vsel %vm3219_vm7, %v11342_v47, -inf }
 0xf86   :  { %v4018_v23 = vsel %vm3219_vm7, %v4003_v34, -inf }
 0xf8a   :  { %v15425_v6 = vpop.f32.mrb[32].mxu0 }
 0xf8b   :  { %v15427_v42 = vpop.f32.mrb[33].mxu0 }
 0xf92   :  { %v11335_v63 = vpop.f32.mrb[34].mxu0 }
 0xf93   :  { %v3912_v8 = vpop.f32.mrb[35].mxu0  ;;  %v4015_v11 = vsel %vm3219_vm7, %v11335_v63, -inf }
 0xf94   :  { %4016 = vmax.xlane.f32.xlu1 %v4015_v11  ;;  %v4012_v18 = vsel %vm3219_vm7, %v3912_v8, -inf }
 0xf95   :  { %4013 = vmax.xlane.f32.xlu0 %v4012_v18 }
 0xf99   :  { %4019 = vmax.xlane.f32.xlu0 %v4018_v23 }
 0xf9d   :  { %4022 = vmax.xlane.f32.xlu0 %v4021_v46 }
0x1021   :  { %v4017_v14 = vpop.xlane.xlu1 %4016 }
0x1022   :  { %v4014_v9 = vpop.xlane.xlu0 %4013  ;;  %v4025_v52 = vsub.f32 %v11335_v63, %v4017_v14 }
0x1024   :  { %v4030_v2 = vmul.f32 1.442695, %v4025_v52 }
0x1026   :  { %v4020_v20 = vpop.xlane.xlu0 %4019 }
0x1027   :  { %v4026_v53 = vsub.f32 %v4003_v34, %v4020_v20 }
0x1029   :  { %v4032_v12 = vmul.f32 1.442695, %v4026_v53 }
0x102a   :  { %v4023_v27 = vpop.xlane.xlu0 %4022 }
0x102b   :  { %13596 = vpow2.f32 %v4032_v12  ;;  %v4027_v56 = vsub.f32 %v11342_v47, %v4023_v27  ;;  %v4024_v47 = vsub.f32 %v3912_v8, %v4014_v9 }
0x102d   :  { %v4034_v49 = vmul.f32 1.442695, %v4027_v56  ;;  %v4028_v63 = vmul.f32 1.442695, %v4024_v47 }
0x102f   :  { %13598 = vpow2.f32 %v4034_v49 }
0x1030   :  { %13600 = vpow2.f32 %v4030_v2 }
0x1031   :  { %13602 = vpow2.f32 %v4028_v63 }
0x1035   :  { %v13597_v57 = vpop.eup %13596 }
0x1036   :  { %v4042_v11 = vsel %vm3219_vm7, %v13597_v57, 0.0 }
0x1037   :  { %4043 = vadd.xlane.f32.xlu1 %v4042_v11 }
0x1039   :  { %v13599_v18 = vpop.eup %13598 }
0x103a   :  { %v4045_v23 = vsel %vm3219_vm7, %v13599_v18, 0.0  ;;  %v15435_v46 = vpop.eup %13600 }
0x103b   :  { %4046 = vadd.xlane.f32.xlu0 %v4045_v23  ;;  %v4039_v34 = vsel %vm3219_vm7, %v15435_v46, 0.0  ;;  %v13603_v14 = vpop.eup %13602 }
0x103c   :  { %v4036_v20 = vsel %vm3219_vm7, %v13603_v14, 0.0 }
0x103f   :  { %4040 = vadd.xlane.f32.xlu0 %v4039_v34 }
0x1048   :  { %13227 = vrot.lane.b32.xlu1 %v15321_v33, %s14393_s3 }
0x104c   :  { %13237 = vrot.lane.b32.xlu1 %v15285_v60, %s14395_s13 }
0x1050   :  { %13242 = vrot.lane.b32.xlu1 %v15297_v21, %s14395_s13 }
0x1055   :  { %13232 = vrot.lane.b32.xlu0 %v15329_v55, %s14393_s3 }
0x1059   :  { %4230 = vrot.lane.b32.xlu0 %v15259_v24, %s14395_s13 }
0x105d   :  { %4321 = vrot.lane.b32.xlu0 %v15267_v30, %s14395_s13 }
0x1074   :  { %4037 = vadd.xlane.f32.xlu1 %v4036_v20 }
0x1085   :  { %4232 = vrot.lane.b32.xlu1 %v15295_v5, %s14395_s13 }
0x1089   :  { %4323 = vrot.lane.b32.xlu1 %v15309_v22, %s14395_s13 }
0x10c4   :  { %v4044_v60 = vpop.xlane.xlu1 %4043 }
0x10c5   :  { %13604 = vrcp.f32 %v4044_v60 }
0x10c8   :  { %v13228_v21 = vpop.permute.xlu1 %13227  ;;  %v4047_v24 = vpop.xlane.xlu0 %4046 }
0x10c9   :  { %v13230_v53 = vunpack.i.h.bf16 %v13228_v21  ;;  %v13229_v52 = vunpack.i.l.bf16 %v13228_v21  ;;  %13606 = vrcp.f32 %v4047_v24 }
0x10cb   :  { %v12437_v30 = vpack.c.bf16 %v13230_v53, %v13229_v52 }
0x10cc   :  { %v13238_v8 = vpop.permute.xlu1 %13237  ;;  %v4041_v9 = vpop.xlane.xlu0 %4040 }
0x10cd   :  { %v13240_v12 = vunpack.i.h.bf16 %v13238_v8  ;;  %v13239_v27 = vunpack.i.l.bf16 %v13238_v8  ;;  %12438 = vmatprep.subr.bf16.mxu0 %v12437_v30  ;;  %13608 = vrcp.f32 %v4041_v9 }
0x10ce   :  { %12440 = vmatpush3.bf16.msra.mxu0 %v12437_v30 }
0x10cf   :  { %v13605_v56 = vpop.eup %13604  ;;  %v12445_v2 = vpack.c.bf16 %v13240_v12, %v13239_v27 }
0x10d0   :  { %v13243_v5 = vpop.permute.xlu1 %13242  ;;  %v13233_v49 = vpop.permute.xlu0 %13232  ;;  %v4054_v11 = vmul.f32 %v13605_v56, %v13597_v57 }
0x10d1   :  { %v13245_v22 = vunpack.i.h.bf16 %v13243_v5  ;;  %v13244_v23 = vunpack.i.l.bf16 %v13243_v5  ;;  %v13235_v34 = vunpack.i.h.bf16 %v13233_v49  ;;  %v13234_v47 = vunpack.i.l.bf16 %v13233_v49  ;;  %12447 = vmatprep.subr.msk.bf16.mxu0 %vm15281_vm6, %v12445_v2 }
0x10d2   :  { %11354 = vmatprep.mubr.msk.f32.mxu1 %vm3219_vm7, %v4054_v11 }
0x10d3   :  { %v12441_v63 = vpack.c.bf16 %v13235_v34, %v13234_v47  ;;  %v13607_v20 = vpop.eup %13606  ;;  %v12451_v21 = vpack.c.bf16 %v13245_v22, %v13244_v23 }
0x10d4   :  { %v4231_v60 = vpop.permute.xlu0 %4230  ;;  %v4055_v24 = vmul.f32 %v13607_v20, %v13599_v18 }
0x10d5   :  { %12442 = vmatprep.subr.bf16.mxu1 %v12441_v63 }
0x10d6   :  { %12444 = vmatpush3.bf16.msra.mxu1 %v12441_v63 }
0x10d7   :  { %12453 = vmatprep.subr.msk.bf16.mxu1 %vm15281_vm6, %v12451_v21  ;;  %v13609_v8 = vpop.eup %13608 }
0x10d8   :  { %v4322_v57 = vpop.permute.xlu0 %4321  ;;  %v4053_v18 = vmul.f32 %v13609_v8, %v15435_v46 }
0x10d9   :  { %11355 = vmatmul.mubr.msk.f32.vlgmr.msra.gmra.mrb[56].mxu1 %vm3219_vm7, %v4055_v24 }
0x10da   :  { %11368 = vmatprep.mubr.msk.f32.mxu1 %vm3044_vm5, %v4322_v57 }
0x10df   :  { %12456 = vmatpush3.bf16.xpose.msk.msra.mxu1 %vm15281_vm6, %v12451_v21 }
0x1101   :  { %v4038_v53 = vpop.xlane.xlu1 %4037 }
0x1102   :  { %13610 = vrcp.f32 %v4038_v53 }
0x1105   :  { %v4233_v52 = vpop.permute.xlu1 %4232 }
0x1109   :  { %v4324_v30 = vpop.permute.xlu1 %4323 }
0x110a   :  { %11369 = vmatmul.mubr.msk.f32.vlgmr.msra.gmra.mrb[58].mxu1 %vm3044_vm5, %v4324_v30 }
0x110c   :  { %v13611_v12 = vpop.eup %13610 }
0x110d   :  { %v4052_v27 = vmul.f32 %v13611_v12, %v13603_v14 }
0x110f   :  { %11347 = vmatprep.mubr.msk.f32.mxu0 %vm3219_vm7, %v4052_v27 }
0x1110   :  { %11348 = vmatmul.mubr.msk.f32.vlgmr.msra.gmra.mrb[36].mxu0 %vm3219_vm7, %v4053_v18 }
0x1111   :  { %12450 = vmatpush3.bf16.xpose.msk.msra.mxu0 %vm15281_vm6, %v12445_v2  ;;  %11361 = vmatprep.mubr.msk.f32.mxu0 %vm3044_vm5, %v4231_v60 }
0x1118   :  { %11362 = vmatmul.mubr.msk.f32.vlgmr.msra.gmra.mrb[38].mxu0 %vm3044_vm5, %v4233_v52 }
0x11ac   :  { %v15473_v9 = vpop.f32.mrb[56].mxu1 }
0x11ad   :  { %v15475_v56 = vpop.f32.mrb[57].mxu1 }
0x11dd   :  { %v11370_v5 = vpop.f32.mrb[58].mxu1 }
0x11de   :  { %v4403_v49 = vpop.f32.mrb[59].mxu1  ;;  %v4421_v47 = vsel %vm3219_vm7, %v11370_v5, -inf }
0x11df   :  { %v4418_v34 = vsel %vm3219_vm7, %v4403_v49, -inf }
0x11e3   :  { %v15477_v14 = vpop.f32.mrb[36].mxu0 }
0x11e4   :  { %v15479_v46 = vpop.f32.mrb[37].mxu0 }
0x11eb   :  { %v11363_v11 = vpop.f32.mrb[38].mxu0 }
0x11ec   :  { %v4312_v22 = vpop.f32.mrb[39].mxu0  ;;  %v4415_v23 = vsel %vm3219_vm7, %v11363_v11, -inf }
0x11ed   :  { %4416 = vmax.xlane.f32.xlu1 %v4415_v23  ;;  %v4412_v2 = vsel %vm3219_vm7, %v4312_v22, -inf }
0x11ee   :  { %4413 = vmax.xlane.f32.xlu0 %v4412_v2 }
0x11f2   :  { %4419 = vmax.xlane.f32.xlu0 %v4418_v34 }
0x11f6   :  { %4422 = vmax.xlane.f32.xlu0 %v4421_v47 }
0x127a   :  { %v4417_v60 = vpop.xlane.xlu1 %4416 }
0x127b   :  { %v4414_v63 = vpop.xlane.xlu0 %4413  ;;  %v4425_v57 = vsub.f32 %v11363_v11, %v4417_v60 }
0x127c   :  { %v4424_v20 = vsub.f32 %v4312_v22, %v4414_v63 }
0x127d   :  { %v4430_v12 = vmul.f32 1.442695, %v4425_v57 }
0x127e   :  { %v4428_v53 = vmul.f32 1.442695, %v4424_v20 }
0x127f   :  { %v4420_v21 = vpop.xlane.xlu0 %4419 }
0x1280   :  { %v4426_v24 = vsub.f32 %v4403_v49, %v4420_v21 }
0x1282   :  { %v4432_v52 = vmul.f32 1.442695, %v4426_v24 }
0x1283   :  { %v4423_v30 = vpop.xlane.xlu0 %4422 }
0x1284   :  { %13612 = vpow2.f32 %v4432_v52  ;;  %v4427_v8 = vsub.f32 %v11370_v5, %v4423_v30 }
0x1285   :  { %13614 = vpow2.f32 %v4428_v53 }
0x1286   :  { %v4434_v27 = vmul.f32 1.442695, %v4427_v8 }
0x1288   :  { %13616 = vpow2.f32 %v4434_v27 }
0x1289   :  { %13618 = vpow2.f32 %v4430_v12 }
0x128e   :  { %v13613_v18 = vpop.eup %13612 }
0x128f   :  { %v4442_v23 = vsel %vm3219_vm7, %v13613_v18, 0.0  ;;  %v13615_v2 = vpop.eup %13614 }
0x1290   :  { %4443 = vadd.xlane.f32.xlu1 %v4442_v23  ;;  %v4436_v34 = vsel %vm3219_vm7, %v13615_v2, 0.0 }
0x1292   :  { %v13617_v22 = vpop.eup %13616 }
0x1293   :  { %v4445_v49 = vsel %vm3219_vm7, %v13617_v22, 0.0  ;;  %v13619_v11 = vpop.eup %13618 }
0x1294   :  { %4437 = vadd.xlane.f32.xlu1 %v4436_v34  ;;  %4446 = vadd.xlane.f32.xlu0 %v4445_v49  ;;  %v4439_v5 = vsel %vm3219_vm7, %v13619_v11, 0.0 }
0x1298   :  { %4440 = vadd.xlane.f32.xlu0 %v4439_v5 }
0x12a5   :  { %13247 = vrot.lane.b32.xlu1 %v15321_v33, %s14395_s13  ;;  %v2746_v33 = vrot.slane %v15253_v44, %v14743_v43 }
0x12a7   :  { %v2850_v49 = vadd.f32 %v15265_v29, %v2746_v33 }
0x12ae   :  { %13252 = vrot.lane.b32.xlu0 %v15329_v55, %s14395_s13 }
0x131d   :  { %v4444_v47 = vpop.xlane.xlu1 %4443 }
0x131e   :  { %13620 = vrcp.f32 %v4444_v47 }
0x1321   :  { %v4438_v63 = vpop.xlane.xlu1 %4437  ;;  %v4447_v20 = vpop.xlane.xlu0 %4446 }
0x1322   :  { %13622 = vrcp.f32 %v4438_v63  ;;  %v15505_v63 = vmul.f32 0.17677669, %v2850_v49 }
0x1323   :  { %13624 = vrcp.f32 %v4447_v20 }
0x1325   :  { %v13248_v60 = vpop.permute.xlu1 %13247  ;;  %v4441_v21 = vpop.xlane.xlu0 %4440 }
0x1326   :  { %v13250_v24 = vunpack.i.h.bf16 %v13248_v60  ;;  %v13249_v57 = vunpack.i.l.bf16 %v13248_v60  ;;  %13626 = vrcp.f32 %v4441_v21 }
0x1328   :  { %v13621_v53 = vpop.eup %13620  ;;  %v12457_v52 = vpack.c.bf16 %v13250_v24, %v13249_v57 }
0x1329   :  { %v13253_v30 = vpop.permute.xlu0 %13252  ;;  %v4454_v8 = vmul.f32 %v13621_v53, %v13613_v18  ;;  %v2838_v18 = vadd.f32 %v15257_v45, %v2746_v33  ;;  %v2844_v45 = vadd.f32 %v15261_v28, %v2746_v33 }
0x132a   :  { %v13255_v12 = vunpack.i.h.bf16 %v13253_v30  ;;  %v13254_v55 = vunpack.i.l.bf16 %v13253_v30  ;;  %12458 = vmatprep.subr.bf16.mxu0 %v12457_v52 }
0x132b   :  { %12460 = vmatpush3.bf16.msra.mxu0 %v12457_v52  ;;  %11382 = vmatprep.mubr.msk.f32.mxu1 %vm3219_vm7, %v4454_v8  ;;  %v15507_v60 = vmul.f32 0.17677669, %v2838_v18  ;;  %v15523_v29 = vmul.f32 0.17677669, %v2844_v45 }
0x132c   :  { %v13623_v27 = vpop.eup %13622  ;;  %12467 = vmatprep.subr.msk.bf16.mxu0 %vm15281_vm6, %v15287_v10  ;;  %v12461_v23 = vpack.c.bf16 %v13255_v12, %v13254_v55 }
0x132d   :  { %v13625_v34 = vpop.eup %13624  ;;  %v4452_v5 = vmul.f32 %v13623_v27, %v13615_v2  ;;  %v2856_v2 = vadd.f32 %v15269_v61, %v2746_v33 }
0x132e   :  { %12462 = vmatprep.subr.bf16.mxu1 %v12461_v23  ;;  %v4455_v47 = vmul.f32 %v13625_v34, %v13617_v22 }
0x132f   :  { %11375 = vmatprep.mubr.msk.f32.mxu0 %vm3219_vm7, %v4452_v5  ;;  %12464 = vmatpush3.bf16.msra.mxu1 %v12461_v23 }
0x1330   :  { %v13627_v44 = vpop.eup %13626  ;;  %12473 = vmatprep.subr.msk.bf16.mxu1 %vm15281_vm6, %v15299_v3 }
0x1331   :  { %v4453_v20 = vmul.f32 %v13627_v44, %v13619_v11 }
0x1332   :  { %11383 = vmatmul.mubr.msk.f32.vlgmr.msra.gmra.mrb[60].mxu1 %vm3219_vm7, %v4455_v47 }
0x1333   :  { %11376 = vmatmul.mubr.msk.f32.vlgmr.msra.gmra.mrb[40].mxu0 %vm3219_vm7, %v4453_v20  ;;  %11396 = vmatprep.mubr.msk.f32.mxu1 %vm3044_vm5, %v15505_v63 }
0x1334   :  { %12470 = vmatpush3.bf16.xpose.msk.msra.mxu0 %vm15281_vm6, %v15287_v10  ;;  %11389 = vmatprep.mubr.msk.f32.mxu0 %vm3044_vm5, %v15507_v60  ;;  %v15530_v10 = vmul.f32 0.17677669, %v2856_v2 }
0x1335   :  { %12478 = vmatprep.subr.bf16.mxu0 %v15323_v38 }
0x1338   :  { %12476 = vmatpush3.bf16.xpose.msk.msra.mxu1 %vm15281_vm6, %v15299_v3 }
0x1339   :  { %12482 = vmatprep.subr.bf16.mxu1 %v15331_v62 }
0x133b   :  { %11390 = vmatmul.mubr.msk.f32.vlgmr.msra.gmra.mrb[42].mxu0 %vm3044_vm5, %v15523_v29 }
0x133c   :  { %12480 = vmatpush3.bf16.msra.mxu0 %v15323_v38 }
0x133f   :  { %11397 = vmatmul.mubr.msk.f32.vlgmr.msra.gmra.mrb[62].mxu1 %vm3044_vm5, %v15530_v10 }
0x1340   :  { %12484 = vmatpush3.bf16.msra.mxu1 %v15331_v62 }
0x1405   :  { %v15535_v28 = vpop.f32.mrb[60].mxu1 }
0x1406   :  { %v15537_v3 = vpop.f32.mrb[40].mxu0  ;;  %v15539_v22 = vpop.f32.mrb[61].mxu1 }
0x1407   :  { %v15541_v61 = vpop.f32.mrb[41].mxu0 }
0x140e   :  { %v11391_v11 = vpop.f32.mrb[42].mxu0 }
0x140f   :  { %v4708_v21 = vpop.f32.mrb[43].mxu0  ;;  %v4807_v24 = vsel %vm3219_vm7, %v11391_v11, -inf }
0x1410   :  { %4808 = vmax.xlane.f32.xlu0 %v4807_v24  ;;  %v4804_v38 = vsel %vm3219_vm7, %v4708_v21, -inf }
0x1411   :  { %4805 = vmax.xlane.f32.xlu1 %v4804_v38 }
0x1412   :  { %v11398_v57 = vpop.f32.mrb[62].mxu1 }
0x1413   :  { %v4795_v53 = vpop.f32.mrb[63].mxu1  ;;  %v4813_v62 = vsel %vm3219_vm7, %v11398_v57, -inf }
0x1414   :  { %4814 = vmax.xlane.f32.xlu0 %v4813_v62  ;;  %v4810_v52 = vsel %vm3219_vm7, %v4795_v53, -inf }
0x1415   :  { %4811 = vmax.xlane.f32.xlu1 %v4810_v52 }
0x149d   :  { %v4809_v30 = vpop.xlane.xlu0 %4808 }
0x149e   :  { %v4817_v8 = vsub.f32 %v11391_v11, %v4809_v30  ;;  %v4806_v33 = vpop.xlane.xlu1 %4805 }
0x149f   :  { %v4816_v11 = vsub.f32 %v4708_v21, %v4806_v33 }
0x14a0   :  { %v4822_v12 = vmul.f32 1.442695, %v4817_v8 }
0x14a1   :  { %v4815_v55 = vpop.xlane.xlu0 %4814  ;;  %v4820_v24 = vmul.f32 1.442695, %v4816_v11 }
0x14a2   :  { %13628 = vpow2.f32 %v4822_v12  ;;  %v4819_v27 = vsub.f32 %v11398_v57, %v4815_v55  ;;  %v4812_v23 = vpop.xlane.xlu1 %4811 }
0x14a3   :  { %v4818_v34 = vsub.f32 %v4795_v53, %v4812_v23 }
0x14a4   :  { %v4826_v49 = vmul.f32 1.442695, %v4819_v27 }
0x14a5   :  { %v4824_v5 = vmul.f32 1.442695, %v4818_v34 }
0x14a6   :  { %13630 = vpow2.f32 %v4826_v49 }
0x14a7   :  { %13632 = vpow2.f32 %v4824_v5 }
0x14a8   :  { %13634 = vpow2.f32 %v4820_v24 }
0x14ac   :  { %v13629_v18 = vpop.eup %13628 }
0x14ad   :  { %v4831_v44 = vsel %vm3219_vm7, %v13629_v18, 0.0 }
0x14ae   :  { %4832 = vadd.xlane.f32.xlu0 %v4831_v44 }
0x14b0   :  { %v13631_v47 = vpop.eup %13630 }
0x14b1   :  { %v13633_v20 = vpop.eup %13632  ;;  %v4837_v45 = vsel %vm3219_vm7, %v13631_v47, 0.0 }
0x14b2   :  { %4838 = vadd.xlane.f32.xlu0 %v4837_v45  ;;  %v4834_v2 = vsel %vm3219_vm7, %v13633_v20, 0.0  ;;  %v13635_v38 = vpop.eup %13634 }
0x14b3   :  { %4835 = vadd.xlane.f32.xlu1 %v4834_v2  ;;  %v4828_v57 = vsel %vm3219_vm7, %v13635_v38, 0.0 }
0x14c4   :  { %13257 = vrot.lane.b32.xlu1 %v15289_v13, %s14394_s5 }
0x14c8   :  { %13262 = vrot.lane.b32.xlu0 %v15301_v35, %s14394_s5  ;;  %5010 = vrot.lane.b32.xlu1 %v15507_v60, %s14394_s5 }
0x14cc   :  { %5101 = vrot.lane.b32.xlu0 %v15505_v63, %s14394_s5 }
0x14ec   :  { %4829 = vadd.xlane.f32.xlu1 %v4828_v57 }
0x14fd   :  { %5012 = vrot.lane.b32.xlu1 %v15523_v29, %s14394_s5 }
0x1501   :  { %5103 = vrot.lane.b32.xlu1 %v15530_v10, %s14394_s5 }
0x153b   :  { %v4833_v53 = vpop.xlane.xlu0 %4832 }
0x153f   :  { %v4839_v62 = vpop.xlane.xlu0 %4838 }
0x1540   :  { %13636 = vrcp.f32 %v4839_v62  ;;  %v4836_v52 = vpop.xlane.xlu1 %4835 }
0x1541   :  { %13638 = vrcp.f32 %v4836_v52 }
0x1542   :  { %13640 = vrcp.f32 %v4833_v53 }
0x1543   :  { %v13263_v30 = vpop.permute.xlu0 %13262 }
0x1544   :  { %v13265_v8 = vunpack.i.h.bf16 %v13263_v30  ;;  %v13264_v21 = vunpack.i.l.bf16 %v13263_v30  ;;  %v13258_v33 = vpop.permute.xlu1 %13257 }
0x1545   :  { %v13260_v12 = vunpack.i.h.bf16 %v13258_v33  ;;  %v13259_v55 = vunpack.i.l.bf16 %v13258_v33 }
0x1546   :  { %v12491_v27 = vpack.c.bf16 %v13265_v8, %v13264_v21 }
0x1547   :  { %v12485_v23 = vpack.c.bf16 %v13260_v12, %v13259_v55  ;;  %v5102_v45 = vpop.permute.xlu0 %5101 }
0x1548   :  { %12493 = vmatprep.subr.msk.bf16.mxu1 %vm15281_vm6, %v12491_v27  ;;  %v5011_v2 = vpop.permute.xlu1 %5010 }
0x1549   :  { %12487 = vmatprep.subr.msk.bf16.mxu0 %vm15281_vm6, %v12485_v23 }
0x154a   :  { %v13637_v34 = vpop.eup %13636 }
0x154b   :  { %v13639_v49 = vpop.eup %13638  ;;  %v4847_v44 = vmul.f32 %v13637_v34, %v13631_v47 }
0x154c   :  { %v4846_v5 = vmul.f32 %v13639_v49, %v13633_v20  ;;  %v13641_v20 = vpop.eup %13640 }
0x154d   :  { %v4845_v52 = vmul.f32 %v13641_v20, %v13629_v18 }
0x154e   :  { %11410 = vmatprep.mubr.msk.f32.mxu1 %vm3219_vm7, %v4846_v5 }
0x154f   :  { %11411 = vmatmul.mubr.msk.f32.vlgmr.msra.gmra.mrb[64].mxu1 %vm3219_vm7, %v4847_v44 }
0x1550   :  { %12496 = vmatpush3.bf16.xpose.msk.msra.mxu1 %vm15281_vm6, %v12491_v27  ;;  %11424 = vmatprep.mubr.msk.f32.mxu1 %vm3044_vm5, %v5102_v45 }
0x1579   :  { %v4830_v11 = vpop.xlane.xlu1 %4829 }
0x157a   :  { %13642 = vrcp.f32 %v4830_v11 }
0x157d   :  { %v5013_v24 = vpop.permute.xlu1 %5012 }
0x1581   :  { %v5104_v57 = vpop.permute.xlu1 %5103 }
0x1582   :  { %11425 = vmatmul.mubr.msk.f32.vlgmr.msra.gmra.mrb[66].mxu1 %vm3044_vm5, %v5104_v57 }
0x1584   :  { %v13643_v47 = vpop.eup %13642 }
0x1585   :  { %v4844_v62 = vmul.f32 %v13643_v47, %v13635_v38 }
0x1587   :  { %11403 = vmatprep.mubr.msk.f32.mxu0 %vm3219_vm7, %v4844_v62 }
0x1588   :  { %11404 = vmatmul.mubr.msk.f32.vlgmr.msra.gmra.mrb[44].mxu0 %vm3219_vm7, %v4845_v52 }
0x1589   :  { %12490 = vmatpush3.bf16.xpose.msk.msra.mxu0 %vm15281_vm6, %v12485_v23  ;;  %11417 = vmatprep.mubr.msk.f32.mxu0 %vm3044_vm5, %v5011_v2 }
0x1590   :  { %11418 = vmatmul.mubr.msk.f32.vlgmr.msra.gmra.mrb[46].mxu0 %vm3044_vm5, %v5013_v24 }
0x1622   :  { %v15579_v53 = vpop.f32.mrb[64].mxu1 }
0x1623   :  { %v15581_v30 = vpop.f32.mrb[65].mxu1 }
0x1655   :  { %v11426_v8 = vpop.f32.mrb[66].mxu1 }
0x1656   :  { %v5183_v21 = vpop.f32.mrb[67].mxu1  ;;  %v5201_v34 = vsel %vm3219_vm7, %v11426_v8, -inf }
0x1657   :  { %v5198_v23 = vsel %vm3219_vm7, %v5183_v21, -inf }
0x165b   :  { %v15583_v33 = vpop.f32.mrb[44].mxu0 }
0x165c   :  { %v15585_v18 = vpop.f32.mrb[45].mxu0 }
0x1663   :  { %v11419_v38 = vpop.f32.mrb[46].mxu0 }
0x1664   :  { %v5092_v12 = vpop.f32.mrb[47].mxu0  ;;  %v5195_v55 = vsel %vm3219_vm7, %v11419_v38, -inf }
0x1665   :  { %5196 = vmax.xlane.f32.xlu1 %v5195_v55  ;;  %v5192_v27 = vsel %vm3219_vm7, %v5092_v12, -inf }
0x1666   :  { %5193 = vmax.xlane.f32.xlu0 %v5192_v27 }
0x166a   :  { %5199 = vmax.xlane.f32.xlu0 %v5198_v23 }
0x166e   :  { %5202 = vmax.xlane.f32.xlu0 %v5201_v34 }
0x16f2   :  { %v5197_v5 = vpop.xlane.xlu1 %5196 }
0x16f3   :  { %v5194_v49 = vpop.xlane.xlu0 %5193  ;;  %v5205_v2 = vsub.f32 %v11419_v38, %v5197_v5 }
0x16f5   :  { %v5210_v20 = vmul.f32 1.442695, %v5205_v2 }
0x16f7   :  { %v5200_v44 = vpop.xlane.xlu0 %5199 }
0x16f8   :  { %v5206_v45 = vsub.f32 %v5183_v21, %v5200_v44 }
0x16fa   :  { %v5212_v11 = vmul.f32 1.442695, %v5206_v45 }
0x16fb   :  { %v5203_v24 = vpop.xlane.xlu0 %5202 }
0x16fc   :  { %13644 = vpow2.f32 %v5212_v11  ;;  %v5207_v57 = vsub.f32 %v11426_v8, %v5203_v24  ;;  %v5204_v8 = vsub.f32 %v5092_v12, %v5194_v49 }
0x16fe   :  { %v5214_v47 = vmul.f32 1.442695, %v5207_v57  ;;  %v5208_v38 = vmul.f32 1.442695, %v5204_v8 }
0x1700   :  { %13646 = vpow2.f32 %v5214_v47 }
0x1701   :  { %13648 = vpow2.f32 %v5210_v20 }
0x1702   :  { %13650 = vpow2.f32 %v5208_v38 }
0x1706   :  { %v13645_v62 = vpop.eup %13644 }
0x1707   :  { %v5222_v52 = vsel %vm3219_vm7, %v13645_v62, 0.0 }
0x1708   :  { %5223 = vadd.xlane.f32.xlu1 %v5222_v52 }
0x170a   :  { %v13647_v55 = vpop.eup %13646 }
0x170b   :  { %v5225_v27 = vsel %vm3219_vm7, %v13647_v55, 0.0  ;;  %v15593_v23 = vpop.eup %13648 }
0x170c   :  { %5226 = vadd.xlane.f32.xlu0 %v5225_v27  ;;  %v5219_v21 = vsel %vm3219_vm7, %v15593_v23, 0.0  ;;  %v13651_v34 = vpop.eup %13650 }
0x170d   :  { %v5216_v5 = vsel %vm3219_vm7, %v13651_v34, 0.0 }
0x1710   :  { %5220 = vadd.xlane.f32.xlu0 %v5219_v21 }
0x1719   :  { %13267 = vrot.lane.b32.xlu1 %v15325_v25, %s14394_s5 }
0x171d   :  { %13277 = vrot.lane.b32.xlu1 %v15289_v13, %s14393_s3 }
0x1721   :  { %13282 = vrot.lane.b32.xlu1 %v15301_v35, %s14393_s3 }
0x1726   :  { %13272 = vrot.lane.b32.xlu0 %v15333_v15, %s14394_s5 }
0x172a   :  { %5414 = vrot.lane.b32.xlu0 %v15507_v60, %s14393_s3 }
0x172e   :  { %5505 = vrot.lane.b32.xlu0 %v15505_v63, %s14393_s3 }
0x1745   :  { %5217 = vadd.xlane.f32.xlu1 %v5216_v5 }
0x1756   :  { %5416 = vrot.lane.b32.xlu1 %v15523_v29, %s14393_s3 }
0x175a   :  { %5507 = vrot.lane.b32.xlu1 %v15530_v10, %s14393_s3 }
0x1795   :  { %v5224_v44 = vpop.xlane.xlu1 %5223 }
0x1796   :  { %13652 = vrcp.f32 %v5224_v44 }
0x1799   :  { %v13268_v45 = vpop.permute.xlu1 %13267  ;;  %v5227_v2 = vpop.xlane.xlu0 %5226 }
0x179a   :  { %v13270_v11 = vunpack.i.h.bf16 %v13268_v45  ;;  %v13269_v24 = vunpack.i.l.bf16 %v13268_v45  ;;  %13654 = vrcp.f32 %v5227_v2 }
0x179c   :  { %v12497_v12 = vpack.c.bf16 %v13270_v11, %v13269_v24 }
0x179d   :  { %v13278_v49 = vpop.permute.xlu1 %13277  ;;  %v5221_v57 = vpop.xlane.xlu0 %5220 }
0x179e   :  { %v13280_v20 = vunpack.i.h.bf16 %v13278_v49  ;;  %v13279_v47 = vunpack.i.l.bf16 %v13278_v49  ;;  %12498 = vmatprep.subr.bf16.mxu0 %v12497_v12  ;;  %13656 = vrcp.f32 %v5221_v57 }
0x179f   :  { %12500 = vmatpush3.bf16.msra.mxu0 %v12497_v12 }
0x17a0   :  { %v13653_v52 = vpop.eup %13652  ;;  %v12505_v27 = vpack.c.bf16 %v13280_v20, %v13279_v47 }
0x17a1   :  { %v13283_v21 = vpop.permute.xlu1 %13282  ;;  %v13273_v8 = vpop.permute.xlu0 %13272  ;;  %v5234_v38 = vmul.f32 %v13653_v52, %v13645_v62 }
0x17a2   :  { %v13285_v5 = vunpack.i.h.bf16 %v13283_v21  ;;  %v13284_v37 = vunpack.i.l.bf16 %v13283_v21  ;;  %v13275_v44 = vunpack.i.h.bf16 %v13273_v8  ;;  %v13274_v4 = vunpack.i.l.bf16 %v13273_v8  ;;  %12507 = vmatprep.subr.msk.bf16.mxu0 %vm15281_vm6, %v12505_v27 }
0x17a3   :  { %11438 = vmatprep.mubr.msk.f32.mxu1 %vm3219_vm7, %v5234_v38 }
0x17a4   :  { %v12501_v45 = vpack.c.bf16 %v13275_v44, %v13274_v4  ;;  %v13655_v2 = vpop.eup %13654  ;;  %v12511_v24 = vpack.c.bf16 %v13285_v5, %v13284_v37 }
0x17a5   :  { %v5415_v11 = vpop.permute.xlu0 %5414  ;;  %v5235_v12 = vmul.f32 %v13655_v2, %v13647_v55 }
0x17a6   :  { %12502 = vmatprep.subr.bf16.mxu1 %v12501_v45 }
0x17a7   :  { %12504 = vmatpush3.bf16.msra.mxu1 %v12501_v45 }
0x17a8   :  { %12513 = vmatprep.subr.msk.bf16.mxu1 %vm15281_vm6, %v12511_v24  ;;  %v13657_v37 = vpop.eup %13656 }
0x17a9   :  { %v5506_v62 = vpop.permute.xlu0 %5505  ;;  %v5233_v55 = vmul.f32 %v13657_v37, %v15593_v23 }
0x17aa   :  { %11439 = vmatmul.mubr.msk.f32.vlgmr.msra.gmra.mrb[68].mxu1 %vm3219_vm7, %v5235_v12 }
0x17ab   :  { %11452 = vmatprep.mubr.msk.f32.mxu1 %vm3044_vm5, %v5506_v62 }
0x17b0   :  { %12516 = vmatpush3.bf16.xpose.msk.msra.mxu1 %vm15281_vm6, %v12511_v24 }
0x17d2   :  { %v5218_v49 = vpop.xlane.xlu1 %5217 }
0x17d3   :  { %13658 = vrcp.f32 %v5218_v49 }
0x17d6   :  { %v5417_v4 = vpop.permute.xlu1 %5416 }
0x17da   :  { %v5508_v20 = vpop.permute.xlu1 %5507 }
0x17db   :  { %11453 = vmatmul.mubr.msk.f32.vlgmr.msra.gmra.mrb[70].mxu1 %vm3044_vm5, %v5508_v20 }
0x17dd   :  { %v13659_v47 = vpop.eup %13658 }
0x17de   :  { %v5232_v52 = vmul.f32 %v13659_v47, %v13651_v34 }
0x17e0   :  { %11431 = vmatprep.mubr.msk.f32.mxu0 %vm3219_vm7, %v5232_v52 }
0x17e1   :  { %11432 = vmatmul.mubr.msk.f32.vlgmr.msra.gmra.mrb[48].mxu0 %vm3219_vm7, %v5233_v55 }
0x17e2   :  { %12510 = vmatpush3.bf16.xpose.msk.msra.mxu0 %vm15281_vm6, %v12505_v27  ;;  %11445 = vmatprep.mubr.msk.f32.mxu0 %vm3044_vm5, %v5415_v11 }
0x17e9   :  { %11446 = vmatmul.mubr.msk.f32.vlgmr.msra.gmra.mrb[50].mxu0 %vm3044_vm5, %v5417_v4 }
0x187d   :  { %v15631_v57 = vpop.f32.mrb[68].mxu1 }
0x187e   :  { %v15635_v8 = vpop.f32.mrb[69].mxu1 }
0x18ae   :  { %v11454_v34 = vpop.f32.mrb[70].mxu1 }
0x18af   :  { %v5587_v38 = vpop.f32.mrb[71].mxu1  ;;  %v5605_v49 = vsel %vm3219_vm7, %v11454_v34, -inf }
0x18b0   :  { %v5602_v62 = vsel %vm3219_vm7, %v5587_v38, -inf }
0x18b4   :  { %v15639_v5 = vpop.f32.mrb[48].mxu0 }
0x18b5   :  { %v15643_v44 = vpop.f32.mrb[49].mxu0 }
0x18bc   :  { %v11447_v2 = vpop.f32.mrb[50].mxu0 }
0x18bd   :  { %v5496_v11 = vpop.f32.mrb[51].mxu0  ;;  %v5599_v24 = vsel %vm3219_vm7, %v11447_v2, -inf }
0x18be   :  { %5600 = vmax.xlane.f32.xlu1 %v5599_v24  ;;  %v5596_v12 = vsel %vm3219_vm7, %v5496_v11, -inf }
0x18bf   :  { %5597 = vmax.xlane.f32.xlu0 %v5596_v12 }
0x18c3   :  { %5603 = vmax.xlane.f32.xlu0 %v5602_v62 }
0x18c7   :  { %5606 = vmax.xlane.f32.xlu0 %v5605_v49 }
0x194b   :  { %v5601_v20 = vpop.xlane.xlu1 %5600 }
0x194c   :  { %v5598_v4 = vpop.xlane.xlu0 %5597  ;;  %v5609_v52 = vsub.f32 %v11447_v2, %v5601_v20 }
0x194e   :  { %v5614_v23 = vmul.f32 1.442695, %v5609_v52 }
0x1950   :  { %v5604_v37 = vpop.xlane.xlu0 %5603 }
0x1951   :  { %v5610_v47 = vsub.f32 %v5587_v38, %v5604_v37 }
0x1953   :  { %v5616_v55 = vmul.f32 1.442695, %v5610_v47 }
0x1954   :  { %v5607_v26 = vpop.xlane.xlu0 %5606 }
0x1955   :  { %13660 = vpow2.f32 %v5616_v55  ;;  %v5611_v21 = vsub.f32 %v11454_v34, %v5607_v26  ;;  %v5608_v26 = vsub.f32 %v5496_v11, %v5598_v4 }
0x1957   :  { %v5618_v24 = vmul.f32 1.442695, %v5611_v21  ;;  %v5612_v21 = vmul.f32 1.442695, %v5608_v26 }
0x1959   :  { %13662 = vpow2.f32 %v5618_v24 }
0x195a   :  { %13664 = vpow2.f32 %v5614_v23 }
0x195b   :  { %13666 = vpow2.f32 %v5612_v21 }
0x195f   :  { %v13661_v12 = vpop.eup %13660 }
0x1960   :  { %v5626_v27 = vsel %vm3219_vm7, %v13661_v12, 0.0 }
0x1961   :  { %5627 = vadd.xlane.f32.xlu1 %v5626_v27 }
0x1963   :  { %v13663_v62 = vpop.eup %13662 }
0x1964   :  { %v5629_v49 = vsel %vm3219_vm7, %v13663_v62, 0.0  ;;  %v15653_v45 = vpop.eup %13664 }
0x1965   :  { %5630 = vadd.xlane.f32.xlu0 %v5629_v49  ;;  %v5623_v38 = vsel %vm3219_vm7, %v15653_v45, 0.0  ;;  %v13667_v23 = vpop.eup %13666 }
0x1966   :  { %v5620_v34 = vsel %vm3219_vm7, %v13667_v23, 0.0 }
0x1969   :  { %5624 = vadd.xlane.f32.xlu0 %v5623_v38 }
0x1972   :  { %13287 = vrot.lane.b32.xlu1 %v15325_v25, %s14393_s3 }
0x1976   :  { %13297 = vrot.lane.b32.xlu1 %v15289_v13, %s14395_s13 }
0x197a   :  { %13302 = vrot.lane.b32.xlu1 %v15301_v35, %s14395_s13 }
0x197f   :  { %13292 = vrot.lane.b32.xlu0 %v15333_v15, %s14393_s3 }
0x1983   :  { %5814 = vrot.lane.b32.xlu0 %v15507_v60, %s14395_s13 }
0x1987   :  { %5905 = vrot.lane.b32.xlu0 %v15505_v63, %s14395_s13 }
0x199e   :  { %5621 = vadd.xlane.f32.xlu1 %v5620_v34 }
0x19af   :  { %5816 = vrot.lane.b32.xlu1 %v15523_v29, %s14395_s13 }
0x19b3   :  { %5907 = vrot.lane.b32.xlu1 %v15530_v10, %s14395_s13 }
0x19ee   :  { %v5628_v13 = vpop.xlane.xlu1 %5627 }
0x19ef   :  { %13668 = vrcp.f32 %v5628_v13 }
0x19f2   :  { %v13288_v35 = vpop.permute.xlu1 %13287  ;;  %v5631_v60 = vpop.xlane.xlu0 %5630 }
0x19f3   :  { %v13290_v27 = vunpack.i.h.bf16 %v13288_v35  ;;  %v13289_v2 = vunpack.i.l.bf16 %v13288_v35  ;;  %13670 = vrcp.f32 %v5631_v60 }
0x19f5   :  { %v12517_v63 = vpack.c.bf16 %v13290_v27, %v13289_v2 }
0x19f6   :  { %v13298_v11 = vpop.permute.xlu1 %13297  ;;  %v5625_v4 = vpop.xlane.xlu0 %5624 }
0x19f7   :  { %v13300_v20 = vunpack.i.h.bf16 %v13298_v11  ;;  %v13299_v37 = vunpack.i.l.bf16 %v13298_v11  ;;  %12518 = vmatprep.subr.bf16.mxu0 %v12517_v63  ;;  %13672 = vrcp.f32 %v5625_v4 }
0x19f8   :  { %12520 = vmatpush3.bf16.msra.mxu0 %v12517_v63 }
0x19f9   :  { %v13669_v47 = vpop.eup %13668  ;;  %v12525_v52 = vpack.c.bf16 %v13300_v20, %v13299_v37 }
0x19fa   :  { %v13303_v29 = vpop.permute.xlu1 %13302  ;;  %v13293_v55 = vpop.permute.xlu0 %13292  ;;  %v5638_v24 = vmul.f32 %v13669_v47, %v13661_v12 }
0x19fb   :  { %v13305_v10 = vunpack.i.h.bf16 %v13303_v29  ;;  %v13304_v49 = vunpack.i.l.bf16 %v13303_v29  ;;  %v13295_v38 = vunpack.i.h.bf16 %v13293_v55  ;;  %v13294_v26 = vunpack.i.l.bf16 %v13293_v55  ;;  %12527 = vmatprep.subr.msk.bf16.mxu0 %vm15281_vm6, %v12525_v52 }
0x19fc   :  { %11466 = vmatprep.mubr.msk.f32.mxu1 %vm3219_vm7, %v5638_v24 }
0x19fd   :  { %v12521_v21 = vpack.c.bf16 %v13295_v38, %v13294_v26  ;;  %v13671_v34 = vpop.eup %13670  ;;  %v12531_v35 = vpack.c.bf16 %v13305_v10, %v13304_v49 }
0x19fe   :  { %v5815_v13 = vpop.permute.xlu0 %5814  ;;  %v5639_v60 = vmul.f32 %v13671_v34, %v13663_v62 }
0x19ff   :  { %12522 = vmatprep.subr.bf16.mxu1 %v12521_v21 }
0x1a00   :  { %12524 = vmatpush3.bf16.msra.mxu1 %v12521_v21 }
0x1a01   :  { %12533 = vmatprep.subr.msk.bf16.mxu1 %vm15281_vm6, %v12531_v35  ;;  %v13673_v11 = vpop.eup %13672 }
0x1a02   :  { %v5906_v12 = vpop.permute.xlu0 %5905  ;;  %v5637_v62 = vmul.f32 %v13673_v11, %v15653_v45 }
0x1a03   :  { %11467 = vmatmul.mubr.msk.f32.vlgmr.msra.gmra.mrb[72].mxu1 %vm3219_vm7, %v5639_v60 }
0x1a04   :  { %11480 = vmatprep.mubr.msk.f32.mxu1 %vm3044_vm5, %v5906_v12 }
0x1a09   :  { %12536 = vmatpush3.bf16.xpose.msk.msra.mxu1 %vm15281_vm6, %v12531_v35 }
0x1a2b   :  { %v5622_v27 = vpop.xlane.xlu1 %5621 }
0x1a2c   :  { %13674 = vrcp.f32 %v5622_v27 }
0x1a2f   :  { %v5817_v2 = vpop.permute.xlu1 %5816 }
0x1a33   :  { %v5908_v63 = vpop.permute.xlu1 %5907 }
0x1a34   :  { %11481 = vmatmul.mubr.msk.f32.vlgmr.msra.gmra.mrb[74].mxu1 %vm3044_vm5, %v5908_v63 }
0x1a36   :  { %v13675_v20 = vpop.eup %13674 }
0x1a37   :  { %v5636_v37 = vmul.f32 %v13675_v20, %v13667_v23 }
0x1a39   :  { %11459 = vmatprep.mubr.msk.f32.mxu0 %vm3219_vm7, %v5636_v37 }
0x1a3a   :  { %11460 = vmatmul.mubr.msk.f32.vlgmr.msra.gmra.mrb[52].mxu0 %vm3219_vm7, %v5637_v62 }
0x1a3b   :  { %12530 = vmatpush3.bf16.xpose.msk.msra.mxu0 %vm15281_vm6, %v12525_v52  ;;  %11473 = vmatprep.mubr.msk.f32.mxu0 %vm3044_vm5, %v5815_v13 }
0x1a42   :  { %11474 = vmatmul.mubr.msk.f32.vlgmr.msra.gmra.mrb[54].mxu0 %vm3044_vm5, %v5817_v2 }
0x1ad6   :  { %v15691_v4 = vpop.f32.mrb[72].mxu1 }
0x1ad7   :  { %v13366_v47 = vpack.i.bf16 %v15473_v9, %v15691_v4  ;;  %v15695_v29 = vpop.f32.mrb[73].mxu1 }
0x1ad8   :  { %v13351_v45 = vpack.i.bf16 %v15475_v56, %v15695_v29  ;;  %v16408_v56 = vpack.i.bf16 %v15425_v6, %v15631_v57  ;;  %v6470_v29 = vld [vmem:[#allocation31 + $0x98] sm:$0xff]  ;;  %v6488_v57 = vld [vmem:[#allocation31 + $0x128] sm:$0xff] }
0x1b07   :  { %v11482_v23 = vpop.f32.mrb[74].mxu1 }
0x1b08   :  { %v5987_v55 = vpop.f32.mrb[75].mxu1  ;;  %v6005_v35 = vsel %vm3219_vm7, %v11482_v23, -inf }
0x1b09   :  { %v6002_v13 = vsel %vm3219_vm7, %v5987_v55, -inf }
0x1b0d   :  { %v11461_v24 = vpop.f32.mrb[52].mxu0 }
0x1b0e   :  { %v13331_v10 = vpack.i.bf16 %v15477_v14, %v11461_v24  ;;  %v5718_v52 = vpop.f32.mrb[53].mxu0 }
0x1b0f   :  { %v13321_v49 = vpack.i.bf16 %v15479_v46, %v5718_v52 }
0x1b15   :  { %v11475_v38 = vpop.f32.mrb[54].mxu0 }
0x1b16   :  { %v5896_v26 = vpop.f32.mrb[55].mxu0  ;;  %v5999_v21 = vsel %vm3219_vm7, %v11475_v38, -inf }
0x1b17   :  { %6000 = vmax.xlane.f32.xlu1 %v5999_v21  ;;  %v5996_v34 = vsel %vm3219_vm7, %v5896_v26, -inf }
0x1b18   :  { %5997 = vmax.xlane.f32.xlu0 %v5996_v34 }
0x1b1c   :  { %6003 = vmax.xlane.f32.xlu0 %v6002_v13 }
0x1b20   :  { %6006 = vmax.xlane.f32.xlu0 %v6005_v35  ;;  %v16405_v35 = vpack.i.bf16 %v15423_v50, %v15643_v44 }
0x1ba4   :  { %v6001_v14 = vpop.xlane.xlu1 %6000 }
0x1ba5   :  { %v5998_v60 = vpop.xlane.xlu0 %5997  ;;  %v6009_v46 = vsub.f32 %v11475_v38, %v6001_v14 }
0x1ba6   :  { %v6008_v12 = vsub.f32 %v5896_v26, %v5998_v60  ;;  %v16406_v60 = vpack.i.bf16 %v15421_v59, %v15639_v5 }
0x1ba7   :  { %v6014_v62 = vmul.f32 1.442695, %v6009_v46 }
0x1ba8   :  { %v6012_v63 = vmul.f32 1.442695, %v6008_v12 }
0x1ba9   :  { %v6004_v27 = vpop.xlane.xlu0 %6003 }
0x1baa   :  { %v6010_v2 = vsub.f32 %v5987_v55, %v6004_v27 }
0x1bac   :  { %v6016_v11 = vmul.f32 1.442695, %v6010_v2 }
0x1bad   :  { %v6007_v20 = vpop.xlane.xlu0 %6006 }
0x1bae   :  { %13676 = vpow2.f32 %v6016_v11  ;;  %v6011_v37 = vsub.f32 %v11482_v23, %v6007_v20 }
0x1baf   :  { %13678 = vpow2.f32 %v6012_v63 }
0x1bb0   :  { %v6018_v24 = vmul.f32 1.442695, %v6011_v37 }
0x1bb2   :  { %13680 = vpow2.f32 %v6018_v24 }
0x1bb3   :  { %13682 = vpow2.f32 %v6014_v62 }
0x1bb8   :  { %v13677_v52 = vpop.eup %13676 }
0x1bb9   :  { %v6026_v21 = vsel %vm3219_vm7, %v13677_v52, 0.0  ;;  %v13679_v34 = vpop.eup %13678 }
0x1bba   :  { %6027 = vadd.xlane.f32.xlu1 %v6026_v21  ;;  %v6020_v13 = vsel %vm3219_vm7, %v13679_v34, 0.0 }
0x1bbc   :  { %v13681_v26 = vpop.eup %13680 }
0x1bbd   :  { %v6029_v55 = vsel %vm3219_vm7, %v13681_v26, 0.0  ;;  %v13683_v38 = vpop.eup %13682 }
0x1bbe   :  { %6021 = vadd.xlane.f32.xlu1 %v6020_v13  ;;  %6030 = vadd.xlane.f32.xlu0 %v6029_v55  ;;  %v6023_v23 = vsel %vm3219_vm7, %v13683_v38, 0.0  ;;  %v2676_v13 = vld [vmem:[#allocation29 + $0x18] sm:$0xff]  ;;  %v2673_v55 = vld [vmem:[#allocation29] sm:$0xff] }
0x1bc2   :  { %6024 = vadd.xlane.f32.xlu0 %v6023_v23 }
0x1bcf   :  { %13307 = vrot.lane.b32.xlu1 %v15325_v25, %s14395_s13 }
0x1bd3   :  { %13317 = vrot.lane.b32.xlu1 %v16405_v35, %s14395_s13  ;;  %v2675_v35 = vld [vmem:[#allocation29 + $0x10] sm:$0xff] }
0x1bd7   :  { %13322 = vrot.lane.b32.xlu1 %v13321_v49, %s14393_s3 }
0x1bd8   :  { %13312 = vrot.lane.b32.xlu0 %v15333_v15, %s14395_s13 }
0x1bdb   :  { %13327 = vrot.lane.b32.xlu1 %v16406_v60, %s14395_s13  ;;  %v2678_v60 = vld [vmem:[#allocation29 + $0x28] sm:$0xff] }
0x1bdc   :  { %13332 = vrot.lane.b32.xlu0 %v13331_v10, %s14393_s3 }
0x1c47   :  { %v6028_v12 = vpop.xlane.xlu1 %6027 }
0x1c48   :  { %13684 = vrcp.f32 %v6028_v12  ;;  %v2680_v12 = vld [vmem:[#allocation29 + $0x38] sm:$0xff] }
0x1c4b   :  { %v6022_v25 = vpop.xlane.xlu1 %6021  ;;  %v6031_v14 = vpop.xlane.xlu0 %6030 }
0x1c4c   :  { %13686 = vrcp.f32 %v6022_v25  ;;  %v12547_v25 = vpack.c.bf16 %v2675_v35, %v2673_v55  ;;  %v2693_v35 = vld [vmem:[#allocation29 + $0xa0] sm:$0xff] }
0x1c4d   :  { %13688 = vrcp.f32 %v6031_v14  ;;  %v2677_v14 = vld [vmem:[#allocation29 + $0x20] sm:$0xff] }
0x1c4f   :  { %v13308_v50 = vpop.permute.xlu1 %13307  ;;  %v6025_v44 = vpop.xlane.xlu0 %6024 }
0x1c50   :  { %v13310_v27 = vunpack.i.h.bf16 %v13308_v50  ;;  %v13309_v49 = vunpack.i.l.bf16 %v13308_v50  ;;  %13690 = vrcp.f32 %v6025_v44  ;;  %v2679_v50 = vld [vmem:[#allocation29 + $0x30] sm:$0xff]  ;;  %v2682_v44 = vld [vmem:[#allocation29 + $0x48] sm:$0xff] }
0x1c52   :  { %v13685_v2 = vpop.eup %13684  ;;  %v12537_v15 = vpack.c.bf16 %v13310_v27, %v13309_v49  ;;  %v2684_v27 = vld [vmem:[#allocation29 + $0x58] sm:$0xff]  ;;  %v2681_v49 = vld [vmem:[#allocation29 + $0x40] sm:$0xff] }
0x1c53   :  { %v13313_v46 = vpop.permute.xlu0 %13312  ;;  %v6038_v63 = vmul.f32 %v13685_v2, %v13677_v52  ;;  %v2674_v52 = vld [vmem:[#allocation29 + $0x8] sm:$0xff]  ;;  %v2683_v2 = vld [vmem:[#allocation29 + $0x50] sm:$0xff] }
0x1c54   :  { %v13315_v11 = vunpack.i.h.bf16 %v13313_v46  ;;  %v13314_v59 = vunpack.i.l.bf16 %v13313_v46  ;;  %12538 = vmatprep.subr.bf16.mxu0 %v12537_v15  ;;  %v12545_v23 = vpack.c.bf16 %v2676_v13, %v2674_v52  ;;  %v2688_v46 = vld [vmem:[#allocation29 + $0x78] sm:$0xff]  ;;  %v2694_v52 = vld [vmem:[#allocation29 + $0xa8] sm:$0xff] }
0x1c55   :  { %12540 = vmatpush3.bf16.msra.mxu0 %v12537_v15  ;;  %11494 = vmatprep.mubr.msk.f32.mxu1 %vm3219_vm7, %v6038_v63  ;;  %v2686_v15 = vld [vmem:[#allocation29 + $0x68] sm:$0xff]  ;;  %v12555_v63 = vpack.c.bf16 %v2683_v2, %v2681_v49  ;;  %v2696_v13 = vld [vmem:[#allocation29 + $0xb8] sm:$0xff]  ;;  %v2701_v2 = vld [vmem:[#allocation29 + $0xe0] sm:$0xff] }
0x1c56   :  { %v13687_v5 = vpop.eup %13686  ;;  %v12541_v10 = vpack.c.bf16 %v13315_v11, %v13314_v59  ;;  %12546 = vmatprep.subr.bf16.mxu0 %v12545_v23  ;;  %v12557_v11 = vpack.c.bf16 %v2688_v46, %v2686_v15  ;;  %v2685_v59 = vld [vmem:[#allocation29 + $0x60] sm:$0xff]  ;;  %v12565_v23 = vpack.c.bf16 %v2696_v13, %v2694_v52  ;;  %v2703_v15 = vld [vmem:[#allocation29 + $0xf0] sm:$0xff]  ;;  %v2706_v46 = vld [vmem:[#allocation29 + $0x108] sm:$0xff] }
0x1c57   :  { %v13689_v20 = vpop.eup %13688  ;;  %v6036_v37 = vmul.f32 %v13687_v5, %v13679_v34  ;;  %v12549_v34 = vpack.c.bf16 %v2680_v12, %v2678_v60  ;;  %v2687_v5 = vld [vmem:[#allocation29 + $0x70] sm:$0xff]  ;;  %v2698_v12 = vld [vmem:[#allocation29 + $0xc8] sm:$0xff] }
0x1c58   :  { %12542 = vmatprep.subr.bf16.mxu1 %v12541_v10  ;;  %v6039_v24 = vmul.f32 %v13689_v20, %v13681_v26  ;;  %v12551_v26 = vpack.c.bf16 %v2679_v50, %v2677_v14  ;;  %v2692_v20 = vld [vmem:[#allocation29 + $0x98] sm:$0xff]  ;;  %v2695_v60 = vld [vmem:[#allocation29 + $0xb0] sm:$0xff]  ;;  %v2697_v50 = vld [vmem:[#allocation29 + $0xc0] sm:$0xff] }
0x1c59   :  { %11487 = vmatprep.mubr.msk.f32.mxu0 %vm3219_vm7, %v6036_v37  ;;  %12544 = vmatpush3.bf16.msra.mxu1 %v12541_v10  ;;  %v2690_v10 = vld [vmem:[#allocation29 + $0x88] sm:$0xff]  ;;  %v12559_v37 = vpack.c.bf16 %v2687_v5, %v2685_v59  ;;  %v2705_v5 = vld [vmem:[#allocation29 + $0x100] sm:$0xff]  ;;  %v2711_v52 = vld [vmem:[#allocation29 + $0x130] sm:$0xff] }
0x1c5a   :  { %v13691_v62 = vpop.eup %13690  ;;  %v2714_v13 = vld [vmem:[#allocation29 + $0x148] sm:$0xff] }
0x1c5b   :  { %v6037_v21 = vmul.f32 %v13691_v62, %v13683_v38  ;;  %v12553_v38 = vpack.c.bf16 %v2684_v27, %v2682_v44  ;;  %v12561_v62 = vpack.c.bf16 %v2692_v20, %v2690_v10  ;;  %v2699_v44 = vld [vmem:[#allocation29 + $0xd0] sm:$0xff]  ;;  %v2702_v27 = vld [vmem:[#allocation29 + $0xe8] sm:$0xff] }
0x1c5c   :  { %11495 = vmatmul.mubr.msk.f32.vlgmr.msra.gmra.mrb[76].mxu1 %vm3219_vm7, %v6039_v24  ;;  %v2689_v24 = vld [vmem:[#allocation29 + $0x80] sm:$0xff]  ;;  %v2707_v10 = vld [vmem:[#allocation29 + $0x110] sm:$0xff]  ;;  %v2710_v20 = vld [vmem:[#allocation29 + $0x128] sm:$0xff] }
0x1c5d   :  { %11488 = vmatmul.mubr.msk.f32.vlgmr.msra.gmra.mrb[56].mxu0 %vm3219_vm7, %v6037_v21  ;;  %v2691_v21 = vld [vmem:[#allocation29 + $0x90] sm:$0xff] }
0x1c5e   :  { %12548 = vmatpush1.bf16.msra.mxu0 %v12547_v25  ;;  %v12563_v55 = vpack.c.bf16 %v2691_v21, %v2689_v24  ;;  %v2700_v25 = vld [vmem:[#allocation29 + $0xd8] sm:$0xff]  ;;  %v2709_v21 = vld [vmem:[#allocation29 + $0x120] sm:$0xff] }
0x1c5f   :  { %12550 = vmatprep.subr.bf16.mxu0 %v12549_v34  ;;  %v12567_v34 = vpack.c.bf16 %v2695_v60, %v2693_v35  ;;  %v12569_v14 = vpack.c.bf16 %v2700_v25, %v2698_v12  ;;  %v2713_v60 = vld [vmem:[#allocation29 + $0x140] sm:$0xff]  ;;  %v2715_v12 = vld [vmem:[#allocation29 + $0x150] sm:$0xff]  ;;  %v2718_v25 = vld [vmem:[#allocation29 + $0x168] sm:$0xff] }
0x1c62   :  { %12552 = vmatpush1.bf16.msra.mxu0 %v12551_v26  ;;  %v2704_v26 = vld [vmem:[#allocation29 + $0xf8] sm:$0xff] }
0x1c63   :  { %12554 = vmatprep.subr.bf16.mxu0 %v12553_v38  ;;  %v12571_v38 = vpack.c.bf16 %v2699_v44, %v2697_v50  ;;  %v12573_v49 = vpack.c.bf16 %v2704_v26, %v2702_v27  ;;  %v2717_v44 = vld [vmem:[#allocation29 + $0x160] sm:$0xff]  ;;  %v2719_v27 = vld [vmem:[#allocation29 + $0x170] sm:$0xff]  ;;  %v2722_v26 = vld [vmem:[#allocation29 + $0x188] sm:$0xff] }
0x1c66   :  { %12556 = vmatpush1.bf16.msra.mxu0 %v12555_v63  ;;  %v2708_v63 = vld [vmem:[#allocation29 + $0x118] sm:$0xff] }
0x1c67   :  { %12558 = vmatprep.subr.bf16.mxu0 %v12557_v11  ;;  %v12575_v11 = vpack.c.bf16 %v2703_v15, %v2701_v2  ;;  %v12577_v59 = vpack.c.bf16 %v2708_v63, %v2706_v46  ;;  %v2721_v15 = vld [vmem:[#allocation29 + $0x180] sm:$0xff]  ;;  %v2723_v46 = vld [vmem:[#allocation29 + $0x190] sm:$0xff]  ;;  %v2726_v63 = vld [vmem:[#allocation29 + $0x1a8] sm:$0xff] }
0x1c6a   :  { %12560 = vmatpush1.bf16.msra.mxu0 %v12559_v37  ;;  %v2712_v37 = vld [vmem:[#allocation29 + $0x138] sm:$0xff] }
0x1c6b   :  { %12562 = vmatprep.subr.bf16.mxu0 %v12561_v62  ;;  %v12579_v62 = vpack.c.bf16 %v2707_v10, %v2705_v5  ;;  %v12581_v24 = vpack.c.bf16 %v2712_v37, %v2710_v20  ;;  %v2725_v10 = vld [vmem:[#allocation29 + $0x1a0] sm:$0xff]  ;;  %v2727_v20 = vld [vmem:[#allocation29 + $0x1b0] sm:$0xff]  ;;  %v2730_v37 = vld [vmem:[#allocation29 + $0x1c8] sm:$0xff] }
0x1c6e   :  { %12564 = vmatpush1.bf16.msra.mxu0 %v12563_v55  ;;  %v2716_v55 = vld [vmem:[#allocation29 + $0x158] sm:$0xff] }
0x1c6f   :  { %12566 = vmatprep.subr.bf16.mxu0 %v12565_v23  ;;  %v12583_v23 = vpack.c.bf16 %v2711_v52, %v2709_v21  ;;  %v12585_v35 = vpack.c.bf16 %v2716_v55, %v2714_v13  ;;  %v2729_v52 = vld [vmem:[#allocation29 + $0x1c0] sm:$0xff]  ;;  %v2731_v13 = vld [vmem:[#allocation29 + $0x1d0] sm:$0xff] }
0x1c70   :  { %v12603_v55 = vpack.c.bf16 %v2731_v13, %v2729_v52  ;;  %v6481_v52 = vld [vmem:[#allocation31 + $0xf0] sm:$0xff]  ;;  %v6494_v13 = vld [vmem:[#allocation31 + $0x158] sm:$0xff] }
0x1c72   :  { %12568 = vmatpush1.bf16.msra.mxu0 %v12567_v34  ;;  %v2720_v34 = vld [vmem:[#allocation29 + $0x178] sm:$0xff] }
0x1c73   :  { %12570 = vmatprep.subr.bf16.mxu0 %v12569_v14  ;;  %v12587_v14 = vpack.c.bf16 %v2715_v12, %v2713_v60  ;;  %v12589_v50 = vpack.c.bf16 %v2720_v34, %v2718_v25  ;;  %v2733_v12 = vld [vmem:[#allocation29 + $0x1e0] sm:$0xff]  ;;  %v2735_v25 = vld [vmem:[#allocation29 + $0x1f0] sm:$0xff] }
0x1c74   :  { %v12607_v34 = vpack.c.bf16 %v2735_v25, %v2733_v12  ;;  %v6506_v12 = vld [vmem:[#allocation31 + $0x1b8] sm:$0xff] }
0x1c76   :  { %12572 = vmatpush1.bf16.msra.mxu0 %v12571_v38  ;;  %v2724_v38 = vld [vmem:[#allocation29 + $0x198] sm:$0xff] }
0x1c77   :  { %12574 = vmatprep.subr.bf16.mxu0 %v12573_v49  ;;  %v12591_v49 = vpack.c.bf16 %v2719_v27, %v2717_v44  ;;  %v12593_v2 = vpack.c.bf16 %v2724_v38, %v2722_v26 }
0x1c7a   :  { %12576 = vmatpush1.bf16.msra.mxu0 %v12575_v11  ;;  %v2728_v11 = vld [vmem:[#allocation29 + $0x1b8] sm:$0xff] }
0x1c7b   :  { %12578 = vmatprep.subr.bf16.mxu0 %v12577_v59  ;;  %v12595_v59 = vpack.c.bf16 %v2723_v46, %v2721_v15  ;;  %v12597_v5 = vpack.c.bf16 %v2728_v11, %v2726_v63  ;;  %v6458_v15 = vld [vmem:[#allocation31 + $0x38] sm:$0xff]  ;;  %v6457_v63 = vld [vmem:[#allocation31 + $0x30] sm:$0xff]  ;;  %v6460_v11 = vld [vmem:[#allocation31 + $0x48] sm:$0xff] }
0x1c7e   :  { %12580 = vmatpush1.bf16.msra.mxu0 %v12579_v62  ;;  %v2732_v62 = vld [vmem:[#allocation29 + $0x1d8] sm:$0xff] }
0x1c7f   :  { %12582 = vmatprep.subr.bf16.mxu0 %v12581_v24  ;;  %v12599_v24 = vpack.c.bf16 %v2727_v20, %v2725_v10  ;;  %v12601_v21 = vpack.c.bf16 %v2732_v62, %v2730_v37  ;;  %v6464_v10 = vld [vmem:[#allocation31 + $0x68] sm:$0xff]  ;;  %v6482_v62 = vld [vmem:[#allocation31 + $0xf8] sm:$0xff] }
0x1c80   :  { %v6476_v37 = vld [vmem:[#allocation31 + $0xc8] sm:$0xff] }
0x1c82   :  { %12584 = vmatpush1.bf16.msra.mxu0 %v12583_v23  ;;  %v2734_v23 = vld [vmem:[#allocation29 + $0x1e8] sm:$0xff] }
0x1c83   :  { %12586 = vmatprep.subr.bf16.mxu0 %v12585_v35  ;;  %v2736_v35 = vld [vmem:[#allocation29 + $0x1f8] sm:$0xff] }
0x1c84   :  { %v12605_v60 = vpack.c.bf16 %v2736_v35, %v2734_v23  ;;  %v6487_v23 = vld [vmem:[#allocation31 + $0x120] sm:$0xff]  ;;  %v6493_v35 = vld [vmem:[#allocation31 + $0x150] sm:$0xff] }
0x1c85   :  { %v12623_v25 = vpack.c.bf16 %v6493_v35, %v6487_v23  ;;  %v6577_v23 = vld [vmem:[#allocation31 + $0x3f0] sm:$0xff]  ;;  %v6584_v35 = vld [vmem:[#allocation31 + $0x428] sm:$0xff] }
0x1c86   :  { %12588 = vmatpush1.bf16.msra.mxu0 %v12587_v14 }
0x1c87   :  { %12590 = vmatprep.subr.bf16.mxu0 %v12589_v50 }
0x1c8a   :  { %12592 = vmatpush1.bf16.msra.mxu0 %v12591_v49 }
0x1c8b   :  { %12594 = vmatprep.subr.bf16.mxu0 %v12593_v2 }
0x1c8e   :  { %12596 = vmatpush1.bf16.msra.mxu0 %v12595_v59 }
0x1c8f   :  { %12598 = vmatprep.subr.bf16.mxu0 %v12597_v5 }
0x1c92   :  { %12600 = vmatpush1.bf16.msra.mxu0 %v12599_v24  ;;  %v12617_v24 = vpack.c.bf16 %v6482_v62, %v6476_v37 }
0x1c93   :  { %12602 = vmatprep.subr.bf16.mxu0 %v12601_v21  ;;  %v6475_v21 = vld [vmem:[#allocation31 + $0xc0] sm:$0xff] }
0x1c94   :  { %v12619_v6 = vpack.c.bf16 %v6481_v52, %v6475_v21  ;;  %v6565_v21 = vld [vmem:[#allocation31 + $0x390] sm:$0xff]  ;;  %v6572_v52 = vld [vmem:[#allocation31 + $0x3c8] sm:$0xff] }
0x1c96   :  { %12604 = vmatpush1.bf16.msra.mxu0 %v12603_v55  ;;  %v12621_v55 = vpack.c.bf16 %v6494_v13, %v6488_v57 }
0x1c97   :  { %12606 = vmatprep.subr.bf16.mxu0 %v12605_v60  ;;  %v6500_v60 = vld [vmem:[#allocation31 + $0x188] sm:$0xff] }
0x1c9a   :  { %12608 = vmatpush1.bf16.msra.mxu0 %v12607_v34  ;;  %v12625_v34 = vpack.c.bf16 %v6506_v12, %v6500_v60  ;;  %v6590_v60 = vld [vmem:[#allocation31 + $0x458] sm:$0xff] }
0x1d2f   :  { %v11496_v14 = vpop.f32.mrb[76].mxu1 }
0x1d30   :  { %v13371_v50 = vpack.i.bf16 %v15535_v28, %v11496_v14  ;;  %v11489_v44 = vpop.f32.mrb[56].mxu0  ;;  %v6205_v27 = vpop.f32.mrb[77].mxu1  ;;  %v16407_v28 = vpack.i.bf16 %v15427_v42, %v15635_v8  ;;  %v6469_v42 = vld [vmem:[#allocation31 + $0x90] sm:$0xff]  ;;  %v12613_v8 = vpack.c.bf16 %v6470_v29, %v6464_v10  ;;  %v6499_v14 = vld [vmem:[#allocation31 + $0x180] sm:$0xff]  ;;  %v6554_v10 = vld [vmem:[#allocation31 + $0x338] sm:$0xff] }
0x1d31   :  { %v13336_v26 = vpack.i.bf16 %v15537_v3, %v11489_v44  ;;  %v13356_v38 = vpack.i.bf16 %v15539_v22, %v6205_v27  ;;  %v6118_v49 = vpop.f32.mrb[57].mxu0  ;;  %v6452_v3 = vld [vmem:[#allocation31 + $0x8] sm:$0xff]  ;;  %v6451_v22 = vld [vmem:[#allocation31] sm:$0xff]  ;;  %v6518_v27 = vld [vmem:[#allocation31 + $0x218] sm:$0xff] }
0x1d32   :  { %v13341_v2 = vpack.i.bf16 %v15541_v61, %v6118_v49  ;;  %v12609_v46 = vpack.c.bf16 %v6458_v15, %v6452_v3  ;;  %v6454_v61 = vld [vmem:[#allocation31 + $0x18] sm:$0xff]  ;;  %v12611_v59 = vpack.c.bf16 %v6457_v63, %v6451_v22  ;;  %v6512_v44 = vld [vmem:[#allocation31 + $0x1e8] sm:$0xff]  ;;  %v6523_v3 = vld [vmem:[#allocation31 + $0x240] sm:$0xff] }
0x1d33   :  { %13337 = vrot.lane.b32.xlu1 %v13336_v26, %s14394_s5  ;;  %v12673_v5 = vpack.c.bf16 %v6460_v11, %v6454_v61  ;;  %v12629_v4 = vpack.c.bf16 %v6518_v27, %v6512_v44  ;;  %v6517_v26 = vld [vmem:[#allocation31 + $0x210] sm:$0xff]  ;;  %v6530_v49 = vld [vmem:[#allocation31 + $0x278] sm:$0xff]  ;;  %v6536_v22 = vld [vmem:[#allocation31 + $0x2a8] sm:$0xff] }
0x1d34   :  { %13342 = vrot.lane.b32.xlu0 %v13341_v2, %s14394_s5  ;;  %12610 = vmatprep.subr.bf16.mxu1 %v12609_v46  ;;  %v6529_v15 = vld [vmem:[#allocation31 + $0x270] sm:$0xff]  ;;  %v6542_v46 = vld [vmem:[#allocation31 + $0x2d8] sm:$0xff]  ;;  %v6535_v11 = vld [vmem:[#allocation31 + $0x2a0] sm:$0xff] }
0x1d35   :  { %12612 = vmatpush1.bf16.msra.mxu1 %v12611_v59  ;;  %12674 = vmatprep.subr.bf16.mxu0 %v12673_v5  ;;  %v12635_v63 = vpack.c.bf16 %v6529_v15, %v6523_v3  ;;  %v12637_v61 = vpack.c.bf16 %v6542_v46, %v6536_v22  ;;  %v6541_v59 = vld [vmem:[#allocation31 + $0x2d0] sm:$0xff]  ;;  %v6548_v5 = vld [vmem:[#allocation31 + $0x308] sm:$0xff]  ;;  %v6602_v44 = vld [vmem:[#allocation31 + $0x4b8] sm:$0xff]  ;;  %v13318_v22 = vpop.permute.xlu1 %13317 }
0x1d36   :  { %12614 = vmatprep.subr.bf16.mxu1 %v12613_v8  ;;  %v12641_v29 = vpack.c.bf16 %v6554_v10, %v6548_v5  ;;  %v6560_v8 = vld [vmem:[#allocation31 + $0x368] sm:$0xff]  ;;  %v6613_v3 = vld [vmem:[#allocation31 + $0x510] sm:$0xff] }
0x1d37   :  { %13352 = vrot.lane.b32.xlu1 %v13351_v45, %s14393_s3  ;;  %v6463_v45 = vld [vmem:[#allocation31 + $0x60] sm:$0xff] }
0x1d38   :  { %13347 = vrot.lane.b32.xlu0 %v16407_v28, %s14395_s13  ;;  %v12615_v20 = vpack.c.bf16 %v6469_v42, %v6463_v45  ;;  %v6547_v45 = vld [vmem:[#allocation31 + $0x300] sm:$0xff]  ;;  %v6553_v42 = vld [vmem:[#allocation31 + $0x330] sm:$0xff] }
0x1d39   :  { %v12643_v37 = vpack.c.bf16 %v6553_v42, %v6547_v45  ;;  %v13323_v46 = vpop.permute.xlu1 %13322  ;;  %v6453_v45 = vld [vmem:[#allocation31 + $0x10] sm:$0xff]  ;;  %v6459_v42 = vld [vmem:[#allocation31 + $0x40] sm:$0xff] }
0x1d3a   :  { %12616 = vmatpush1.bf16.msra.mxu1 %v12615_v20  ;;  %v6566_v20 = vld [vmem:[#allocation31 + $0x398] sm:$0xff]  ;;  %v13325_v10 = vunpack.i.h.bf16 %v13323_v46 }
0x1d3b   :  { %13362 = vrot.lane.b32.xlu1 %v16408_v56, %s14395_s13  ;;  %12618 = vmatprep.subr.bf16.mxu1 %v12617_v24  ;;  %v12639_v56 = vpack.c.bf16 %v6541_v59, %v6535_v11  ;;  %v12645_v62 = vpack.c.bf16 %v6566_v20, %v6560_v8  ;;  %v6559_v24 = vld [vmem:[#allocation31 + $0x360] sm:$0xff]  ;;  %v13319_v11 = vunpack.i.l.bf16 %v13318_v22  ;;  %v13333_v59 = vpop.permute.xlu0 %13332 }
0x1d3c   :  { %13357 = vrot.lane.b32.xlu0 %v13356_v38, %s14394_s5  ;;  %v6524_v38 = vld [vmem:[#allocation31 + $0x248] sm:$0xff]  ;;  %v12647_v57 = vpack.c.bf16 %v6565_v21, %v6559_v24  ;;  %v6466_v24 = vld [vmem:[#allocation31 + $0x78] sm:$0xff] }
0x1d3d   :  { %v12633_v28 = vpack.c.bf16 %v6530_v49, %v6524_v38  ;;  %v6614_v38 = vld [vmem:[#allocation31 + $0x518] sm:$0xff]  ;;  %v6472_v21 = vld [vmem:[#allocation31 + $0xa8] sm:$0xff] }
0x1d3e   :  { %12620 = vmatpush1.bf16.msra.mxu1 %v12619_v6  ;;  %v6578_v6 = vld [vmem:[#allocation31 + $0x3f8] sm:$0xff] }
0x1d3f   :  { %13372 = vrot.lane.b32.xlu1 %v13371_v50, %s14394_s5  ;;  %12622 = vmatprep.subr.bf16.mxu1 %v12621_v55  ;;  %v6505_v50 = vld [vmem:[#allocation31 + $0x1b0] sm:$0xff]  ;;  %v12649_v13 = vpack.c.bf16 %v6578_v6, %v6572_v52  ;;  %v6571_v55 = vld [vmem:[#allocation31 + $0x3c0] sm:$0xff] }
0x1d40   :  { %13367 = vrot.lane.b32.xlu0 %v13366_v47, %s14393_s3  ;;  %v12627_v9 = vpack.c.bf16 %v6505_v50, %v6499_v14  ;;  %v6511_v47 = vld [vmem:[#allocation31 + $0x1e0] sm:$0xff]  ;;  %v12651_v12 = vpack.c.bf16 %v6577_v23, %v6571_v55  ;;  %v6589_v14 = vld [vmem:[#allocation31 + $0x450] sm:$0xff]  ;;  %v6596_v50 = vld [vmem:[#allocation31 + $0x488] sm:$0xff]  ;;  %v13334_v55 = vunpack.i.l.bf16 %v13333_v59 }
0x1d41   :  { %v12631_v2 = vpack.c.bf16 %v6517_v26, %v6511_v47  ;;  %v6601_v47 = vld [vmem:[#allocation31 + $0x4b0] sm:$0xff]  ;;  %v6608_v26 = vld [vmem:[#allocation31 + $0x4e8] sm:$0xff] }
0x1d42   :  { %12624 = vmatpush1.bf16.msra.mxu1 %v12623_v25  ;;  %v12653_v25 = vpack.c.bf16 %v6590_v60, %v6584_v35  ;;  %v12675_v60 = vpack.c.bf16 %v6459_v42, %v6453_v45 }
0x1d43   :  { %12626 = vmatprep.subr.bf16.mxu1 %v12625_v34  ;;  %v6583_v34 = vld [vmem:[#allocation31 + $0x420] sm:$0xff] }
0x1d44   :  { %v12655_v27 = vpack.c.bf16 %v6589_v14, %v6583_v34  ;;  %v6465_v34 = vld [vmem:[#allocation31 + $0x70] sm:$0xff]  ;;  %v6471_v14 = vld [vmem:[#allocation31 + $0xa0] sm:$0xff] }
0x1d46   :  { %12628 = vmatpush1.bf16.msra.mxu1 %v12627_v9  ;;  %v12657_v9 = vpack.c.bf16 %v6602_v44, %v6596_v50 }
0x1d47   :  { %12630 = vmatprep.subr.bf16.mxu1 %v12629_v4  ;;  %v6595_v4 = vld [vmem:[#allocation31 + $0x480] sm:$0xff] }
0x1d48   :  { %v12659_v49 = vpack.c.bf16 %v6601_v47, %v6595_v4  ;;  %v6484_v4 = vld [vmem:[#allocation31 + $0x108] sm:$0xff]  ;;  %v13335_v47 = vunpack.i.h.bf16 %v13333_v59 }
0x1d4a   :  { %12632 = vmatpush1.bf16.msra.mxu1 %v12631_v2  ;;  %v12661_v2 = vpack.c.bf16 %v6614_v38, %v6608_v26 }
0x1d4b   :  { %12634 = vmatprep.subr.bf16.mxu1 %v12633_v28  ;;  %v6607_v28 = vld [vmem:[#allocation31 + $0x4e0] sm:$0xff] }
0x1d4c   :  { %v12663_v15 = vpack.c.bf16 %v6613_v3, %v6607_v28  ;;  %v6477_v28 = vld [vmem:[#allocation31 + $0xd0] sm:$0xff]  ;;  %v6483_v3 = vld [vmem:[#allocation31 + $0x100] sm:$0xff] }
0x1d4d   :  { %v12683_v42 = vpack.c.bf16 %v6483_v3, %v6477_v28 }
0x1d4e   :  { %12636 = vmatpush1.bf16.msra.mxu1 %v12635_v63  ;;  %v13328_v63 = vpop.permute.xlu1 %13327 }
0x1d4f   :  { %12638 = vmatprep.subr.bf16.mxu1 %v12637_v61  ;;  %v13320_v61 = vunpack.i.h.bf16 %v13318_v22  ;;  %v13329_v5 = vunpack.i.l.bf16 %v13328_v63  ;;  %v13330_v8 = vunpack.i.h.bf16 %v13328_v63 }
0x1d52   :  { %12640 = vmatpush1.bf16.msra.mxu1 %v12639_v56  ;;  %v13324_v56 = vunpack.i.l.bf16 %v13323_v46 }
0x1d53   :  { %12642 = vmatprep.subr.bf16.mxu1 %v12641_v29 }
0x1d56   :  { %12644 = vmatpush1.bf16.msra.mxu1 %v12643_v37  ;;  %v6323_v37 = vsel %vm3044_vm5, %v15585_v18, %v13319_v11 }
0x1d57   :  { %12646 = vmatprep.subr.bf16.mxu1 %v12645_v62  ;;  %v6310_v62 = vsel %vm3044_vm5, %v15375_v16, %v13320_v61  ;;  %v6327_v23 = vsel %vm611_vm4, %v6323_v37, %v13324_v56  ;;  %v12677_v16 = vpack.c.bf16 %v6472_v21, %v6466_v24  ;;  %v6496_v56 = vld [vmem:[#allocation31 + $0x168] sm:$0xff] }
0x1d58   :  { %v6314_v35 = vsel %vm611_vm4, %v6310_v62, %v13325_v10  ;;  %v6490_v10 = vld [vmem:[#allocation31 + $0x138] sm:$0xff] }
0x1d59   :  { %v12685_v21 = vpack.c.bf16 %v6496_v56, %v6490_v10  ;;  %v6556_v10 = vld [vmem:[#allocation31 + $0x348] sm:$0xff] }
0x1d5a   :  { %12648 = vmatpush1.bf16.msra.mxu1 %v12647_v57 }
0x1d5b   :  { %12650 = vmatprep.subr.bf16.mxu1 %v12649_v13  ;;  %v6324_v13 = vsel %vm3044_vm5, %v15583_v33, %v13329_v5  ;;  %v6311_v33 = vsel %vm3044_vm5, %v15373_v32, %v13330_v8 }
0x1d5c   :  { %v6315_v22 = vsel %vm611_vm4, %v6311_v33, %v13335_v47  ;;  %v6501_v33 = vld [vmem:[#allocation31 + $0x190] sm:$0xff] }
0x1d5e   :  { %12652 = vmatpush1.bf16.msra.mxu1 %v12651_v12 }
0x1d5f   :  { %12654 = vmatprep.subr.bf16.mxu1 %v12653_v25 }
0x1d62   :  { %12656 = vmatpush1.bf16.msra.mxu1 %v12655_v27  ;;  %v6328_v27 = vsel %vm611_vm4, %v6324_v13, %v13334_v55 }
0x1d63   :  { %12658 = vmatprep.subr.bf16.mxu1 %v12657_v9  ;;  %v6478_v9 = vld [vmem:[#allocation31 + $0xd8] sm:$0xff] }
0x1d64   :  { %v12681_v63 = vpack.c.bf16 %v6484_v4, %v6478_v9  ;;  %v6507_v9 = vld [vmem:[#allocation31 + $0x1c0] sm:$0xff]  ;;  %v6514_v4 = vld [vmem:[#allocation31 + $0x1f8] sm:$0xff] }
0x1d66   :  { %12660 = vmatpush1.bf16.msra.mxu1 %v12659_v49 }
0x1d67   :  { %12662 = vmatprep.subr.bf16.mxu1 %v12661_v2  ;;  %v12679_v2 = vpack.c.bf16 %v6471_v14, %v6465_v34 }
0x1d6a   :  { %12664 = vmatpush1.bf16.msra.mxu1 %v12663_v15 }
0x1da5   :  { %v13338_v29 = vpop.permute.xlu1 %13337 }
0x1da6   :  { %v13343_v20 = vpop.permute.xlu0 %13342  ;;  %v13339_v52 = vunpack.i.l.bf16 %v13338_v29  ;;  %v13340_v50 = vunpack.i.h.bf16 %v13338_v29 }
0x1da7   :  { %v13345_v6 = vunpack.i.h.bf16 %v13343_v20  ;;  %v13344_v57 = vunpack.i.l.bf16 %v13343_v20 }
0x1da8   :  { %v6332_v49 = vsel %vm6318_vm8, %v6328_v27, %v13339_v52  ;;  %v6320_v5 = vsel %vm6318_vm8, %v6315_v22, %v13340_v50  ;;  %v6531_v22 = vld [vmem:[#allocation31 + $0x280] sm:$0xff] }
0x1da9   :  { %v13353_v12 = vpop.permute.xlu1 %13352  ;;  %v6331_v18 = vsel %vm6318_vm8, %v6327_v23, %v13344_v57  ;;  %v6319_v25 = vsel %vm6318_vm8, %v6314_v35, %v13345_v6  ;;  %v6489_v6 = vld [vmem:[#allocation31 + $0x130] sm:$0xff]  ;;  %v6495_v57 = vld [vmem:[#allocation31 + $0x160] sm:$0xff]  ;;  %v6502_v23 = vld [vmem:[#allocation31 + $0x198] sm:$0xff] }
0x1daa   :  { %v13348_v44 = vpop.permute.xlu0 %13347  ;;  %6410 = vmatprep.mubr.f32.mxu0 %v6331_v18  ;;  %v13355_v61 = vunpack.i.h.bf16 %v13353_v12  ;;  %v13354_v11 = vunpack.i.l.bf16 %v13353_v12  ;;  %v6508_v35 = vld [vmem:[#allocation31 + $0x1c8] sm:$0xff]  ;;  %v12687_v14 = vpack.c.bf16 %v6495_v57, %v6489_v6  ;;  %v6573_v57 = vld [vmem:[#allocation31 + $0x3d0] sm:$0xff] }
0x1dab   :  { %v13350_v26 = vunpack.i.h.bf16 %v13348_v44  ;;  %v13349_v38 = vunpack.i.l.bf16 %v13348_v44  ;;  %6411 = vmatmul.mubr.f32.vlgmr.msra.gmra.mrb[58].mxu0 %v6319_v25  ;;  %v12689_v27 = vpack.c.bf16 %v6508_v35, %v6502_v23  ;;  %v6592_v23 = vld [vmem:[#allocation31 + $0x468] sm:$0xff] }
0x1dac   :  { %6416 = vmatprep.mubr.f32.mxu0 %v6332_v49  ;;  %12676 = vmatpush1.bf16.msra.mxu0 %v12675_v60  ;;  %v6526_v49 = vld [vmem:[#allocation31 + $0x258] sm:$0xff] }
0x1dad   :  { %v13363_v15 = vpop.permute.xlu1 %13362  ;;  %v6325_v46 = vsel %vm3044_vm5, %v15581_v30, %v13349_v38  ;;  %v6312_v32 = vsel %vm3044_vm5, %v15379_v51, %v13350_v26  ;;  %12678 = vmatprep.subr.bf16.mxu0 %v12677_v16  ;;  %v6513_v26 = vld [vmem:[#allocation31 + $0x1f0] sm:$0xff]  ;;  %v6519_v38 = vld [vmem:[#allocation31 + $0x220] sm:$0xff] }
0x1dae   :  { %v13358_v59 = vpop.permute.xlu0 %13357  ;;  %v13365_v8 = vunpack.i.h.bf16 %v13363_v15  ;;  %v13364_v20 = vunpack.i.l.bf16 %v13363_v15  ;;  %v6329_v30 = vsel %vm611_vm4, %v6325_v46, %v13354_v11  ;;  %v6316_v37 = vsel %vm611_vm4, %v6312_v32, %v13355_v61  ;;  %v6525_v15 = vld [vmem:[#allocation31 + $0x250] sm:$0xff]  ;;  %v6538_v46 = vld [vmem:[#allocation31 + $0x2b8] sm:$0xff]  ;;  %v6544_v32 = vld [vmem:[#allocation31 + $0x2e8] sm:$0xff] }
0x1daf   :  { %v13360_v29 = vunpack.i.h.bf16 %v13358_v59  ;;  %v13359_v45 = vunpack.i.l.bf16 %v13358_v59  ;;  %6417 = vmatmul.mubr.f32.gmra.mrb[60].mxu0 %v6320_v5  ;;  %v12695_v28 = vpack.c.bf16 %v6519_v38, %v6513_v26  ;;  %v12701_v61 = vpack.c.bf16 %v6544_v32, %v6538_v46  ;;  %v6537_v11 = vld [vmem:[#allocation31 + $0x2b0] sm:$0xff]  ;;  %v6543_v59 = vld [vmem:[#allocation31 + $0x2e0] sm:$0xff]  ;;  %v6550_v5 = vld [vmem:[#allocation31 + $0x318] sm:$0xff] }
0x1db0   :  { %12680 = vmatpush1.bf16.msra.mxu0 %v12679_v2  ;;  %v6326_v18 = vsel %vm3044_vm5, %v15579_v53, %v13364_v20  ;;  %v6313_v25 = vsel %vm3044_vm5, %v15377_v17, %v13365_v8  ;;  %v6520_v53 = vld [vmem:[#allocation31 + $0x228] sm:$0xff]  ;;  %v12691_v17 = vpack.c.bf16 %v6507_v9, %v6501_v33  ;;  %v12703_v56 = vpack.c.bf16 %v6543_v59, %v6537_v11  ;;  %v6562_v8 = vld [vmem:[#allocation31 + $0x378] sm:$0xff]  ;;  %v6621_v46 = vld [vmem:[#allocation31 + $0x550] sm:$0xff] }
0x1db1   :  { %v13373_v51 = vpop.permute.xlu1 %13372  ;;  %v6333_v62 = vsel %vm6318_vm8, %v6329_v30, %v13359_v45  ;;  %v6321_v24 = vsel %vm6318_vm8, %v6316_v37, %v13360_v29  ;;  %12682 = vmatprep.subr.bf16.mxu0 %v12681_v63  ;;  %v12693_v47 = vpack.c.bf16 %v6520_v53, %v6514_v4  ;;  %v6532_v2 = vld [vmem:[#allocation31 + $0x288] sm:$0xff]  ;;  %v12699_v63 = vpack.c.bf16 %v6531_v22, %v6525_v15  ;;  %v6549_v45 = vld [vmem:[#allocation31 + $0x310] sm:$0xff]  ;;  %v6626_v38 = vld [vmem:[#allocation31 + $0x578] sm:$0xff] }
0x1db2   :  { %v13368_v52 = vpop.permute.xlu0 %13367  ;;  %6422 = vmatprep.mubr.f32.mxu0 %v6333_v62  ;;  %v13375_v60 = vunpack.i.h.bf16 %v13373_v51  ;;  %v13374_v12 = vunpack.i.l.bf16 %v13373_v51  ;;  %v12697_v3 = vpack.c.bf16 %v6532_v2, %v6526_v49  ;;  %v12705_v29 = vpack.c.bf16 %v6556_v10, %v6550_v5  ;;  %v6568_v20 = vld [vmem:[#allocation31 + $0x3a8] sm:$0xff]  ;;  %v6561_v51 = vld [vmem:[#allocation31 + $0x370] sm:$0xff]  ;;  %v6567_v62 = vld [vmem:[#allocation31 + $0x3a0] sm:$0xff] }
0x1db3   :  { %v13370_v13 = vunpack.i.h.bf16 %v13368_v52  ;;  %v13369_v55 = vunpack.i.l.bf16 %v13368_v52  ;;  %6423 = vmatmul.mubr.f32.gmra.mrb[62].mxu0 %v6321_v24  ;;  %v12709_v37 = vpack.c.bf16 %v6568_v20, %v6562_v8  ;;  %v6574_v24 = vld [vmem:[#allocation31 + $0x3d8] sm:$0xff]  ;;  %v12711_v52 = vpack.c.bf16 %v6567_v62, %v6561_v51  ;;  %v6616_v33 = vld [vmem:[#allocation31 + $0x528] sm:$0xff]  ;;  %v6609_v53 = vld [vmem:[#allocation31 + $0x4f0] sm:$0xff] }
0x1db4   :  { %12684 = vmatpush1.bf16.msra.mxu0 %v12683_v42  ;;  %v6555_v42 = vld [vmem:[#allocation31 + $0x340] sm:$0xff]  ;;  %v6620_v26 = vld [vmem:[#allocation31 + $0x548] sm:$0xff]  ;;  %v6638_v59 = vld [vmem:[#allocation31 + $0x5d8] sm:$0xff] }
0x1db5   :  { %v6330_v16 = vsel %vm611_vm4, %v6326_v18, %v13369_v55  ;;  %v6317_v34 = vsel %vm611_vm4, %v6313_v25, %v13370_v13  ;;  %12686 = vmatprep.subr.bf16.mxu0 %v12685_v21  ;;  %v12707_v30 = vpack.c.bf16 %v6555_v42, %v6549_v45  ;;  %v6580_v21 = vld [vmem:[#allocation31 + $0x408] sm:$0xff]  ;;  %v6579_v13 = vld [vmem:[#allocation31 + $0x400] sm:$0xff]  ;;  %v6586_v55 = vld [vmem:[#allocation31 + $0x438] sm:$0xff]  ;;  %v12665_v49 = vpack.c.bf16 %v6626_v38, %v6620_v26 }
0x1db6   :  { %v6334_v50 = vsel %vm6318_vm8, %v6330_v16, %v13374_v12  ;;  %v6322_v44 = vsel %vm6318_vm8, %v6317_v34, %v13375_v60  ;;  %v12713_v6 = vpack.c.bf16 %v6580_v21, %v6574_v24  ;;  %v12715_v35 = vpack.c.bf16 %v6579_v13, %v6573_v57  ;;  %v6585_v12 = vld [vmem:[#allocation31 + $0x430] sm:$0xff]  ;;  %v6591_v18 = vld [vmem:[#allocation31 + $0x460] sm:$0xff]  ;;  %v6598_v25 = vld [vmem:[#allocation31 + $0x498] sm:$0xff] }
0x1db7   :  { %6428 = vmatprep.mubr.f32.mxu0 %v6334_v50  ;;  %v12717_v60 = vpack.c.bf16 %v6592_v23, %v6586_v55  ;;  %v6604_v16 = vld [vmem:[#allocation31 + $0x4c8] sm:$0xff]  ;;  %v12719_v34 = vpack.c.bf16 %v6591_v18, %v6585_v12  ;;  %v6597_v50 = vld [vmem:[#allocation31 + $0x490] sm:$0xff]  ;;  %v6619_v2 = vld [vmem:[#allocation31 + $0x540] sm:$0xff]  ;;  %12666 = vmatprep.subr.bf16.mxu1 %v12665_v49 }
0x1db8   :  { %6429 = vmatmul.mubr.f32.gmra.mrb[64].mxu0 %v6322_v44  ;;  %v6603_v44 = vld [vmem:[#allocation31 + $0x4c0] sm:$0xff]  ;;  %v6628_v22 = vld [vmem:[#allocation31 + $0x588] sm:$0xff]  ;;  %v6633_v8 = vld [vmem:[#allocation31 + $0x5b0] sm:$0xff] }
0x1db9   :  { %12688 = vmatpush1.bf16.msra.mxu0 %v12687_v14  ;;  %v12721_v14 = vpack.c.bf16 %v6604_v16, %v6598_v25  ;;  %v12723_v9 = vpack.c.bf16 %v6603_v44, %v6597_v50  ;;  %v6627_v32 = vld [vmem:[#allocation31 + $0x580] sm:$0xff]  ;;  %v6632_v11 = vld [vmem:[#allocation31 + $0x5a8] sm:$0xff]  ;;  %v6462_v62 = vld [vmem:[#allocation31 + $0x58] sm:$0xff] }
0x1dba   :  { %12690 = vmatprep.subr.bf16.mxu0 %v12689_v27  ;;  %v6610_v27 = vld [vmem:[#allocation31 + $0x4f8] sm:$0xff]  ;;  %v12669_v5 = vpack.c.bf16 %v6638_v59, %v6632_v11  ;;  %v6631_v10 = vld [vmem:[#allocation31 + $0x5a0] sm:$0xff]  ;;  %v6640_v42 = vld [vmem:[#allocation31 + $0x5e8] sm:$0xff] }
0x1dbb   :  { %v12725_v4 = vpack.c.bf16 %v6616_v33, %v6610_v27  ;;  %v6639_v20 = vld [vmem:[#allocation31 + $0x5e0] sm:$0xff]  ;;  %v6456_v51 = vld [vmem:[#allocation31 + $0x28] sm:$0xff]  ;;  %v6461_v12 = vld [vmem:[#allocation31 + $0x50] sm:$0xff] }
0x1dbc   :  { %v12737_v24 = vpack.c.bf16 %v6462_v62, %v6456_v51  ;;  %v2737_v21 = vld [vmem:[%s16409_s14] sm:$0x3]  ;;  %v6468_v16 = vld [vmem:[#allocation31 + $0x88] sm:$0xff]  ;;  %v6486_v38 = vld [vmem:[#allocation31 + $0x118] sm:$0xff] }
0x1dbd   :  { %12692 = vmatpush1.bf16.msra.mxu0 %v12691_v17  ;;  %v6615_v17 = vld [vmem:[#allocation31 + $0x520] sm:$0xff]  ;;  %v6498_v11 = vld [vmem:[#allocation31 + $0x178] sm:$0xff] }
0x1dbe   :  { %12694 = vmatprep.subr.bf16.mxu0 %v12693_v47  ;;  %v12727_v47 = vpack.c.bf16 %v6615_v17, %v6609_v53  ;;  %v6467_v17 = vld [vmem:[#allocation31 + $0x80] sm:$0xff] }
0x1dc1   :  { %12696 = vmatpush1.bf16.msra.mxu0 %v12695_v28  ;;  %v6625_v28 = vld [vmem:[#allocation31 + $0x570] sm:$0xff] }
0x1dc2   :  { %12698 = vmatprep.subr.bf16.mxu0 %v12697_v3  ;;  %v6622_v3 = vld [vmem:[#allocation31 + $0x558] sm:$0xff]  ;;  %v12667_v15 = vpack.c.bf16 %v6625_v28, %v6619_v2 }
0x1dc4   :  { %12668 = vmatpush1.bf16.msra.mxu1 %v12667_v15 }
0x1dc5   :  { %12700 = vmatpush1.bf16.msra.mxu0 %v12699_v63  ;;  %v12729_v63 = vpack.c.bf16 %v6628_v22, %v6622_v3  ;;  %12670 = vmatprep.subr.bf16.mxu1 %v12669_v5 }
0x1dc6   :  { %12702 = vmatprep.subr.bf16.mxu0 %v12701_v61  ;;  %v12731_v61 = vpack.c.bf16 %v6627_v32, %v6621_v46  ;;  %v6479_v46 = vld [vmem:[#allocation31 + $0xe0] sm:$0xff]  ;;  %v6485_v32 = vld [vmem:[#allocation31 + $0x110] sm:$0xff] }
0x1dc9   :  { %12704 = vmatpush1.bf16.msra.mxu0 %v12703_v56  ;;  %v6637_v56 = vld [vmem:[#allocation31 + $0x5d0] sm:$0xff] }
0x1dca   :  { %12706 = vmatprep.subr.bf16.mxu0 %v12705_v29  ;;  %v6634_v29 = vld [vmem:[#allocation31 + $0x5b8] sm:$0xff]  ;;  %v12671_v45 = vpack.c.bf16 %v6637_v56, %v6631_v10  ;;  %v12747_v56 = vpack.c.bf16 %v6485_v32, %v6479_v46  ;;  %v6576_v46 = vld [vmem:[#allocation31 + $0x3e8] sm:$0xff] }
0x1dcb   :  { %v6582_v32 = vld [vmem:[#allocation31 + $0x418] sm:$0xff] }
0x1dcc   :  { %12672 = vmatpush1.bf16.msra.mxu1 %v12671_v45 }
0x1dcd   :  { %12708 = vmatpush1.bf16.msra.mxu0 %v12707_v30  ;;  %v12733_v30 = vpack.c.bf16 %v6640_v42, %v6634_v29  ;;  %12738 = vmatprep.subr.bf16.mxu1 %v12737_v24  ;;  %v6491_v42 = vld [vmem:[#allocation31 + $0x140] sm:$0xff] }
0x1dce   :  { %12710 = vmatprep.subr.bf16.mxu0 %v12709_v37  ;;  %v12735_v37 = vpack.c.bf16 %v6639_v20, %v6633_v8  ;;  %v6497_v8 = vld [vmem:[#allocation31 + $0x170] sm:$0xff] }
0x1dcf   :  { %v12751_v62 = vpack.c.bf16 %v6497_v8, %v6491_v42  ;;  %v6593_v42 = vld [vmem:[#allocation31 + $0x470] sm:$0xff]  ;;  %v6600_v8 = vld [vmem:[#allocation31 + $0x4a8] sm:$0xff] }
0x1dd1   :  { %12712 = vmatpush1.bf16.msra.mxu0 %v12711_v52  ;;  %v6339_v52 = vrot.slane %v2737_v21, %v14739_v41 }
0x1dd2   :  { %12714 = vmatprep.subr.bf16.mxu0 %v12713_v6  ;;  %v6343_v6 = vrot.slane %v2737_v21, %v14743_v43 }
0x1dd5   :  { %12716 = vmatpush1.bf16.msra.mxu0 %v12715_v35 }
0x1dd6   :  { %12718 = vmatprep.subr.bf16.mxu0 %v12717_v60  ;;  %v6455_v60 = vld [vmem:[#allocation31 + $0x20] sm:$0xff] }
0x1dd7   :  { %v12739_v33 = vpack.c.bf16 %v6461_v12, %v6455_v60  ;;  %v6528_v60 = vld [vmem:[#allocation31 + $0x268] sm:$0xff]  ;;  %v6534_v12 = vld [vmem:[#allocation31 + $0x298] sm:$0xff] }
0x1dd9   :  { %12720 = vmatpush1.bf16.msra.mxu0 %v12719_v34  ;;  %v6474_v34 = vld [vmem:[#allocation31 + $0xb8] sm:$0xff] }
0x1dda   :  { %12722 = vmatprep.subr.bf16.mxu0 %v12721_v14  ;;  %v12741_v53 = vpack.c.bf16 %v6474_v34, %v6468_v16  ;;  %v6527_v16 = vld [vmem:[#allocation31 + $0x260] sm:$0xff]  ;;  %v6533_v34 = vld [vmem:[#allocation31 + $0x290] sm:$0xff] }
0x1ddd   :  { %12724 = vmatpush1.bf16.msra.mxu0 %v12723_v9 }
0x1dde   :  { %12726 = vmatprep.subr.bf16.mxu0 %v12725_v4 }
0x1de1   :  { %12728 = vmatpush1.bf16.msra.mxu0 %v12727_v47 }
0x1de2   :  { %12730 = vmatprep.subr.bf16.mxu0 %v12729_v63 }
0x1de5   :  { %12732 = vmatpush1.bf16.msra.mxu0 %v12731_v61  ;;  %v6492_v61 = vld [vmem:[#allocation31 + $0x148] sm:$0xff] }
0x1de6   :  { %12734 = vmatprep.subr.bf16.mxu0 %v12733_v30  ;;  %v12749_v45 = vpack.c.bf16 %v6498_v11, %v6492_v61  ;;  %v6504_v30 = vld [vmem:[#allocation31 + $0x1a8] sm:$0xff]  ;;  %v12777_v61 = vpack.c.bf16 %v6582_v32, %v6576_v46  ;;  %v6575_v11 = vld [vmem:[#allocation31 + $0x3e0] sm:$0xff] }
0x1de9   :  { %12736 = vmatpush1.bf16.msra.mxu0 %v12735_v37  ;;  %v6510_v37 = vld [vmem:[#allocation31 + $0x1d8] sm:$0xff] }
0x1dea   :  { %v12753_v21 = vpack.c.bf16 %v6510_v37, %v6504_v30 }
0x1e7e   :  { %v6412_v57 = vpop.f32.mrb[58].mxu0 }
0x1e7f   :  { %v6413_v13 = vadd.f32 %v6412_v57, %v6339_v52  ;;  %v6414_v55 = vpop.f32.mrb[59].mxu0  ;;  %v6516_v57 = vld [vmem:[#allocation31 + $0x208] sm:$0xff] }
0x1e80   :  { %v6415_v23 = vadd.f32 %v6414_v55, %v6343_v6 }
0x1e81   :  { %v6435_v35 = vadd.f32 %v6413_v13, %v15214_v1  ;;  %v6473_v1 = vld [vmem:[#allocation31 + $0xb0] sm:$0xff]  ;;  %v6522_v13 = vld [vmem:[#allocation31 + $0x238] sm:$0xff] }
0x1e82   :  { %v6436_v18 = vadd.f32 %v6415_v23, %v15212_v39  ;;  %v6418_v25 = vpop.f32.mrb[60].mxu0  ;;  %v6480_v39 = vld [vmem:[#allocation31 + $0xe8] sm:$0xff]  ;;  %v12743_v3 = vpack.c.bf16 %v6473_v1, %v6467_v17  ;;  %v12757_v55 = vpack.c.bf16 %v6522_v13, %v6516_v57  ;;  %v6515_v23 = vld [vmem:[#allocation31 + $0x200] sm:$0xff]  ;;  %v6558_v1 = vld [vmem:[#allocation31 + $0x358] sm:$0xff] }
0x1e83   :  { %v6419_v14 = vadd.f32 %v6418_v25, %v6339_v52  ;;  %v6420_v50 = vpop.f32.mrb[61].mxu0  ;;  %v15790_v9 = vmax.f32 %v6435_v35, 0.0  ;;  %v12745_v22 = vpack.c.bf16 %v6486_v38, %v6480_v39  ;;  %v6521_v35 = vld [vmem:[#allocation31 + $0x230] sm:$0xff]  ;;  %v12761_v25 = vpack.c.bf16 %v6534_v12, %v6528_v60  ;;  %v6552_v17 = vld [vmem:[#allocation31 + $0x328] sm:$0xff]  ;;  %v6551_v39 = vld [vmem:[#allocation31 + $0x320] sm:$0xff] }
0x1e84   :  { %v15788_v44 = vmax.f32 %v6436_v18, 0.0  ;;  %v6421_v27 = vadd.f32 %v6420_v50, %v6343_v6  ;;  %v12759_v18 = vpack.c.bf16 %v6521_v35, %v6515_v23  ;;  %v6546_v50 = vld [vmem:[#allocation31 + $0x2f8] sm:$0xff]  ;;  %v6557_v38 = vld [vmem:[#allocation31 + $0x350] sm:$0xff]  ;;  %v6611_v13 = vld [vmem:[#allocation31 + $0x500] sm:$0xff] }
0x1e85   :  { %v6437_v4 = vadd.f32 %v6419_v14, %v15221_v54  ;;  %v6540_v14 = vld [vmem:[#allocation31 + $0x2c8] sm:$0xff]  ;;  %v6630_v23 = vld [vmem:[#allocation31 + $0x598] sm:$0xff]  ;;  %v6623_v12 = vld [vmem:[#allocation31 + $0x560] sm:$0xff] }
0x1e86   :  { %v6438_v47 = vadd.f32 %v6421_v27, %v15217_v58  ;;  %v6424_v26 = vpop.f32.mrb[62].mxu0  ;;  %6804 = vmatprep.mubr.f32.mxu1 %v15788_v44  ;;  %6893 = vmatprep.mubr.f32.mxu0 %v15788_v44  ;;  %v12763_v27 = vpack.c.bf16 %v6533_v34, %v6527_v16  ;;  %v6642_v16 = vld [vmem:[#allocation31 + $0x5f8] sm:$0xff] }
0x1e87   :  { %v6425_v49 = vadd.f32 %v6424_v26, %v6339_v52  ;;  %v6426_v2 = vpop.f32.mrb[63].mxu0  ;;  %6805 = vmatmul.mubr.f32.vlgmr.msra.gmra.mrb[78].mxu1 %v15790_v9  ;;  %6894 = vmatmul.mubr.f32.vlgmr.msra.gmra.mrb[66].mxu0 %v15790_v9  ;;  %v15800_v15 = vmax.f32 %v6437_v4, 0.0  ;;  %v6539_v4 = vld [vmem:[#allocation31 + $0x2c0] sm:$0xff]  ;;  %v12769_v26 = vpack.c.bf16 %v6558_v1, %v6552_v17 }
0x1e88   :  { %v15798_v28 = vmax.f32 %v6438_v47, 0.0  ;;  %v6427_v54 = vadd.f32 %v6426_v2, %v6343_v6  ;;  %12740 = vmatpush1.bf16.msra.mxu1 %v12739_v33  ;;  %v12765_v33 = vpack.c.bf16 %v6546_v50, %v6540_v14  ;;  %v6570_v2 = vld [vmem:[#allocation31 + $0x3b8] sm:$0xff]  ;;  %v6635_v50 = vld [vmem:[#allocation31 + $0x5c0] sm:$0xff] }
0x1e89   :  { %v6439_v58 = vadd.f32 %v6425_v49, %v15227_v0  ;;  %12742 = vmatprep.subr.bf16.mxu1 %v12741_v53  ;;  %v6545_v53 = vld [vmem:[#allocation31 + $0x2f0] sm:$0xff]  ;;  %v6564_v49 = vld [vmem:[#allocation31 + $0x388] sm:$0xff] }
0x1e8a   :  { %v6440_v63 = vadd.f32 %v6427_v54, %v15223_v7  ;;  %6810 = vmatprep.mubr.f32.mxu1 %v15798_v28  ;;  %6899 = vmatprep.mubr.f32.mxu0 %v15798_v28  ;;  %v12767_v47 = vpack.c.bf16 %v6545_v53, %v6539_v4  ;;  %v12771_v54 = vpack.c.bf16 %v6557_v38, %v6551_v39  ;;  %v15835_v4 = vld [vmem:[%s16410_s16] sm:$0x3f] }
0x1e8b   :  { %v6430_v59 = vpop.f32.mrb[64].mxu0  ;;  %6811 = vmatmul.mubr.f32.gmra.mrb[80].mxu1 %v15800_v15  ;;  %6900 = vmatmul.mubr.f32.gmra.mrb[68].mxu0 %v15800_v15  ;;  %v15810_v29 = vmax.f32 %v6439_v58, 0.0  ;;  %v6563_v58 = vld [vmem:[#allocation31 + $0x380] sm:$0xff]  ;;  %v6713_v53 = vrot.slane %v15835_v4, %v14739_v41 }
0x1e8c   :  { %v15808_v5 = vmax.f32 %v6440_v63, 0.0  ;;  %v6431_v0 = vadd.f32 %v6430_v59, %v6339_v52  ;;  %12744 = vmatpush1.bf16.msra.mxu1 %v12743_v3  ;;  %v6432_v10 = vpop.f32.mrb[65].mxu0  ;;  %v6503_v52 = vld [vmem:[#allocation31 + $0x1a0] sm:$0xff]  ;;  %v12773_v3 = vpack.c.bf16 %v6570_v2, %v6564_v49  ;;  %v6581_v59 = vld [vmem:[#allocation31 + $0x410] sm:$0xff]  ;;  %v16411_v49 = vsub.s32 3, %v14736_v40 }
0x1e8d   :  { %v6433_v7 = vadd.f32 %v6432_v10, %v6343_v6  ;;  %12746 = vmatprep.subr.bf16.mxu1 %v12745_v22  ;;  %v6569_v22 = vld [vmem:[#allocation31 + $0x3b0] sm:$0xff]  ;;  %v6594_v10 = vld [vmem:[#allocation31 + $0x478] sm:$0xff] }
0x1e8e   :  { %v6441_v20 = vadd.f32 %v6431_v0, %v15233_v19  ;;  %6816 = vmatprep.mubr.f32.mxu1 %v15808_v5  ;;  %6905 = vmatprep.mubr.f32.mxu0 %v15808_v5  ;;  %v6509_v19 = vld [vmem:[#allocation31 + $0x1d0] sm:$0xff]  ;;  %v12775_v63 = vpack.c.bf16 %v6569_v22, %v6563_v58  ;;  %v6588_v0 = vld [vmem:[#allocation31 + $0x448] sm:$0xff]  ;;  %v6725_v2 = vrot.slane %v15835_v4, %v16411_v49 }
0x1e8f   :  { %v6442_v51 = vadd.f32 %v6433_v7, %v15229_v36  ;;  %6817 = vmatmul.mubr.f32.gmra.mrb[82].mxu1 %v15810_v29  ;;  %6906 = vmatmul.mubr.f32.gmra.mrb[70].mxu0 %v15810_v29  ;;  %v12755_v36 = vpack.c.bf16 %v6509_v19, %v6503_v52  ;;  %v12781_v7 = vpack.c.bf16 %v6594_v10, %v6588_v0  ;;  %v6618_v52 = vld [vmem:[#allocation31 + $0x538] sm:$0xff] }
0x1e90   :  { %12748 = vmatpush1.bf16.msra.mxu1 %v12747_v56  ;;  %v15820_v6 = vmax.f32 %v6441_v20, 0.0  ;;  %v12779_v56 = vpack.c.bf16 %v6581_v59, %v6575_v11  ;;  %v6606_v20 = vld [vmem:[#allocation31 + $0x4d8] sm:$0xff] }
0x1e91   :  { %v15818_v24 = vmax.f32 %v6442_v51, 0.0  ;;  %12750 = vmatprep.subr.bf16.mxu1 %v12749_v45  ;;  %v6587_v45 = vld [vmem:[#allocation31 + $0x440] sm:$0xff]  ;;  %v12785_v37 = vpack.c.bf16 %v6606_v20, %v6600_v8 }
0x1e92   :  { %v12783_v30 = vpack.c.bf16 %v6593_v42, %v6587_v45  ;;  %v6599_v51 = vld [vmem:[#allocation31 + $0x4a0] sm:$0xff] }
0x1e93   :  { %6822 = vmatprep.mubr.f32.mxu1 %v15818_v24  ;;  %6911 = vmatprep.mubr.f32.mxu0 %v15818_v24 }
0x1e94   :  { %12752 = vmatpush1.bf16.msra.mxu1 %v12751_v62  ;;  %6912 = vmatmul.mubr.f32.gmra.mrb[72].mxu0 %v15820_v6  ;;  %v6605_v62 = vld [vmem:[#allocation31 + $0x4d0] sm:$0xff] }
0x1e95   :  { %6823 = vmatmul.mubr.f32.gmra.mrb[84].mxu1 %v15820_v6  ;;  %12754 = vmatprep.subr.bf16.mxu1 %v12753_v21  ;;  %v6612_v21 = vld [vmem:[#allocation31 + $0x508] sm:$0xff]  ;;  %v12787_v19 = vpack.c.bf16 %v6605_v62, %v6599_v51 }
0x1e96   :  { %6982 = vmatprep.mubr.f32.mxu1 %v15788_v44  ;;  %v12789_v57 = vpack.c.bf16 %v6618_v52, %v6612_v21 }
0x1e98   :  { %12756 = vmatpush1.bf16.msra.mxu1 %v12755_v36  ;;  %v6617_v36 = vld [vmem:[#allocation31 + $0x530] sm:$0xff] }
0x1e99   :  { %12758 = vmatprep.subr.bf16.mxu1 %v12757_v55  ;;  %v6624_v55 = vld [vmem:[#allocation31 + $0x568] sm:$0xff]  ;;  %v12791_v35 = vpack.c.bf16 %v6617_v36, %v6611_v13 }
0x1e9a   :  { %v12793_v60 = vpack.c.bf16 %v6630_v23, %v6624_v55 }
0x1e9c   :  { %12760 = vmatpush1.bf16.msra.mxu1 %v12759_v18  ;;  %v6629_v18 = vld [vmem:[#allocation31 + $0x590] sm:$0xff] }
0x1e9d   :  { %12762 = vmatprep.subr.bf16.mxu1 %v12761_v25  ;;  %v6636_v25 = vld [vmem:[#allocation31 + $0x5c8] sm:$0xff]  ;;  %v12795_v34 = vpack.c.bf16 %v6629_v18, %v6623_v12 }
0x1e9e   :  { %v12797_v14 = vpack.c.bf16 %v6642_v16, %v6636_v25  ;;  %v16412_v16 = vsub.s32 4, %v14736_v40 }
0x1ea0   :  { %12764 = vmatpush1.bf16.msra.mxu1 %v12763_v27  ;;  %v6641_v27 = vld [vmem:[#allocation31 + $0x5f0] sm:$0xff] }
0x1ea1   :  { %12766 = vmatprep.subr.bf16.mxu1 %v12765_v33  ;;  %v12799_v33 = vpack.c.bf16 %v6641_v27, %v6635_v50  ;;  %v16413_v50 = vsub.s32 5, %v14736_v40 }
0x1ea3   :  { %v6733_v27 = vrot.slane %v15835_v4, %v16413_v50 }
0x1ea4   :  { %12768 = vmatpush1.bf16.msra.mxu1 %v12767_v47 }
0x1ea5   :  { %12770 = vmatprep.subr.bf16.mxu1 %v12769_v26  ;;  %v6721_v26 = vrot.slane %v15835_v4, %v14752_v48 }
0x1ea8   :  { %12772 = vmatpush1.bf16.msra.mxu1 %v12771_v54 }
0x1ea9   :  { %12774 = vmatprep.subr.bf16.mxu1 %v12773_v3 }
0x1eac   :  { %12776 = vmatpush1.bf16.msra.mxu1 %v12775_v63 }
0x1ead   :  { %12778 = vmatprep.subr.bf16.mxu1 %v12777_v61 }
0x1eb0   :  { %12780 = vmatpush1.bf16.msra.mxu1 %v12779_v56 }
0x1eb1   :  { %12782 = vmatprep.subr.bf16.mxu1 %v12781_v7 }
0x1eb4   :  { %12784 = vmatpush1.bf16.msra.mxu1 %v12783_v30 }
0x1eb5   :  { %12786 = vmatprep.subr.bf16.mxu1 %v12785_v37 }
0x1eb8   :  { %12788 = vmatpush1.bf16.msra.mxu1 %v12787_v19 }
0x1eb9   :  { %12790 = vmatprep.subr.bf16.mxu1 %v12789_v57 }
0x1ebc   :  { %12792 = vmatpush1.bf16.msra.mxu1 %v12791_v35 }
0x1ebd   :  { %12794 = vmatprep.subr.bf16.mxu1 %v12793_v60 }
0x1ec0   :  { %12796 = vmatpush1.bf16.msra.mxu1 %v12795_v34  ;;  %v6729_v34 = vrot.slane %v15835_v4, %v16412_v16 }
0x1ec1   :  { %12798 = vmatprep.subr.bf16.mxu1 %v12797_v14 }
0x1ec4   :  { %12800 = vmatpush1.bf16.msra.mxu1 %v12799_v33 }
0x1ec7   :  { %6983 = vmatmul.mubr.f32.vlgmr.msra.gmra.mrb[86].mxu1 %v15790_v9 }
0x1ec8   :  { %6988 = vmatprep.mubr.f32.mxu1 %v15798_v28 }
0x1ecb   :  { %6989 = vmatmul.mubr.f32.gmra.mrb[88].mxu1 %v15800_v15 }
0x1ecc   :  { %6994 = vmatprep.mubr.f32.mxu1 %v15808_v5 }
0x1ecf   :  { %6995 = vmatmul.mubr.f32.gmra.mrb[90].mxu1 %v15810_v29 }
0x1ed0   :  { %7000 = vmatprep.mubr.f32.mxu1 %v15818_v24 }
0x1ed3   :  { %7001 = vmatmul.mubr.f32.gmra.mrb[92].mxu1 %v15820_v6 }
0x1f5a   :  { %v6806_v17 = vpop.f32.mrb[78].mxu1  ;;  %v6895_v1 = vpop.f32.mrb[66].mxu0 }
0x1f5b   :  { %v6807_v47 = vadd.f32 %v6806_v17, %v6713_v53  ;;  %v15841_v39 = vpop.f32.mrb[79].mxu1  ;;  %v6897_v38 = vpop.f32.mrb[67].mxu0  ;;  %v6896_v22 = vadd.f32 %v6895_v1, %v6721_v26 }
0x1f5c   :  { %v6898_v48 = vadd.f32 %v6897_v38, %v6725_v2 }
0x1f5d   :  { %v15846_v54 = vmul.f32 0.17677669, %v6807_v47 }
0x1f5e   :  { %v6812_v3 = vpop.f32.mrb[80].mxu1  ;;  %v6901_v58 = vpop.f32.mrb[68].mxu0 }
0x1f5f   :  { %v6902_v46 = vadd.f32 %v6901_v58, %v6721_v26  ;;  %v15848_v32 = vpop.f32.mrb[81].mxu1  ;;  %v6903_v63 = vpop.f32.mrb[69].mxu0  ;;  %11501 = vmatprep.mubr.msk.f32.mxu0 %vm3044_vm5, %v15846_v54  ;;  %v6813_v20 = vadd.f32 %v6812_v3, %v6713_v53 }
0x1f60   :  { %v6904_v61 = vadd.f32 %v6903_v63, %v6725_v2 }
0x1f61   :  { %v12801_v11 = vpack.c.bf16 %v6902_v46, %v6896_v22  ;;  %v15852_v59 = vpack.i.bf16 %v6902_v46, %v6896_v22  ;;  %v15868_v19 = vmul.f32 0.17677669, %v6813_v20 }
0x1f62   :  { %v6818_v0 = vpop.f32.mrb[82].mxu1  ;;  %v6907_v10 = vpop.f32.mrb[70].mxu0  ;;  %v15854_v56 = vpack.c.bf16 %v6904_v61, %v6898_v48  ;;  %v15856_v7 = vpack.i.bf16 %v6904_v61, %v6898_v48 }
0x1f63   :  { %v6819_v45 = vadd.f32 %v6818_v0, %v6713_v53  ;;  %v15858_v42 = vpop.f32.mrb[83].mxu1  ;;  %v6909_v8 = vpop.f32.mrb[71].mxu0  ;;  %12803 = vmatprep.subr.msk.bf16.mxu0 %vm15281_vm6, %v12801_v11  ;;  %v6908_v51 = vadd.f32 %v6907_v10, %v6721_v26 }
0x1f64   :  { %12806 = vmatpush3.bf16.xpose.msk.msra.mxu0 %vm15281_vm6, %v12801_v11  ;;  %v6910_v57 = vadd.f32 %v6909_v8, %v6725_v2 }
0x1f65   :  { %v15864_v30 = vmul.f32 0.17677669, %v6819_v45 }
0x1f67   :  { %v6913_v37 = vpop.f32.mrb[72].mxu0  ;;  %11508 = vmatprep.mubr.msk.f32.mxu1 %vm3044_vm5, %v15864_v30 }
0x1f68   :  { %v6824_v62 = vpop.f32.mrb[84].mxu1  ;;  %v6914_v21 = vadd.f32 %v6913_v37, %v6721_v26  ;;  %v6915_v52 = vpop.f32.mrb[73].mxu0 }
0x1f69   :  { %v15870_v13 = vpop.f32.mrb[85].mxu1  ;;  %v6916_v36 = vadd.f32 %v6915_v52, %v6725_v2  ;;  %v6825_v12 = vadd.f32 %v6824_v62, %v6713_v53 }
0x1f6a   :  { %v12807_v55 = vpack.c.bf16 %v6914_v21, %v6908_v51  ;;  %v15872_v23 = vpack.i.bf16 %v6914_v21, %v6908_v51 }
0x1f6b   :  { %11502 = vmatmul.mubr.msk.f32.vlgmr.msra.gmra.mrb[74].mxu0 %vm3044_vm5, %v15868_v19  ;;  %v15876_v35 = vpack.c.bf16 %v6916_v36, %v6910_v57  ;;  %v15878_v60 = vpack.i.bf16 %v6916_v36, %v6910_v57  ;;  %v15884_v18 = vmul.f32 0.17677669, %v6825_v12 }
0x1f6c   :  { %12809 = vmatprep.subr.msk.bf16.mxu1 %vm15281_vm6, %v12807_v55 }
0x1f6d   :  { %12812 = vmatpush3.bf16.xpose.msk.msra.mxu1 %vm15281_vm6, %v12807_v55 }
0x1f74   :  { %11509 = vmatmul.mubr.msk.f32.vlgmr.msra.gmra.mrb[94].mxu1 %vm3044_vm5, %v15884_v18 }
0x1f9a   :  { %v6984_v25 = vpop.f32.mrb[86].mxu1 }
0x1f9b   :  { %v6986_v14 = vpop.f32.mrb[87].mxu1  ;;  %v6985_v17 = vadd.f32 %v6984_v25, %v6729_v34 }
0x1f9c   :  { %v6987_v53 = vadd.f32 %v6986_v14, %v6733_v27 }
0x1f9e   :  { %v6990_v33 = vpop.f32.mrb[88].mxu1 }
0x1f9f   :  { %v6991_v1 = vadd.f32 %v6990_v33, %v6729_v34  ;;  %v6992_v47 = vpop.f32.mrb[89].mxu1 }
0x1fa0   :  { %v6993_v26 = vadd.f32 %v6992_v47, %v6733_v27 }
0x1fa1   :  { %v12813_v38 = vpack.c.bf16 %v6991_v1, %v6985_v17  ;;  %v15894_v49 = vpack.i.bf16 %v6991_v1, %v6985_v17 }
0x1fa2   :  { %v6996_v2 = vpop.f32.mrb[90].mxu1  ;;  %v15896_v3 = vpack.c.bf16 %v6993_v26, %v6987_v53  ;;  %v15898_v58 = vpack.i.bf16 %v6993_v26, %v6987_v53 }
0x1fa3   :  { %v6998_v22 = vpop.f32.mrb[91].mxu1  ;;  %12814 = vmatprep.subr.bf16.mxu0 %v12813_v38  ;;  %v6997_v46 = vadd.f32 %v6996_v2, %v6729_v34 }
0x1fa4   :  { %12816 = vmatpush3.bf16.msra.mxu0 %v12813_v38  ;;  %v6999_v61 = vadd.f32 %v6998_v22, %v6733_v27 }
0x1fa6   :  { %v7002_v40 = vpop.f32.mrb[92].mxu1 }
0x1fa7   :  { %v7003_v63 = vadd.f32 %v7002_v40, %v6729_v34  ;;  %v7004_v48 = vpop.f32.mrb[93].mxu1 }
0x1fa8   :  { %v7005_v11 = vadd.f32 %v7004_v48, %v6733_v27 }
0x1fa9   :  { %v12817_v0 = vpack.c.bf16 %v7003_v63, %v6997_v46  ;;  %v15900_v10 = vpack.i.bf16 %v7003_v63, %v6997_v46 }
0x1faa   :  { %v15902_v45 = vpack.c.bf16 %v7005_v11, %v6999_v61  ;;  %v15904_v8 = vpack.i.bf16 %v7005_v11, %v6999_v61 }
0x1fab   :  { %12818 = vmatprep.subr.bf16.mxu1 %v12817_v0 }
0x1fac   :  { %12820 = vmatpush3.bf16.msra.mxu1 %v12817_v0 }
0x203e   :  { %v11503_v20 = vpop.f32.mrb[74].mxu0 }
0x203f   :  { %v7093_v37 = vpop.f32.mrb[75].mxu0  ;;  %v7192_v51 = vsel %vm3219_vm7, %v11503_v20, -inf }
0x2040   :  { %7193 = vmax.xlane.f32.xlu1 %v7192_v51  ;;  %v7189_v62 = vsel %vm3219_vm7, %v7093_v37, -inf }
0x2041   :  { %7190 = vmax.xlane.f32.xlu0 %v7189_v62 }
0x2047   :  { %v11510_v21 = vpop.f32.mrb[94].mxu1 }
0x2048   :  { %v7180_v52 = vpop.f32.mrb[95].mxu1  ;;  %v7198_v36 = vsel %vm3219_vm7, %v11510_v21, -inf }
0x2049   :  { %v7195_v57 = vsel %vm3219_vm7, %v7180_v52, -inf }
0x204a   :  { %7196 = vmax.xlane.f32.xlu0 %v7195_v57 }
0x204e   :  { %7199 = vmax.xlane.f32.xlu0 %v7198_v36 }
0x2051   :  { %13377 = vrot.lane.b32.xlu1 %v15852_v59, %s14394_s5 }
0x20cd   :  { %v7194_v55 = vpop.xlane.xlu1 %7193 }
0x20ce   :  { %v7202_v12 = vsub.f32 %v11503_v20, %v7194_v55  ;;  %v7191_v25 = vpop.xlane.xlu0 %7190 }
0x20cf   :  { %v7201_v16 = vsub.f32 %v7093_v37, %v7191_v25 }
0x20d0   :  { %v7207_v34 = vmul.f32 1.442695, %v7202_v12 }
0x20d1   :  { %v7205_v14 = vmul.f32 1.442695, %v7201_v16  ;;  %v13378_v50 = vpop.permute.xlu1 %13377 }
0x20d2   :  { %13692 = vpow2.f32 %v7207_v34  ;;  %v13380_v27 = vunpack.i.h.bf16 %v13378_v50  ;;  %v13379_v33 = vunpack.i.l.bf16 %v13378_v50 }
0x20d3   :  { %13694 = vpow2.f32 %v7205_v14 }
0x20d4   :  { %v12821_v17 = vpack.c.bf16 %v13380_v27, %v13379_v33 }
0x20d6   :  { %12823 = vmatprep.subr.msk.bf16.mxu0 %vm15281_vm6, %v12821_v17 }
0x20d7   :  { %v7197_v1 = vpop.xlane.xlu0 %7196 }
0x20d8   :  { %v7203_v48 = vsub.f32 %v7180_v52, %v7197_v1 }
0x20da   :  { %v7209_v61 = vmul.f32 1.442695, %v7203_v48 }
0x20db   :  { %v7200_v47 = vpop.xlane.xlu0 %7199 }
0x20dc   :  { %v13693_v53 = vpop.eup %13692  ;;  %v7204_v26 = vsub.f32 %v11510_v21, %v7200_v47 }
0x20dd   :  { %v13695_v38 = vpop.eup %13694  ;;  %v7216_v2 = vsel %vm3219_vm7, %v13693_v53, 0.0 }
0x20de   :  { %v7211_v22 = vmul.f32 1.442695, %v7204_v26  ;;  %7217 = vadd.xlane.f32.xlu0 %v7216_v2  ;;  %v7213_v40 = vsel %vm3219_vm7, %v13695_v38, 0.0 }
0x20df   :  { %7214 = vadd.xlane.f32.xlu1 %v7213_v40 }
0x20e0   :  { %13696 = vpow2.f32 %v7211_v22 }
0x20e1   :  { %13698 = vpow2.f32 %v7209_v61 }
0x20ea   :  { %v13697_v46 = vpop.eup %13696 }
0x20eb   :  { %v7222_v63 = vsel %vm3219_vm7, %v13697_v46, 0.0  ;;  %v13699_v11 = vpop.eup %13698 }
0x20ec   :  { %7223 = vadd.xlane.f32.xlu0 %v7222_v63  ;;  %v7219_v0 = vsel %vm3219_vm7, %v13699_v11, 0.0 }
0x20f0   :  { %7395 = vrot.lane.b32.xlu1 %v15846_v54, %s14394_s5 }
0x20f4   :  { %7397 = vrot.lane.b32.xlu1 %v15868_v19, %s14394_s5 }
0x2102   :  { %13382 = vrot.lane.b32.xlu0 %v15872_v23, %s14394_s5 }
0x2106   :  { %7486 = vrot.lane.b32.xlu0 %v15864_v30, %s14394_s5 }
0x2118   :  { %7220 = vadd.xlane.f32.xlu1 %v7219_v0 }
0x2129   :  { %7488 = vrot.lane.b32.xlu1 %v15884_v18, %s14394_s5 }
0x216b   :  { %v7218_v20 = vpop.xlane.xlu0 %7217 }
0x216c   :  { %13700 = vrcp.f32 %v7218_v20  ;;  %v7215_v37 = vpop.xlane.xlu1 %7214 }
0x216d   :  { %13702 = vrcp.f32 %v7215_v37 }
0x2170   :  { %v7396_v36 = vpop.permute.xlu1 %7395 }
0x2174   :  { %v7398_v34 = vpop.permute.xlu1 %7397 }
0x2176   :  { %v13701_v51 = vpop.eup %13700 }
0x2177   :  { %v13703_v62 = vpop.eup %13702  ;;  %v7230_v57 = vmul.f32 %v13701_v51, %v13693_v53 }
0x2178   :  { %v7229_v21 = vmul.f32 %v13703_v62, %v13695_v38 }
0x2179   :  { %v7224_v52 = vpop.xlane.xlu0 %7223 }
0x217a   :  { %11515 = vmatprep.mubr.msk.f32.mxu0 %vm3219_vm7, %v7229_v21  ;;  %13704 = vrcp.f32 %v7224_v52 }
0x217b   :  { %11516 = vmatmul.mubr.msk.f32.vlgmr.msra.gmra.mrb[76].mxu0 %vm3219_vm7, %v7230_v57 }
0x217c   :  { %12826 = vmatpush3.bf16.xpose.msk.msra.mxu0 %vm15281_vm6, %v12821_v17  ;;  %11529 = vmatprep.mubr.msk.f32.mxu0 %vm3044_vm5, %v7396_v36 }
0x217d   :  { %v13383_v55 = vpop.permute.xlu0 %13382 }
0x217e   :  { %v13385_v12 = vunpack.i.h.bf16 %v13383_v55  ;;  %v13384_v25 = vunpack.i.l.bf16 %v13383_v55 }
0x2180   :  { %v12827_v16 = vpack.c.bf16 %v13385_v12, %v13384_v25 }
0x2181   :  { %v7487_v17 = vpop.permute.xlu0 %7486 }
0x2182   :  { %12829 = vmatprep.subr.msk.bf16.mxu1 %vm15281_vm6, %v12827_v16 }
0x2183   :  { %11530 = vmatmul.mubr.msk.f32.vlgmr.msra.gmra.mrb[78].mxu0 %vm3044_vm5, %v7398_v34 }
0x2184   :  { %v13705_v50 = vpop.eup %13704 }
0x2185   :  { %v7232_v1 = vmul.f32 %v13705_v50, %v13697_v46 }
0x21a5   :  { %v7221_v14 = vpop.xlane.xlu1 %7220 }
0x21a6   :  { %13706 = vrcp.f32 %v7221_v14 }
0x21a9   :  { %v7489_v47 = vpop.permute.xlu1 %7488 }
0x21b0   :  { %v13707_v27 = vpop.eup %13706 }
0x21b1   :  { %v7231_v33 = vmul.f32 %v13707_v27, %v13699_v11 }
0x21b3   :  { %11522 = vmatprep.mubr.msk.f32.mxu1 %vm3219_vm7, %v7231_v33 }
0x21b4   :  { %11523 = vmatmul.mubr.msk.f32.vlgmr.msra.gmra.mrb[96].mxu1 %vm3219_vm7, %v7232_v1 }
0x21b5   :  { %12832 = vmatpush3.bf16.xpose.msk.msra.mxu1 %vm15281_vm6, %v12827_v16  ;;  %11536 = vmatprep.mubr.msk.f32.mxu1 %vm3044_vm5, %v7487_v17 }
0x21bc   :  { %11537 = vmatmul.mubr.msk.f32.vlgmr.msra.gmra.mrb[98].mxu1 %vm3044_vm5, %v7489_v47 }
0x224e   :  { %v15942_v53 = vpop.f32.mrb[76].mxu0 }
0x224f   :  { %v15944_v26 = vpop.f32.mrb[77].mxu0 }
0x2256   :  { %v11531_v38 = vpop.f32.mrb[78].mxu0 }
0x2257   :  { %v7477_v2 = vpop.f32.mrb[79].mxu0  ;;  %v7580_v22 = vsel %vm3219_vm7, %v11531_v38, -inf }
0x2258   :  { %7581 = vmax.xlane.f32.xlu1 %v7580_v22  ;;  %v7577_v40 = vsel %vm3219_vm7, %v7477_v2, -inf }
0x2259   :  { %7578 = vmax.xlane.f32.xlu0 %v7577_v40 }
0x2269   :  { %13387 = vrot.lane.b32.xlu1 %v15894_v49, %s14394_s5 }
0x226d   :  { %13397 = vrot.lane.b32.xlu1 %v15852_v59, %s14393_s3 }
0x2271   :  { %13402 = vrot.lane.b32.xlu1 %v15872_v23, %s14393_s3 }
0x2287   :  { %v15954_v46 = vpop.f32.mrb[96].mxu1 }
0x2288   :  { %v15956_v63 = vpop.f32.mrb[97].mxu1 }
0x228f   :  { %v11538_v48 = vpop.f32.mrb[98].mxu1 }
0x2290   :  { %v7568_v61 = vpop.f32.mrb[99].mxu1  ;;  %v7586_v0 = vsel %vm3219_vm7, %v11538_v48, -inf }
0x2291   :  { %v7583_v11 = vsel %vm3219_vm7, %v7568_v61, -inf }
0x2292   :  { %7584 = vmax.xlane.f32.xlu0 %v7583_v11 }
0x2296   :  { %7587 = vmax.xlane.f32.xlu0 %v7586_v0 }
0x22ac   :  { %13392 = vrot.lane.b32.xlu0 %v15900_v10, %s14394_s5 }
0x22e5   :  { %v7582_v20 = vpop.xlane.xlu1 %7581 }
0x22e6   :  { %v7590_v37 = vsub.f32 %v11531_v38, %v7582_v20  ;;  %v7579_v51 = vpop.xlane.xlu0 %7578 }
0x22e7   :  { %v7589_v62 = vsub.f32 %v7477_v2, %v7579_v51 }
0x22e8   :  { %v7595_v21 = vmul.f32 1.442695, %v7590_v37 }
0x22e9   :  { %v7593_v52 = vmul.f32 1.442695, %v7589_v62  ;;  %v13388_v57 = vpop.permute.xlu1 %13387 }
0x22ea   :  { %13708 = vpow2.f32 %v7595_v21  ;;  %v13390_v36 = vunpack.i.h.bf16 %v13388_v57  ;;  %v13389_v55 = vunpack.i.l.bf16 %v13388_v57 }
0x22eb   :  { %13710 = vpow2.f32 %v7593_v52 }
0x22ec   :  { %v12833_v12 = vpack.c.bf16 %v13390_v36, %v13389_v55 }
0x22ed   :  { %v13398_v25 = vpop.permute.xlu1 %13397 }
0x22ee   :  { %v13400_v16 = vunpack.i.h.bf16 %v13398_v25  ;;  %v13399_v34 = vunpack.i.l.bf16 %v13398_v25  ;;  %12834 = vmatprep.subr.bf16.mxu0 %v12833_v12 }
0x22ef   :  { %12836 = vmatpush3.bf16.msra.mxu0 %v12833_v12 }
0x22f0   :  { %v12841_v14 = vpack.c.bf16 %v13400_v16, %v13399_v34 }
0x22f1   :  { %v13403_v22 = vpop.permute.xlu1 %13402 }
0x22f2   :  { %12843 = vmatprep.subr.msk.bf16.mxu0 %vm15281_vm6, %v12841_v14  ;;  %v13405_v0 = vunpack.i.h.bf16 %v13403_v22  ;;  %v13404_v37 = vunpack.i.l.bf16 %v13403_v22 }
0x22f4   :  { %v13709_v50 = vpop.eup %13708  ;;  %v12847_v52 = vpack.c.bf16 %v13405_v0, %v13404_v37 }
0x22f5   :  { %v13711_v27 = vpop.eup %13710  ;;  %v7604_v33 = vsel %vm3219_vm7, %v13709_v50, 0.0 }
0x22f6   :  { %7605 = vadd.xlane.f32.xlu0 %v7604_v33  ;;  %v7601_v1 = vsel %vm3219_vm7, %v13711_v27, 0.0 }
0x22f7   :  { %7602 = vadd.xlane.f32.xlu1 %v7601_v1 }
0x2308   :  { %7801 = vrot.lane.b32.xlu1 %v15868_v19, %s14393_s3 }
0x231f   :  { %v7585_v17 = vpop.xlane.xlu0 %7584 }
0x2320   :  { %v7591_v47 = vsub.f32 %v7568_v61, %v7585_v17 }
0x2322   :  { %v7597_v38 = vmul.f32 1.442695, %v7591_v47 }
0x2323   :  { %v7588_v2 = vpop.xlane.xlu0 %7587 }
0x2324   :  { %13712 = vpow2.f32 %v7597_v38  ;;  %v7592_v40 = vsub.f32 %v11538_v48, %v7588_v2 }
0x2326   :  { %v7599_v11 = vmul.f32 1.442695, %v7592_v40 }
0x2327   :  { %v13393_v20 = vpop.permute.xlu0 %13392 }
0x2328   :  { %13714 = vpow2.f32 %v7599_v11  ;;  %v13395_v51 = vunpack.i.h.bf16 %v13393_v20  ;;  %v13394_v62 = vunpack.i.l.bf16 %v13393_v20 }
0x232a   :  { %v12837_v21 = vpack.c.bf16 %v13395_v51, %v13394_v62 }
0x232c   :  { %12838 = vmatprep.subr.bf16.mxu1 %v12837_v21 }
0x232d   :  { %12840 = vmatpush3.bf16.msra.mxu1 %v12837_v21 }
0x232e   :  { %v13713_v57 = vpop.eup %13712  ;;  %12849 = vmatprep.subr.msk.bf16.mxu1 %vm15281_vm6, %v12847_v52 }
0x232f   :  { %v7607_v61 = vsel %vm3219_vm7, %v13713_v57, 0.0 }
0x2330   :  { %7608 = vadd.xlane.f32.xlu1 %v7607_v61 }
0x2332   :  { %v13715_v36 = vpop.eup %13714 }
0x2333   :  { %v7610_v48 = vsel %vm3219_vm7, %v13715_v36, 0.0 }
0x2334   :  { %7611 = vadd.xlane.f32.xlu0 %v7610_v48 }
0x2341   :  { %7892 = vrot.lane.b32.xlu1 %v15884_v18, %s14393_s3 }
0x234a   :  { %7799 = vrot.lane.b32.xlu0 %v15846_v54, %s14393_s3 }
0x234e   :  { %7890 = vrot.lane.b32.xlu0 %v15864_v30, %s14393_s3 }
0x2383   :  { %v7606_v55 = vpop.xlane.xlu0 %7605 }
0x2384   :  { %13716 = vrcp.f32 %v7606_v55  ;;  %v7603_v12 = vpop.xlane.xlu1 %7602 }
0x2385   :  { %13718 = vrcp.f32 %v7603_v12 }
0x2388   :  { %v7802_v1 = vpop.permute.xlu1 %7801 }
0x238e   :  { %v13717_v25 = vpop.eup %13716 }
0x238f   :  { %v13719_v16 = vpop.eup %13718  ;;  %v7618_v33 = vmul.f32 %v13717_v25, %v13709_v50 }
0x2390   :  { %v7617_v34 = vmul.f32 %v13719_v16, %v13711_v27 }
0x2392   :  { %11543 = vmatprep.mubr.msk.f32.mxu0 %vm3219_vm7, %v7617_v34 }
0x2393   :  { %11544 = vmatmul.mubr.msk.f32.vlgmr.msra.gmra.mrb[80].mxu0 %vm3219_vm7, %v7618_v33 }
0x2394   :  { %12846 = vmatpush3.bf16.xpose.msk.msra.mxu0 %vm15281_vm6, %v12841_v14 }
0x23bd   :  { %v7609_v17 = vpop.xlane.xlu1 %7608 }
0x23be   :  { %13720 = vrcp.f32 %v7609_v17 }
0x23c1   :  { %v7612_v47 = vpop.xlane.xlu0 %7611  ;;  %v7893_v14 = vpop.permute.xlu1 %7892 }
0x23c2   :  { %13722 = vrcp.f32 %v7612_v47 }
0x23c5   :  { %v7800_v38 = vpop.permute.xlu0 %7799 }
0x23c6   :  { %11557 = vmatprep.mubr.msk.f32.mxu0 %vm3044_vm5, %v7800_v38 }
0x23c7   :  { %11558 = vmatmul.mubr.msk.f32.vlgmr.msra.gmra.mrb[82].mxu0 %vm3044_vm5, %v7802_v1 }
0x23c8   :  { %v13721_v2 = vpop.eup %13720 }
0x23c9   :  { %v7619_v27 = vmul.f32 %v13721_v2, %v13713_v57  ;;  %v7891_v40 = vpop.permute.xlu0 %7890 }
0x23cb   :  { %11550 = vmatprep.mubr.msk.f32.mxu1 %vm3219_vm7, %v7619_v27 }
0x23cc   :  { %v13723_v50 = vpop.eup %13722 }
0x23cd   :  { %v7620_v22 = vmul.f32 %v13723_v50, %v13715_v36 }
0x23cf   :  { %11551 = vmatmul.mubr.msk.f32.vlgmr.msra.gmra.mrb[100].mxu1 %vm3219_vm7, %v7620_v22 }
0x23d0   :  { %12852 = vmatpush3.bf16.xpose.msk.msra.mxu1 %vm15281_vm6, %v12847_v52  ;;  %11564 = vmatprep.mubr.msk.f32.mxu1 %vm3044_vm5, %v7891_v40 }
0x23d7   :  { %11565 = vmatmul.mubr.msk.f32.vlgmr.msra.gmra.mrb[102].mxu1 %vm3044_vm5, %v7893_v14 }
0x2466   :  { %v15990_v11 = vpop.f32.mrb[80].mxu0 }
0x2467   :  { %v15992_v0 = vpop.f32.mrb[81].mxu0 }
0x249a   :  { %v11559_v20 = vpop.f32.mrb[82].mxu0 }
0x249b   :  { %v7881_v37 = vpop.f32.mrb[83].mxu0  ;;  %v7984_v51 = vsel %vm3219_vm7, %v11559_v20, -inf }
0x249c   :  { %7985 = vmax.xlane.f32.xlu1 %v7984_v51  ;;  %v7981_v62 = vsel %vm3219_vm7, %v7881_v37, -inf }
0x249d   :  { %7982 = vmax.xlane.f32.xlu0 %v7981_v62 }
0x24a2   :  { %v15996_v21 = vpop.f32.mrb[100].mxu1 }
0x24a3   :  { %v15998_v52 = vpop.f32.mrb[101].mxu1 }
0x24aa   :  { %v11566_v57 = vpop.f32.mrb[102].mxu1 }
0x24ab   :  { %v7972_v61 = vpop.f32.mrb[103].mxu1  ;;  %v7990_v48 = vsel %vm3219_vm7, %v11566_v57, -inf }
0x24ac   :  { %v7987_v36 = vsel %vm3219_vm7, %v7972_v61, -inf }
0x24ad   :  { %7988 = vmax.xlane.f32.xlu0 %v7987_v36  ;;  %13407 = vrot.lane.b32.xlu1 %v15894_v49, %s14393_s3 }
0x24b1   :  { %7991 = vmax.xlane.f32.xlu0 %v7990_v48  ;;  %13417 = vrot.lane.b32.xlu1 %v15852_v59, %s14395_s13 }
0x24b5   :  { %13422 = vrot.lane.b32.xlu1 %v15872_v23, %s14395_s13 }
0x24c7   :  { %13412 = vrot.lane.b32.xlu0 %v15900_v10, %s14393_s3 }
0x2529   :  { %v7986_v55 = vpop.xlane.xlu1 %7985 }
0x252a   :  { %v7994_v12 = vsub.f32 %v11559_v20, %v7986_v55  ;;  %v7983_v25 = vpop.xlane.xlu0 %7982 }
0x252b   :  { %v7993_v16 = vsub.f32 %v7881_v37, %v7983_v25 }
0x252c   :  { %v7999_v34 = vmul.f32 1.442695, %v7994_v12 }
0x252d   :  { %v7997_v33 = vmul.f32 1.442695, %v7993_v16  ;;  %v13408_v1 = vpop.permute.xlu1 %13407 }
0x252e   :  { %13724 = vpow2.f32 %v7999_v34  ;;  %v13410_v17 = vunpack.i.h.bf16 %v13408_v1  ;;  %v13409_v47 = vunpack.i.l.bf16 %v13408_v1 }
0x252f   :  { %13726 = vpow2.f32 %v7997_v33 }
0x2530   :  { %v12853_v38 = vpack.c.bf16 %v13410_v17, %v13409_v47 }
0x2531   :  { %v13418_v2 = vpop.permute.xlu1 %13417 }
0x2532   :  { %v13420_v59 = vunpack.i.h.bf16 %v13418_v2  ;;  %v13419_v27 = vunpack.i.l.bf16 %v13418_v2  ;;  %12854 = vmatprep.subr.bf16.mxu0 %v12853_v38 }
0x2533   :  { %12856 = vmatpush3.bf16.msra.mxu0 %v12853_v38 }
0x2534   :  { %v12861_v23 = vpack.c.bf16 %v13420_v59, %v13419_v27 }
0x2535   :  { %v13423_v51 = vpop.permute.xlu1 %13422 }
0x2536   :  { %12863 = vmatprep.subr.msk.bf16.mxu0 %vm15281_vm6, %v12861_v23  ;;  %v13425_v48 = vunpack.i.h.bf16 %v13423_v51  ;;  %v13424_v12 = vunpack.i.l.bf16 %v13423_v51 }
0x2538   :  { %v13725_v50 = vpop.eup %13724  ;;  %v12867_v33 = vpack.c.bf16 %v13425_v48, %v13424_v12 }
0x2539   :  { %v13727_v22 = vpop.eup %13726  ;;  %v8008_v40 = vsel %vm3219_vm7, %v13725_v50, 0.0 }
0x253a   :  { %v7989_v14 = vpop.xlane.xlu0 %7988  ;;  %8009 = vadd.xlane.f32.xlu0 %v8008_v40  ;;  %v8005_v20 = vsel %vm3219_vm7, %v13727_v22, 0.0 }
0x253b   :  { %8006 = vadd.xlane.f32.xlu1 %v8005_v20  ;;  %v7995_v17 = vsub.f32 %v7972_v61, %v7989_v14 }
0x253d   :  { %v8001_v47 = vmul.f32 1.442695, %v7995_v17 }
0x253e   :  { %v7992_v37 = vpop.xlane.xlu0 %7991 }
0x253f   :  { %v7996_v62 = vsub.f32 %v11566_v57, %v7992_v37 }
0x2541   :  { %v8003_v36 = vmul.f32 1.442695, %v7996_v62 }
0x2542   :  { %v13413_v55 = vpop.permute.xlu0 %13412 }
0x2543   :  { %13728 = vpow2.f32 %v8003_v36  ;;  %v13415_v25 = vunpack.i.h.bf16 %v13413_v55  ;;  %v13414_v16 = vunpack.i.l.bf16 %v13413_v55 }
0x2544   :  { %13730 = vpow2.f32 %v8001_v47 }
0x2545   :  { %v12857_v34 = vpack.c.bf16 %v13415_v25, %v13414_v16 }
0x2547   :  { %12858 = vmatprep.subr.bf16.mxu1 %v12857_v34 }
0x2548   :  { %12860 = vmatpush3.bf16.msra.mxu1 %v12857_v34 }
0x2549   :  { %12869 = vmatprep.subr.msk.bf16.mxu1 %vm15281_vm6, %v12867_v33 }
0x254c   :  { %8201 = vrot.lane.b32.xlu1 %v15868_v19, %s14395_s13 }
0x254d   :  { %v13729_v1 = vpop.eup %13728 }
0x254e   :  { %v8014_v57 = vsel %vm3219_vm7, %v13729_v1, 0.0  ;;  %v13731_v38 = vpop.eup %13730 }
0x254f   :  { %8015 = vadd.xlane.f32.xlu0 %v8014_v57  ;;  %v8011_v2 = vsel %vm3219_vm7, %v13731_v38, 0.0 }
0x2565   :  { %8199 = vrot.lane.b32.xlu0 %v15846_v54, %s14395_s13 }
0x2569   :  { %8290 = vrot.lane.b32.xlu0 %v15864_v30, %s14395_s13 }
0x2570   :  { %8012 = vadd.xlane.f32.xlu1 %v8011_v2 }
0x2581   :  { %8292 = vrot.lane.b32.xlu1 %v15884_v18, %s14395_s13 }
0x25c7   :  { %v8010_v19 = vpop.xlane.xlu0 %8009 }
0x25c8   :  { %13732 = vrcp.f32 %v8010_v19  ;;  %v8007_v59 = vpop.xlane.xlu1 %8006 }
0x25c9   :  { %13734 = vrcp.f32 %v8007_v59 }
0x25cc   :  { %v8202_v20 = vpop.permute.xlu1 %8201 }
0x25d2   :  { %v13733_v61 = vpop.eup %13732 }
0x25d3   :  { %v13735_v27 = vpop.eup %13734  ;;  %v8022_v14 = vmul.f32 %v13733_v61, %v13725_v50 }
0x25d4   :  { %v8021_v40 = vmul.f32 %v13735_v27, %v13727_v22 }
0x25d6   :  { %11571 = vmatprep.mubr.msk.f32.mxu0 %vm3219_vm7, %v8021_v40 }
0x25d7   :  { %11572 = vmatmul.mubr.msk.f32.vlgmr.msra.gmra.mrb[84].mxu0 %vm3219_vm7, %v8022_v14 }
0x25d8   :  { %12866 = vmatpush3.bf16.xpose.msk.msra.mxu0 %vm15281_vm6, %v12861_v23 }
0x25dc   :  { %v8016_v54 = vpop.xlane.xlu0 %8015 }
0x25dd   :  { %13736 = vrcp.f32 %v8016_v54 }
0x25e0   :  { %v8200_v30 = vpop.permute.xlu0 %8199 }
0x25e1   :  { %11585 = vmatprep.mubr.msk.f32.mxu0 %vm3044_vm5, %v8200_v30 }
0x25e2   :  { %11586 = vmatmul.mubr.msk.f32.vlgmr.msra.gmra.mrb[86].mxu0 %vm3044_vm5, %v8202_v20 }
0x25e4   :  { %v8291_v62 = vpop.permute.xlu0 %8290 }
0x25e7   :  { %v13737_v37 = vpop.eup %13736 }
0x25e8   :  { %v8024_v51 = vmul.f32 %v13737_v37, %v13729_v1 }
0x25fd   :  { %v8013_v18 = vpop.xlane.xlu1 %8012 }
0x25fe   :  { %13738 = vrcp.f32 %v8013_v18 }
0x2601   :  { %v8293_v23 = vpop.permute.xlu1 %8292 }
0x2608   :  { %v13739_v22 = vpop.eup %13738 }
0x2609   :  { %v8023_v50 = vmul.f32 %v13739_v22, %v13731_v38 }
0x260b   :  { %11578 = vmatprep.mubr.msk.f32.mxu1 %vm3219_vm7, %v8023_v50 }
0x260c   :  { %11579 = vmatmul.mubr.msk.f32.vlgmr.msra.gmra.mrb[104].mxu1 %vm3219_vm7, %v8024_v51 }
0x260d   :  { %12872 = vmatpush3.bf16.xpose.msk.msra.mxu1 %vm15281_vm6, %v12867_v33  ;;  %11592 = vmatprep.mubr.msk.f32.mxu1 %vm3044_vm5, %v8291_v62 }
0x2614   :  { %11593 = vmatmul.mubr.msk.f32.vlgmr.msra.gmra.mrb[106].mxu1 %vm3044_vm5, %v8293_v23 }
0x26aa   :  { %v16038_v36 = vpop.f32.mrb[84].mxu0 }
0x26ab   :  { %v16040_v48 = vpop.f32.mrb[85].mxu0 }
0x26b5   :  { %v11587_v55 = vpop.f32.mrb[86].mxu0 }
0x26b6   :  { %v8281_v12 = vpop.f32.mrb[87].mxu0  ;;  %v8384_v25 = vsel %vm3219_vm7, %v11587_v55, -inf }
0x26b7   :  { %8385 = vmax.xlane.f32.xlu1 %v8384_v25  ;;  %v8381_v16 = vsel %vm3219_vm7, %v8281_v12, -inf }
0x26b8   :  { %8382 = vmax.xlane.f32.xlu0 %v8381_v16 }
0x26df   :  { %v16044_v34 = vpop.f32.mrb[104].mxu1 }
0x26e0   :  { %v16046_v33 = vpop.f32.mrb[105].mxu1 }
0x26e7   :  { %v11594_v1 = vpop.f32.mrb[106].mxu1 }
0x26e8   :  { %v8372_v57 = vpop.f32.mrb[107].mxu1  ;;  %v8390_v47 = vsel %vm3219_vm7, %v11594_v1, -inf }
0x26e9   :  { %v8387_v17 = vsel %vm3219_vm7, %v8372_v57, -inf }
0x26ea   :  { %8388 = vmax.xlane.f32.xlu0 %v8387_v17 }
0x26ee   :  { %8391 = vmax.xlane.f32.xlu0 %v8390_v47 }
0x2744   :  { %v8386_v38 = vpop.xlane.xlu1 %8385 }
0x2745   :  { %v8394_v2 = vsub.f32 %v11587_v55, %v8386_v38  ;;  %v8383_v19 = vpop.xlane.xlu0 %8382 }
0x2746   :  { %v8393_v59 = vsub.f32 %v8281_v12, %v8383_v19 }
0x2747   :  { %v8399_v61 = vmul.f32 1.442695, %v8394_v2  ;;  %v6717_v2 = vrot.slane %v15835_v4, %v14743_v43 }
0x2748   :  { %v8397_v27 = vmul.f32 1.442695, %v8393_v59 }
0x2749   :  { %13740 = vpow2.f32 %v8399_v61 }
0x274a   :  { %13742 = vpow2.f32 %v8397_v27  ;;  %v6809_v27 = vadd.f32 %v15841_v39, %v6717_v2 }
0x2753   :  { %v13741_v40 = vpop.eup %13740 }
0x2754   :  { %v13743_v14 = vpop.eup %13742  ;;  %v8408_v54 = vsel %vm3219_vm7, %v13741_v40, 0.0 }
0x2755   :  { %8409 = vadd.xlane.f32.xlu0 %v8408_v54  ;;  %v8405_v30 = vsel %vm3219_vm7, %v13743_v14, 0.0 }
0x2756   :  { %8406 = vadd.xlane.f32.xlu1 %v8405_v30 }
0x2777   :  { %v8389_v20 = vpop.xlane.xlu0 %8388 }
0x2778   :  { %v8395_v18 = vsub.f32 %v8372_v57, %v8389_v20 }
0x277a   :  { %v8401_v37 = vmul.f32 1.442695, %v8395_v18 }
0x277b   :  { %v8392_v22 = vpop.xlane.xlu0 %8391 }
0x277c   :  { %13744 = vpow2.f32 %v8401_v37  ;;  %v8396_v50 = vsub.f32 %v11594_v1, %v8392_v22  ;;  %v16065_v37 = vmul.f32 0.17677669, %v6809_v27  ;;  %v6821_v22 = vadd.f32 %v15858_v42, %v6717_v2 }
0x277d   :  { %v6815_v42 = vadd.f32 %v15848_v32, %v6717_v2 }
0x277e   :  { %v8403_v51 = vmul.f32 1.442695, %v8396_v50  ;;  %v16075_v50 = vmul.f32 0.17677669, %v6821_v22 }
0x2780   :  { %13746 = vpow2.f32 %v8403_v51  ;;  %v16088_v51 = vmul.f32 0.17677669, %v6815_v42 }
0x2786   :  { %v13745_v62 = vpop.eup %13744 }
0x2787   :  { %v8411_v23 = vsel %vm3219_vm7, %v13745_v62, 0.0 }
0x2788   :  { %8412 = vadd.xlane.f32.xlu1 %v8411_v23 }
0x278a   :  { %v13747_v55 = vpop.eup %13746 }
0x278b   :  { %v8414_v12 = vsel %vm3219_vm7, %v13747_v55, 0.0 }
0x278c   :  { %8415 = vadd.xlane.f32.xlu0 %v8414_v12 }
0x2799   :  { %13427 = vrot.lane.b32.xlu1 %v15894_v49, %s14395_s13 }
0x27a2   :  { %13432 = vrot.lane.b32.xlu0 %v15900_v10, %s14395_s13 }
0x27e2   :  { %v8410_v57 = vpop.xlane.xlu0 %8409 }
0x27e3   :  { %v8407_v25 = vpop.xlane.xlu1 %8406 }
0x27e4   :  { %13748 = vrcp.f32 %v8407_v25 }
0x27e5   :  { %13750 = vrcp.f32 %v8410_v57 }
0x27ee   :  { %v13749_v16 = vpop.eup %13748 }
0x27ef   :  { %v8421_v1 = vmul.f32 %v13749_v16, %v13743_v14  ;;  %v13751_v10 = vpop.eup %13750 }
0x27f0   :  { %v8422_v20 = vmul.f32 %v13751_v10, %v13741_v40 }
0x27f1   :  { %11599 = vmatprep.mubr.msk.f32.mxu0 %vm3219_vm7, %v8421_v1 }
0x2815   :  { %v8413_v17 = vpop.xlane.xlu1 %8412 }
0x2816   :  { %13752 = vrcp.f32 %v8413_v17 }
0x2819   :  { %v13428_v47 = vpop.permute.xlu1 %13427  ;;  %v8416_v38 = vpop.xlane.xlu0 %8415 }
0x281a   :  { %v13430_v19 = vunpack.i.h.bf16 %v13428_v47  ;;  %v13429_v49 = vunpack.i.l.bf16 %v13428_v47  ;;  %13754 = vrcp.f32 %v8416_v38 }
0x281c   :  { %v12873_v59 = vpack.c.bf16 %v13430_v19, %v13429_v49 }
0x281d   :  { %v13433_v61 = vpop.permute.xlu0 %13432 }
0x281e   :  { %v13435_v14 = vunpack.i.h.bf16 %v13433_v61  ;;  %v13434_v54 = vunpack.i.l.bf16 %v13433_v61  ;;  %12874 = vmatprep.subr.bf16.mxu0 %v12873_v59 }
0x281f   :  { %12876 = vmatpush3.bf16.msra.mxu0 %v12873_v59 }
0x2820   :  { %v13753_v30 = vpop.eup %13752  ;;  %v12877_v18 = vpack.c.bf16 %v13435_v14, %v13434_v54  ;;  %12883 = vmatprep.subr.msk.bf16.mxu0 %vm15281_vm6, %v15854_v56 }
0x2821   :  { %v8423_v4 = vmul.f32 %v13753_v30, %v13745_v62  ;;  %v6827_v62 = vadd.f32 %v15870_v13, %v6717_v2 }
0x2822   :  { %11600 = vmatmul.mubr.msk.f32.vlgmr.msra.gmra.mrb[88].mxu0 %vm3219_vm7, %v8422_v20  ;;  %12878 = vmatprep.subr.bf16.mxu1 %v12877_v18 }
0x2823   :  { %12880 = vmatpush3.bf16.msra.mxu1 %v12877_v18  ;;  %11606 = vmatprep.mubr.msk.f32.mxu1 %vm3219_vm7, %v8423_v4 }
0x2824   :  { %v13755_v39 = vpop.eup %13754  ;;  %11613 = vmatprep.mubr.msk.f32.mxu0 %vm3044_vm5, %v16065_v37  ;;  %12889 = vmatprep.subr.msk.bf16.mxu1 %vm15281_vm6, %v15876_v35 }
0x2825   :  { %v8424_v40 = vmul.f32 %v13755_v39, %v13747_v55 }
0x2827   :  { %11607 = vmatmul.mubr.msk.f32.vlgmr.msra.gmra.mrb[108].mxu1 %vm3219_vm7, %v8424_v40 }
0x2828   :  { %12886 = vmatpush3.bf16.xpose.msk.msra.mxu0 %vm15281_vm6, %v15854_v56  ;;  %11620 = vmatprep.mubr.msk.f32.mxu1 %vm3044_vm5, %v16075_v50  ;;  %v16095_v56 = vmul.f32 0.17677669, %v6827_v62 }
0x2829   :  { %12894 = vmatprep.subr.bf16.mxu0 %v15896_v3 }
0x282c   :  { %12892 = vmatpush3.bf16.xpose.msk.msra.mxu1 %vm15281_vm6, %v15876_v35 }
0x282d   :  { %12898 = vmatprep.subr.bf16.mxu1 %v15902_v45 }
0x282f   :  { %11614 = vmatmul.mubr.msk.f32.vlgmr.msra.gmra.mrb[90].mxu0 %vm3044_vm5, %v16088_v51 }
0x2830   :  { %12896 = vmatpush3.bf16.msra.mxu0 %v15896_v3 }
0x2833   :  { %11621 = vmatmul.mubr.msk.f32.vlgmr.msra.gmra.mrb[110].mxu1 %vm3044_vm5, %v16095_v56 }
0x2834   :  { %12900 = vmatpush3.bf16.msra.mxu1 %v15902_v45 }
0x28f5   :  { %v16100_v32 = vpop.f32.mrb[88].mxu0 }
0x28f6   :  { %v16102_v35 = vpop.f32.mrb[89].mxu0 }
0x28fa   :  { %v16104_v23 = vpop.f32.mrb[108].mxu1 }
0x28fb   :  { %v16106_v13 = vpop.f32.mrb[109].mxu1 }
0x2902   :  { %v11615_v55 = vpop.f32.mrb[90].mxu0 }
0x2903   :  { %v8677_v12 = vpop.f32.mrb[91].mxu0  ;;  %v8776_v25 = vsel %vm3219_vm7, %v11615_v55, -inf }
0x2904   :  { %8777 = vmax.xlane.f32.xlu0 %v8776_v25  ;;  %v8773_v3 = vsel %vm3219_vm7, %v8677_v12, -inf }
0x2905   :  { %8774 = vmax.xlane.f32.xlu1 %v8773_v3 }
0x2906   :  { %v11622_v16 = vpop.f32.mrb[110].mxu1 }
0x2907   :  { %v8764_v1 = vpop.f32.mrb[111].mxu1  ;;  %v8782_v45 = vsel %vm3219_vm7, %v11622_v16, -inf }
0x2908   :  { %8783 = vmax.xlane.f32.xlu0 %v8782_v45  ;;  %v8779_v57 = vsel %vm3219_vm7, %v8764_v1, -inf }
0x2909   :  { %8780 = vmax.xlane.f32.xlu1 %v8779_v57 }
0x291a   :  { %13437 = vrot.lane.b32.xlu1 %v15856_v7, %s14394_s5 }
0x2991   :  { %v8778_v17 = vpop.xlane.xlu0 %8777 }
0x2992   :  { %v8786_v47 = vsub.f32 %v11615_v55, %v8778_v17  ;;  %v8775_v38 = vpop.xlane.xlu1 %8774 }
0x2993   :  { %v8785_v2 = vsub.f32 %v8677_v12, %v8775_v38 }
0x2994   :  { %v8791_v19 = vmul.f32 1.442695, %v8786_v47 }
0x2995   :  { %v8789_v49 = vmul.f32 1.442695, %v8785_v2  ;;  %v8784_v59 = vpop.xlane.xlu0 %8783 }
0x2996   :  { %13756 = vpow2.f32 %v8791_v19  ;;  %v8788_v10 = vsub.f32 %v11622_v16, %v8784_v59  ;;  %v8781_v61 = vpop.xlane.xlu1 %8780 }
0x2997   :  { %13758 = vpow2.f32 %v8789_v49  ;;  %v8787_v62 = vsub.f32 %v8764_v1, %v8781_v61 }
0x2998   :  { %v8795_v27 = vmul.f32 1.442695, %v8788_v10 }
0x2999   :  { %v8793_v55 = vmul.f32 1.442695, %v8787_v62 }
0x299a   :  { %13760 = vpow2.f32 %v8795_v27  ;;  %v13438_v14 = vpop.permute.xlu1 %13437 }
0x299b   :  { %v13440_v54 = vunpack.i.h.bf16 %v13438_v14  ;;  %v13439_v30 = vunpack.i.l.bf16 %v13438_v14  ;;  %13762 = vpow2.f32 %v8793_v55 }
0x299d   :  { %v12901_v20 = vpack.c.bf16 %v13440_v54, %v13439_v30 }
0x299f   :  { %12903 = vmatprep.subr.msk.bf16.mxu0 %vm15281_vm6, %v12901_v20 }
0x29a0   :  { %v13757_v18 = vpop.eup %13756 }
0x29a1   :  { %v13759_v4 = vpop.eup %13758  ;;  %v8800_v22 = vsel %vm3219_vm7, %v13757_v18, 0.0 }
0x29a2   :  { %8801 = vadd.xlane.f32.xlu0 %v8800_v22  ;;  %v8797_v39 = vsel %vm3219_vm7, %v13759_v4, 0.0 }
0x29a3   :  { %8798 = vadd.xlane.f32.xlu1 %v8797_v39 }
0x29a4   :  { %v13761_v40 = vpop.eup %13760 }
0x29a5   :  { %v8806_v42 = vsel %vm3219_vm7, %v13761_v40, 0.0  ;;  %v13763_v12 = vpop.eup %13762 }
0x29a6   :  { %8807 = vadd.xlane.f32.xlu0 %v8806_v42  ;;  %v8803_v25 = vsel %vm3219_vm7, %v13763_v12, 0.0 }
0x29b4   :  { %8979 = vrot.lane.b32.xlu1 %v16065_v37, %s14394_s5 }
0x29b8   :  { %8981 = vrot.lane.b32.xlu1 %v16088_v51, %s14394_s5 }
0x29bc   :  { %13442 = vrot.lane.b32.xlu0 %v15878_v60, %s14394_s5 }
0x29c0   :  { %9070 = vrot.lane.b32.xlu0 %v16075_v50, %s14394_s5 }
0x29dc   :  { %8804 = vadd.xlane.f32.xlu1 %v8803_v25 }
0x29ed   :  { %9072 = vrot.lane.b32.xlu1 %v16095_v56, %s14394_s5 }
0x2a2f   :  { %v8802_v3 = vpop.xlane.xlu0 %8801 }
0x2a30   :  { %13764 = vrcp.f32 %v8802_v3  ;;  %v8799_v16 = vpop.xlane.xlu1 %8798 }
0x2a31   :  { %13766 = vrcp.f32 %v8799_v16 }
0x2a33   :  { %v8808_v45 = vpop.xlane.xlu0 %8807 }
0x2a34   :  { %v8980_v59 = vpop.permute.xlu1 %8979  ;;  %13768 = vrcp.f32 %v8808_v45 }
0x2a37   :  { %v13443_v57 = vpop.permute.xlu0 %13442 }
0x2a38   :  { %v13445_v17 = vunpack.i.h.bf16 %v13443_v57  ;;  %v13444_v47 = vunpack.i.l.bf16 %v13443_v57  ;;  %v8982_v10 = vpop.permute.xlu1 %8981 }
0x2a3a   :  { %v13765_v38 = vpop.eup %13764  ;;  %v12907_v2 = vpack.c.bf16 %v13445_v17, %v13444_v47 }
0x2a3b   :  { %v13767_v1 = vpop.eup %13766  ;;  %v8814_v49 = vmul.f32 %v13765_v38, %v13757_v18  ;;  %v9071_v18 = vpop.permute.xlu0 %9070 }
0x2a3c   :  { %12909 = vmatprep.subr.msk.bf16.mxu1 %vm15281_vm6, %v12907_v2  ;;  %v8813_v19 = vmul.f32 %v13767_v1, %v13759_v4 }
0x2a3e   :  { %11627 = vmatprep.mubr.msk.f32.mxu0 %vm3219_vm7, %v8813_v19  ;;  %v13769_v27 = vpop.eup %13768 }
0x2a3f   :  { %11628 = vmatmul.mubr.msk.f32.vlgmr.msra.gmra.mrb[92].mxu0 %vm3219_vm7, %v8814_v49  ;;  %v8816_v30 = vmul.f32 %v13769_v27, %v13761_v40 }
0x2a40   :  { %12906 = vmatpush3.bf16.xpose.msk.msra.mxu0 %vm15281_vm6, %v12901_v20  ;;  %11641 = vmatprep.mubr.msk.f32.mxu0 %vm3044_vm5, %v8980_v59 }
0x2a47   :  { %11642 = vmatmul.mubr.msk.f32.vlgmr.msra.gmra.mrb[94].mxu0 %vm3044_vm5, %v8982_v10 }
0x2a69   :  { %v8805_v61 = vpop.xlane.xlu1 %8804 }
0x2a6a   :  { %13770 = vrcp.f32 %v8805_v61 }
0x2a6d   :  { %v9073_v20 = vpop.permute.xlu1 %9072 }
0x2a74   :  { %v13771_v14 = vpop.eup %13770 }
0x2a75   :  { %v8815_v54 = vmul.f32 %v13771_v14, %v13763_v12 }
0x2a77   :  { %11634 = vmatprep.mubr.msk.f32.mxu1 %vm3219_vm7, %v8815_v54 }
0x2a78   :  { %11635 = vmatmul.mubr.msk.f32.vlgmr.msra.gmra.mrb[112].mxu1 %vm3219_vm7, %v8816_v30 }
0x2a79   :  { %12912 = vmatpush3.bf16.xpose.msk.msra.mxu1 %vm15281_vm6, %v12907_v2  ;;  %11648 = vmatprep.mubr.msk.f32.mxu1 %vm3044_vm5, %v9071_v18 }
0x2a80   :  { %11649 = vmatmul.mubr.msk.f32.vlgmr.msra.gmra.mrb[114].mxu1 %vm3044_vm5, %v9073_v20 }
0x2b12   :  { %v16144_v4 = vpop.f32.mrb[92].mxu0 }
0x2b13   :  { %v16146_v22 = vpop.f32.mrb[93].mxu0 }
0x2b1a   :  { %v11643_v39 = vpop.f32.mrb[94].mxu0 }
0x2b1b   :  { %v9061_v42 = vpop.f32.mrb[95].mxu0  ;;  %v9164_v40 = vsel %vm3219_vm7, %v11643_v39, -inf }
0x2b1c   :  { %9165 = vmax.xlane.f32.xlu1 %v9164_v40  ;;  %v9161_v62 = vsel %vm3219_vm7, %v9061_v42, -inf }
0x2b1d   :  { %9162 = vmax.xlane.f32.xlu0 %v9161_v62 }
0x2b2d   :  { %13447 = vrot.lane.b32.xlu1 %v15898_v58, %s14394_s5 }
0x2b31   :  { %13457 = vrot.lane.b32.xlu1 %v15856_v7, %s14393_s3 }
0x2b35   :  { %13462 = vrot.lane.b32.xlu1 %v15878_v60, %s14393_s3 }
0x2b4b   :  { %v16156_v55 = vpop.f32.mrb[112].mxu1 }
0x2b4c   :  { %v16158_v12 = vpop.f32.mrb[113].mxu1 }
0x2b53   :  { %v11650_v25 = vpop.f32.mrb[114].mxu1 }
0x2b54   :  { %v9152_v3 = vpop.f32.mrb[115].mxu1  ;;  %v9170_v45 = vsel %vm3219_vm7, %v11650_v25, -inf }
0x2b55   :  { %v9167_v16 = vsel %vm3219_vm7, %v9152_v3, -inf }
0x2b56   :  { %9168 = vmax.xlane.f32.xlu0 %v9167_v16 }
0x2b5a   :  { %9171 = vmax.xlane.f32.xlu0 %v9170_v45 }
0x2b70   :  { %13452 = vrot.lane.b32.xlu0 %v15904_v8, %s14394_s5 }
0x2ba9   :  { %v9166_v57 = vpop.xlane.xlu1 %9165 }
0x2baa   :  { %v9174_v17 = vsub.f32 %v11643_v39, %v9166_v57  ;;  %v9163_v47 = vpop.xlane.xlu0 %9162 }
0x2bab   :  { %v9173_v38 = vsub.f32 %v9061_v42, %v9163_v47 }
0x2bac   :  { %v9179_v2 = vmul.f32 1.442695, %v9174_v17 }
0x2bad   :  { %v9177_v1 = vmul.f32 1.442695, %v9173_v38  ;;  %v13448_v19 = vpop.permute.xlu1 %13447 }
0x2bae   :  { %13772 = vpow2.f32 %v9179_v2  ;;  %v13450_v49 = vunpack.i.h.bf16 %v13448_v19  ;;  %v13449_v59 = vunpack.i.l.bf16 %v13448_v19 }
0x2baf   :  { %13774 = vpow2.f32 %v9177_v1 }
0x2bb0   :  { %v12913_v10 = vpack.c.bf16 %v13450_v49, %v13449_v59 }
0x2bb1   :  { %v13458_v61 = vpop.permute.xlu1 %13457 }
0x2bb2   :  { %v13460_v27 = vunpack.i.h.bf16 %v13458_v61  ;;  %v13459_v14 = vunpack.i.l.bf16 %v13458_v61  ;;  %12914 = vmatprep.subr.bf16.mxu0 %v12913_v10 }
0x2bb3   :  { %12916 = vmatpush3.bf16.msra.mxu0 %v12913_v10 }
0x2bb4   :  { %v12921_v54 = vpack.c.bf16 %v13460_v27, %v13459_v14 }
0x2bb5   :  { %v13463_v45 = vpop.permute.xlu1 %13462 }
0x2bb6   :  { %12923 = vmatprep.subr.msk.bf16.mxu0 %vm15281_vm6, %v12921_v54  ;;  %v13465_v47 = vunpack.i.h.bf16 %v13463_v45  ;;  %v13464_v2 = vunpack.i.l.bf16 %v13463_v45 }
0x2bb8   :  { %v13773_v30 = vpop.eup %13772  ;;  %v12927_v59 = vpack.c.bf16 %v13465_v47, %v13464_v2 }
0x2bb9   :  { %v13775_v18 = vpop.eup %13774  ;;  %v9188_v20 = vsel %vm3219_vm7, %v13773_v30, 0.0 }
0x2bba   :  { %9189 = vadd.xlane.f32.xlu0 %v9188_v20  ;;  %v9185_v39 = vsel %vm3219_vm7, %v13775_v18, 0.0 }
0x2bbb   :  { %9186 = vadd.xlane.f32.xlu1 %v9185_v39 }
0x2bcc   :  { %9385 = vrot.lane.b32.xlu1 %v16088_v51, %s14393_s3 }
0x2be3   :  { %v9169_v42 = vpop.xlane.xlu0 %9168 }
0x2be4   :  { %v9175_v40 = vsub.f32 %v9152_v3, %v9169_v42 }
0x2be6   :  { %v9181_v62 = vmul.f32 1.442695, %v9175_v40 }
0x2be7   :  { %v9172_v16 = vpop.xlane.xlu0 %9171 }
0x2be8   :  { %13776 = vpow2.f32 %v9181_v62  ;;  %v9176_v57 = vsub.f32 %v11650_v25, %v9172_v16 }
0x2bea   :  { %v9183_v17 = vmul.f32 1.442695, %v9176_v57 }
0x2beb   :  { %v13453_v38 = vpop.permute.xlu0 %13452 }
0x2bec   :  { %13778 = vpow2.f32 %v9183_v17  ;;  %v13455_v1 = vunpack.i.h.bf16 %v13453_v38  ;;  %v13454_v19 = vunpack.i.l.bf16 %v13453_v38 }
0x2bee   :  { %v12917_v49 = vpack.c.bf16 %v13455_v1, %v13454_v19 }
0x2bf0   :  { %12918 = vmatprep.subr.bf16.mxu1 %v12917_v49 }
0x2bf1   :  { %12920 = vmatpush3.bf16.msra.mxu1 %v12917_v49 }
0x2bf2   :  { %v13777_v10 = vpop.eup %13776  ;;  %12929 = vmatprep.subr.msk.bf16.mxu1 %vm15281_vm6, %v12927_v59 }
0x2bf3   :  { %v9191_v3 = vsel %vm3219_vm7, %v13777_v10, 0.0 }
0x2bf4   :  { %9192 = vadd.xlane.f32.xlu1 %v9191_v3 }
0x2bf6   :  { %v13779_v61 = vpop.eup %13778 }
0x2bf7   :  { %v9194_v25 = vsel %vm3219_vm7, %v13779_v61, 0.0 }
0x2bf8   :  { %9195 = vadd.xlane.f32.xlu0 %v9194_v25 }
0x2c05   :  { %9476 = vrot.lane.b32.xlu1 %v16095_v56, %s14393_s3 }
0x2c0e   :  { %9383 = vrot.lane.b32.xlu0 %v16065_v37, %s14393_s3 }
0x2c12   :  { %9474 = vrot.lane.b32.xlu0 %v16075_v50, %s14393_s3 }
0x2c47   :  { %v9190_v27 = vpop.xlane.xlu0 %9189 }
0x2c48   :  { %13780 = vrcp.f32 %v9190_v27  ;;  %v9187_v14 = vpop.xlane.xlu1 %9186 }
0x2c49   :  { %13782 = vrcp.f32 %v9187_v14 }
0x2c4c   :  { %v9386_v62 = vpop.permute.xlu1 %9385 }
0x2c52   :  { %v13781_v20 = vpop.eup %13780 }
0x2c53   :  { %v13783_v39 = vpop.eup %13782  ;;  %v9202_v40 = vmul.f32 %v13781_v20, %v13773_v30 }
0x2c54   :  { %v9201_v42 = vmul.f32 %v13783_v39, %v13775_v18 }
0x2c56   :  { %11655 = vmatprep.mubr.msk.f32.mxu0 %vm3219_vm7, %v9201_v42 }
0x2c57   :  { %11656 = vmatmul.mubr.msk.f32.vlgmr.msra.gmra.mrb[96].mxu0 %vm3219_vm7, %v9202_v40 }
0x2c58   :  { %12926 = vmatpush3.bf16.xpose.msk.msra.mxu0 %vm15281_vm6, %v12921_v54 }
0x2c81   :  { %v9193_v16 = vpop.xlane.xlu1 %9192 }
0x2c82   :  { %13784 = vrcp.f32 %v9193_v16 }
0x2c85   :  { %v9196_v45 = vpop.xlane.xlu0 %9195  ;;  %v9477_v54 = vpop.permute.xlu1 %9476 }
0x2c86   :  { %13786 = vrcp.f32 %v9196_v45 }
0x2c89   :  { %v9384_v57 = vpop.permute.xlu0 %9383 }
0x2c8a   :  { %11669 = vmatprep.mubr.msk.f32.mxu0 %vm3044_vm5, %v9384_v57 }
0x2c8b   :  { %11670 = vmatmul.mubr.msk.f32.vlgmr.msra.gmra.mrb[98].mxu0 %vm3044_vm5, %v9386_v62 }
0x2c8c   :  { %v13785_v17 = vpop.eup %13784 }
0x2c8d   :  { %v9203_v18 = vmul.f32 %v13785_v17, %v13777_v10  ;;  %v9475_v38 = vpop.permute.xlu0 %9474 }
0x2c8f   :  { %11662 = vmatprep.mubr.msk.f32.mxu1 %vm3219_vm7, %v9203_v18 }
0x2c90   :  { %v13787_v30 = vpop.eup %13786 }
0x2c91   :  { %v9204_v47 = vmul.f32 %v13787_v30, %v13779_v61 }
0x2c93   :  { %11663 = vmatmul.mubr.msk.f32.vlgmr.msra.gmra.mrb[116].mxu1 %vm3219_vm7, %v9204_v47 }
0x2c94   :  { %12932 = vmatpush3.bf16.xpose.msk.msra.mxu1 %vm15281_vm6, %v12927_v59  ;;  %11676 = vmatprep.mubr.msk.f32.mxu1 %vm3044_vm5, %v9475_v38 }
0x2c9b   :  { %11677 = vmatmul.mubr.msk.f32.vlgmr.msra.gmra.mrb[118].mxu1 %vm3044_vm5, %v9477_v54 }
0x2d2a   :  { %v16192_v2 = vpop.f32.mrb[96].mxu0 }
0x2d2b   :  { %v13506_v1 = vpack.i.bf16 %v15990_v11, %v16192_v2  ;;  %v16196_v19 = vpop.f32.mrb[97].mxu0 }
0x2d2c   :  { %v13496_v49 = vpack.i.bf16 %v15992_v0, %v16196_v19 }
0x2d5e   :  { %v11671_v10 = vpop.f32.mrb[98].mxu0 }
0x2d5f   :  { %v9465_v3 = vpop.f32.mrb[99].mxu0  ;;  %v9568_v61 = vsel %vm3219_vm7, %v11671_v10, -inf }
0x2d60   :  { %9569 = vmax.xlane.f32.xlu1 %v9568_v61  ;;  %v9565_v59 = vsel %vm3219_vm7, %v9465_v3, -inf }
0x2d61   :  { %9566 = vmax.xlane.f32.xlu0 %v9565_v59 }
0x2d66   :  { %v16202_v25 = vpop.f32.mrb[116].mxu1 }
0x2d67   :  { %v13536_v27 = vpack.i.bf16 %v15996_v21, %v16202_v25  ;;  %v16206_v14 = vpop.f32.mrb[117].mxu1 }
0x2d68   :  { %v13526_v20 = vpack.i.bf16 %v15998_v52, %v16206_v14 }
0x2d6e   :  { %v11678_v39 = vpop.f32.mrb[118].mxu1 }
0x2d6f   :  { %v9556_v42 = vpop.f32.mrb[119].mxu1  ;;  %v9574_v62 = vsel %vm3219_vm7, %v11678_v39, -inf }
0x2d70   :  { %v9571_v40 = vsel %vm3219_vm7, %v9556_v42, -inf }
0x2d71   :  { %9572 = vmax.xlane.f32.xlu0 %v9571_v40  ;;  %13467 = vrot.lane.b32.xlu1 %v15898_v58, %s14393_s3 }
0x2d75   :  { %9575 = vmax.xlane.f32.xlu0 %v9574_v62  ;;  %13477 = vrot.lane.b32.xlu1 %v15856_v7, %s14395_s13 }
0x2d79   :  { %13482 = vrot.lane.b32.xlu1 %v15878_v60, %s14395_s13 }
0x2d8b   :  { %13472 = vrot.lane.b32.xlu0 %v15904_v8, %s14393_s3 }
0x2ded   :  { %v9570_v16 = vpop.xlane.xlu1 %9569 }
0x2dee   :  { %v9578_v45 = vsub.f32 %v11671_v10, %v9570_v16  ;;  %v9567_v57 = vpop.xlane.xlu0 %9566 }
0x2def   :  { %v9577_v17 = vsub.f32 %v9465_v3, %v9567_v57 }
0x2df0   :  { %v9583_v18 = vmul.f32 1.442695, %v9578_v45 }
0x2df1   :  { %v9581_v30 = vmul.f32 1.442695, %v9577_v17  ;;  %v13468_v47 = vpop.permute.xlu1 %13467 }
0x2df2   :  { %13788 = vpow2.f32 %v9583_v18  ;;  %v13470_v38 = vunpack.i.h.bf16 %v13468_v47  ;;  %v13469_v54 = vunpack.i.l.bf16 %v13468_v47 }
0x2df3   :  { %13790 = vpow2.f32 %v9581_v30 }
0x2df4   :  { %v12933_v61 = vpack.c.bf16 %v13470_v38, %v13469_v54 }
0x2df5   :  { %v13478_v59 = vpop.permute.xlu1 %13477 }
0x2df6   :  { %v13480_v7 = vunpack.i.h.bf16 %v13478_v59  ;;  %v13479_v40 = vunpack.i.l.bf16 %v13478_v59  ;;  %12934 = vmatprep.subr.bf16.mxu0 %v12933_v61 }
0x2df7   :  { %12936 = vmatpush3.bf16.msra.mxu0 %v12933_v61 }
0x2df8   :  { %v12941_v60 = vpack.c.bf16 %v13480_v7, %v13479_v40 }
0x2df9   :  { %v13483_v17 = vpop.permute.xlu1 %13482 }
0x2dfa   :  { %12943 = vmatprep.subr.msk.bf16.mxu0 %vm15281_vm6, %v12941_v60  ;;  %v13485_v47 = vunpack.i.h.bf16 %v13483_v17  ;;  %v13484_v54 = vunpack.i.l.bf16 %v13483_v17 }
0x2dfc   :  { %v13789_v10 = vpop.eup %13788  ;;  %v12947_v40 = vpack.c.bf16 %v13485_v47, %v13484_v54 }
0x2dfd   :  { %v13791_v62 = vpop.eup %13790  ;;  %v9592_v3 = vsel %vm3219_vm7, %v13789_v10, 0.0 }
0x2dfe   :  { %v9573_v16 = vpop.xlane.xlu0 %9572  ;;  %9593 = vadd.xlane.f32.xlu0 %v9592_v3  ;;  %v9589_v45 = vsel %vm3219_vm7, %v13791_v62, 0.0 }
0x2dff   :  { %9590 = vadd.xlane.f32.xlu1 %v9589_v45  ;;  %v9579_v45 = vsub.f32 %v9556_v42, %v9573_v16 }
0x2e02   :  { %v9576_v57 = vpop.xlane.xlu0 %9575 }
0x2e03   :  { %v9580_v18 = vsub.f32 %v11678_v39, %v9576_v57  ;;  %v9585_v57 = vmul.f32 1.442695, %v9579_v45 }
0x2e05   :  { %v9587_v30 = vmul.f32 1.442695, %v9580_v18 }
0x2e06   :  { %v13473_v38 = vpop.permute.xlu0 %13472 }
0x2e07   :  { %13792 = vpow2.f32 %v9587_v30  ;;  %v13475_v61 = vunpack.i.h.bf16 %v13473_v38  ;;  %v13474_v59 = vunpack.i.l.bf16 %v13473_v38 }
0x2e08   :  { %13794 = vpow2.f32 %v9585_v57 }
0x2e09   :  { %v12937_v7 = vpack.c.bf16 %v13475_v61, %v13474_v59 }
0x2e0b   :  { %12938 = vmatprep.subr.bf16.mxu1 %v12937_v7 }
0x2e0c   :  { %12940 = vmatpush3.bf16.msra.mxu1 %v12937_v7 }
0x2e0d   :  { %12949 = vmatprep.subr.msk.bf16.mxu1 %vm15281_vm6, %v12947_v40 }
0x2e10   :  { %9785 = vrot.lane.b32.xlu1 %v16088_v51, %s14395_s13 }
0x2e11   :  { %v13793_v3 = vpop.eup %13792 }
0x2e12   :  { %v9598_v39 = vsel %vm3219_vm7, %v13793_v3, 0.0  ;;  %v13795_v17 = vpop.eup %13794 }
0x2e13   :  { %9599 = vadd.xlane.f32.xlu0 %v9598_v39  ;;  %v9595_v18 = vsel %vm3219_vm7, %v13795_v17, 0.0 }
0x2e29   :  { %9783 = vrot.lane.b32.xlu0 %v16065_v37, %s14395_s13 }
0x2e2d   :  { %9874 = vrot.lane.b32.xlu0 %v16075_v50, %s14395_s13 }
0x2e34   :  { %9596 = vadd.xlane.f32.xlu1 %v9595_v18 }
0x2e45   :  { %9876 = vrot.lane.b32.xlu1 %v16095_v56, %s14395_s13 }
0x2e8b   :  { %v9594_v51 = vpop.xlane.xlu0 %9593 }
0x2e8c   :  { %13796 = vrcp.f32 %v9594_v51  ;;  %v9591_v30 = vpop.xlane.xlu1 %9590 }
0x2e8d   :  { %13798 = vrcp.f32 %v9591_v30 }
0x2e90   :  { %v9786_v54 = vpop.permute.xlu1 %9785 }
0x2e96   :  { %v13797_v42 = vpop.eup %13796 }
0x2e97   :  { %v13799_v16 = vpop.eup %13798  ;;  %v9606_v38 = vmul.f32 %v13797_v42, %v13789_v10 }
0x2e98   :  { %v9605_v47 = vmul.f32 %v13799_v16, %v13791_v62 }
0x2e9a   :  { %11683 = vmatprep.mubr.msk.f32.mxu0 %vm3219_vm7, %v9605_v47 }
0x2e9b   :  { %11684 = vmatmul.mubr.msk.f32.vlgmr.msra.gmra.mrb[100].mxu0 %vm3219_vm7, %v9606_v38 }
0x2e9c   :  { %12946 = vmatpush3.bf16.xpose.msk.msra.mxu0 %vm15281_vm6, %v12941_v60 }
0x2ea0   :  { %v9600_v37 = vpop.xlane.xlu0 %9599 }
0x2ea1   :  { %13800 = vrcp.f32 %v9600_v37 }
0x2ea4   :  { %v9784_v50 = vpop.permute.xlu0 %9783 }
0x2ea5   :  { %11697 = vmatprep.mubr.msk.f32.mxu0 %vm3044_vm5, %v9784_v50 }
0x2ea6   :  { %11698 = vmatmul.mubr.msk.f32.vlgmr.msra.gmra.mrb[102].mxu0 %vm3044_vm5, %v9786_v54 }
0x2ea8   :  { %v9875_v7 = vpop.permute.xlu0 %9874 }
0x2eab   :  { %v13801_v61 = vpop.eup %13800 }
0x2eac   :  { %v9608_v59 = vmul.f32 %v13801_v61, %v13793_v3 }
0x2ec1   :  { %v9597_v56 = vpop.xlane.xlu1 %9596 }
0x2ec2   :  { %13802 = vrcp.f32 %v9597_v56 }
0x2ec5   :  { %v9877_v60 = vpop.permute.xlu1 %9876 }
0x2ecc   :  { %v13803_v62 = vpop.eup %13802 }
0x2ecd   :  { %v9607_v10 = vmul.f32 %v13803_v62, %v13795_v17 }
0x2ecf   :  { %11690 = vmatprep.mubr.msk.f32.mxu1 %vm3219_vm7, %v9607_v10 }
0x2ed0   :  { %11691 = vmatmul.mubr.msk.f32.vlgmr.msra.gmra.mrb[120].mxu1 %vm3219_vm7, %v9608_v59 }
0x2ed1   :  { %12952 = vmatpush3.bf16.xpose.msk.msra.mxu1 %vm15281_vm6, %v12947_v40  ;;  %11704 = vmatprep.mubr.msk.f32.mxu1 %vm3044_vm5, %v9875_v7 }
0x2ed8   :  { %11705 = vmatmul.mubr.msk.f32.vlgmr.msra.gmra.mrb[122].mxu1 %vm3044_vm5, %v9877_v60 }
0x2f6e   :  { %v11685_v39 = vpop.f32.mrb[100].mxu0 }
0x2f6f   :  { %v13511_v45 = vpack.i.bf16 %v16038_v36, %v11685_v39  ;;  %v9687_v57 = vpop.f32.mrb[101].mxu0 }
0x2f70   :  { %v13501_v17 = vpack.i.bf16 %v16040_v48, %v9687_v57 }
0x2f79   :  { %v11699_v3 = vpop.f32.mrb[102].mxu0 }
0x2f7a   :  { %v9865_v18 = vpop.f32.mrb[103].mxu0  ;;  %v9968_v51 = vsel %vm3219_vm7, %v11699_v3, -inf }
0x2f7b   :  { %9969 = vmax.xlane.f32.xlu1 %v9968_v51  ;;  %v9965_v30 = vsel %vm3219_vm7, %v9865_v18, -inf }
0x2f7c   :  { %9966 = vmax.xlane.f32.xlu0 %v9965_v30 }
0x2fa3   :  { %v16252_v31 = vpop.f32.mrb[120].mxu1 }
0x2fa4   :  { %v13546_v40 = vpack.i.bf16 %v16044_v34, %v16252_v31  ;;  %v16256_v42 = vpop.f32.mrb[121].mxu1 }
0x2fa5   :  { %v13531_v36 = vpack.i.bf16 %v16046_v33, %v16256_v42 }
0x2fab   :  { %v11706_v16 = vpop.f32.mrb[122].mxu1 }
0x2fac   :  { %v9956_v48 = vpop.f32.mrb[123].mxu1  ;;  %v9974_v38 = vsel %vm3219_vm7, %v11706_v16, -inf }
0x2fad   :  { %v9971_v47 = vsel %vm3219_vm7, %v9956_v48, -inf }
0x2fae   :  { %9972 = vmax.xlane.f32.xlu0 %v9971_v47 }
0x2fb2   :  { %9975 = vmax.xlane.f32.xlu0 %v9974_v38 }
0x3008   :  { %v9970_v37 = vpop.xlane.xlu1 %9969 }
0x3009   :  { %v9978_v50 = vsub.f32 %v11699_v3, %v9970_v37  ;;  %v9967_v54 = vpop.xlane.xlu0 %9966 }
0x300a   :  { %v9977_v56 = vsub.f32 %v9865_v18, %v9967_v54 }
0x300b   :  { %v9983_v61 = vmul.f32 1.442695, %v9978_v50 }
0x300c   :  { %v9981_v62 = vmul.f32 1.442695, %v9977_v56 }
0x300d   :  { %13804 = vpow2.f32 %v9983_v61 }
0x300e   :  { %13806 = vpow2.f32 %v9981_v62 }
0x3017   :  { %v13805_v10 = vpop.eup %13804 }
0x3018   :  { %v13807_v59 = vpop.eup %13806  ;;  %v9992_v7 = vsel %vm3219_vm7, %v13805_v10, 0.0 }
0x3019   :  { %9993 = vadd.xlane.f32.xlu0 %v9992_v7  ;;  %v9989_v60 = vsel %vm3219_vm7, %v13807_v59, 0.0 }
0x301a   :  { %9990 = vadd.xlane.f32.xlu1 %v9989_v60 }
0x303b   :  { %v9973_v39 = vpop.xlane.xlu0 %9972 }
0x303c   :  { %v9979_v57 = vsub.f32 %v9956_v48, %v9973_v39 }
0x303e   :  { %v9985_v51 = vmul.f32 1.442695, %v9979_v57  ;;  %v6645_v57 = vld [vmem:[#allocation32 + $0x8] sm:$0xff] }
0x303f   :  { %v9976_v30 = vpop.xlane.xlu0 %9975 }
0x3040   :  { %13808 = vpow2.f32 %v9985_v51  ;;  %v9980_v3 = vsub.f32 %v11706_v16, %v9976_v30  ;;  %v6647_v51 = vld [vmem:[#allocation32 + $0x18] sm:$0xff]  ;;  %v6644_v30 = vld [vmem:[#allocation32] sm:$0xff] }
0x3042   :  { %v9987_v47 = vmul.f32 1.442695, %v9980_v3  ;;  %v12961_v3 = vpack.c.bf16 %v6647_v51, %v6645_v57  ;;  %v6667_v57 = vld [vmem:[#allocation32 + $0xb8] sm:$0xff] }
0x3044   :  { %13810 = vpow2.f32 %v9987_v47  ;;  %v6646_v47 = vld [vmem:[#allocation32 + $0x10] sm:$0xff] }
0x304a   :  { %v13809_v18 = vpop.eup %13808 }
0x304b   :  { %v9995_v38 = vsel %vm3219_vm7, %v13809_v18, 0.0 }
0x304c   :  { %9996 = vadd.xlane.f32.xlu1 %v9995_v38  ;;  %v6649_v38 = vld [vmem:[#allocation32 + $0x28] sm:$0xff] }
0x304e   :  { %v13811_v37 = vpop.eup %13810 }
0x304f   :  { %v9998_v50 = vsel %vm3219_vm7, %v13811_v37, 0.0 }
0x3050   :  { %9999 = vadd.xlane.f32.xlu0 %v9998_v50  ;;  %v6651_v50 = vld [vmem:[#allocation32 + $0x38] sm:$0xff] }
0x305d   :  { %13487 = vrot.lane.b32.xlu1 %v15898_v58, %s14395_s13 }
0x3061   :  { %13497 = vrot.lane.b32.xlu1 %v13496_v49, %s14395_s13 }
0x3065   :  { %13502 = vrot.lane.b32.xlu1 %v13501_v17, %s14393_s3 }
0x3066   :  { %13492 = vrot.lane.b32.xlu0 %v15904_v8, %s14395_s13 }
0x3069   :  { %13507 = vrot.lane.b32.xlu1 %v13506_v1, %s14395_s13 }
0x306a   :  { %13512 = vrot.lane.b32.xlu0 %v13511_v45, %s14393_s3 }
0x30a6   :  { %v9994_v0 = vpop.xlane.xlu0 %9993 }
0x30a7   :  { %v9991_v16 = vpop.xlane.xlu1 %9990 }
0x30a8   :  { %13812 = vrcp.f32 %v9991_v16  ;;  %v12965_v16 = vpack.c.bf16 %v6651_v50, %v6649_v38  ;;  %v6669_v38 = vld [vmem:[#allocation32 + $0xc8] sm:$0xff]  ;;  %v6671_v50 = vld [vmem:[#allocation32 + $0xd8] sm:$0xff] }
0x30a9   :  { %13814 = vrcp.f32 %v9994_v0  ;;  %v6655_v0 = vld [vmem:[#allocation32 + $0x58] sm:$0xff] }
0x30b2   :  { %v13813_v58 = vpop.eup %13812 }
0x30b3   :  { %v10005_v48 = vmul.f32 %v13813_v58, %v13807_v59  ;;  %v13815_v11 = vpop.eup %13814  ;;  %v6650_v58 = vld [vmem:[#allocation32 + $0x30] sm:$0xff] }
0x30b4   :  { %v10006_v62 = vmul.f32 %v13815_v11, %v13805_v10  ;;  %v12963_v10 = vpack.c.bf16 %v6646_v47, %v6644_v30  ;;  %v6666_v47 = vld [vmem:[#allocation32 + $0xb0] sm:$0xff] }
0x30b5   :  { %11711 = vmatprep.mubr.msk.f32.mxu0 %vm3219_vm7, %v10005_v48  ;;  %v6653_v48 = vld [vmem:[#allocation32 + $0x48] sm:$0xff] }
0x30d9   :  { %v9997_v19 = vpop.xlane.xlu1 %9996 }
0x30da   :  { %13816 = vrcp.f32 %v9997_v19 }
0x30dd   :  { %v13488_v49 = vpop.permute.xlu1 %13487  ;;  %v10000_v17 = vpop.xlane.xlu0 %9999 }
0x30de   :  { %v13490_v8 = vunpack.i.h.bf16 %v13488_v49  ;;  %v13489_v54 = vunpack.i.l.bf16 %v13488_v49  ;;  %13818 = vrcp.f32 %v10000_v17  ;;  %v6652_v49 = vld [vmem:[#allocation32 + $0x40] sm:$0xff]  ;;  %v6654_v17 = vld [vmem:[#allocation32 + $0x50] sm:$0xff] }
0x30e0   :  { %v12953_v56 = vpack.c.bf16 %v13490_v8, %v13489_v54  ;;  %v6657_v8 = vld [vmem:[#allocation32 + $0x68] sm:$0xff]  ;;  %v6659_v54 = vld [vmem:[#allocation32 + $0x78] sm:$0xff] }
0x30e1   :  { %v13493_v2 = vpop.permute.xlu0 %13492  ;;  %v12973_v11 = vpack.c.bf16 %v6659_v54, %v6657_v8  ;;  %v6677_v8 = vld [vmem:[#allocation32 + $0x108] sm:$0xff]  ;;  %v6679_v54 = vld [vmem:[#allocation32 + $0x118] sm:$0xff]  ;;  %v13498_v33 = vpop.permute.xlu1 %13497 }
0x30e2   :  { %v13495_v1 = vunpack.i.h.bf16 %v13493_v2  ;;  %v13494_v45 = vunpack.i.l.bf16 %v13493_v2  ;;  %12954 = vmatprep.subr.bf16.mxu0 %v12953_v56  ;;  %v6656_v2 = vld [vmem:[#allocation32 + $0x60] sm:$0xff]  ;;  %v13499_v52 = vunpack.i.l.bf16 %v13498_v33 }
0x30e3   :  { %12956 = vmatpush3.bf16.msra.mxu0 %v12953_v56  ;;  %v12971_v56 = vpack.c.bf16 %v6654_v17, %v6652_v49  ;;  %v6672_v49 = vld [vmem:[#allocation32 + $0xe0] sm:$0xff]  ;;  %v6674_v17 = vld [vmem:[#allocation32 + $0xf0] sm:$0xff] }
0x30e4   :  { %v13817_v61 = vpop.eup %13816  ;;  %v12957_v59 = vpack.c.bf16 %v13495_v1, %v13494_v45  ;;  %12962 = vmatprep.subr.bf16.mxu0 %v12961_v3  ;;  %v6658_v1 = vld [vmem:[#allocation32 + $0x70] sm:$0xff]  ;;  %v6661_v45 = vld [vmem:[#allocation32 + $0x88] sm:$0xff]  ;;  %v6664_v3 = vld [vmem:[#allocation32 + $0xa0] sm:$0xff] }
0x30e5   :  { %v10007_v7 = vmul.f32 %v13817_v61, %v13809_v18  ;;  %v6648_v18 = vld [vmem:[#allocation32 + $0x20] sm:$0xff]  ;;  %v6663_v61 = vld [vmem:[#allocation32 + $0x98] sm:$0xff] }
0x30e6   :  { %11712 = vmatmul.mubr.msk.f32.vlgmr.msra.gmra.mrb[104].mxu0 %vm3219_vm7, %v10006_v62  ;;  %12958 = vmatprep.subr.bf16.mxu1 %v12957_v59  ;;  %v12967_v19 = vpack.c.bf16 %v6650_v58, %v6648_v18  ;;  %v12975_v62 = vpack.c.bf16 %v6658_v1, %v6656_v2  ;;  %v6668_v18 = vld [vmem:[#allocation32 + $0xc0] sm:$0xff]  ;;  %v6670_v58 = vld [vmem:[#allocation32 + $0xd0] sm:$0xff] }
0x30e7   :  { %12960 = vmatpush3.bf16.msra.mxu1 %v12957_v59  ;;  %11718 = vmatprep.mubr.msk.f32.mxu1 %vm3219_vm7, %v10007_v7  ;;  %v12977_v59 = vpack.c.bf16 %v6663_v61, %v6661_v45  ;;  %v6660_v7 = vld [vmem:[#allocation32 + $0x80] sm:$0xff]  ;;  %v6678_v1 = vld [vmem:[#allocation32 + $0x110] sm:$0xff]  ;;  %v6681_v45 = vld [vmem:[#allocation32 + $0x128] sm:$0xff] }
0x30e8   :  { %v13819_v60 = vpop.eup %13818  ;;  %12964 = vmatpush1.bf16.msra.mxu0 %v12963_v10  ;;  %v12983_v10 = vpack.c.bf16 %v6666_v47, %v6664_v3  ;;  %v6676_v2 = vld [vmem:[#allocation32 + $0x100] sm:$0xff]  ;;  %v6683_v61 = vld [vmem:[#allocation32 + $0x138] sm:$0xff]  ;;  %v6686_v47 = vld [vmem:[#allocation32 + $0x150] sm:$0xff] }
0x30e9   :  { %v10008_v39 = vmul.f32 %v13819_v60, %v13811_v37  ;;  %12966 = vmatprep.subr.bf16.mxu0 %v12965_v16  ;;  %v12969_v37 = vpack.c.bf16 %v6655_v0, %v6653_v48  ;;  %v6662_v60 = vld [vmem:[#allocation32 + $0x90] sm:$0xff]  ;;  %v12985_v16 = vpack.c.bf16 %v6671_v50, %v6669_v38  ;;  %v6673_v48 = vld [vmem:[#allocation32 + $0xe8] sm:$0xff]  ;;  %v6675_v0 = vld [vmem:[#allocation32 + $0xf8] sm:$0xff] }
0x30ea   :  { %v12979_v51 = vpack.c.bf16 %v6662_v60, %v6660_v7  ;;  %v6680_v7 = vld [vmem:[#allocation32 + $0x120] sm:$0xff]  ;;  %v6682_v60 = vld [vmem:[#allocation32 + $0x130] sm:$0xff]  ;;  %v6689_v38 = vld [vmem:[#allocation32 + $0x168] sm:$0xff] }
0x30eb   :  { %11719 = vmatmul.mubr.msk.f32.vlgmr.msra.gmra.mrb[124].mxu1 %vm3219_vm7, %v10008_v39  ;;  %v6665_v39 = vld [vmem:[#allocation32 + $0xa8] sm:$0xff]  ;;  %v6684_v3 = vld [vmem:[#allocation32 + $0x140] sm:$0xff]  ;;  %v6691_v50 = vld [vmem:[#allocation32 + $0x178] sm:$0xff] }
0x30ec   :  { %12968 = vmatpush1.bf16.msra.mxu0 %v12967_v19  ;;  %v12981_v30 = vpack.c.bf16 %v6667_v57, %v6665_v39  ;;  %v12987_v19 = vpack.c.bf16 %v6670_v58, %v6668_v18  ;;  %v6685_v39 = vld [vmem:[#allocation32 + $0x148] sm:$0xff]  ;;  %v6687_v57 = vld [vmem:[#allocation32 + $0x158] sm:$0xff]  ;;  %v6688_v18 = vld [vmem:[#allocation32 + $0x160] sm:$0xff] }
0x30ed   :  { %12970 = vmatprep.subr.bf16.mxu0 %v12969_v37  ;;  %v12989_v37 = vpack.c.bf16 %v6675_v0, %v6673_v48  ;;  %v6690_v58 = vld [vmem:[#allocation32 + $0x170] sm:$0xff]  ;;  %v6693_v48 = vld [vmem:[#allocation32 + $0x188] sm:$0xff]  ;;  %v6695_v0 = vld [vmem:[#allocation32 + $0x198] sm:$0xff] }
0x30f0   :  { %12972 = vmatpush1.bf16.msra.mxu0 %v12971_v56  ;;  %v12991_v56 = vpack.c.bf16 %v6674_v17, %v6672_v49  ;;  %v6692_v49 = vld [vmem:[#allocation32 + $0x180] sm:$0xff]  ;;  %v6694_v17 = vld [vmem:[#allocation32 + $0x190] sm:$0xff] }
0x30f1   :  { %12974 = vmatprep.subr.bf16.mxu0 %v12973_v11  ;;  %v12993_v11 = vpack.c.bf16 %v6679_v54, %v6677_v8  ;;  %v6697_v8 = vld [vmem:[#allocation32 + $0x1a8] sm:$0xff]  ;;  %v6699_v54 = vld [vmem:[#allocation32 + $0x1b8] sm:$0xff] }
0x30f4   :  { %12976 = vmatpush1.bf16.msra.mxu0 %v12975_v62  ;;  %v12995_v62 = vpack.c.bf16 %v6678_v1, %v6676_v2  ;;  %v6696_v2 = vld [vmem:[#allocation32 + $0x1a0] sm:$0xff]  ;;  %v6698_v1 = vld [vmem:[#allocation32 + $0x1b0] sm:$0xff] }
0x30f5   :  { %12978 = vmatprep.subr.bf16.mxu0 %v12977_v59  ;;  %v12997_v59 = vpack.c.bf16 %v6683_v61, %v6681_v45  ;;  %v6701_v45 = vld [vmem:[#allocation32 + $0x1c8] sm:$0xff]  ;;  %v6703_v61 = vld [vmem:[#allocation32 + $0x1d8] sm:$0xff] }
0x30f8   :  { %12980 = vmatpush1.bf16.msra.mxu0 %v12979_v51  ;;  %v12999_v51 = vpack.c.bf16 %v6682_v60, %v6680_v7  ;;  %v6700_v7 = vld [vmem:[#allocation32 + $0x1c0] sm:$0xff]  ;;  %v6702_v60 = vld [vmem:[#allocation32 + $0x1d0] sm:$0xff] }
0x30f9   :  { %12982 = vmatprep.subr.bf16.mxu0 %v12981_v30  ;;  %v13001_v30 = vpack.c.bf16 %v6687_v57, %v6685_v39  ;;  %v13019_v39 = vpack.c.bf16 %v6702_v60, %v6700_v7  ;;  %v6705_v57 = vld [vmem:[#allocation32 + $0x1e8] sm:$0xff] }
0x30fc   :  { %12984 = vmatpush1.bf16.msra.mxu0 %v12983_v10  ;;  %v13003_v10 = vpack.c.bf16 %v6686_v47, %v6684_v3  ;;  %v6704_v3 = vld [vmem:[#allocation32 + $0x1e0] sm:$0xff]  ;;  %v6706_v47 = vld [vmem:[#allocation32 + $0x1f0] sm:$0xff] }
0x30fd   :  { %12986 = vmatprep.subr.bf16.mxu0 %v12985_v16  ;;  %v13005_v16 = vpack.c.bf16 %v6691_v50, %v6689_v38  ;;  %v13023_v38 = vpack.c.bf16 %v6706_v47, %v6704_v3 }
0x3100   :  { %12988 = vmatpush1.bf16.msra.mxu0 %v12987_v19  ;;  %v13007_v19 = vpack.c.bf16 %v6690_v58, %v6688_v18 }
0x3101   :  { %12990 = vmatprep.subr.bf16.mxu0 %v12989_v37  ;;  %v13009_v37 = vpack.c.bf16 %v6695_v0, %v6693_v48 }
0x3104   :  { %12992 = vmatpush1.bf16.msra.mxu0 %v12991_v56  ;;  %v13011_v56 = vpack.c.bf16 %v6694_v17, %v6692_v49 }
0x3105   :  { %12994 = vmatprep.subr.bf16.mxu0 %v12993_v11  ;;  %v13013_v11 = vpack.c.bf16 %v6699_v54, %v6697_v8 }
0x3108   :  { %12996 = vmatpush1.bf16.msra.mxu0 %v12995_v62  ;;  %v13015_v62 = vpack.c.bf16 %v6698_v1, %v6696_v2 }
0x3109   :  { %12998 = vmatprep.subr.bf16.mxu0 %v12997_v59  ;;  %v13017_v59 = vpack.c.bf16 %v6703_v61, %v6701_v45 }
0x310c   :  { %13000 = vmatpush1.bf16.msra.mxu0 %v12999_v51  ;;  %v6707_v51 = vld [vmem:[#allocation32 + $0x1f8] sm:$0xff] }
0x310d   :  { %13002 = vmatprep.subr.bf16.mxu0 %v13001_v30  ;;  %v13021_v30 = vpack.c.bf16 %v6707_v51, %v6705_v57 }
0x3110   :  { %13004 = vmatpush1.bf16.msra.mxu0 %v13003_v10 }
0x3111   :  { %13006 = vmatprep.subr.bf16.mxu0 %v13005_v16 }
0x3114   :  { %13008 = vmatpush1.bf16.msra.mxu0 %v13007_v19 }
0x3115   :  { %13010 = vmatprep.subr.bf16.mxu0 %v13009_v37  ;;  %v10291_v37 = vsel %vm3044_vm5, %v16146_v22, %v13499_v52 }
0x3118   :  { %13012 = vmatpush1.bf16.msra.mxu0 %v13011_v56 }
0x3119   :  { %13014 = vmatprep.subr.bf16.mxu0 %v13013_v11 }
0x311c   :  { %13016 = vmatpush1.bf16.msra.mxu0 %v13015_v62 }
0x311d   :  { %13018 = vmatprep.subr.bf16.mxu0 %v13017_v59 }
0x3120   :  { %13020 = vmatpush1.bf16.msra.mxu0 %v13019_v39 }
0x3121   :  { %13022 = vmatprep.subr.bf16.mxu0 %v13021_v30 }
0x3124   :  { %13024 = vmatpush1.bf16.msra.mxu0 %v13023_v38 }
0x31b9   :  { %v11713_v50 = vpop.f32.mrb[104].mxu0 }
0x31ba   :  { %v13516_v10 = vpack.i.bf16 %v16100_v32, %v11713_v50  ;;  %v10087_v16 = vpop.f32.mrb[105].mxu0  ;;  %v13503_v32 = vpop.permute.xlu1 %13502 }
0x31bb   :  { %v13521_v18 = vpack.i.bf16 %v16102_v35, %v10087_v16  ;;  %v13504_v42 = vunpack.i.l.bf16 %v13503_v32 }
0x31bc   :  { %13517 = vrot.lane.b32.xlu1 %v13516_v10, %s14394_s5 }
0x31bd   :  { %13522 = vrot.lane.b32.xlu0 %v13521_v18, %s14394_s5  ;;  %v10295_v8 = vsel %vm611_vm4, %v10291_v37, %v13504_v42  ;;  %v10435_v42 = vld [vmem:[#allocation34 + $0x80] sm:$0xff] }
0x31be   :  { %v11720_v58 = vpop.f32.mrb[124].mxu1  ;;  %v13508_v35 = vpop.permute.xlu1 %13507 }
0x31bf   :  { %v13551_v48 = vpack.i.bf16 %v16104_v23, %v11720_v58  ;;  %v10174_v0 = vpop.f32.mrb[125].mxu1  ;;  %v13500_v23 = vunpack.i.h.bf16 %v13498_v33  ;;  %v13509_v14 = vunpack.i.l.bf16 %v13508_v35 }
0x31c0   :  { %v13541_v19 = vpack.i.bf16 %v16106_v13, %v10174_v0  ;;  %13532 = vrot.lane.b32.xlu1 %v13531_v36, %s14393_s3  ;;  %v13513_v13 = vpop.permute.xlu0 %13512 }
0x31c1   :  { %13527 = vrot.lane.b32.xlu0 %v13526_v20, %s14395_s13  ;;  %v13505_v20 = vunpack.i.h.bf16 %v13503_v32  ;;  %v10279_v25 = vsel %vm3044_vm5, %v15944_v26, %v13500_v23  ;;  %v10292_v49 = vsel %vm3044_vm5, %v16144_v4, %v13509_v14  ;;  %v13514_v17 = vunpack.i.l.bf16 %v13513_v13 }
0x31c2   :  { %v13515_v61 = vunpack.i.h.bf16 %v13513_v13 }
0x31c3   :  { %v10283_v54 = vsel %vm611_vm4, %v10279_v25, %v13505_v20  ;;  %v10296_v22 = vsel %vm611_vm4, %v10292_v49, %v13514_v17  ;;  %v10439_v17 = vld [vmem:[#allocation34 + $0xa0] sm:$0xff] }
0x31c4   :  { %13537 = vrot.lane.b32.xlu1 %v13536_v27, %s14395_s13  ;;  %v13510_v27 = vunpack.i.h.bf16 %v13508_v35 }
0x31c5   :  { %13542 = vrot.lane.b32.xlu0 %v13541_v19, %s14394_s5 }
0x31c6   :  { %v10280_v45 = vsel %vm3044_vm5, %v15942_v53, %v13510_v27  ;;  %v10419_v27 = vld [vmem:[#allocation34] sm:$0xff] }
0x31c7   :  { %v10284_v60 = vsel %vm611_vm4, %v10280_v45, %v13515_v61  ;;  %v10425_v45 = vld [vmem:[#allocation34 + $0x30] sm:$0xff]  ;;  %v10426_v61 = vld [vmem:[#allocation34 + $0x38] sm:$0xff] }
0x31c8   :  { %13552 = vrot.lane.b32.xlu1 %v13551_v48, %s14394_s5 }
0x31c9   :  { %13547 = vrot.lane.b32.xlu0 %v13546_v40, %s14393_s3 }
0x322e   :  { %v13518_v21 = vpop.permute.xlu1 %13517 }
0x322f   :  { %v13523_v36 = vpop.permute.xlu0 %13522  ;;  %v13519_v34 = vunpack.i.l.bf16 %v13518_v21  ;;  %v13520_v2 = vunpack.i.h.bf16 %v13518_v21  ;;  %v10436_v21 = vld [vmem:[#allocation34 + $0x88] sm:$0xff] }
0x3230   :  { %v13525_v31 = vunpack.i.h.bf16 %v13523_v36  ;;  %v13524_v40 = vunpack.i.l.bf16 %v13523_v36  ;;  %v13025_v25 = vpack.c.bf16 %v10436_v21, %v10435_v42  ;;  %v10420_v36 = vld [vmem:[#allocation34 + $0x8] sm:$0xff] }
0x3231   :  { %v10300_v59 = vsel %vm6318_vm8, %v10296_v22, %v13519_v34  ;;  %v10288_v53 = vsel %vm6318_vm8, %v10284_v60, %v13520_v2  ;;  %v13027_v37 = vpack.c.bf16 %v10420_v36, %v10419_v27  ;;  %v10441_v2 = vld [vmem:[#allocation34 + $0xb0] sm:$0xff]  ;;  %v10427_v60 = vld [vmem:[#allocation34 + $0x40] sm:$0xff] }
0x3232   :  { %v13533_v56 = vpop.permute.xlu1 %13532  ;;  %v10299_v11 = vsel %vm6318_vm8, %v10295_v8, %v13524_v40  ;;  %v10287_v26 = vsel %vm6318_vm8, %v10283_v54, %v13525_v31  ;;  %13026 = vmatprep.subr.bf16.mxu1 %v13025_v25  ;;  %v10421_v31 = vld [vmem:[#allocation34 + $0x10] sm:$0xff]  ;;  %v10422_v40 = vld [vmem:[#allocation34 + $0x18] sm:$0xff]  ;;  %v10440_v8 = vld [vmem:[#allocation34 + $0xa8] sm:$0xff] }
0x3233   :  { %v13528_v1 = vpop.permute.xlu0 %13527  ;;  %10378 = vmatprep.mubr.f32.mxu0 %v10299_v11  ;;  %v13535_v51 = vunpack.i.h.bf16 %v13533_v56  ;;  %v13534_v30 = vunpack.i.l.bf16 %v13533_v56  ;;  %13028 = vmatpush3.bf16.msra.mxu1 %v13027_v37  ;;  %v13031_v49 = vpack.c.bf16 %v10422_v40, %v10421_v31  ;;  %v13033_v54 = vpack.c.bf16 %v10440_v8, %v10439_v17  ;;  %v10423_v56 = vld [vmem:[#allocation34 + $0x20] sm:$0xff]  ;;  %v10424_v11 = vld [vmem:[#allocation34 + $0x28] sm:$0xff] }
0x3234   :  { %v13530_v4 = vunpack.i.h.bf16 %v13528_v1  ;;  %v13529_v62 = vunpack.i.l.bf16 %v13528_v1  ;;  %10379 = vmatmul.mubr.f32.vlgmr.msra.gmra.mrb[106].mxu0 %v10287_v26  ;;  %v13035_v26 = vpack.c.bf16 %v10424_v11, %v10423_v56  ;;  %v10442_v1 = vld [vmem:[#allocation34 + $0xb8] sm:$0xff] }
0x3235   :  { %10384 = vmatprep.mubr.f32.mxu0 %v10300_v59  ;;  %v13037_v22 = vpack.c.bf16 %v10442_v1, %v10441_v2  ;;  %v10444_v59 = vld [vmem:[#allocation34 + $0xc8] sm:$0xff] }
0x3236   :  { %v13538_v7 = vpop.permute.xlu1 %13537  ;;  %v10293_v39 = vsel %vm3044_vm5, %v16158_v12, %v13529_v62  ;;  %v10281_v57 = vsel %vm3044_vm5, %v15956_v63, %v13530_v4  ;;  %v13039_v4 = vpack.c.bf16 %v10426_v61, %v10425_v45  ;;  %v10443_v62 = vld [vmem:[#allocation34 + $0xc0] sm:$0xff] }
0x3237   :  { %v13543_v3 = vpop.permute.xlu0 %13542  ;;  %v13540_v50 = vunpack.i.h.bf16 %v13538_v7  ;;  %v13539_v10 = vunpack.i.l.bf16 %v13538_v7  ;;  %v10297_v16 = vsel %vm611_vm4, %v10293_v39, %v13534_v30  ;;  %v10285_v18 = vsel %vm611_vm4, %v10281_v57, %v13535_v51  ;;  %v10428_v39 = vld [vmem:[#allocation34 + $0x48] sm:$0xff]  ;;  %v10445_v51 = vld [vmem:[#allocation34 + $0xd0] sm:$0xff]  ;;  %v10446_v30 = vld [vmem:[#allocation34 + $0xd8] sm:$0xff] }
0x3238   :  { %v13545_v47 = vunpack.i.h.bf16 %v13543_v3  ;;  %v13544_v38 = vunpack.i.l.bf16 %v13543_v3  ;;  %10385 = vmatmul.mubr.f32.gmra.mrb[108].mxu0 %v10288_v53  ;;  %v13041_v7 = vpack.c.bf16 %v10444_v59, %v10443_v62  ;;  %v13043_v57 = vpack.c.bf16 %v10428_v39, %v10427_v60  ;;  %v10429_v53 = vld [vmem:[#allocation34 + $0x50] sm:$0xff] }
0x3239   :  { %v10294_v35 = vsel %vm3044_vm5, %v16156_v55, %v13539_v10  ;;  %v10282_v23 = vsel %vm3044_vm5, %v15954_v46, %v13540_v50  ;;  %v10437_v55 = vld [vmem:[#allocation34 + $0x90] sm:$0xff]  ;;  %v10438_v46 = vld [vmem:[#allocation34 + $0x98] sm:$0xff]  ;;  %v13045_v3 = vpack.c.bf16 %v10446_v30, %v10445_v51  ;;  %v10447_v50 = vld [vmem:[#allocation34 + $0xe0] sm:$0xff] }
0x323a   :  { %v13553_v58 = vpop.permute.xlu1 %13552  ;;  %v10301_v12 = vsel %vm6318_vm8, %v10297_v16, %v13544_v38  ;;  %v10289_v48 = vsel %vm6318_vm8, %v10285_v18, %v13545_v47  ;;  %v13029_v34 = vpack.c.bf16 %v10438_v46, %v10437_v55  ;;  %v10430_v47 = vld [vmem:[#allocation34 + $0x58] sm:$0xff]  ;;  %v10448_v10 = vld [vmem:[#allocation34 + $0xe8] sm:$0xff]  ;;  %v10431_v16 = vld [vmem:[#allocation34 + $0x60] sm:$0xff] }
0x323b   :  { %v13548_v63 = vpop.permute.xlu0 %13547  ;;  %10390 = vmatprep.mubr.f32.mxu0 %v10301_v12  ;;  %v13555_v33 = vunpack.i.h.bf16 %v13553_v58  ;;  %v13554_v32 = vunpack.i.l.bf16 %v13553_v58  ;;  %v13047_v38 = vpack.c.bf16 %v10430_v47, %v10429_v53  ;;  %v13049_v18 = vpack.c.bf16 %v10448_v10, %v10447_v50  ;;  %v10432_v58 = vld [vmem:[#allocation34 + $0x68] sm:$0xff]  ;;  %v10449_v12 = vld [vmem:[#allocation34 + $0xf0] sm:$0xff] }
0x323c   :  { %v13550_v0 = vunpack.i.h.bf16 %v13548_v63  ;;  %v13549_v19 = vunpack.i.l.bf16 %v13548_v63  ;;  %10391 = vmatmul.mubr.f32.gmra.mrb[110].mxu0 %v10289_v48  ;;  %13030 = vmatprep.subr.bf16.mxu1 %v13029_v34  ;;  %v10450_v48 = vld [vmem:[#allocation34 + $0xf8] sm:$0xff]  ;;  %v13051_v63 = vpack.c.bf16 %v10432_v58, %v10431_v16 }
0x323d   :  { %13032 = vmatpush3.bf16.msra.mxu1 %v13031_v49 }
0x323e   :  { %v10298_v52 = vsel %vm611_vm4, %v10294_v35, %v13549_v19  ;;  %v10286_v13 = vsel %vm611_vm4, %v10282_v23, %v13550_v0  ;;  %13034 = vmatprep.subr.bf16.mxu1 %v13033_v54  ;;  %v13053_v0 = vpack.c.bf16 %v10450_v48, %v10449_v12  ;;  %v10433_v19 = vld [vmem:[#allocation34 + $0x70] sm:$0xff]  ;;  %v6708_v35 = vld [vmem:[%s14565_s27] sm:$0x3]  ;;  %s14396_s27 = smov [#allocation35]  }
0x323f   :  { %v10302_v14 = vsel %vm6318_vm8, %v10298_v52, %v13554_v32  ;;  %v10290_v20 = vsel %vm6318_vm8, %v10286_v13, %v13555_v33  ;;  %v10434_v33 = vld [vmem:[#allocation34 + $0x78] sm:$0xff]  ;;  %v10307_v23 = vrot.slane %v6708_v35, %v14739_v41  ;;  %v10311_v52 = vrot.slane %v6708_v35, %v14743_v43  ;;  %s10576_s29 = sshll.u32 %s14396_s27, 4  ;;  %s10577_s29 = int_to_ptr.vmem [resolvable:$true] %s10576_s29 }
0x3240   :  { %10396 = vmatprep.mubr.f32.mxu0 %v10302_v14  ;;  %v13055_v32 = vpack.c.bf16 %v10434_v33, %v10433_v19  ;;  %s14282_s18 = scalar_lea.vmem %s10577_s29, 32  ;;  %p14287_p1 = scmp.lt.s32.totalorder %s10577_s29, %s10577_s29 }
0x3241   :  { %10397 = vmatmul.mubr.f32.gmra.mrb[112].mxu0 %v10290_v20  ;;  %13036 = vmatpush3.bf16.msra.mxu1 %v13035_v26  ;;  %p14283_p0 = scmp.ne.s32.totalorder %s10577_s29, %s14282_s18  ;;  %p14288_p2 = scmp.lt.s32.totalorder %s14282_s18, %s14282_s18 }
0x3242   :  { %13038 = vmatprep.subr.bf16.mxu1 %v13037_v22 }
0x3243   :  { %p14289_p3 = por %p14288_p2, %p14287_p1 }
0x3245   :  { %13040 = vmatpush3.bf16.msra.mxu1 %v13039_v4  ;;  %p14290_p4 = pnand %p14289_p3, %p14283_p0 }
0x3246   :  { %13042 = vmatprep.subr.bf16.mxu1 %v13041_v7 }
0x3249   :  { %13044 = vmatpush3.bf16.msra.mxu1 %v13043_v57 }
0x324a   :  { %13046 = vmatprep.subr.bf16.mxu1 %v13045_v3 }
0x324d   :  { %13048 = vmatpush3.bf16.msra.mxu1 %v13047_v38 }
0x324e   :  { %13050 = vmatprep.subr.bf16.mxu1 %v13049_v18 }
0x3251   :  { %13052 = vmatpush3.bf16.msra.mxu1 %v13051_v63 }
0x3252   :  { %13054 = vmatprep.subr.bf16.mxu1 %v13053_v0 }
0x3255   :  { %13056 = vmatpush3.bf16.msra.mxu1 %v13055_v32 }
0x3307   :  { %v10380_v13 = vpop.f32.mrb[106].mxu0 }
0x3308   :  { %v10381_v14 = vadd.f32 %v10380_v13, %v10307_v23  ;;  %v10382_v20 = vpop.f32.mrb[107].mxu0 }
0x3309   :  { %v10383_v42 = vadd.f32 %v10382_v20, %v10311_v52 }
0x330a   :  { %v10403_v25 = vadd.f32 %v10381_v14, %v15790_v9 }
0x330b   :  { %v10386_v21 = vpop.f32.mrb[108].mxu0  ;;  %v10404_v37 = vadd.f32 %v10383_v42, %v15788_v44  ;;  %v10845_v42 = vld [vmem:[%s14575_s24] ss:$0 sm:$0xff] }
0x330c   :  { %v10387_v27 = vadd.f32 %v10386_v21, %v10307_v23  ;;  %v10388_v36 = vpop.f32.mrb[109].mxu0  ;;  %v10411_v41 = vmax.f32 %v10403_v25, 0.0 }
0x330d   :  { %v10389_v55 = vadd.f32 %v10388_v36, %v10311_v52  ;;  %v10412_v49 = vmax.f32 %v10404_v37, 0.0 }
0x330e   :  { %v10405_v46 = vadd.f32 %v10387_v27, %v15800_v15 }
0x330f   :  { %v10406_v34 = vadd.f32 %v10389_v55, %v15798_v28  ;;  %v10392_v31 = vpop.f32.mrb[110].mxu0 }
0x3310   :  { %v10413_v40 = vmax.f32 %v10405_v46, 0.0  ;;  %v10394_v43 = vpop.f32.mrb[111].mxu0  ;;  %v10393_v8 = vadd.f32 %v10392_v31, %v10307_v23 }
0x3311   :  { %v10414_v17 = vmax.f32 %v10406_v34, 0.0  ;;  %v10395_v56 = vadd.f32 %v10394_v43, %v10311_v52 }
0x3312   :  { %v10452_v54 = vadd.f32 %v10413_v40, %v10411_v41  ;;  %v10407_v44 = vadd.f32 %v10393_v8, %v15810_v29 }
0x3313   :  { %v10459_v11 = vadd.f32 %v10414_v17, %v10412_v49  ;;  %v10408_v28 = vadd.f32 %v10395_v56, %v15808_v5 }
0x3314   :  { %v10453_v9 = vrot.slane %v10452_v54, 4  ;;  %v10398_v26 = vpop.f32.mrb[112].mxu0  ;;  %v10415_v7 = vmax.f32 %v10407_v44, 0.0 }
0x3315   :  { %v10460_v2 = vrot.slane %v10459_v11, 4  ;;  %v10399_v1 = vadd.f32 %v10398_v26, %v10307_v23  ;;  %v10400_v22 = vpop.f32.mrb[113].mxu0  ;;  %v10416_v57 = vmax.f32 %v10408_v28, 0.0 }
0x3316   :  { %v10454_v15 = vadd.f32 %v10453_v9, %v10452_v54  ;;  %v10401_v45 = vadd.f32 %v10400_v22, %v10311_v52 }
0x3317   :  { %v10461_v61 = vadd.f32 %v10460_v2, %v10459_v11  ;;  %v10409_v4 = vadd.f32 %v10399_v1, %v15820_v6 }
0x3318   :  { %v10410_v62 = vadd.f32 %v10401_v45, %v15818_v24  ;;  %v10455_v59 = vrot.slane %v10454_v15, 2 }
0x3319   :  { %v10417_v60 = vmax.f32 %v10409_v4, 0.0  ;;  %v10462_v39 = vrot.slane %v10461_v61, 2 }
0x331a   :  { %v10418_v51 = vmax.f32 %v10410_v62, 0.0  ;;  %v10456_v29 = vadd.f32 %v10455_v59, %v10454_v15 }
0x331b   :  { %v10466_v30 = vadd.f32 %v10417_v60, %v10415_v7  ;;  %v10463_v38 = vadd.f32 %v10462_v39, %v10461_v61 }
0x331c   :  { %v10473_v3 = vadd.f32 %v10418_v51, %v10416_v57  ;;  %v10457_v16 = vrot.slane %v10456_v29, 1 }
0x331d   :  { %v10467_v53 = vrot.slane %v10466_v30, 4  ;;  %v10464_v6 = vrot.slane %v10463_v38, 1 }
0x331e   :  { %v10474_v47 = vrot.slane %v10473_v3, 4  ;;  %v10458_v12 = vadd.f32 %v10457_v16, %v10456_v29 }
0x331f   :  { %v10468_v50 = vadd.f32 %v10467_v53, %v10466_v30  ;;  %v10465_v63 = vadd.f32 %v10464_v6, %v10463_v38 }
0x3320   :  { %v10475_v5 = vadd.f32 %v10474_v47, %v10473_v3  ;;  %v10480_v32 = vmul.f32 0.0625, %v10458_v12 }
0x3321   :  { %v10469_v10 = vrot.slane %v10468_v50, 2  ;;  %v10481_v23 = vmul.f32 0.0625, %v10465_v63 }
0x3322   :  { %v10476_v18 = vrot.slane %v10475_v5, 2 }
0x3323   :  { %v10470_v58 = vadd.f32 %v10469_v10, %v10468_v50 }
0x3324   :  { %v10477_v24 = vadd.f32 %v10476_v18, %v10475_v5 }
0x3325   :  { %v10471_v48 = vrot.slane %v10470_v58, 1 }
0x3326   :  { %v10478_v0 = vrot.slane %v10477_v24, 1 }
0x3327   :  { %v10472_v19 = vadd.f32 %v10471_v48, %v10470_v58 }
0x3328   :  { %v10479_v33 = vadd.f32 %v10478_v0, %v10477_v24 }
0x3329   :  { %v10482_v35 = vmul.f32 0.0625, %v10472_v19 }
0x332a   :  { %v10483_v52 = vmul.f32 0.0625, %v10479_v33 }
0x332b   :  { %v10495_v13 = vsel %vm10494_vm9, %v10482_v35, %v10480_v32 }
0x332c   :  { %v10496_v14 = vsel %vm10494_vm9, %v10483_v52, %v10481_v23 }
0x332d   :  { %10563 = vmatprep.mubr.f32.mxu1 %v10496_v14 }
0x332e   :  { %10564 = vmatmul.mubr.f32.vlgmr.msra.gmra.mrb[126].mxu1 %v10495_v13 }
0x3401   :  { %v11210_v20 = vpop.f32.mrb[126].mxu1 }
0x3402   :  { %v11211_v21 = vpop.f32.mrb[127].mxu1 }
0x3403   :  { %v11212_v25 = vadd.f32 %v11211_v21, %v11210_v20 }
0x3405   :  { %v10566_v27 = vadd.f32 %v11212_v25, %v10845_v42 }
0x3407   :  { %10569 = vst [vmem:[#allocation35] sm:$0x3] %v10566_v27 }
0x3408   :  { %14293 = shalt.err (!%p14290_p4)
}
0x3409   :  { %s14294_s22 = scalar_lea.hbm %s14580_s19, 32 }
0x340a   :  { %p14295_p5 = scmp.ne.s32.totalorder %s14580_s19, %s14294_s22  ;;  %p14298_p6 = scmp.lt.u32.totalorder %s14294_s22, %s14580_s19 }
0x340c   :  { %p14300_p7 = pnand %p14298_p6, %p14295_p5 }
0x340e   :  { %14303 = shalt.err (!%p14300_p7)
}
0x340f   :  { %10579 = dma.vmem_to_hbm [thread:$0]  %s10577_s29, 32, %s14580_s19, [#allocation4]  }
0x3410   :  { %14326 = dma.done.wait [#allocation4], 32  }
0x3411   :  { %14327 = vsyncadd [#allocation4], 4294967264 }
0x3412   :  { %10583 = vsyncpa [#allocation3], 1 }
0x3413   :  { %10584 = vsyncpa [#allocation6], 1 }
0x3414   :  { %10585 = vsyncpa [#allocation9], 1 }
0x3415   :  { %10586 = vsyncpa [#allocation12], 1 }
0x3416   :  { %10587 = vsyncpa [#allocation15], 1 }
0x3417   :  { %10588 = vsyncpa [#allocation18], 1 }
0x3418   :  { %10589 = vsyncpa [#allocation21], 1 }
0x3419   :  { %10590 = vsyncpa [#allocation24], 1 }
0x341a   :  { %10591 = vsyncpa [#allocation27], 1 }
0x341b   :  { %10592 = vsyncpa [#allocation30], 1 }
0x341c   :  { %10593 = vsyncpa [#allocation33], 1 }
0x341d   :  { %10594 = vsyncpa [#allocation4], 1 }

</bundles_post_ra>
